<compile_context>
chip_gen: v6e
topology: v6e:2x2x1
jax: 0.10.0
libtpu: 0.0.40
codegen_flags: <defaults>
</compile_context>

<pallas_src>
import functools

import jax
import jax.numpy as jnp
from jax.experimental import pallas as pl
from jax.experimental.pallas import tpu as pltpu

EPS = 1e-5  # PyTorch BatchNorm default eps


# --------------------------------------------------------------------------
# Pallas kernel 1: tiled matmul with fused (bias, ReLU) epilogue.
#   out = relu(x @ w + bias)          (BN scale pre-folded into w and bias)
# Two variants: single-K (no scratch, direct store) and multi-K (f32 acc).
# --------------------------------------------------------------------------
def _matmul_bias_relu_1k_kernel(x_ref, w_ref, b_ref, o_ref):
    y = jnp.dot(x_ref[...].astype(w_ref.dtype), w_ref[...],
                preferred_element_type=jnp.float32)
    o_ref[...] = jnp.maximum(y + b_ref[...], 0.0).astype(o_ref.dtype)


def _matmul_bias_relu_kernel(x_ref, w_ref, b_ref, o_ref, acc_ref, *, nk):
    k = pl.program_id(1)

    @pl.when(k == 0)
    def _():
        acc_ref[...] = jnp.zeros_like(acc_ref)

    acc_ref[...] += jnp.dot(x_ref[...].astype(w_ref.dtype), w_ref[...],
                            preferred_element_type=jnp.float32)

    @pl.when(k == nk - 1)
    def _():
        o_ref[...] = jnp.maximum(acc_ref[...] + b_ref[...], 0.0).astype(o_ref.dtype)


def _pick_tk(K):
    # Tile the reduction dim only if a 128-aligned tile divides it evenly.
    for tk in (512, 256, 128):
        if K % tk == 0:
            return tk
    return K


def _pick_tm(M):
    # M tile: multiple of 8 that divides M; small M kept whole.
    if M <= 512:
        return M
    for tm in (512, 448, 384, 320, 256, 128):
        if M % tm == 0:
            return tm
    return M


def matmul_bias_relu(x, w, bias):
    """relu(x @ w + bias); x:(M,K) f32, w:(K,N) (bf16/f32), bias:(N,) f32."""
    M, K = x.shape
    K2, N = w.shape
    assert K == K2
    tk = _pick_tk(K)
    nk = K // tk
    tm = _pick_tm(M)
    nm = M // tm
    bias2 = bias.reshape(1, N).astype(jnp.float32)

    if nk == 1:
        # Single reduction step: no accumulator scratch, no zero-init.
        return pl.pallas_call(
            _matmul_bias_relu_1k_kernel,
            out_shape=jax.ShapeDtypeStruct((M, N), jnp.float32),
            grid=(nm,),
            in_specs=[
                pl.BlockSpec((tm, K), lambda i: (i, 0)),
                pl.BlockSpec((K, N), lambda i: (0, 0)),
                pl.BlockSpec((1, N), lambda i: (0, 0)),
            ],
            out_specs=pl.BlockSpec((tm, N), lambda i: (i, 0)),
            compiler_params=pltpu.CompilerParams(
                dimension_semantics=("parallel",)),
        )(x, w, bias2)

    kernel = functools.partial(_matmul_bias_relu_kernel, nk=nk)
    return pl.pallas_call(
        kernel,
        out_shape=jax.ShapeDtypeStruct((M, N), jnp.float32),
        grid=(nm, nk),
        in_specs=[
            pl.BlockSpec((tm, tk), lambda i, k: (i, k)),
            pl.BlockSpec((tk, N), lambda i, k: (k, 0)),
            pl.BlockSpec((1, N), lambda i, k: (0, 0)),
        ],
        out_specs=pl.BlockSpec((tm, N), lambda i, k: (i, 0)),
        scratch_shapes=[pltpu.VMEM((tm, N), jnp.float32)],
        compiler_params=pltpu.CompilerParams(
            dimension_semantics=("parallel", "arbitrary")),
    )(x, w, bias2)


# --------------------------------------------------------------------------
# Pallas kernel 2: 2x2 max pooling (stride 2), matching nn.MaxPool2d((2, 2)).
# NHWC-native: the wrapper does a FREE row-major reshape
#   (B, H, W, C) -> (B, H/2, 2, W/2, 2C)
# so the H-pool is a leading-dim max and the W-pool is a max of the two
# lane-halves of the last dim. No transposes, channels stay on the lane axis.
# --------------------------------------------------------------------------
def _maxpool_kernel(x_ref, o_ref, *, C):
    x = x_ref[...]                               # (1, H/2, 2, W/2, 2C)
    m = jnp.maximum(x[:, :, 0], x[:, :, 1])      # (1, H/2, W/2, 2C)  pool over H
    o_ref[...] = jnp.maximum(m[..., :C], m[..., C:])   # pool over W


def maxpool2x2_nhwc(x):
    """x: (B, H, W, C) -> (B, H//2, W//2, C)."""
    B, H, W, C = x.shape
    Hh, Wh = H // 2, W // 2
    xr = x.reshape(B, Hh, 2, Wh, 2 * C)          # free (row-major) reshape
    return pl.pallas_call(
        functools.partial(_maxpool_kernel, C=C),
        out_shape=jax.ShapeDtypeStruct((B, Hh, Wh, C), x.dtype),
        grid=(B,),
        in_specs=[pl.BlockSpec((1, Hh, 2, Wh, 2 * C),
                               lambda b: (b, 0, 0, 0, 0))],
        out_specs=pl.BlockSpec((1, Hh, Wh, C), lambda b: (b, 0, 0, 0)),
        compiler_params=pltpu.CompilerParams(dimension_semantics=("parallel",)),
    )(xr)


# --------------------------------------------------------------------------
# Module-level building blocks (glue in JAX, hot path in the Pallas kernels).
# --------------------------------------------------------------------------
def _bn_fold_scale_bias(p):
    """Return (scale, bias) s.t. relu((x@w + b) BN) == relu(x@(w*scale) + bias)."""
    scale = p["gamma"] / jnp.sqrt(p["var"] + EPS)
    bias = (p["b"] - p["mean"]) * scale + p["beta"]
    return scale, bias


def conv_unit(x_nhwc, p, ker):
    """Conv2d(ker, pad=ker//2) + BatchNorm2d + ReLU + MaxPool2d(2,2)."""
    B, H, W, C_in = x_nhwc.shape
    pad = ker // 2
    xp = jnp.pad(x_nhwc, ((0, 0), (pad, pad), (pad, pad), (0, 0)))
    # im2col (glue): feature order is (dy, dx, c_in)
    patches = []
    for dy in range(ker):
        for dx in range(ker):
            patches.append(xp[:, dy:dy + H, dx:dx + W, :])
    patches = jnp.concatenate(patches, axis=-1)          # (B, H, W, ker*ker*Cin)
    K = ker * ker * C_in
    C_out = p["w"].shape[0]
    # PyTorch conv weight (O, I, kh, kw) -> (kh, kw, I, O) -> (K, O)
    wm = jnp.transpose(p["w"], (2, 3, 1, 0)).reshape(K, C_out)
    scale, bias = _bn_fold_scale_bias(p)
    wm = (wm * scale[None, :]).astype(jnp.bfloat16)       # fold BN scale, bf16 stream
    y = matmul_bias_relu(patches.reshape(B * H * W, K), wm, bias)
    y = y.reshape(B, H, W, C_out)
    return maxpool2x2_nhwc(y)


def fc_unit(x, p):
    """Linear + BatchNorm1d + Dropout(eval: identity) + ReLU."""
    scale, bias = _bn_fold_scale_bias(p)
    wm = (p["w"].T * scale[None, :]).astype(jnp.bfloat16)
    return matmul_bias_relu(x, wm, bias)


def clasic_forward(params, x_nchw):
    x = jnp.transpose(x_nchw, (0, 2, 3, 1))   # NCHW -> NHWC (once)
    x = conv_unit(x, params["conv1"], ker=7)  # (B, 24, 24, 32)
    x = conv_unit(x, params["conv2"], ker=5)  # (B, 12, 12, 64)
    x = conv_unit(x, params["conv3"], ker=3)  # (B, 6, 6, 128)
    # nn.Flatten on NCHW order -> transpose back before flattening (tiny tensor)
    B = x.shape[0]
    x = jnp.transpose(x, (0, 3, 1, 2)).reshape(B, -1)   # (B, 128*6*6)
    x = fc_unit(x, params["fc1"])             # (B, 1000)
    x = fc_unit(x, params["fc2"])             # (B, 500)
    x = fc_unit(x, params["fc3"])             # (B, 3)
    return x


# --------------------------------------------------------------------------
# Deterministic parameter initialization (shapes from Clasic.__init__).
# --------------------------------------------------------------------------
def _bn_defaults(n):
    return dict(
        gamma=jnp.ones((n,), jnp.float32),
        beta=jnp.zeros((n,), jnp.float32),
        mean=jnp.zeros((n,), jnp.float32),
        var=jnp.ones((n,), jnp.float32),
    )


def _init_conv(key, cin, cout, ker):
    k1, k2 = jax.random.split(key)
    fan_in = cin * ker * ker
    w = jax.random.normal(k1, (cout, cin, ker, ker), jnp.float32) / jnp.sqrt(fan_in)
    b = 0.01 * jax.random.normal(k2, (cout,), jnp.float32)
    return dict(w=w, b=b, **_bn_defaults(cout))


def _init_fc(key, fin, fout):
    k1, k2 = jax.random.split(key)
    w = jax.random.normal(k1, (fout, fin), jnp.float32) / jnp.sqrt(fin)
    b = 0.01 * jax.random.normal(k2, (fout,), jnp.float32)
    return dict(w=w, b=b, **_bn_defaults(fout))


def init_params(key):
    ks = jax.random.split(key, 6)
    return dict(
        conv1=_init_conv(ks[0], 3, 32, 7),
        conv2=_init_conv(ks[1], 32, 64, 5),
        conv3=_init_conv(ks[2], 64, 128, 3),
        fc1=_init_fc(ks[3], 128 * 6 * 6, 1000),
        fc2=_init_fc(ks[4], 1000, 500),
        fc3=_init_fc(ks[5], 500, 3),
    )


if __name__ == "__main__":
    key = jax.random.PRNGKey(0)
    k_param, k_input = jax.random.split(key)
    params = init_params(k_param)
    # Input consistent with the module: 3 channels, 48x48 spatial
    # (3 maxpools of 2 -> 6x6, matching Flatten size 128*6*6). NCHW like PyTorch.
    x = jax.random.normal(k_input, (2, 3, 48, 48), jnp.float32)

    fwd = jax.jit(clasic_forward)
    out = fwd(params, x)
    jax.block_until_ready(out)
    assert out.shape == (2, 3) and out.dtype == jnp.float32
    print("KERNEL_OK")
</pallas_src>

<mosaic_0001>
module attributes {stable_mosaic.version = 11 : i64} {
  func.func @_matmul_bias_relu_1k_kernel(%arg0: i32, %arg1: memref<512x147xf32, #tpu.memory_space<vmem>>, %arg2: memref<147x32xbf16, #tpu.memory_space<vmem>>, %arg3: memref<1x32xf32, #tpu.memory_space<vmem>>, %arg4: memref<512x32xf32, #tpu.memory_space<vmem>>) attributes {dimension_semantics = [#tpu.dimension_semantics<parallel>], iteration_bounds = array<i64: 9>, scalar_prefetch = 0 : i64, scratch_operands = 0 : i64, tpu.core_type = #tpu.core_type<tc>, window_params = [{transform_indices = @transform_0, window_bounds = array<i64: 512, 147>}, {pipeline_mode = #tpu.pipeline_mode<synchronous>, transform_indices = @transform_1, window_bounds = array<i64: 147, 32>}, {pipeline_mode = #tpu.pipeline_mode<synchronous>, transform_indices = @transform_2, window_bounds = array<i64: 1, 32>}, {transform_indices = @transform_3, window_bounds = array<i64: 512, 32>}]} {
    %c0 = arith.constant 0 : index
    %c0_0 = arith.constant 0 : index
    %0 = vector.load %arg1[%c0, %c0_0] : memref<512x147xf32, #tpu.memory_space<vmem>>, vector<512x147xf32>
    %1 = arith.truncf %0 : vector<512x147xf32> to vector<512x147xbf16>
    %c0_1 = arith.constant 0 : index
    %c0_2 = arith.constant 0 : index
    %2 = vector.load %arg2[%c0_1, %c0_2] : memref<147x32xbf16, #tpu.memory_space<vmem>>, vector<147x32xbf16>
    %cst = arith.constant dense<0.000000e+00> : vector<512x32xf32>
    %3 = tpu.matmul %1, %2, %cst {dimension_numbers = #tpu.dot_dimension_numbers<[1], [0], [0], [1], [0, 0, 1, 1], [], []>} : vector<512x147xbf16>, vector<147x32xbf16>, vector<512x32xf32> -> vector<512x32xf32>
    %c0_3 = arith.constant 0 : index
    %c0_4 = arith.constant 0 : index
    %4 = vector.load %arg3[%c0_3, %c0_4] : memref<1x32xf32, #tpu.memory_space<vmem>>, vector<1x32xf32>
    %5 = vector.broadcast %4 : vector<1x32xf32> to vector<512x32xf32>
    %6 = arith.addf %3, %5 : vector<512x32xf32>
    %cst_5 = arith.constant 0.000000e+00 : f32
    %7 = vector.broadcast %cst_5 : f32 to vector<512x32xf32>
    %8 = arith.maximumf %6, %7 : vector<512x32xf32>
    %c0_6 = arith.constant 0 : index
    %c0_7 = arith.constant 0 : index
    %9 = vector.load %arg4[%c0_6, %c0_7] : memref<512x32xf32, #tpu.memory_space<vmem>>, vector<512x32xf32>
    tpu.vector_store %arg4[%c0_6, %c0_7], %8 {strides = array<i32>} : memref<512x32xf32, #tpu.memory_space<vmem>>, vector<512x32xf32>,
    return
  }
  func.func @transform_0(%arg0: i32) -> (i32, i32) {
    %c0_i32 = arith.constant 0 : i32
    %c0_i32_0 = arith.constant 0 : i32
    return %arg0, %c0_i32 : i32, i32
  }
  func.func @transform_1(%arg0: i32) -> (i32, i32) {
    %c0_i32 = arith.constant 0 : i32
    %c0_i32_0 = arith.constant 0 : i32
    %c0_i32_1 = arith.constant 0 : i32
    return %c0_i32, %c0_i32_0 : i32, i32
  }
  func.func @transform_2(%arg0: i32) -> (i32, i32) {
    %c0_i32 = arith.constant 0 : i32
    %c0_i32_0 = arith.constant 0 : i32
    %c0_i32_1 = arith.constant 0 : i32
    return %c0_i32, %c0_i32_0 : i32, i32
  }
  func.func @transform_3(%arg0: i32) -> (i32, i32) {
    %c0_i32 = arith.constant 0 : i32
    %c0_i32_0 = arith.constant 0 : i32
    return %arg0, %c0_i32 : i32, i32
  }
}

module attributes {stable_mosaic.version = 11 : i64} {
  func.func @_maxpool_kernel(%arg0: i32, %arg1: memref<1x24x2x24x64xf32, #tpu.memory_space<vmem>>, %arg2: memref<1x24x24x32xf32, #tpu.memory_space<vmem>>) attributes {dimension_semantics = [#tpu.dimension_semantics<parallel>], iteration_bounds = array<i64: 2>, scalar_prefetch = 0 : i64, scratch_operands = 0 : i64, tpu.core_type = #tpu.core_type<tc>, window_params = [{transform_indices = @transform_0, window_bounds = array<i64: 1, 24, 2, 24, 64>}, {transform_indices = @transform_1, window_bounds = array<i64: 1, 24, 24, 32>}]} {
    %c0 = arith.constant 0 : index
    %c0_0 = arith.constant 0 : index
    %c0_1 = arith.constant 0 : index
    %c0_2 = arith.constant 0 : index
    %c0_3 = arith.constant 0 : index
    %0 = vector.load %arg1[%c0, %c0_0, %c0_1, %c0_2, %c0_3] : memref<1x24x2x24x64xf32, #tpu.memory_space<vmem>>, vector<1x24x2x24x64xf32>
    %1 = vector.extract_strided_slice %0 {offsets = [0, 0, 0, 0, 0], sizes = [1, 24, 1, 24, 64], strides = [1, 1, 1, 1, 1]} : vector<1x24x2x24x64xf32> to vector<1x24x1x24x64xf32>
    %2 = vector.shape_cast %1 : vector<1x24x1x24x64xf32> to vector<1x24x24x64xf32>
    %3 = vector.extract_strided_slice %0 {offsets = [0, 0, 1, 0, 0], sizes = [1, 24, 1, 24, 64], strides = [1, 1, 1, 1, 1]} : vector<1x24x2x24x64xf32> to vector<1x24x1x24x64xf32>
    %4 = vector.shape_cast %3 : vector<1x24x1x24x64xf32> to vector<1x24x24x64xf32>
    %5 = arith.maximumf %2, %4 : vector<1x24x24x64xf32>
    %6 = vector.extract_strided_slice %5 {offsets = [0, 0, 0, 0], sizes = [1, 24, 24, 32], strides = [1, 1, 1, 1]} : vector<1x24x24x64xf32> to vector<1x24x24x32xf32>
    %7 = vector.extract_strided_slice %5 {offsets = [0, 0, 0, 32], sizes = [1, 24, 24, 32], strides = [1, 1, 1, 1]} : vector<1x24x24x64xf32> to vector<1x24x24x32xf32>
    %8 = arith.maximumf %6, %7 : vector<1x24x24x32xf32>
    %c0_4 = arith.constant 0 : index
    %c0_5 = arith.constant 0 : index
    %c0_6 = arith.constant 0 : index
    %c0_7 = arith.constant 0 : index
    %9 = vector.load %arg2[%c0_4, %c0_5, %c0_6, %c0_7] : memref<1x24x24x32xf32, #tpu.memory_space<vmem>>, vector<1x24x24x32xf32>
    tpu.vector_store %arg2[%c0_4, %c0_5, %c0_6, %c0_7], %8 {strides = array<i32>} : memref<1x24x24x32xf32, #tpu.memory_space<vmem>>, vector<1x24x24x32xf32>,
    return
  }
  func.func @transform_0(%arg0: i32) -> (i32, i32, i32, i32, i32) {
    %c0_i32 = arith.constant 0 : i32
    %c0_i32_0 = arith.constant 0 : i32
    %c0_i32_1 = arith.constant 0 : i32
    %c0_i32_2 = arith.constant 0 : i32
    %c0_i32_3 = arith.constant 0 : i32
    return %arg0, %c0_i32, %c0_i32_0, %c0_i32_1, %c0_i32_2 : i32, i32, i32, i32, i32
  }
  func.func @transform_1(%arg0: i32) -> (i32, i32, i32, i32) {
    %c0_i32 = arith.constant 0 : i32
    %c0_i32_0 = arith.constant 0 : i32
    %c0_i32_1 = arith.constant 0 : i32
    %c0_i32_2 = arith.constant 0 : i32
    return %arg0, %c0_i32, %c0_i32_0, %c0_i32_1 : i32, i32, i32, i32
  }
}

module attributes {stable_mosaic.version = 11 : i64} {
  func.func @_matmul_bias_relu_1k_kernel(%arg0: i32, %arg1: memref<384x800xf32, #tpu.memory_space<vmem>>, %arg2: memref<800x64xbf16, #tpu.memory_space<vmem>>, %arg3: memref<1x64xf32, #tpu.memory_space<vmem>>, %arg4: memref<384x64xf32, #tpu.memory_space<vmem>>) attributes {dimension_semantics = [#tpu.dimension_semantics<parallel>], iteration_bounds = array<i64: 3>, scalar_prefetch = 0 : i64, scratch_operands = 0 : i64, tpu.core_type = #tpu.core_type<tc>, window_params = [{transform_indices = @transform_0, window_bounds = array<i64: 384, 800>}, {pipeline_mode = #tpu.pipeline_mode<synchronous>, transform_indices = @transform_1, window_bounds = array<i64: 800, 64>}, {pipeline_mode = #tpu.pipeline_mode<synchronous>, transform_indices = @transform_2, window_bounds = array<i64: 1, 64>}, {transform_indices = @transform_3, window_bounds = array<i64: 384, 64>}]} {
    %c0 = arith.constant 0 : index
    %c0_0 = arith.constant 0 : index
    %0 = vector.load %arg1[%c0, %c0_0] : memref<384x800xf32, #tpu.memory_space<vmem>>, vector<384x800xf32>
    %1 = arith.truncf %0 : vector<384x800xf32> to vector<384x800xbf16>
    %c0_1 = arith.constant 0 : index
    %c0_2 = arith.constant 0 : index
    %2 = vector.load %arg2[%c0_1, %c0_2] : memref<800x64xbf16, #tpu.memory_space<vmem>>, vector<800x64xbf16>
    %cst = arith.constant dense<0.000000e+00> : vector<384x64xf32>
    %3 = tpu.matmul %1, %2, %cst {dimension_numbers = #tpu.dot_dimension_numbers<[1], [0], [0], [1], [0, 0, 1, 1], [], []>} : vector<384x800xbf16>, vector<800x64xbf16>, vector<384x64xf32> -> vector<384x64xf32>
    %c0_3 = arith.constant 0 : index
    %c0_4 = arith.constant 0 : index
    %4 = vector.load %arg3[%c0_3, %c0_4] : memref<1x64xf32, #tpu.memory_space<vmem>>, vector<1x64xf32>
    %5 = vector.broadcast %4 : vector<1x64xf32> to vector<384x64xf32>
    %6 = arith.addf %3, %5 : vector<384x64xf32>
    %cst_5 = arith.constant 0.000000e+00 : f32
    %7 = vector.broadcast %cst_5 : f32 to vector<384x64xf32>
    %8 = arith.maximumf %6, %7 : vector<384x64xf32>
    %c0_6 = arith.constant 0 : index
    %c0_7 = arith.constant 0 : index
    %9 = vector.load %arg4[%c0_6, %c0_7] : memref<384x64xf32, #tpu.memory_space<vmem>>, vector<384x64xf32>
    tpu.vector_store %arg4[%c0_6, %c0_7], %8 {strides = array<i32>} : memref<384x64xf32, #tpu.memory_space<vmem>>, vector<384x64xf32>,
    return
  }
  func.func @transform_0(%arg0: i32) -> (i32, i32) {
    %c0_i32 = arith.constant 0 : i32
    %c0_i32_0 = arith.constant 0 : i32
    return %arg0, %c0_i32 : i32, i32
  }
  func.func @transform_1(%arg0: i32) -> (i32, i32) {
    %c0_i32 = arith.constant 0 : i32
    %c0_i32_0 = arith.constant 0 : i32
    %c0_i32_1 = arith.constant 0 : i32
    return %c0_i32, %c0_i32_0 : i32, i32
  }
  func.func @transform_2(%arg0: i32) -> (i32, i32) {
    %c0_i32 = arith.constant 0 : i32
    %c0_i32_0 = arith.constant 0 : i32
    %c0_i32_1 = arith.constant 0 : i32
    return %c0_i32, %c0_i32_0 : i32, i32
  }
  func.func @transform_3(%arg0: i32) -> (i32, i32) {
    %c0_i32 = arith.constant 0 : i32
    %c0_i32_0 = arith.constant 0 : i32
    return %arg0, %c0_i32 : i32, i32
  }
}

module attributes {stable_mosaic.version = 11 : i64} {
  func.func @_maxpool_kernel(%arg0: i32, %arg1: memref<1x12x2x12x128xf32, #tpu.memory_space<vmem>>, %arg2: memref<1x12x12x64xf32, #tpu.memory_space<vmem>>) attributes {dimension_semantics = [#tpu.dimension_semantics<parallel>], iteration_bounds = array<i64: 2>, scalar_prefetch = 0 : i64, scratch_operands = 0 : i64, tpu.core_type = #tpu.core_type<tc>, window_params = [{transform_indices = @transform_0, window_bounds = array<i64: 1, 12, 2, 12, 128>}, {transform_indices = @transform_1, window_bounds = array<i64: 1, 12, 12, 64>}]} {
    %c0 = arith.constant 0 : index
    %c0_0 = arith.constant 0 : index
    %c0_1 = arith.constant 0 : index
    %c0_2 = arith.constant 0 : index
    %c0_3 = arith.constant 0 : index
    %0 = vector.load %arg1[%c0, %c0_0, %c0_1, %c0_2, %c0_3] : memref<1x12x2x12x128xf32, #tpu.memory_space<vmem>>, vector<1x12x2x12x128xf32>
    %1 = vector.extract_strided_slice %0 {offsets = [0, 0, 0, 0, 0], sizes = [1, 12, 1, 12, 128], strides = [1, 1, 1, 1, 1]} : vector<1x12x2x12x128xf32> to vector<1x12x1x12x128xf32>
    %2 = vector.shape_cast %1 : vector<1x12x1x12x128xf32> to vector<1x12x12x128xf32>
    %3 = vector.extract_strided_slice %0 {offsets = [0, 0, 1, 0, 0], sizes = [1, 12, 1, 12, 128], strides = [1, 1, 1, 1, 1]} : vector<1x12x2x12x128xf32> to vector<1x12x1x12x128xf32>
    %4 = vector.shape_cast %3 : vector<1x12x1x12x128xf32> to vector<1x12x12x128xf32>
    %5 = arith.maximumf %2, %4 : vector<1x12x12x128xf32>
    %6 = vector.extract_strided_slice %5 {offsets = [0, 0, 0, 0], sizes = [1, 12, 12, 64], strides = [1, 1, 1, 1]} : vector<1x12x12x128xf32> to vector<1x12x12x64xf32>
    %7 = vector.extract_strided_slice %5 {offsets = [0, 0, 0, 64], sizes = [1, 12, 12, 64], strides = [1, 1, 1, 1]} : vector<1x12x12x128xf32> to vector<1x12x12x64xf32>
    %8 = arith.maximumf %6, %7 : vector<1x12x12x64xf32>
    %c0_4 = arith.constant 0 : index
    %c0_5 = arith.constant 0 : index
    %c0_6 = arith.constant 0 : index
    %c0_7 = arith.constant 0 : index
    %9 = vector.load %arg2[%c0_4, %c0_5, %c0_6, %c0_7] : memref<1x12x12x64xf32, #tpu.memory_space<vmem>>, vector<1x12x12x64xf32>
    tpu.vector_store %arg2[%c0_4, %c0_5, %c0_6, %c0_7], %8 {strides = array<i32>} : memref<1x12x12x64xf32, #tpu.memory_space<vmem>>, vector<1x12x12x64xf32>,
    return
  }
  func.func @transform_0(%arg0: i32) -> (i32, i32, i32, i32, i32) {
    %c0_i32 = arith.constant 0 : i32
    %c0_i32_0 = arith.constant 0 : i32
    %c0_i32_1 = arith.constant 0 : i32
    %c0_i32_2 = arith.constant 0 : i32
    %c0_i32_3 = arith.constant 0 : i32
    return %arg0, %c0_i32, %c0_i32_0, %c0_i32_1, %c0_i32_2 : i32, i32, i32, i32, i32
  }
  func.func @transform_1(%arg0: i32) -> (i32, i32, i32, i32) {
    %c0_i32 = arith.constant 0 : i32
    %c0_i32_0 = arith.constant 0 : i32
    %c0_i32_1 = arith.constant 0 : i32
    %c0_i32_2 = arith.constant 0 : i32
    return %arg0, %c0_i32, %c0_i32_0, %c0_i32_1 : i32, i32, i32, i32
  }
}

module attributes {stable_mosaic.version = 11 : i64} {
  func.func @_matmul_bias_relu_1k_kernel(%arg0: i32, %arg1: memref<288x576xf32, #tpu.memory_space<vmem>>, %arg2: memref<576x128xbf16, #tpu.memory_space<vmem>>, %arg3: memref<1x128xf32, #tpu.memory_space<vmem>>, %arg4: memref<288x128xf32, #tpu.memory_space<vmem>>) attributes {dimension_semantics = [#tpu.dimension_semantics<parallel>], iteration_bounds = array<i64: 1>, scalar_prefetch = 0 : i64, scratch_operands = 0 : i64, tpu.core_type = #tpu.core_type<tc>, window_params = [{transform_indices = @transform_0, window_bounds = array<i64: 288, 576>}, {pipeline_mode = #tpu.pipeline_mode<synchronous>, transform_indices = @transform_1, window_bounds = array<i64: 576, 128>}, {pipeline_mode = #tpu.pipeline_mode<synchronous>, transform_indices = @transform_2, window_bounds = array<i64: 1, 128>}, {transform_indices = @transform_3, window_bounds = array<i64: 288, 128>}]} {
    %c0 = arith.constant 0 : index
    %c0_0 = arith.constant 0 : index
    %0 = vector.load %arg1[%c0, %c0_0] : memref<288x576xf32, #tpu.memory_space<vmem>>, vector<288x576xf32>
    %1 = arith.truncf %0 : vector<288x576xf32> to vector<288x576xbf16>
    %c0_1 = arith.constant 0 : index
    %c0_2 = arith.constant 0 : index
    %2 = vector.load %arg2[%c0_1, %c0_2] : memref<576x128xbf16, #tpu.memory_space<vmem>>, vector<576x128xbf16>
    %cst = arith.constant dense<0.000000e+00> : vector<288x128xf32>
    %3 = tpu.matmul %1, %2, %cst {dimension_numbers = #tpu.dot_dimension_numbers<[1], [0], [0], [1], [0, 0, 1, 1], [], []>} : vector<288x576xbf16>, vector<576x128xbf16>, vector<288x128xf32> -> vector<288x128xf32>
    %c0_3 = arith.constant 0 : index
    %c0_4 = arith.constant 0 : index
    %4 = vector.load %arg3[%c0_3, %c0_4] : memref<1x128xf32, #tpu.memory_space<vmem>>, vector<1x128xf32>
    %5 = vector.broadcast %4 : vector<1x128xf32> to vector<288x128xf32>
    %6 = arith.addf %3, %5 : vector<288x128xf32>
    %cst_5 = arith.constant 0.000000e+00 : f32
    %7 = vector.broadcast %cst_5 : f32 to vector<288x128xf32>
    %8 = arith.maximumf %6, %7 : vector<288x128xf32>
    %c0_6 = arith.constant 0 : index
    %c0_7 = arith.constant 0 : index
    %9 = vector.load %arg4[%c0_6, %c0_7] : memref<288x128xf32, #tpu.memory_space<vmem>>, vector<288x128xf32>
    tpu.vector_store %arg4[%c0_6, %c0_7], %8 {strides = array<i32>} : memref<288x128xf32, #tpu.memory_space<vmem>>, vector<288x128xf32>,
    return
  }
  func.func @transform_0(%arg0: i32) -> (i32, i32) {
    %c0_i32 = arith.constant 0 : i32
    %c0_i32_0 = arith.constant 0 : i32
    return %arg0, %c0_i32 : i32, i32
  }
  func.func @transform_1(%arg0: i32) -> (i32, i32) {
    %c0_i32 = arith.constant 0 : i32
    %c0_i32_0 = arith.constant 0 : i32
    %c0_i32_1 = arith.constant 0 : i32
    return %c0_i32, %c0_i32_0 : i32, i32
  }
  func.func @transform_2(%arg0: i32) -> (i32, i32) {
    %c0_i32 = arith.constant 0 : i32
    %c0_i32_0 = arith.constant 0 : i32
    %c0_i32_1 = arith.constant 0 : i32
    return %c0_i32, %c0_i32_0 : i32, i32
  }
  func.func @transform_3(%arg0: i32) -> (i32, i32) {
    %c0_i32 = arith.constant 0 : i32
    %c0_i32_0 = arith.constant 0 : i32
    return %arg0, %c0_i32 : i32, i32
  }
}

module attributes {stable_mosaic.version = 11 : i64} {
  func.func @_maxpool_kernel(%arg0: i32, %arg1: memref<1x6x2x6x256xf32, #tpu.memory_space<vmem>>, %arg2: memref<1x6x6x128xf32, #tpu.memory_space<vmem>>) attributes {dimension_semantics = [#tpu.dimension_semantics<parallel>], iteration_bounds = array<i64: 2>, scalar_prefetch = 0 : i64, scratch_operands = 0 : i64, tpu.core_type = #tpu.core_type<tc>, window_params = [{transform_indices = @transform_0, window_bounds = array<i64: 1, 6, 2, 6, 256>}, {transform_indices = @transform_1, window_bounds = array<i64: 1, 6, 6, 128>}]} {
    %c0 = arith.constant 0 : index
    %c0_0 = arith.constant 0 : index
    %c0_1 = arith.constant 0 : index
    %c0_2 = arith.constant 0 : index
    %c0_3 = arith.constant 0 : index
    %0 = vector.load %arg1[%c0, %c0_0, %c0_1, %c0_2, %c0_3] : memref<1x6x2x6x256xf32, #tpu.memory_space<vmem>>, vector<1x6x2x6x256xf32>
    %1 = vector.extract_strided_slice %0 {offsets = [0, 0, 0, 0, 0], sizes = [1, 6, 1, 6, 256], strides = [1, 1, 1, 1, 1]} : vector<1x6x2x6x256xf32> to vector<1x6x1x6x256xf32>
    %2 = vector.shape_cast %1 : vector<1x6x1x6x256xf32> to vector<1x6x6x256xf32>
    %3 = vector.extract_strided_slice %0 {offsets = [0, 0, 1, 0, 0], sizes = [1, 6, 1, 6, 256], strides = [1, 1, 1, 1, 1]} : vector<1x6x2x6x256xf32> to vector<1x6x1x6x256xf32>
    %4 = vector.shape_cast %3 : vector<1x6x1x6x256xf32> to vector<1x6x6x256xf32>
    %5 = arith.maximumf %2, %4 : vector<1x6x6x256xf32>
    %6 = vector.extract_strided_slice %5 {offsets = [0, 0, 0, 0], sizes = [1, 6, 6, 128], strides = [1, 1, 1, 1]} : vector<1x6x6x256xf32> to vector<1x6x6x128xf32>
    %7 = vector.extract_strided_slice %5 {offsets = [0, 0, 0, 128], sizes = [1, 6, 6, 128], strides = [1, 1, 1, 1]} : vector<1x6x6x256xf32> to vector<1x6x6x128xf32>
    %8 = arith.maximumf %6, %7 : vector<1x6x6x128xf32>
    %c0_4 = arith.constant 0 : index
    %c0_5 = arith.constant 0 : index
    %c0_6 = arith.constant 0 : index
    %c0_7 = arith.constant 0 : index
    %9 = vector.load %arg2[%c0_4, %c0_5, %c0_6, %c0_7] : memref<1x6x6x128xf32, #tpu.memory_space<vmem>>, vector<1x6x6x128xf32>
    tpu.vector_store %arg2[%c0_4, %c0_5, %c0_6, %c0_7], %8 {strides = array<i32>} : memref<1x6x6x128xf32, #tpu.memory_space<vmem>>, vector<1x6x6x128xf32>,
    return
  }
  func.func @transform_0(%arg0: i32) -> (i32, i32, i32, i32, i32) {
    %c0_i32 = arith.constant 0 : i32
    %c0_i32_0 = arith.constant 0 : i32
    %c0_i32_1 = arith.constant 0 : i32
    %c0_i32_2 = arith.constant 0 : i32
    %c0_i32_3 = arith.constant 0 : i32
    return %arg0, %c0_i32, %c0_i32_0, %c0_i32_1, %c0_i32_2 : i32, i32, i32, i32, i32
  }
  func.func @transform_1(%arg0: i32) -> (i32, i32, i32, i32) {
    %c0_i32 = arith.constant 0 : i32
    %c0_i32_0 = arith.constant 0 : i32
    %c0_i32_1 = arith.constant 0 : i32
    %c0_i32_2 = arith.constant 0 : i32
    return %arg0, %c0_i32, %c0_i32_0, %c0_i32_1 : i32, i32, i32, i32
  }
}

module attributes {stable_mosaic.version = 11 : i64} {
  func.func @_matmul_bias_relu_kernel(%arg0: i32, %arg1: i32, %arg2: memref<2x512xf32, #tpu.memory_space<vmem>>, %arg3: memref<512x1000xbf16, #tpu.memory_space<vmem>>, %arg4: memref<1x1000xf32, #tpu.memory_space<vmem>>, %arg5: memref<2x1000xf32, #tpu.memory_space<vmem>>, %arg6: memref<2x1000xf32, #tpu.memory_space<vmem>>) attributes {dimension_semantics = [#tpu.dimension_semantics<parallel>, #tpu.dimension_semantics<arbitrary>], iteration_bounds = array<i64: 1, 9>, scalar_prefetch = 0 : i64, scratch_operands = 1 : i64, tpu.core_type = #tpu.core_type<tc>, window_params = [{transform_indices = @transform_0, window_bounds = array<i64: 2, 512>}, {transform_indices = @transform_1, window_bounds = array<i64: 512, 1000>}, {pipeline_mode = #tpu.pipeline_mode<synchronous>, transform_indices = @transform_2, window_bounds = array<i64: 1, 1000>}, {transform_indices = @transform_3, window_bounds = array<i64: 2, 1000>}]} {
    %c0_i32 = arith.constant 0 : i32
    %0 = arith.cmpi eq, %arg1, %c0_i32 : i32
    %1 = arith.extui %0 : i1 to i32
    %c0_i32_0 = arith.constant 0 : i32
    %2 = arith.cmpi ne, %1, %c0_i32_0 : i32
    scf.if %2 {
      %cst_9 = arith.constant 0.000000e+00 : f32
      %13 = vector.broadcast %cst_9 : f32 to vector<2x1000xf32>
      %c0_10 = arith.constant 0 : index
      %c0_11 = arith.constant 0 : index
      %14 = vector.load %arg6[%c0_10, %c0_11] : memref<2x1000xf32, #tpu.memory_space<vmem>>, vector<2x1000xf32>
      tpu.vector_store %arg6[%c0_10, %c0_11], %13 {strides = array<i32>} : memref<2x1000xf32, #tpu.memory_space<vmem>>, vector<2x1000xf32>,
    } else {
    }
    %c0 = arith.constant 0 : index
    %c0_1 = arith.constant 0 : index
    %3 = vector.load %arg6[%c0, %c0_1] : memref<2x1000xf32, #tpu.memory_space<vmem>>, vector<2x1000xf32>
    %c0_2 = arith.constant 0 : index
    %c0_3 = arith.constant 0 : index
    %4 = vector.load %arg2[%c0_2, %c0_3] : memref<2x512xf32, #tpu.memory_space<vmem>>, vector<2x512xf32>
    %5 = arith.truncf %4 : vector<2x512xf32> to vector<2x512xbf16>
    %c0_4 = arith.constant 0 : index
    %c0_5 = arith.constant 0 : index
    %6 = vector.load %arg3[%c0_4, %c0_5] : memref<512x1000xbf16, #tpu.memory_space<vmem>>, vector<512x1000xbf16>
    %cst = arith.constant dense<0.000000e+00> : vector<2x1000xf32>
    %7 = tpu.matmul %5, %6, %cst {dimension_numbers = #tpu.dot_dimension_numbers<[1], [0], [0], [1], [0, 0, 1, 1], [], []>} : vector<2x512xbf16>, vector<512x1000xbf16>, vector<2x1000xf32> -> vector<2x1000xf32>
    %8 = arith.addf %3, %7 : vector<2x1000xf32>
    %c0_6 = arith.constant 0 : index
    %c0_7 = arith.constant 0 : index
    %9 = vector.load %arg6[%c0_6, %c0_7] : memref<2x1000xf32, #tpu.memory_space<vmem>>, vector<2x1000xf32>
    tpu.vector_store %arg6[%c0_6, %c0_7], %8 {strides = array<i32>} : memref<2x1000xf32, #tpu.memory_space<vmem>>, vector<2x1000xf32>,
    %c8_i32 = arith.constant 8 : i32
    %10 = arith.cmpi eq, %arg1, %c8_i32 : i32
    %11 = arith.extui %10 : i1 to i32
    %c0_i32_8 = arith.constant 0 : i32
    %12 = arith.cmpi ne, %11, %c0_i32_8 : i32
    scf.if %12 {
      %c0_9 = arith.constant 0 : index
      %c0_10 = arith.constant 0 : index
      %13 = vector.load %arg6[%c0_9, %c0_10] : memref<2x1000xf32, #tpu.memory_space<vmem>>, vector<2x1000xf32>
      %c0_11 = arith.constant 0 : index
      %c0_12 = arith.constant 0 : index
      %14 = vector.load %arg4[%c0_11, %c0_12] : memref<1x1000xf32, #tpu.memory_space<vmem>>, vector<1x1000xf32>
      %15 = vector.broadcast %14 : vector<1x1000xf32> to vector<2x1000xf32>
      %16 = arith.addf %13, %15 : vector<2x1000xf32>
      %cst_13 = arith.constant 0.000000e+00 : f32
      %17 = vector.broadcast %cst_13 : f32 to vector<2x1000xf32>
      %18 = arith.maximumf %16, %17 : vector<2x1000xf32>
      %c0_14 = arith.constant 0 : index
      %c0_15 = arith.constant 0 : index
      %19 = vector.load %arg5[%c0_14, %c0_15] : memref<2x1000xf32, #tpu.memory_space<vmem>>, vector<2x1000xf32>
      tpu.vector_store %arg5[%c0_14, %c0_15], %18 {strides = array<i32>} : memref<2x1000xf32, #tpu.memory_space<vmem>>, vector<2x1000xf32>,
    } else {
    }
    return
  }
  func.func @transform_0(%arg0: i32, %arg1: i32) -> (i32, i32) {
    %c0_i32 = arith.constant 0 : i32
    return %arg0, %arg1 : i32, i32
  }
  func.func @transform_1(%arg0: i32, %arg1: i32) -> (i32, i32) {
    %c0_i32 = arith.constant 0 : i32
    %c0_i32_0 = arith.constant 0 : i32
    return %arg1, %c0_i32 : i32, i32
  }
  func.func @transform_2(%arg0: i32, %arg1: i32) -> (i32, i32) {
    %c0_i32 = arith.constant 0 : i32
    %c0_i32_0 = arith.constant 0 : i32
    %c0_i32_1 = arith.constant 0 : i32
    return %c0_i32, %c0_i32_0 : i32, i32
  }
  func.func @transform_3(%arg0: i32, %arg1: i32) -> (i32, i32) {
    %c0_i32 = arith.constant 0 : i32
    %c0_i32_0 = arith.constant 0 : i32
    return %arg0, %c0_i32 : i32, i32
  }
}

module attributes {stable_mosaic.version = 11 : i64} {
  func.func @_matmul_bias_relu_1k_kernel(%arg0: i32, %arg1: memref<2x1000xf32, #tpu.memory_space<vmem>>, %arg2: memref<1000x500xbf16, #tpu.memory_space<vmem>>, %arg3: memref<1x500xf32, #tpu.memory_space<vmem>>, %arg4: memref<2x500xf32, #tpu.memory_space<vmem>>) attributes {dimension_semantics = [#tpu.dimension_semantics<parallel>], iteration_bounds = array<i64: 1>, scalar_prefetch = 0 : i64, scratch_operands = 0 : i64, tpu.core_type = #tpu.core_type<tc>, window_params = [{transform_indices = @transform_0, window_bounds = array<i64: 2, 1000>}, {pipeline_mode = #tpu.pipeline_mode<synchronous>, transform_indices = @transform_1, window_bounds = array<i64: 1000, 500>}, {pipeline_mode = #tpu.pipeline_mode<synchronous>, transform_indices = @transform_2, window_bounds = array<i64: 1, 500>}, {transform_indices = @transform_3, window_bounds = array<i64: 2, 500>}]} {
    %c0 = arith.constant 0 : index
    %c0_0 = arith.constant 0 : index
    %0 = vector.load %arg1[%c0, %c0_0] : memref<2x1000xf32, #tpu.memory_space<vmem>>, vector<2x1000xf32>
    %1 = arith.truncf %0 : vector<2x1000xf32> to vector<2x1000xbf16>
    %c0_1 = arith.constant 0 : index
    %c0_2 = arith.constant 0 : index
    %2 = vector.load %arg2[%c0_1, %c0_2] : memref<1000x500xbf16, #tpu.memory_space<vmem>>, vector<1000x500xbf16>
    %cst = arith.constant dense<0.000000e+00> : vector<2x500xf32>
    %3 = tpu.matmul %1, %2, %cst {dimension_numbers = #tpu.dot_dimension_numbers<[1], [0], [0], [1], [0, 0, 1, 1], [], []>} : vector<2x1000xbf16>, vector<1000x500xbf16>, vector<2x500xf32> -> vector<2x500xf32>
    %c0_3 = arith.constant 0 : index
    %c0_4 = arith.constant 0 : index
    %4 = vector.load %arg3[%c0_3, %c0_4] : memref<1x500xf32, #tpu.memory_space<vmem>>, vector<1x500xf32>
    %5 = vector.broadcast %4 : vector<1x500xf32> to vector<2x500xf32>
    %6 = arith.addf %3, %5 : vector<2x500xf32>
    %cst_5 = arith.constant 0.000000e+00 : f32
    %7 = vector.broadcast %cst_5 : f32 to vector<2x500xf32>
    %8 = arith.maximumf %6, %7 : vector<2x500xf32>
    %c0_6 = arith.constant 0 : index
    %c0_7 = arith.constant 0 : index
    %9 = vector.load %arg4[%c0_6, %c0_7] : memref<2x500xf32, #tpu.memory_space<vmem>>, vector<2x500xf32>
    tpu.vector_store %arg4[%c0_6, %c0_7], %8 {strides = array<i32>} : memref<2x500xf32, #tpu.memory_space<vmem>>, vector<2x500xf32>,
    return
  }
  func.func @transform_0(%arg0: i32) -> (i32, i32) {
    %c0_i32 = arith.constant 0 : i32
    %c0_i32_0 = arith.constant 0 : i32
    return %arg0, %c0_i32 : i32, i32
  }
  func.func @transform_1(%arg0: i32) -> (i32, i32) {
    %c0_i32 = arith.constant 0 : i32
    %c0_i32_0 = arith.constant 0 : i32
    %c0_i32_1 = arith.constant 0 : i32
    return %c0_i32, %c0_i32_0 : i32, i32
  }
  func.func @transform_2(%arg0: i32) -> (i32, i32) {
    %c0_i32 = arith.constant 0 : i32
    %c0_i32_0 = arith.constant 0 : i32
    %c0_i32_1 = arith.constant 0 : i32
    return %c0_i32, %c0_i32_0 : i32, i32
  }
  func.func @transform_3(%arg0: i32) -> (i32, i32) {
    %c0_i32 = arith.constant 0 : i32
    %c0_i32_0 = arith.constant 0 : i32
    return %arg0, %c0_i32 : i32, i32
  }
}

module attributes {stable_mosaic.version = 11 : i64} {
  func.func @_matmul_bias_relu_1k_kernel(%arg0: i32, %arg1: memref<2x500xf32, #tpu.memory_space<vmem>>, %arg2: memref<500x3xbf16, #tpu.memory_space<vmem>>, %arg3: memref<1x3xf32, #tpu.memory_space<vmem>>, %arg4: memref<2x3xf32, #tpu.memory_space<vmem>>) attributes {dimension_semantics = [#tpu.dimension_semantics<parallel>], iteration_bounds = array<i64: 1>, scalar_prefetch = 0 : i64, scratch_operands = 0 : i64, tpu.core_type = #tpu.core_type<tc>, window_params = [{transform_indices = @transform_0, window_bounds = array<i64: 2, 500>}, {pipeline_mode = #tpu.pipeline_mode<synchronous>, transform_indices = @transform_1, window_bounds = array<i64: 500, 3>}, {pipeline_mode = #tpu.pipeline_mode<synchronous>, transform_indices = @transform_2, window_bounds = array<i64: 1, 3>}, {transform_indices = @transform_3, window_bounds = array<i64: 2, 3>}]} {
    %c0 = arith.constant 0 : index
    %c0_0 = arith.constant 0 : index
    %0 = vector.load %arg1[%c0, %c0_0] : memref<2x500xf32, #tpu.memory_space<vmem>>, vector<2x500xf32>
    %1 = arith.truncf %0 : vector<2x500xf32> to vector<2x500xbf16>
    %c0_1 = arith.constant 0 : index
    %c0_2 = arith.constant 0 : index
    %2 = vector.load %arg2[%c0_1, %c0_2] : memref<500x3xbf16, #tpu.memory_space<vmem>>, vector<500x3xbf16>
    %cst = arith.constant dense<0.000000e+00> : vector<2x3xf32>
    %3 = tpu.matmul %1, %2, %cst {dimension_numbers = #tpu.dot_dimension_numbers<[1], [0], [0], [1], [0, 0, 1, 1], [], []>} : vector<2x500xbf16>, vector<500x3xbf16>, vector<2x3xf32> -> vector<2x3xf32>
    %c0_3 = arith.constant 0 : index
    %c0_4 = arith.constant 0 : index
    %4 = vector.load %arg3[%c0_3, %c0_4] : memref<1x3xf32, #tpu.memory_space<vmem>>, vector<1x3xf32>
    %5 = vector.broadcast %4 : vector<1x3xf32> to vector<2x3xf32>
    %6 = arith.addf %3, %5 : vector<2x3xf32>
    %cst_5 = arith.constant 0.000000e+00 : f32
    %7 = vector.broadcast %cst_5 : f32 to vector<2x3xf32>
    %8 = arith.maximumf %6, %7 : vector<2x3xf32>
    %c0_6 = arith.constant 0 : index
    %c0_7 = arith.constant 0 : index
    %9 = vector.load %arg4[%c0_6, %c0_7] : memref<2x3xf32, #tpu.memory_space<vmem>>, vector<2x3xf32>
    tpu.vector_store %arg4[%c0_6, %c0_7], %8 {strides = array<i32>} : memref<2x3xf32, #tpu.memory_space<vmem>>, vector<2x3xf32>,
    return
  }
  func.func @transform_0(%arg0: i32) -> (i32, i32) {
    %c0_i32 = arith.constant 0 : i32
    %c0_i32_0 = arith.constant 0 : i32
    return %arg0, %c0_i32 : i32, i32
  }
  func.func @transform_1(%arg0: i32) -> (i32, i32) {
    %c0_i32 = arith.constant 0 : i32
    %c0_i32_0 = arith.constant 0 : i32
    %c0_i32_1 = arith.constant 0 : i32
    return %c0_i32, %c0_i32_0 : i32, i32
  }
  func.func @transform_2(%arg0: i32) -> (i32, i32) {
    %c0_i32 = arith.constant 0 : i32
    %c0_i32_0 = arith.constant 0 : i32
    %c0_i32_1 = arith.constant 0 : i32
    return %c0_i32, %c0_i32_0 : i32, i32
  }
  func.func @transform_3(%arg0: i32) -> (i32, i32) {
    %c0_i32 = arith.constant 0 : i32
    %c0_i32_0 = arith.constant 0 : i32
    return %arg0, %c0_i32 : i32, i32
  }
}

</mosaic_0001>

<bundles_post_ra>
// kernel: clasic_forward.10
= control target key start
LH: loop header
LB: loop body
LE: loop exit
PB: predicated region body
PF: predicated region fallthrough
CT: control target
= control target key end

     0   :  { %s860_s6 = smov 0   ;;  %s1533_s0 = inlined_call_operand.vmem [shape: f32[2,24,2,24,64], index: 0, kind: input, shape index: {}]   ;;  %s1534_s1 = inlined_call_operand.vmem [shape: f32[2,24,24,32], index: 1, kind: output, shape index: {}]  }
   0x1 LB: > { %s821_s7 = sadd.s32 4294967295, %s847_s6   ;;  %p825_p0 = scmp.ge.s32.totalorder %s847_s6, 1  ;;  %s847_s6 = sphi %s860_s6, %s11_s6  }
   0x2   : > { %p87_p1 = scmp.lt.s32.totalorder %s847_s6, 3 }
   0x4   : > { %p88_p2 = pnand %p825_p0, %p87_p1 }
   0x6   : > { %91 = sbr.rel (%p88_p2) target bundleno = 279 (0x117), region = 24 }
   0xb   : > { %p107_p3 = scmp.lt.s32.totalorder %s821_s7, 1  ;;  %s849_s12 = smov 96   ;;  %vm693_vm0 = vcmask 261120  }
   0xd   : > { %s1560_s7 = smov (!%p107_p3, %s821_s7), 1 }
   0xe   : > { %s830_s8 = smul.u32 1152, %s1560_s7 }
   0xf   : > { %s831_s13 = smul.u32 576, %s1560_s7 }
  0x10   : > { %s874_s11 = scalar_lea.vmem %s1533_s0, %s830_s8 }
  0x11   : > { %v119_v0 = vld [vmem:[%s874_s11 + $0x10] sm:$0xff]  ;;  %v122_v1 = vld [vmem:[%s874_s11 + $0x28] sm:$0xff]  ;;  %v117_v2 = vld [vmem:[%s874_s11] sm:$0xff]  ;;  %s1238_s16 = scalar_lea.vmem %s1534_s1, %s831_s13 }
  0x12   : > { %v879_v3 = vmax.f32 %v119_v0, %v122_v1  ;;  %v120_v4 = vld [vmem:[%s874_s11 + $0x18] sm:$0xff]  ;;  %v123_v5 = vld [vmem:[%s874_s11 + $0x30] sm:$0xff]  ;;  %v126_v6 = vld [vmem:[%s874_s11 + $0x48] sm:$0xff] }
  0x13   : > { %v884_v7 = vmax.f32 %v117_v2, %v120_v4  ;;  %v118_v8 = vld [vmem:[%s874_s11 + $0x8] sm:$0xff]  ;;  %v121_v9 = vld [vmem:[%s874_s11 + $0x20] sm:$0xff]  ;;  %v890_v10 = vmax.f32 %v123_v5, %v126_v6  ;;  %v128_v13 = vld [vmem:[%s874_s11 + $0x58] sm:$0xff] }
  0x14   : > { %409 = vrot.lane.b32.xlu1 %v879_v3, %s849_s12  ;;  %v894_v11 = vmax.f32 %v118_v8, %v121_v9  ;;  %v125_v12 = vld [vmem:[%s874_s11 + $0x40] sm:$0xff]  ;;  %v124_v14 = vld [vmem:[%s874_s11 + $0x38] sm:$0xff]  ;;  %v127_v15 = vld [vmem:[%s874_s11 + $0x50] sm:$0xff] }
  0x15   : > { %405 = vrot.lane.b32.xlu0 %v884_v7, %s849_s12  ;;  %v902_v16 = vmax.f32 %v125_v12, %v128_v13  ;;  %v906_v17 = vmax.f32 %v124_v14, %v127_v15  ;;  %v130_v18 = vld [vmem:[%s874_s11 + $0x68] sm:$0xff]  ;;  %v133_v19 = vld [vmem:[%s874_s11 + $0x80] sm:$0xff]  ;;  %v132_v21 = vld [vmem:[%s874_s11 + $0x78] sm:$0xff] }
  0x16   : > { %v129_v20 = vld [vmem:[%s874_s11 + $0x60] sm:$0xff]  ;;  %v914_v22 = vmax.f32 %v130_v18, %v133_v19  ;;  %v135_v24 = vld [vmem:[%s874_s11 + $0x90] sm:$0xff]  ;;  %v138_v25 = vld [vmem:[%s874_s11 + $0xa8] sm:$0xff] }
  0x17   : > { %v918_v23 = vmax.f32 %v129_v20, %v132_v21  ;;  %v131_v26 = vld [vmem:[%s874_s11 + $0x70] sm:$0xff]  ;;  %v134_v27 = vld [vmem:[%s874_s11 + $0x88] sm:$0xff]  ;;  %v926_v28 = vmax.f32 %v135_v24, %v138_v25  ;;  %v137_v30 = vld [vmem:[%s874_s11 + $0xa0] sm:$0xff] }
  0x18   : > { %411 = vrot.lane.b32.xlu1 %v890_v10, %s849_s12  ;;  %v930_v29 = vmax.f32 %v131_v26, %v134_v27  ;;  %v140_v31 = vld [vmem:[%s874_s11 + $0xb8] sm:$0xff]  ;;  %v139_v33 = vld [vmem:[%s874_s11 + $0xb0] sm:$0xff]  ;;  %v142_v36 = vld [vmem:[%s874_s11 + $0xc8] sm:$0xff] }
  0x19   : > { %407 = vrot.lane.b32.xlu0 %v894_v11, %s849_s12  ;;  %v136_v32 = vld [vmem:[%s874_s11 + $0x98] sm:$0xff]  ;;  %v938_v34 = vmax.f32 %v137_v30, %v140_v31  ;;  %v145_v37 = vld [vmem:[%s874_s11 + $0xe0] sm:$0xff]  ;;  %v147_v42 = vld [vmem:[%s874_s11 + $0xf0] sm:$0xff] }
  0x1a   : > { %v942_v35 = vmax.f32 %v136_v32, %v139_v33  ;;  %v141_v38 = vld [vmem:[%s874_s11 + $0xc0] sm:$0xff]  ;;  %v144_v39 = vld [vmem:[%s874_s11 + $0xd8] sm:$0xff]  ;;  %v950_v40 = vmax.f32 %v142_v36, %v145_v37  ;;  %v150_v43 = vld [vmem:[%s874_s11 + $0x108] sm:$0xff] }
  0x1b   : > { %v954_v41 = vmax.f32 %v141_v38, %v144_v39  ;;  %v143_v44 = vld [vmem:[%s874_s11 + $0xd0] sm:$0xff]  ;;  %v146_v45 = vld [vmem:[%s874_s11 + $0xe8] sm:$0xff]  ;;  %v962_v46 = vmax.f32 %v147_v42, %v150_v43  ;;  %v149_v48 = vld [vmem:[%s874_s11 + $0x100] sm:$0xff] }
  0x1c   : > { %415 = vrot.lane.b32.xlu1 %v902_v16, %s849_s12  ;;  %v966_v47 = vmax.f32 %v143_v44, %v146_v45  ;;  %v152_v49 = vld [vmem:[%s874_s11 + $0x118] sm:$0xff]  ;;  %v151_v51 = vld [vmem:[%s874_s11 + $0x110] sm:$0xff]  ;;  %v154_v54 = vld [vmem:[%s874_s11 + $0x128] sm:$0xff] }
  0x1d   : > { %413 = vrot.lane.b32.xlu0 %v906_v17, %s849_s12  ;;  %v148_v50 = vld [vmem:[%s874_s11 + $0xf8] sm:$0xff]  ;;  %v974_v52 = vmax.f32 %v149_v48, %v152_v49  ;;  %v157_v55 = vld [vmem:[%s874_s11 + $0x140] sm:$0xff]  ;;  %v159_v60 = vld [vmem:[%s874_s11 + $0x150] sm:$0xff] }
  0x1e   : > { %v978_v53 = vmax.f32 %v148_v50, %v151_v51  ;;  %v153_v56 = vld [vmem:[%s874_s11 + $0x120] sm:$0xff]  ;;  %v156_v57 = vld [vmem:[%s874_s11 + $0x138] sm:$0xff]  ;;  %v986_v58 = vmax.f32 %v154_v54, %v157_v55  ;;  %v162_v61 = vld [vmem:[%s874_s11 + $0x168] sm:$0xff] }
  0x1f   : > { %v990_v59 = vmax.f32 %v153_v56, %v156_v57  ;;  %v155_v62 = vld [vmem:[%s874_s11 + $0x130] sm:$0xff]  ;;  %v158_v63 = vld [vmem:[%s874_s11 + $0x148] sm:$0xff]  ;;  %v998_v0 = vmax.f32 %v159_v60, %v162_v61  ;;  %v161_v2 = vld [vmem:[%s874_s11 + $0x160] sm:$0xff] }
  0x20   : > { %419 = vrot.lane.b32.xlu1 %v914_v22, %s849_s12  ;;  %v1002_v1 = vmax.f32 %v155_v62, %v158_v63  ;;  %v164_v4 = vld [vmem:[%s874_s11 + $0x178] sm:$0xff]  ;;  %v163_v6 = vld [vmem:[%s874_s11 + $0x170] sm:$0xff]  ;;  %v166_v12 = vld [vmem:[%s874_s11 + $0x188] sm:$0xff] }
  0x21   : > { %417 = vrot.lane.b32.xlu0 %v918_v23, %s849_s12  ;;  %v160_v5 = vld [vmem:[%s874_s11 + $0x158] sm:$0xff]  ;;  %v1010_v8 = vmax.f32 %v161_v2, %v164_v4  ;;  %v169_v13 = vld [vmem:[%s874_s11 + $0x1a0] sm:$0xff]  ;;  %v171_v20 = vld [vmem:[%s874_s11 + $0x1b0] sm:$0xff] }
  0x22   : > { %v1014_v9 = vmax.f32 %v160_v5, %v163_v6  ;;  %v165_v14 = vld [vmem:[%s874_s11 + $0x180] sm:$0xff]  ;;  %v168_v15 = vld [vmem:[%s874_s11 + $0x198] sm:$0xff]  ;;  %v1022_v18 = vmax.f32 %v166_v12, %v169_v13  ;;  %v174_v21 = vld [vmem:[%s874_s11 + $0x1c8] sm:$0xff] }
  0x23   : > { %v1026_v19 = vmax.f32 %v165_v14, %v168_v15  ;;  %v167_v24 = vld [vmem:[%s874_s11 + $0x190] sm:$0xff]  ;;  %v170_v25 = vld [vmem:[%s874_s11 + $0x1a8] sm:$0xff]  ;;  %v1034_v26 = vmax.f32 %v171_v20, %v174_v21  ;;  %v173_v30 = vld [vmem:[%s874_s11 + $0x1c0] sm:$0xff] }
  0x24   : > { %423 = vrot.lane.b32.xlu1 %v926_v28, %s849_s12  ;;  %v1038_v27 = vmax.f32 %v167_v24, %v170_v25  ;;  %v176_v31 = vld [vmem:[%s874_s11 + $0x1d8] sm:$0xff]  ;;  %v175_v33 = vld [vmem:[%s874_s11 + $0x1d0] sm:$0xff]  ;;  %v178_v38 = vld [vmem:[%s874_s11 + $0x1e8] sm:$0xff] }
  0x25   : > { %421 = vrot.lane.b32.xlu0 %v930_v29, %s849_s12  ;;  %v172_v32 = vld [vmem:[%s874_s11 + $0x1b8] sm:$0xff]  ;;  %v1046_v36 = vmax.f32 %v173_v30, %v176_v31  ;;  %v181_v39 = vld [vmem:[%s874_s11 + $0x200] sm:$0xff]  ;;  %v183_v48 = vld [vmem:[%s874_s11 + $0x210] sm:$0xff] }
  0x26   : > { %v1050_v37 = vmax.f32 %v172_v32, %v175_v33  ;;  %v177_v42 = vld [vmem:[%s874_s11 + $0x1e0] sm:$0xff]  ;;  %v180_v43 = vld [vmem:[%s874_s11 + $0x1f8] sm:$0xff]  ;;  %v1058_v44 = vmax.f32 %v178_v38, %v181_v39  ;;  %v186_v49 = vld [vmem:[%s874_s11 + $0x228] sm:$0xff] }
  0x27   : > { %v1062_v45 = vmax.f32 %v177_v42, %v180_v43  ;;  %v179_v50 = vld [vmem:[%s874_s11 + $0x1f0] sm:$0xff]  ;;  %v182_v51 = vld [vmem:[%s874_s11 + $0x208] sm:$0xff]  ;;  %v1070_v54 = vmax.f32 %v183_v48, %v186_v49  ;;  %v185_v56 = vld [vmem:[%s874_s11 + $0x220] sm:$0xff] }
  0x28   : > { %427 = vrot.lane.b32.xlu1 %v938_v34, %s849_s12  ;;  %v1074_v55 = vmax.f32 %v179_v50, %v182_v51  ;;  %v188_v57 = vld [vmem:[%s874_s11 + $0x238] sm:$0xff]  ;;  %v187_v61 = vld [vmem:[%s874_s11 + $0x230] sm:$0xff]  ;;  %v190_v2 = vld [vmem:[%s874_s11 + $0x248] sm:$0xff] }
  0x29   : > { %425 = vrot.lane.b32.xlu0 %v942_v35, %s849_s12  ;;  %v184_v60 = vld [vmem:[%s874_s11 + $0x218] sm:$0xff]  ;;  %v1082_v62 = vmax.f32 %v185_v56, %v188_v57  ;;  %v193_v4 = vld [vmem:[%s874_s11 + $0x260] sm:$0xff]  ;;  %v195_v14 = vld [vmem:[%s874_s11 + $0x270] sm:$0xff] }
  0x2a   : > { %v1086_v63 = vmax.f32 %v184_v60, %v187_v61  ;;  %v189_v5 = vld [vmem:[%s874_s11 + $0x240] sm:$0xff]  ;;  %v192_v6 = vld [vmem:[%s874_s11 + $0x258] sm:$0xff]  ;;  %v1094_v12 = vmax.f32 %v190_v2, %v193_v4  ;;  %v198_v15 = vld [vmem:[%s874_s11 + $0x288] sm:$0xff] }
  0x2b   : > { %v1098_v13 = vmax.f32 %v189_v5, %v192_v6  ;;  %v191_v20 = vld [vmem:[%s874_s11 + $0x250] sm:$0xff]  ;;  %v194_v21 = vld [vmem:[%s874_s11 + $0x268] sm:$0xff]  ;;  %v1106_v24 = vmax.f32 %v195_v14, %v198_v15  ;;  %v197_v30 = vld [vmem:[%s874_s11 + $0x280] sm:$0xff] }
  0x2c   : > { %431 = vrot.lane.b32.xlu1 %v950_v40, %s849_s12  ;;  %v1110_v25 = vmax.f32 %v191_v20, %v194_v21  ;;  %v200_v31 = vld [vmem:[%s874_s11 + $0x298] sm:$0xff]  ;;  %v199_v33 = vld [vmem:[%s874_s11 + $0x290] sm:$0xff]  ;;  %v202_v42 = vld [vmem:[%s874_s11 + $0x2a8] sm:$0xff] }
  0x2d   : > { %429 = vrot.lane.b32.xlu0 %v954_v41, %s849_s12  ;;  %v196_v32 = vld [vmem:[%s874_s11 + $0x278] sm:$0xff]  ;;  %v1118_v38 = vmax.f32 %v197_v30, %v200_v31  ;;  %v205_v43 = vld [vmem:[%s874_s11 + $0x2c0] sm:$0xff]  ;;  %v207_v56 = vld [vmem:[%s874_s11 + $0x2d0] sm:$0xff] }
  0x2e   : > { %v1122_v39 = vmax.f32 %v196_v32, %v199_v33  ;;  %v201_v48 = vld [vmem:[%s874_s11 + $0x2a0] sm:$0xff]  ;;  %v204_v49 = vld [vmem:[%s874_s11 + $0x2b8] sm:$0xff]  ;;  %v1130_v50 = vmax.f32 %v202_v42, %v205_v43  ;;  %v210_v57 = vld [vmem:[%s874_s11 + $0x2e8] sm:$0xff] }
  0x2f   : > { %v1134_v51 = vmax.f32 %v201_v48, %v204_v49  ;;  %v203_v60 = vld [vmem:[%s874_s11 + $0x2b0] sm:$0xff]  ;;  %v206_v61 = vld [vmem:[%s874_s11 + $0x2c8] sm:$0xff]  ;;  %v1142_v2 = vmax.f32 %v207_v56, %v210_v57  ;;  %v209_v5 = vld [vmem:[%s874_s11 + $0x2e0] sm:$0xff] }
  0x30   : > { %435 = vrot.lane.b32.xlu1 %v962_v46, %s849_s12  ;;  %v1146_v4 = vmax.f32 %v203_v60, %v206_v61  ;;  %v212_v6 = vld [vmem:[%s874_s11 + $0x2f8] sm:$0xff]  ;;  %v211_v15 = vld [vmem:[%s874_s11 + $0x2f0] sm:$0xff]  ;;  %v214_v30 = vld [vmem:[%s874_s11 + $0x308] sm:$0xff] }
  0x31   : > { %433 = vrot.lane.b32.xlu0 %v966_v47, %s849_s12  ;;  %v208_v14 = vld [vmem:[%s874_s11 + $0x2d8] sm:$0xff]  ;;  %v1154_v20 = vmax.f32 %v209_v5, %v212_v6  ;;  %v217_v31 = vld [vmem:[%s874_s11 + $0x320] sm:$0xff]  ;;  %v219_v48 = vld [vmem:[%s874_s11 + $0x330] sm:$0xff] }
  0x32   : > { %v1158_v21 = vmax.f32 %v208_v14, %v211_v15  ;;  %v213_v32 = vld [vmem:[%s874_s11 + $0x300] sm:$0xff]  ;;  %v216_v33 = vld [vmem:[%s874_s11 + $0x318] sm:$0xff]  ;;  %v1166_v42 = vmax.f32 %v214_v30, %v217_v31  ;;  %v222_v49 = vld [vmem:[%s874_s11 + $0x348] sm:$0xff] }
  0x33   : > { %v1170_v43 = vmax.f32 %v213_v32, %v216_v33  ;;  %v215_v56 = vld [vmem:[%s874_s11 + $0x310] sm:$0xff]  ;;  %v218_v57 = vld [vmem:[%s874_s11 + $0x328] sm:$0xff]  ;;  %v1178_v60 = vmax.f32 %v219_v48, %v222_v49  ;;  %v221_v5 = vld [vmem:[%s874_s11 + $0x340] sm:$0xff] }
  0x34   : > { %439 = vrot.lane.b32.xlu1 %v974_v52, %s849_s12  ;;  %v1182_v61 = vmax.f32 %v215_v56, %v218_v57  ;;  %v224_v6 = vld [vmem:[%s874_s11 + $0x358] sm:$0xff]  ;;  %v223_v15 = vld [vmem:[%s874_s11 + $0x350] sm:$0xff]  ;;  %v226_v32 = vld [vmem:[%s874_s11 + $0x368] sm:$0xff] }
  0x35   : > { %437 = vrot.lane.b32.xlu0 %v978_v53, %s849_s12  ;;  %v220_v14 = vld [vmem:[%s874_s11 + $0x338] sm:$0xff]  ;;  %v1190_v30 = vmax.f32 %v221_v5, %v224_v6  ;;  %v229_v33 = vld [vmem:[%s874_s11 + $0x380] sm:$0xff]  ;;  %v231_v5 = vld [vmem:[%s874_s11 + $0x390] sm:$0xff] }
  0x36   : > { %1543 = vst [vmem:[#allocation2_spill] sm:$0xff] %v1182_v61  ;;  %v1194_v31 = vmax.f32 %v220_v14, %v223_v15  ;;  %v225_v48 = vld [vmem:[%s874_s11 + $0x360] sm:$0xff]  ;;  %v228_v49 = vld [vmem:[%s874_s11 + $0x378] sm:$0xff]  ;;  %v1202_v56 = vmax.f32 %v226_v32, %v229_v33  ;;  %v234_v6 = vld [vmem:[%s874_s11 + $0x3a8] sm:$0xff] }
  0x37   : > { %1544 = vst [vmem:[#allocation3_spill] sm:$0xff] %v1190_v30  ;;  %v1206_v57 = vmax.f32 %v225_v48, %v228_v49  ;;  %v227_v14 = vld [vmem:[%s874_s11 + $0x370] sm:$0xff]  ;;  %v230_v15 = vld [vmem:[%s874_s11 + $0x388] sm:$0xff]  ;;  %v233_v33 = vld [vmem:[%s874_s11 + $0x3a0] sm:$0xff] }
  0x38   : > { %443 = vrot.lane.b32.xlu1 %v986_v58, %s849_s12  ;;  %1545 = vst [vmem:[#allocation4_spill] sm:$0xff] %v1194_v31  ;;  %1546 = vst [vmem:[#allocation5_spill] sm:$0xff] %v1202_v56  ;;  %v1218_v32 = vmax.f32 %v227_v14, %v230_v15  ;;  %v236_v48 = vld [vmem:[%s874_s11 + $0x3b8] sm:$0xff]  ;;  %v241_v14 = vld [vmem:[%s874_s11 + $0x3e0] sm:$0xff] }
  0x39   : > { %441 = vrot.lane.b32.xlu0 %v990_v59, %s849_s12  ;;  %1547 = vst [vmem:[#allocation6_spill] sm:$0xff] %v1206_v57  ;;  %v232_v49 = vld [vmem:[%s874_s11 + $0x398] sm:$0xff] }
  0x3a   : > { %1549 = vst [vmem:[#allocation8_spill] sm:$0xff] %v1218_v32 }
  0x3c   : > { %447 = vrot.lane.b32.xlu1 %v998_v0, %s849_s12 }
  0x3d   : > { %445 = vrot.lane.b32.xlu0 %v1002_v1, %s849_s12 }
  0x40   : > { %451 = vrot.lane.b32.xlu1 %v1010_v8, %s849_s12 }
  0x41   : > { %449 = vrot.lane.b32.xlu0 %v1014_v9, %s849_s12 }
  0x44   : > { %455 = vrot.lane.b32.xlu1 %v1022_v18, %s849_s12 }
  0x45   : > { %453 = vrot.lane.b32.xlu0 %v1026_v19, %s849_s12 }
  0x48   : > { %459 = vrot.lane.b32.xlu1 %v1034_v26, %s849_s12 }
  0x49   : > { %457 = vrot.lane.b32.xlu0 %v1038_v27, %s849_s12 }
  0x4c   : > { %463 = vrot.lane.b32.xlu1 %v1046_v36, %s849_s12 }
  0x4d   : > { %461 = vrot.lane.b32.xlu0 %v1050_v37, %s849_s12 }
  0x50   : > { %467 = vrot.lane.b32.xlu1 %v1058_v44, %s849_s12 }
  0x51   : > { %465 = vrot.lane.b32.xlu0 %v1062_v45, %s849_s12 }
  0x54   : > { %471 = vrot.lane.b32.xlu1 %v1070_v54, %s849_s12 }
  0x55   : > { %469 = vrot.lane.b32.xlu0 %v1074_v55, %s849_s12 }
  0x58   : > { %475 = vrot.lane.b32.xlu1 %v1082_v62, %s849_s12 }
  0x59   : > { %473 = vrot.lane.b32.xlu0 %v1086_v63, %s849_s12 }
  0x5c   : > { %479 = vrot.lane.b32.xlu1 %v1094_v12, %s849_s12 }
  0x5d   : > { %477 = vrot.lane.b32.xlu0 %v1098_v13, %s849_s12 }
  0x60   : > { %483 = vrot.lane.b32.xlu1 %v1106_v24, %s849_s12 }
  0x61   : > { %481 = vrot.lane.b32.xlu0 %v1110_v25, %s849_s12 }
  0x64   : > { %487 = vrot.lane.b32.xlu1 %v1118_v38, %s849_s12 }
  0x65   : > { %485 = vrot.lane.b32.xlu0 %v1122_v39, %s849_s12 }
  0x68   : > { %491 = vrot.lane.b32.xlu1 %v1130_v50, %s849_s12 }
  0x69   : > { %489 = vrot.lane.b32.xlu0 %v1134_v51, %s849_s12 }
  0x6c   : > { %495 = vrot.lane.b32.xlu1 %v1142_v2, %s849_s12 }
  0x6d   : > { %493 = vrot.lane.b32.xlu0 %v1146_v4, %s849_s12 }
  0x70   : > { %499 = vrot.lane.b32.xlu1 %v1154_v20, %s849_s12 }
  0x71   : > { %497 = vrot.lane.b32.xlu0 %v1158_v21, %s849_s12 }
  0x74   : > { %503 = vrot.lane.b32.xlu1 %v1166_v42, %s849_s12 }
  0x75   : > { %501 = vrot.lane.b32.xlu0 %v1170_v43, %s849_s12 }
  0x78   : > { %507 = vrot.lane.b32.xlu1 %v1178_v60, %s849_s12 }
  0x79   : > { %505 = vrot.lane.b32.xlu0 %v1182_v61, %s849_s12  ;;  %v1214_v61 = vmax.f32 %v231_v5, %v234_v6  ;;  %v238_v6 = vld [vmem:[%s874_s11 + $0x3c8] sm:$0xff] }
  0x7b   : > { %1548 = vst [vmem:[#allocation7_spill] sm:$0xff] %v1214_v61 }
  0x7c   : > { %511 = vrot.lane.b32.xlu1 %v1190_v30, %s849_s12  ;;  %v1227_v30 = vmax.f32 %v233_v33, %v236_v48  ;;  %v237_v33 = vld [vmem:[%s874_s11 + $0x3c0] sm:$0xff]  ;;  %v240_v48 = vld [vmem:[%s874_s11 + $0x3d8] sm:$0xff] }
  0x7d   : > { %509 = vrot.lane.b32.xlu0 %v1194_v31, %s849_s12  ;;  %v235_v31 = vld [vmem:[%s874_s11 + $0x3b0] sm:$0xff] }
  0x7e   : > { %v1231_v5 = vmax.f32 %v232_v49, %v235_v31 }
  0x80   : > { %515 = vrot.lane.b32.xlu1 %v1202_v56, %s849_s12  ;;  %v243_v56 = vld [vmem:[%s874_s11 + $0x3f0] sm:$0xff] }
  0x81   : > { %513 = vrot.lane.b32.xlu0 %v1206_v57, %s849_s12  ;;  %v1252_v57 = vmax.f32 %v237_v33, %v240_v48  ;;  %v245_v48 = vld [vmem:[%s874_s11 + $0x400] sm:$0xff] }
  0x84   : > { %519 = vrot.lane.b32.xlu1 %v1214_v61, %s849_s12  ;;  %v1246_v61 = vmax.f32 %v238_v6, %v241_v14  ;;  %v242_v6 = vld [vmem:[%s874_s11 + $0x3e8] sm:$0xff] }
  0x85   : > { %517 = vrot.lane.b32.xlu0 %v1218_v32, %s849_s12 }
  0x86   : > { %v410_v15 = vpop.permute.xlu1 %409 }
  0x87   : > { %v623_v31 = vmax.f32 %v879_v3, %v410_v15  ;;  %v406_v49 = vpop.permute.xlu0 %405  ;;  %v246_v3 = vld [vmem:[%s874_s11 + $0x408] sm:$0xff]  ;;  %v239_v15 = vld [vmem:[%s874_s11 + $0x3d0] sm:$0xff] }
  0x88   : > { %v621_v32 = vmax.f32 %v884_v7, %v406_v49  ;;  %523 = vrot.lane.b32.xlu1 %v1227_v30, %s849_s12  ;;  %v1264_v33 = vmax.f32 %v243_v56, %v246_v3  ;;  %v247_v56 = vld [vmem:[%s874_s11 + $0x410] sm:$0xff] }
  0x89   : > { %696 = vst.msk [vmem:[%s1238_s16 + $0x10] sm:$0xff] %vm693_vm0, %v623_v31  ;;  %521 = vrot.lane.b32.xlu0 %v1231_v5, %s849_s12 }
  0x8a   : > { %694 = vst.msk [vmem:[%s1238_s16] sm:$0xff] %vm693_vm0, %v621_v32  ;;  %v412_v7 = vpop.permute.xlu1 %411  ;;  %v1270_v32 = vmax.f32 %v239_v15, %v242_v6 }
  0x8b   : > { %v624_v14 = vmax.f32 %v890_v10, %v412_v7  ;;  %v408_v31 = vpop.permute.xlu0 %407  ;;  %v248_v10 = vld [vmem:[%s874_s11 + $0x418] sm:$0xff] }
  0x8c   : > { %v622_v49 = vmax.f32 %v894_v11, %v408_v31  ;;  %527 = vrot.lane.b32.xlu1 %v1246_v61, %s849_s12  ;;  %v244_v7 = vld [vmem:[%s874_s11 + $0x3f8] sm:$0xff]  ;;  %v1282_v15 = vmax.f32 %v245_v48, %v248_v10 }
  0x8d   : > { %697 = vst.msk [vmem:[%s1238_s16 + $0x18] sm:$0xff] %vm693_vm0, %v624_v14  ;;  %525 = vrot.lane.b32.xlu0 %v1252_v57, %s849_s12  ;;  %v1288_v6 = vmax.f32 %v244_v7, %v247_v56  ;;  %v252_v48 = vld [vmem:[%s874_s11 + $0x438] sm:$0xff] }
  0x8e   : > { %695 = vst.msk [vmem:[%s1238_s16 + $0x8] sm:$0xff] %vm693_vm0, %v622_v49  ;;  %v416_v11 = vpop.permute.xlu1 %415  ;;  %v250_v49 = vld [vmem:[%s874_s11 + $0x428] sm:$0xff] }
  0x8f   : > { %v626_v3 = vmax.f32 %v902_v16, %v416_v11  ;;  %v414_v14 = vpop.permute.xlu0 %413  ;;  %1550 = vst [vmem:[#allocation9_spill] sm:$0xff] %v1288_v6  ;;  %v253_v16 = vld [vmem:[%s874_s11 + $0x440] sm:$0xff] }
  0x90   : > { %v625_v31 = vmax.f32 %v906_v17, %v414_v14  ;;  %531 = vrot.lane.b32.xlu1 %v1264_v33, %s849_s12  ;;  %v249_v11 = vld [vmem:[%s874_s11 + $0x420] sm:$0xff]  ;;  %v1300_v7 = vmax.f32 %v250_v49, %v253_v16  ;;  %v254_v49 = vld [vmem:[%s874_s11 + $0x448] sm:$0xff] }
  0x91   : > { %699 = vst.msk [vmem:[%s1238_s16 + $0x28] sm:$0xff] %vm693_vm0, %v626_v3  ;;  %529 = vrot.lane.b32.xlu0 %v1270_v32, %s849_s12  ;;  %v1306_v56 = vmax.f32 %v249_v11, %v252_v48 }
  0x92   : > { %698 = vst.msk [vmem:[%s1238_s16 + $0x20] sm:$0xff] %vm693_vm0, %v625_v31  ;;  %v420_v17 = vpop.permute.xlu1 %419  ;;  %v255_v31 = vld [vmem:[%s874_s11 + $0x450] sm:$0xff] }
  0x93   : > { %v628_v10 = vmax.f32 %v914_v22, %v420_v17  ;;  %v418_v3 = vpop.permute.xlu0 %417  ;;  %v258_v22 = vld [vmem:[%s874_s11 + $0x468] sm:$0xff]  ;;  %v251_v17 = vld [vmem:[%s874_s11 + $0x430] sm:$0xff] }
  0x94   : > { %v627_v14 = vmax.f32 %v918_v23, %v418_v3  ;;  %535 = vrot.lane.b32.xlu1 %v1282_v15, %s849_s12  ;;  %v1318_v11 = vmax.f32 %v255_v31, %v258_v22  ;;  %v1324_v48 = vmax.f32 %v251_v17, %v254_v49 }
  0x95   : > { %701 = vst.msk [vmem:[%s1238_s16 + $0x38] sm:$0xff] %vm693_vm0, %v628_v10  ;;  %533 = vrot.lane.b32.xlu0 %v1288_v6, %s849_s12  ;;  %v260_v6 = vld [vmem:[%s874_s11 + $0x478] sm:$0xff] }
  0x96   : > { %700 = vst.msk [vmem:[%s1238_s16 + $0x30] sm:$0xff] %vm693_vm0, %v627_v14  ;;  %v424_v23 = vpop.permute.xlu1 %423  ;;  %v257_v14 = vld [vmem:[%s874_s11 + $0x460] sm:$0xff] }
  0x97   : > { %v630_v16 = vmax.f32 %v926_v28, %v424_v23  ;;  %v422_v10 = vpop.permute.xlu0 %421  ;;  %v259_v23 = vld [vmem:[%s874_s11 + $0x470] sm:$0xff] }
  0x98   : > { %v629_v3 = vmax.f32 %v930_v29, %v422_v10  ;;  %539 = vrot.lane.b32.xlu1 %v1300_v7, %s849_s12  ;;  %v256_v29 = vld [vmem:[%s874_s11 + $0x458] sm:$0xff] }
  0x99   : > { %703 = vst.msk [vmem:[%s1238_s16 + $0x48] sm:$0xff] %vm693_vm0, %v630_v16  ;;  %537 = vrot.lane.b32.xlu0 %v1306_v56, %s849_s12  ;;  %v1336_v16 = vmax.f32 %v257_v14, %v260_v6  ;;  %v1342_v17 = vmax.f32 %v256_v29, %v259_v23 }
  0x9a   : > { %702 = vst.msk [vmem:[%s1238_s16 + $0x40] sm:$0xff] %vm693_vm0, %v629_v3  ;;  %v428_v28 = vpop.permute.xlu1 %427 }
  0x9b   : > { %v632_v10 = vmax.f32 %v938_v34, %v428_v28  ;;  %v426_v31 = vpop.permute.xlu0 %425 }
  0x9c   : > { %v631_v22 = vmax.f32 %v942_v35, %v426_v31  ;;  %543 = vrot.lane.b32.xlu1 %v1318_v11, %s849_s12 }
  0x9d   : > { %705 = vst.msk [vmem:[%s1238_s16 + $0x58] sm:$0xff] %vm693_vm0, %v632_v10  ;;  %541 = vrot.lane.b32.xlu0 %v1324_v48, %s849_s12 }
  0x9e   : > { %704 = vst.msk [vmem:[%s1238_s16 + $0x50] sm:$0xff] %vm693_vm0, %v631_v22  ;;  %v432_v34 = vpop.permute.xlu1 %431 }
  0x9f   : > { %v634_v49 = vmax.f32 %v950_v40, %v432_v34  ;;  %v430_v35 = vpop.permute.xlu0 %429 }
  0xa0   : > { %v633_v3 = vmax.f32 %v954_v41, %v430_v35  ;;  %547 = vrot.lane.b32.xlu1 %v1336_v16, %s849_s12 }
  0xa1   : > { %707 = vst.msk [vmem:[%s1238_s16 + $0x68] sm:$0xff] %vm693_vm0, %v634_v49  ;;  %545 = vrot.lane.b32.xlu0 %v1342_v17, %s849_s12 }
  0xa2   : > { %706 = vst.msk [vmem:[%s1238_s16 + $0x60] sm:$0xff] %vm693_vm0, %v633_v3  ;;  %v436_v6 = vpop.permute.xlu1 %435 }
  0xa3   : > { %v636_v14 = vmax.f32 %v962_v46, %v436_v6  ;;  %v434_v40 = vpop.permute.xlu0 %433 }
  0xa4   : > { %v635_v28 = vmax.f32 %v966_v47, %v434_v40 }
  0xa5   : > { %709 = vst.msk [vmem:[%s1238_s16 + $0x78] sm:$0xff] %vm693_vm0, %v636_v14 }
  0xa6   : > { %708 = vst.msk [vmem:[%s1238_s16 + $0x70] sm:$0xff] %vm693_vm0, %v635_v28  ;;  %v440_v41 = vpop.permute.xlu1 %439 }
  0xa7   : > { %v638_v29 = vmax.f32 %v974_v52, %v440_v41  ;;  %v438_v23 = vpop.permute.xlu0 %437 }
  0xa8   : > { %v637_v10 = vmax.f32 %v978_v53, %v438_v23 }
  0xa9   : > { %711 = vst.msk [vmem:[%s1238_s16 + $0x88] sm:$0xff] %vm693_vm0, %v638_v29 }
  0xaa   : > { %710 = vst.msk [vmem:[%s1238_s16 + $0x80] sm:$0xff] %vm693_vm0, %v637_v10  ;;  %v444_v46 = vpop.permute.xlu1 %443 }
  0xab   : > { %v640_v47 = vmax.f32 %v986_v58, %v444_v46  ;;  %v442_v31 = vpop.permute.xlu0 %441 }
  0xac   : > { %v639_v22 = vmax.f32 %v990_v59, %v442_v31 }
  0xad   : > { %713 = vst.msk [vmem:[%s1238_s16 + $0x98] sm:$0xff] %vm693_vm0, %v640_v47 }
  0xae   : > { %712 = vst.msk [vmem:[%s1238_s16 + $0x90] sm:$0xff] %vm693_vm0, %v639_v22  ;;  %v448_v52 = vpop.permute.xlu1 %447 }
  0xaf   : > { %v642_v53 = vmax.f32 %v998_v0, %v448_v52  ;;  %v446_v34 = vpop.permute.xlu0 %445 }
  0xb0   : > { %v641_v49 = vmax.f32 %v1002_v1, %v446_v34 }
  0xb1   : > { %715 = vst.msk [vmem:[%s1238_s16 + $0xa8] sm:$0xff] %vm693_vm0, %v642_v53 }
  0xb2   : > { %714 = vst.msk [vmem:[%s1238_s16 + $0xa0] sm:$0xff] %vm693_vm0, %v641_v49  ;;  %v452_v58 = vpop.permute.xlu1 %451 }
  0xb3   : > { %v644_v59 = vmax.f32 %v1010_v8, %v452_v58  ;;  %v450_v35 = vpop.permute.xlu0 %449 }
  0xb4   : > { %v643_v3 = vmax.f32 %v1014_v9, %v450_v35 }
  0xb5   : > { %717 = vst.msk [vmem:[%s1238_s16 + $0xb8] sm:$0xff] %vm693_vm0, %v644_v59 }
  0xb6   : > { %716 = vst.msk [vmem:[%s1238_s16 + $0xb0] sm:$0xff] %vm693_vm0, %v643_v3  ;;  %v456_v0 = vpop.permute.xlu1 %455 }
  0xb7   : > { %v646_v1 = vmax.f32 %v1022_v18, %v456_v0  ;;  %v454_v6 = vpop.permute.xlu0 %453 }
  0xb8   : > { %v645_v14 = vmax.f32 %v1026_v19, %v454_v6 }
  0xb9   : > { %719 = vst.msk [vmem:[%s1238_s16 + $0xc8] sm:$0xff] %vm693_vm0, %v646_v1 }
  0xba   : > { %718 = vst.msk [vmem:[%s1238_s16 + $0xc0] sm:$0xff] %vm693_vm0, %v645_v14  ;;  %v460_v8 = vpop.permute.xlu1 %459 }
  0xbb   : > { %v648_v9 = vmax.f32 %v1034_v26, %v460_v8  ;;  %v458_v40 = vpop.permute.xlu0 %457 }
  0xbc   : > { %v647_v28 = vmax.f32 %v1038_v27, %v458_v40 }
  0xbd   : > { %721 = vst.msk [vmem:[%s1238_s16 + $0xd8] sm:$0xff] %vm693_vm0, %v648_v9 }
  0xbe   : > { %720 = vst.msk [vmem:[%s1238_s16 + $0xd0] sm:$0xff] %vm693_vm0, %v647_v28  ;;  %v464_v18 = vpop.permute.xlu1 %463  ;;  %v1551_v28 = vld [vmem:[#allocation2_spill] sm:$0xff] }
  0xbf   : > { %v650_v19 = vmax.f32 %v1046_v36, %v464_v18  ;;  %v462_v41 = vpop.permute.xlu0 %461 }
  0xc0   : > { %v649_v29 = vmax.f32 %v1050_v37, %v462_v41 }
  0xc1   : > { %723 = vst.msk [vmem:[%s1238_s16 + $0xe8] sm:$0xff] %vm693_vm0, %v650_v19  ;;  %v1552_v19 = vld [vmem:[#allocation3_spill] sm:$0xff] }
  0xc2   : > { %722 = vst.msk [vmem:[%s1238_s16 + $0xe0] sm:$0xff] %vm693_vm0, %v649_v29  ;;  %v468_v26 = vpop.permute.xlu1 %467  ;;  %v1553_v29 = vld [vmem:[#allocation4_spill] sm:$0xff] }
  0xc3   : > { %v652_v27 = vmax.f32 %v1058_v44, %v468_v26  ;;  %v466_v23 = vpop.permute.xlu0 %465 }
  0xc4   : > { %v651_v10 = vmax.f32 %v1062_v45, %v466_v23 }
  0xc5   : > { %725 = vst.msk [vmem:[%s1238_s16 + $0xf8] sm:$0xff] %vm693_vm0, %v652_v27  ;;  %v1554_v27 = vld [vmem:[#allocation5_spill] sm:$0xff] }
  0xc6   : > { %724 = vst.msk [vmem:[%s1238_s16 + $0xf0] sm:$0xff] %vm693_vm0, %v651_v10  ;;  %v472_v36 = vpop.permute.xlu1 %471 }
  0xc7   : > { %v654_v37 = vmax.f32 %v1070_v54, %v472_v36  ;;  %v470_v46 = vpop.permute.xlu0 %469  ;;  %v1555_v36 = vld [vmem:[#allocation6_spill] sm:$0xff] }
  0xc8   : > { %v653_v47 = vmax.f32 %v1074_v55, %v470_v46 }
  0xc9   : > { %727 = vst.msk [vmem:[%s1238_s16 + $0x108] sm:$0xff] %vm693_vm0, %v654_v37 }
  0xca   : > { %726 = vst.msk [vmem:[%s1238_s16 + $0x100] sm:$0xff] %vm693_vm0, %v653_v47  ;;  %v476_v44 = vpop.permute.xlu1 %475  ;;  %v1556_v47 = vld [vmem:[#allocation7_spill] sm:$0xff] }
  0xcb   : > { %v656_v45 = vmax.f32 %v1082_v62, %v476_v44  ;;  %v474_v31 = vpop.permute.xlu0 %473 }
  0xcc   : > { %v655_v22 = vmax.f32 %v1086_v63, %v474_v31  ;;  %v1557_v31 = vld [vmem:[#allocation8_spill] sm:$0xff] }
  0xcd   : > { %729 = vst.msk [vmem:[%s1238_s16 + $0x118] sm:$0xff] %vm693_vm0, %v656_v45 }
  0xce   : > { %728 = vst.msk [vmem:[%s1238_s16 + $0x110] sm:$0xff] %vm693_vm0, %v655_v22  ;;  %v480_v54 = vpop.permute.xlu1 %479 }
  0xcf   : > { %v658_v55 = vmax.f32 %v1094_v12, %v480_v54  ;;  %v478_v52 = vpop.permute.xlu0 %477 }
  0xd0   : > { %v657_v53 = vmax.f32 %v1098_v13, %v478_v52 }
  0xd1   : > { %731 = vst.msk [vmem:[%s1238_s16 + $0x128] sm:$0xff] %vm693_vm0, %v658_v55 }
  0xd2   : > { %730 = vst.msk [vmem:[%s1238_s16 + $0x120] sm:$0xff] %vm693_vm0, %v657_v53  ;;  %v484_v62 = vpop.permute.xlu1 %483 }
  0xd3   : > { %v660_v63 = vmax.f32 %v1106_v24, %v484_v62  ;;  %v482_v34 = vpop.permute.xlu0 %481 }
  0xd4   : > { %v659_v49 = vmax.f32 %v1110_v25, %v482_v34 }
  0xd5   : > { %733 = vst.msk [vmem:[%s1238_s16 + $0x138] sm:$0xff] %vm693_vm0, %v660_v63 }
  0xd6   : > { %732 = vst.msk [vmem:[%s1238_s16 + $0x130] sm:$0xff] %vm693_vm0, %v659_v49  ;;  %v488_v12 = vpop.permute.xlu1 %487 }
  0xd7   : > { %v662_v13 = vmax.f32 %v1118_v38, %v488_v12  ;;  %v486_v58 = vpop.permute.xlu0 %485 }
  0xd8   : > { %v661_v59 = vmax.f32 %v1122_v39, %v486_v58 }
  0xd9   : > { %735 = vst.msk [vmem:[%s1238_s16 + $0x148] sm:$0xff] %vm693_vm0, %v662_v13 }
  0xda   : > { %734 = vst.msk [vmem:[%s1238_s16 + $0x140] sm:$0xff] %vm693_vm0, %v661_v59  ;;  %v492_v24 = vpop.permute.xlu1 %491  ;;  %v1558_v59 = vld [vmem:[#allocation9_spill] sm:$0xff] }
  0xdb   : > { %v664_v25 = vmax.f32 %v1130_v50, %v492_v24  ;;  %v490_v35 = vpop.permute.xlu0 %489 }
  0xdc   : > { %v663_v3 = vmax.f32 %v1134_v51, %v490_v35 }
  0xdd   : > { %737 = vst.msk [vmem:[%s1238_s16 + $0x158] sm:$0xff] %vm693_vm0, %v664_v25 }
  0xde   : > { %736 = vst.msk [vmem:[%s1238_s16 + $0x150] sm:$0xff] %vm693_vm0, %v663_v3  ;;  %v496_v38 = vpop.permute.xlu1 %495 }
  0xdf   : > { %v666_v39 = vmax.f32 %v1142_v2, %v496_v38  ;;  %v494_v0 = vpop.permute.xlu0 %493 }
  0xe0   : > { %v665_v1 = vmax.f32 %v1146_v4, %v494_v0 }
  0xe1   : > { %739 = vst.msk [vmem:[%s1238_s16 + $0x168] sm:$0xff] %vm693_vm0, %v666_v39 }
  0xe2   : > { %738 = vst.msk [vmem:[%s1238_s16 + $0x160] sm:$0xff] %vm693_vm0, %v665_v1  ;;  %v500_v50 = vpop.permute.xlu1 %499 }
  0xe3   : > { %v668_v51 = vmax.f32 %v1154_v20, %v500_v50  ;;  %v498_v6 = vpop.permute.xlu0 %497 }
  0xe4   : > { %v667_v14 = vmax.f32 %v1158_v21, %v498_v6 }
  0xe5   : > { %741 = vst.msk [vmem:[%s1238_s16 + $0x178] sm:$0xff] %vm693_vm0, %v668_v51 }
  0xe6   : > { %740 = vst.msk [vmem:[%s1238_s16 + $0x170] sm:$0xff] %vm693_vm0, %v667_v14  ;;  %v504_v2 = vpop.permute.xlu1 %503 }
  0xe7   : > { %v670_v4 = vmax.f32 %v1166_v42, %v504_v2  ;;  %v502_v8 = vpop.permute.xlu0 %501 }
  0xe8   : > { %v669_v9 = vmax.f32 %v1170_v43, %v502_v8 }
  0xe9   : > { %743 = vst.msk [vmem:[%s1238_s16 + $0x188] sm:$0xff] %vm693_vm0, %v670_v4 }
  0xea   : > { %742 = vst.msk [vmem:[%s1238_s16 + $0x180] sm:$0xff] %vm693_vm0, %v669_v9  ;;  %v508_v20 = vpop.permute.xlu1 %507 }
  0xeb   : > { %v672_v21 = vmax.f32 %v1178_v60, %v508_v20  ;;  %v506_v40 = vpop.permute.xlu0 %505 }
  0xec   : > { %v671_v18 = vmax.f32 %v1551_v28, %v506_v40 }
  0xed   : > { %745 = vst.msk [vmem:[%s1238_s16 + $0x198] sm:$0xff] %vm693_vm0, %v672_v21 }
  0xee   : > { %744 = vst.msk [vmem:[%s1238_s16 + $0x190] sm:$0xff] %vm693_vm0, %v671_v18  ;;  %v512_v42 = vpop.permute.xlu1 %511 }
  0xef   : > { %v674_v43 = vmax.f32 %v1552_v19, %v512_v42  ;;  %v510_v41 = vpop.permute.xlu0 %509 }
  0xf0   : > { %v673_v26 = vmax.f32 %v1553_v29, %v510_v41 }
  0xf1   : > { %747 = vst.msk [vmem:[%s1238_s16 + $0x1a8] sm:$0xff] %vm693_vm0, %v674_v43 }
  0xf2   : > { %746 = vst.msk [vmem:[%s1238_s16 + $0x1a0] sm:$0xff] %vm693_vm0, %v673_v26  ;;  %v516_v60 = vpop.permute.xlu1 %515 }
  0xf3   : > { %v676_v23 = vmax.f32 %v1554_v27, %v516_v60  ;;  %v514_v10 = vpop.permute.xlu0 %513 }
  0xf4   : > { %v675_v37 = vmax.f32 %v1555_v36, %v514_v10 }
  0xf5   : > { %749 = vst.msk [vmem:[%s1238_s16 + $0x1b8] sm:$0xff] %vm693_vm0, %v676_v23 }
  0xf6   : > { %748 = vst.msk [vmem:[%s1238_s16 + $0x1b0] sm:$0xff] %vm693_vm0, %v675_v37  ;;  %v520_v46 = vpop.permute.xlu1 %519 }
  0xf7   : > { %v678_v44 = vmax.f32 %v1556_v47, %v520_v46  ;;  %v518_v45 = vpop.permute.xlu0 %517 }
  0xf8   : > { %v677_v22 = vmax.f32 %v1557_v31, %v518_v45 }
  0xf9   : > { %751 = vst.msk [vmem:[%s1238_s16 + $0x1c8] sm:$0xff] %vm693_vm0, %v678_v44 }
  0xfa   : > { %750 = vst.msk [vmem:[%s1238_s16 + $0x1c0] sm:$0xff] %vm693_vm0, %v677_v22  ;;  %v524_v54 = vpop.permute.xlu1 %523 }
  0xfb   : > { %v680_v55 = vmax.f32 %v1227_v30, %v524_v54  ;;  %v522_v52 = vpop.permute.xlu0 %521 }
  0xfc   : > { %v679_v53 = vmax.f32 %v1231_v5, %v522_v52 }
  0xfd   : > { %753 = vst.msk [vmem:[%s1238_s16 + $0x1d8] sm:$0xff] %vm693_vm0, %v680_v55 }
  0xfe   : > { %752 = vst.msk [vmem:[%s1238_s16 + $0x1d0] sm:$0xff] %vm693_vm0, %v679_v53  ;;  %v528_v62 = vpop.permute.xlu1 %527 }
  0xff   : > { %v682_v63 = vmax.f32 %v1246_v61, %v528_v62  ;;  %v526_v34 = vpop.permute.xlu0 %525 }
 0x100   : > { %v681_v49 = vmax.f32 %v1252_v57, %v526_v34 }
 0x101   : > { %755 = vst.msk [vmem:[%s1238_s16 + $0x1e8] sm:$0xff] %vm693_vm0, %v682_v63 }
 0x102   : > { %754 = vst.msk [vmem:[%s1238_s16 + $0x1e0] sm:$0xff] %vm693_vm0, %v681_v49  ;;  %v532_v30 = vpop.permute.xlu1 %531 }
 0x103   : > { %v684_v5 = vmax.f32 %v1264_v33, %v532_v30  ;;  %v530_v12 = vpop.permute.xlu0 %529 }
 0x104   : > { %v683_v13 = vmax.f32 %v1270_v32, %v530_v12 }
 0x105   : > { %757 = vst.msk [vmem:[%s1238_s16 + $0x1f8] sm:$0xff] %vm693_vm0, %v684_v5 }
 0x106   : > { %756 = vst.msk [vmem:[%s1238_s16 + $0x1f0] sm:$0xff] %vm693_vm0, %v683_v13  ;;  %v536_v61 = vpop.permute.xlu1 %535 }
 0x107   : > { %v686_v57 = vmax.f32 %v1282_v15, %v536_v61  ;;  %v534_v58 = vpop.permute.xlu0 %533 }
 0x108   : > { %v685_v24 = vmax.f32 %v1558_v59, %v534_v58 }
 0x109   : > { %759 = vst.msk [vmem:[%s1238_s16 + $0x208] sm:$0xff] %vm693_vm0, %v686_v57 }
 0x10a   : > { %758 = vst.msk [vmem:[%s1238_s16 + $0x200] sm:$0xff] %vm693_vm0, %v685_v24  ;;  %v540_v33 = vpop.permute.xlu1 %539 }
 0x10b   : > { %v688_v32 = vmax.f32 %v1300_v7, %v540_v33  ;;  %v538_v25 = vpop.permute.xlu0 %537 }
 0x10c   : > { %v687_v35 = vmax.f32 %v1306_v56, %v538_v25 }
 0x10d   : > { %761 = vst.msk [vmem:[%s1238_s16 + $0x218] sm:$0xff] %vm693_vm0, %v688_v32 }
 0x10e   : > { %760 = vst.msk [vmem:[%s1238_s16 + $0x210] sm:$0xff] %vm693_vm0, %v687_v35  ;;  %v544_v15 = vpop.permute.xlu1 %543 }
 0x10f   : > { %v690_v3 = vmax.f32 %v1318_v11, %v544_v15  ;;  %v542_v38 = vpop.permute.xlu0 %541 }
 0x110   : > { %v689_v39 = vmax.f32 %v1324_v48, %v542_v38 }
 0x111   : > { %763 = vst.msk [vmem:[%s1238_s16 + $0x228] sm:$0xff] %vm693_vm0, %v690_v3 }
 0x112   : > { %762 = vst.msk [vmem:[%s1238_s16 + $0x220] sm:$0xff] %vm693_vm0, %v689_v39  ;;  %v548_v0 = vpop.permute.xlu1 %547 }
 0x113   : > { %v692_v7 = vmax.f32 %v1336_v16, %v548_v0  ;;  %v546_v1 = vpop.permute.xlu0 %545 }
 0x114   : > { %v691_v56 = vmax.f32 %v1342_v17, %v546_v1 }
 0x115   : > { %765 = vst.msk [vmem:[%s1238_s16 + $0x238] sm:$0xff] %vm693_vm0, %v692_v7 }
 0x116   : > { %764 = vst.msk [vmem:[%s1238_s16 + $0x230] sm:$0xff] %vm693_vm0, %v691_v56 }
 0x117 PF: > { %s11_s6 = sadd.s32 1, %s847_s6  }
 0x118   : > { %p8_p4 = scmp.ge.s32.totalorder %s11_s6, 4  }
 0x11a   :  { %10 = sbr.rel (!%p8_p4) target bundleno = 1 (0x1), region = 54 }

// kernel: clasic_forward.9
= control target key start
LH: loop header
LB: loop body
LE: loop exit
PB: predicated region body
PF: predicated region fallthrough
CT: control target
= control target key end

     0   :  { %s1157_s12 = smov 0   ;;  %s1589_s0 = inlined_call_operand.vmem [shape: f32[4608,147], index: 0, kind: input, shape index: {}]   ;;  %s1590_s1 = inlined_call_operand.vmem [shape: bf16[147,32], index: 1, kind: input, shape index: {}]   ;;  %s1591_s2 = inlined_call_operand.vmem [shape: f32[1,32], index: 2, kind: input, shape index: {}]   ;;  %s1592_s3 = inlined_call_operand.vmem [shape: f32[4608,32], index: 3, kind: output, shape index: {}]  }
   0x1 LB: > { %s1031_s13 = sadd.s32 4294967295, %s1133_s12   ;;  %p1035_p0 = scmp.ge.s32.totalorder %s1133_s12, 1  ;;  %s1133_s12 = sphi %s1157_s12, %s13_s12  }
   0x2   : > { %p139_p1 = scmp.lt.s32.totalorder %s1133_s12, 10 }
   0x4   : > { %p140_p2 = pnand %p1035_p0, %p139_p1 }
   0x5   : > { %s1036_s20 = sshll.u32 (!%p140_p2), %s1031_s13, 6 }
   0x6   : > { %143 = sbr.rel (%p140_p2) target bundleno = 374 (0x176), region = 32  ;;  %p165_p3 = scmp.lt.s32.totalorder (!%p140_p2), %s1036_s20, 575 }
   0xb   : > { %v1117_v0 = vld [vmem:[%s1590_s1 + $0x38] sm:$0xff]   ;;  %v1135_v1 = vmov 0   ;;  %v1118_v2 = vld [vmem:[%s1590_s1 + $0x30] sm:$0xff]   ;;  %v1119_v3 = vld [vmem:[%s1590_s1 + $0x28] sm:$0xff]   ;;  %s1594_s20 = smov (!%p165_p3, %s1036_s20), 575  ;;  %vm453_vm0 = vcmask 154624  }
   0xc   : > { %557 = vmatprep.subr.bf16.mxu0 %v1135_v1  ;;  %1087 = vmatprep.subr.bf16.mxu1 %v1135_v1  ;;  %v1120_v4 = vld [vmem:[%s1590_s1 + $0x20] sm:$0xff]   ;;  %s1086_s23 = sshll.u32 %s1594_s20, 4  ;;  %v1121_v8 = vld [vmem:[%s1590_s1 + $0x18] sm:$0xff]   ;;  %v1122_v12 = vld [vmem:[%s1590_s1 + $0x10] sm:$0xff]   ;;  %vm550_vm1 = vcmask 1040384   ;;  %vm551_vm2 = vcmask 1041408  }
   0xd   : > { %558 = vmatpush1.bf16.msra.mxu0 %v1117_v0  ;;  %1097 = vmatpush1.bf16.msra.mxu1 %v1117_v0  ;;  %s1191_s26 = scalar_lea.vmem %s1589_s0, %s1086_s23  ;;  %v1123_v13 = vld [vmem:[%s1590_s1 + $0x8] sm:$0xff]   ;;  %v1136_v14 = vmov 65535   ;;  %v1124_v16 = vld [vmem:[%s1590_s1] sm:$0xff]   ;;  %s1040_s15 = sshll.u32 %s1594_s20, 3  ;;  %vm910_vm3 = vcmask 261120  }
   0xe   : > { %559 = vmatprep.subr.bf16.mxu0 %v1135_v1  ;;  %1088 = vmatprep.subr.bf16.mxu1 %v1135_v1  ;;  %v179_v5 = vld [vmem:[%s1191_s26 + $0x8] sm:$0xff]  ;;  %v181_v6 = vld [vmem:[%s1191_s26 + $0x18] sm:$0xff]  ;;  %v552_v15 = vsel %vm550_vm1, 4294967295, %v1136_v14  ;;  %v1126_v20 = vld [vmem:[%s1590_s1 + $0x40] sm:$0xff]   ;;  %s1394_s18 = scalar_lea.vmem %s1592_s3, %s1040_s15 }
   0xf   : > { %v243_v7 = vld [vmem:[%s1191_s26 + $0x208] sm:$0xff]  ;;  %v307_v9 = vpack.c.bf16 %v181_v6, %v179_v5  ;;  %v245_v10 = vld [vmem:[%s1191_s26 + $0x218] sm:$0xff]  ;;  %v553_v18 = vsel %vm551_vm2, %v552_v15, 0  ;;  %v178_v21 = vld [vmem:[%s1191_s26] sm:$0xff] }
  0x10   : > { %v339_v11 = vpack.c.bf16 %v245_v10, %v243_v7  ;;  %v1125_v17 = vld [vmem:[%s1590_s1 + $0x48] ss:$0 sps:$4 sm:$0x33]   ;;  %v180_v22 = vld [vmem:[%s1191_s26 + $0x10] sm:$0xff]  ;;  %v242_v23 = vld [vmem:[%s1191_s26 + $0x200] sm:$0xff] }
  0x11   : > { %560 = vmatpush1.bf16.msra.mxu0 %v1118_v2  ;;  %1098 = vmatpush1.bf16.msra.mxu1 %v1118_v2  ;;  %v555_v19 = vand.u32 %v1125_v17, %v553_v18  ;;  %v244_v24 = vld [vmem:[%s1191_s26 + $0x210] sm:$0xff]  ;;  %v183_v25 = vld [vmem:[%s1191_s26 + $0x28] sm:$0xff]  ;;  %v185_v26 = vld [vmem:[%s1191_s26 + $0x38] sm:$0xff]  ;;  %v306_v29 = vpack.c.bf16 %v180_v22, %v178_v21 }
  0x12   : > { %561 = vmatprep.subr.bf16.mxu0 %v1135_v1  ;;  %1089 = vmatprep.subr.bf16.mxu1 %v1135_v1  ;;  %v247_v27 = vld [vmem:[%s1191_s26 + $0x228] sm:$0xff]  ;;  %v249_v28 = vld [vmem:[%s1191_s26 + $0x238] sm:$0xff]  ;;  %v338_v30 = vpack.c.bf16 %v244_v24, %v242_v23  ;;  %v309_v31 = vpack.c.bf16 %v185_v26, %v183_v25  ;;  %v182_v33 = vld [vmem:[%s1191_s26 + $0x20] sm:$0xff] }
  0x13   : > { %1052 = vmatprep.mubr.msk.bf16.mxu0 %vm453_vm0, %v307_v9  ;;  %1068 = vmatprep.mubr.msk.bf16.mxu1 %vm453_vm0, %v339_v11  ;;  %v341_v32 = vpack.c.bf16 %v249_v28, %v247_v27  ;;  %v184_v34 = vld [vmem:[%s1191_s26 + $0x30] sm:$0xff]  ;;  %v246_v35 = vld [vmem:[%s1191_s26 + $0x220] sm:$0xff]  ;;  %v187_v37 = vld [vmem:[%s1191_s26 + $0x48] sm:$0xff] }
  0x14   : > { %v248_v36 = vld [vmem:[%s1191_s26 + $0x230] sm:$0xff]  ;;  %v189_v38 = vld [vmem:[%s1191_s26 + $0x58] sm:$0xff]  ;;  %v251_v39 = vld [vmem:[%s1191_s26 + $0x248] sm:$0xff]  ;;  %v308_v41 = vpack.c.bf16 %v184_v34, %v182_v33 }
  0x15   : > { %562 = vmatpush1.bf16.msra.mxu0 %v1119_v3  ;;  %1099 = vmatpush1.bf16.msra.mxu1 %v1119_v3  ;;  %v253_v40 = vld [vmem:[%s1191_s26 + $0x258] sm:$0xff]  ;;  %v340_v42 = vpack.c.bf16 %v248_v36, %v246_v35  ;;  %v311_v43 = vpack.c.bf16 %v189_v38, %v187_v37  ;;  %v186_v45 = vld [vmem:[%s1191_s26 + $0x40] sm:$0xff]  ;;  %v188_v46 = vld [vmem:[%s1191_s26 + $0x50] sm:$0xff] }
  0x16   : > { %563 = vmatprep.subr.bf16.mxu0 %v1135_v1  ;;  %1090 = vmatprep.subr.bf16.mxu1 %v1135_v1  ;;  %v343_v44 = vpack.c.bf16 %v253_v40, %v251_v39  ;;  %v250_v47 = vld [vmem:[%s1191_s26 + $0x240] sm:$0xff]  ;;  %v252_v48 = vld [vmem:[%s1191_s26 + $0x250] sm:$0xff]  ;;  %v191_v49 = vld [vmem:[%s1191_s26 + $0x68] sm:$0xff]  ;;  %v310_v53 = vpack.c.bf16 %v188_v46, %v186_v45 }
  0x17   : > { %v193_v50 = vld [vmem:[%s1191_s26 + $0x78] sm:$0xff]  ;;  %v255_v51 = vld [vmem:[%s1191_s26 + $0x268] sm:$0xff]  ;;  %v342_v54 = vpack.c.bf16 %v252_v48, %v250_v47  ;;  %v190_v57 = vld [vmem:[%s1191_s26 + $0x60] sm:$0xff] }
  0x18   : > { %v257_v52 = vld [vmem:[%s1191_s26 + $0x278] sm:$0xff]  ;;  %v313_v55 = vpack.c.bf16 %v193_v50, %v191_v49  ;;  %v192_v58 = vld [vmem:[%s1191_s26 + $0x70] sm:$0xff]  ;;  %v254_v59 = vld [vmem:[%s1191_s26 + $0x260] sm:$0xff] }
  0x19   : > { %564 = vmatpush1.bf16.msra.mxu0 %v1120_v4  ;;  %1100 = vmatpush1.bf16.msra.mxu1 %v1120_v4  ;;  %v345_v56 = vpack.c.bf16 %v257_v52, %v255_v51  ;;  %v256_v60 = vld [vmem:[%s1191_s26 + $0x270] sm:$0xff]  ;;  %v195_v61 = vld [vmem:[%s1191_s26 + $0x88] sm:$0xff]  ;;  %v197_v62 = vld [vmem:[%s1191_s26 + $0x98] sm:$0xff] }
  0x1a   : > { %565 = vmatprep.subr.bf16.mxu0 %v1135_v1  ;;  %1091 = vmatprep.subr.bf16.mxu1 %v1135_v1  ;;  %v259_v63 = vld [vmem:[%s1191_s26 + $0x288] sm:$0xff]  ;;  %v261_v0 = vld [vmem:[%s1191_s26 + $0x298] sm:$0xff]  ;;  %v344_v2 = vpack.c.bf16 %v256_v60, %v254_v59  ;;  %v315_v3 = vpack.c.bf16 %v197_v62, %v195_v61  ;;  %v194_v5 = vld [vmem:[%s1191_s26 + $0x80] sm:$0xff] }
  0x1b   : > { %v347_v4 = vpack.c.bf16 %v261_v0, %v259_v63  ;;  %v196_v6 = vld [vmem:[%s1191_s26 + $0x90] sm:$0xff]  ;;  %v258_v7 = vld [vmem:[%s1191_s26 + $0x280] sm:$0xff]  ;;  %v199_v9 = vld [vmem:[%s1191_s26 + $0xa8] sm:$0xff] }
  0x1c   : > { %v201_v10 = vld [vmem:[%s1191_s26 + $0xb8] sm:$0xff]  ;;  %v263_v11 = vld [vmem:[%s1191_s26 + $0x2a8] sm:$0xff]  ;;  %v198_v17 = vld [vmem:[%s1191_s26 + $0xa0] sm:$0xff] }
  0x1d   : > { %566 = vmatpush1.bf16.msra.mxu0 %v1121_v8  ;;  %1101 = vmatpush1.bf16.msra.mxu1 %v1121_v8  ;;  %v260_v8 = vld [vmem:[%s1191_s26 + $0x290] sm:$0xff]  ;;  %v317_v15 = vpack.c.bf16 %v201_v10, %v199_v9  ;;  %v203_v21 = vld [vmem:[%s1191_s26 + $0xc8] sm:$0xff]  ;;  %v205_v22 = vld [vmem:[%s1191_s26 + $0xd8] sm:$0xff] }
  0x1e   : > { %567 = vmatprep.subr.bf16.mxu0 %v1135_v1  ;;  %1092 = vmatprep.subr.bf16.mxu1 %v1135_v1  ;;  %v346_v14 = vpack.c.bf16 %v260_v8, %v258_v7  ;;  %v200_v18 = vld [vmem:[%s1191_s26 + $0xb0] sm:$0xff]  ;;  %v267_v23 = vld [vmem:[%s1191_s26 + $0x2c8] sm:$0xff]  ;;  %v269_v24 = vld [vmem:[%s1191_s26 + $0x2d8] sm:$0xff]  ;;  %v319_v27 = vpack.c.bf16 %v205_v22, %v203_v21 }
  0x1f   : > { %v316_v25 = vpack.c.bf16 %v200_v18, %v198_v17  ;;  %v351_v28 = vpack.c.bf16 %v269_v24, %v267_v23  ;;  %v207_v33 = vld [vmem:[%s1191_s26 + $0xe8] sm:$0xff]  ;;  %v209_v34 = vld [vmem:[%s1191_s26 + $0xf8] sm:$0xff] }
  0x20   : > { %v271_v35 = vld [vmem:[%s1191_s26 + $0x2e8] sm:$0xff]  ;;  %v273_v36 = vld [vmem:[%s1191_s26 + $0x2f8] sm:$0xff]  ;;  %v321_v39 = vpack.c.bf16 %v209_v34, %v207_v33 }
  0x21   : > { %568 = vmatpush1.bf16.msra.mxu0 %v1122_v12  ;;  %1102 = vmatpush1.bf16.msra.mxu1 %v1122_v12  ;;  %v265_v12 = vld [vmem:[%s1191_s26 + $0x2b8] sm:$0xff]  ;;  %v353_v40 = vpack.c.bf16 %v273_v36, %v271_v35  ;;  %v211_v45 = vld [vmem:[%s1191_s26 + $0x108] sm:$0xff] }
  0x22   : > { %569 = vmatprep.subr.bf16.mxu0 %v1135_v1  ;;  %1093 = vmatprep.subr.bf16.mxu1 %v1135_v1  ;;  %v213_v46 = vld [vmem:[%s1191_s26 + $0x118] sm:$0xff]  ;;  %v275_v47 = vld [vmem:[%s1191_s26 + $0x308] sm:$0xff] }
  0x23   : > { %v277_v48 = vld [vmem:[%s1191_s26 + $0x318] sm:$0xff]  ;;  %v323_v51 = vpack.c.bf16 %v213_v46, %v211_v45  ;;  %v279_v59 = vld [vmem:[%s1191_s26 + $0x328] sm:$0xff] }
  0x24   : > { %v355_v52 = vpack.c.bf16 %v277_v48, %v275_v47  ;;  %v281_v60 = vld [vmem:[%s1191_s26 + $0x338] sm:$0xff]  ;;  %v283_v7 = vld [vmem:[%s1191_s26 + $0x348] sm:$0xff] }
  0x25   : > { %570 = vmatpush1.bf16.msra.mxu0 %v1123_v13  ;;  %1103 = vmatpush1.bf16.msra.mxu1 %v1123_v13  ;;  %v314_v13 = vpack.c.bf16 %v196_v6, %v194_v5  ;;  %v357_v0 = vpack.c.bf16 %v281_v60, %v279_v59  ;;  %v219_v5 = vld [vmem:[%s1191_s26 + $0x148] sm:$0xff]  ;;  %v221_v6 = vld [vmem:[%s1191_s26 + $0x158] sm:$0xff] }
  0x26   : > { %571 = vmatprep.subr.bf16.mxu0 %v1135_v1  ;;  %1094 = vmatprep.subr.bf16.mxu1 %v1135_v1  ;;  %v285_v8 = vld [vmem:[%s1191_s26 + $0x358] sm:$0xff]  ;;  %v223_v17 = vld [vmem:[%s1191_s26 + $0x168] sm:$0xff] }
  0x27   : > { %v225_v18 = vld [vmem:[%s1191_s26 + $0x178] sm:$0xff] }
  0x28   : > { %v329_v23 = vpack.c.bf16 %v225_v18, %v223_v17 }
  0x29   : > { %572 = vmatpush1.bf16.msra.mxu0 %v1124_v16  ;;  %1104 = vmatpush1.bf16.msra.mxu1 %v1124_v16  ;;  %v349_v16 = vpack.c.bf16 %v265_v12, %v263_v11  ;;  %v327_v11 = vpack.c.bf16 %v221_v6, %v219_v5  ;;  %v359_v12 = vpack.c.bf16 %v285_v8, %v283_v7 }
  0x2a   : > { %585 = vmatprep.subr.bf16.mxu0 %v1135_v1  ;;  %1095 = vmatprep.subr.bf16.mxu1 %v1135_v1 }
  0x2d   : > { %586 = vmatpush2.bf16.msra.mxu0 %v555_v19  ;;  %1105 = vmatpush2.bf16.msra.mxu1 %v555_v19  ;;  %v262_v19 = vld [vmem:[%s1191_s26 + $0x2a0] sm:$0xff] }
  0x2e   : > { %587 = vmatprep.subr.bf16.mxu0 %v1135_v1  ;;  %1096 = vmatprep.subr.bf16.mxu1 %v1135_v1  ;;  %v312_v1 = vpack.c.bf16 %v192_v58, %v190_v57  ;;  %v215_v57 = vld [vmem:[%s1191_s26 + $0x128] sm:$0xff]  ;;  %v217_v58 = vld [vmem:[%s1191_s26 + $0x138] sm:$0xff] }
  0x2f   : > { %v325_v63 = vpack.c.bf16 %v217_v58, %v215_v57 }
  0x31   : > { %588 = vmatpush2.bf16.msra.mxu0 %v1126_v20  ;;  %1106 = vmatpush2.bf16.msra.mxu1 %v1126_v20  ;;  %v264_v20 = vld [vmem:[%s1191_s26 + $0x2b0] sm:$0xff] }
  0x32   : > { %v348_v26 = vpack.c.bf16 %v264_v20, %v262_v19  ;;  %v287_v19 = vld [vmem:[%s1191_s26 + $0x368] sm:$0xff]  ;;  %v289_v20 = vld [vmem:[%s1191_s26 + $0x378] sm:$0xff] }
  0x33   : > { %v361_v24 = vpack.c.bf16 %v289_v20, %v287_v19 }
  0x34   : > { %590 = vmatmul.mubr.bf16.vlgmr.msra.gmra.mxu0 %v306_v29  ;;  %718 = vmatmul.mubr.bf16.vlgmr.msra.gmra.mxu1 %v338_v30  ;;  %v202_v29 = vld [vmem:[%s1191_s26 + $0xc0] sm:$0xff]  ;;  %v204_v30 = vld [vmem:[%s1191_s26 + $0xd0] sm:$0xff] }
  0x35   : > { %1053 = vmatprep.mubr.msk.bf16.mxu0 %vm453_vm0, %v309_v31  ;;  %1069 = vmatprep.mubr.msk.bf16.mxu1 %vm453_vm0, %v341_v32  ;;  %v266_v31 = vld [vmem:[%s1191_s26 + $0x2c0] sm:$0xff]  ;;  %v268_v32 = vld [vmem:[%s1191_s26 + $0x2d0] sm:$0xff]  ;;  %v318_v37 = vpack.c.bf16 %v204_v30, %v202_v29  ;;  %v227_v29 = vld [vmem:[%s1191_s26 + $0x188] sm:$0xff] }
  0x36   : > { %v350_v38 = vpack.c.bf16 %v268_v32, %v266_v31  ;;  %v229_v30 = vld [vmem:[%s1191_s26 + $0x198] sm:$0xff]  ;;  %v291_v31 = vld [vmem:[%s1191_s26 + $0x388] sm:$0xff] }
  0x37   : > { %v293_v32 = vld [vmem:[%s1191_s26 + $0x398] sm:$0xff]  ;;  %v331_v35 = vpack.c.bf16 %v229_v30, %v227_v29 }
  0x38   : > { %v363_v36 = vpack.c.bf16 %v293_v32, %v291_v31 }
  0x3c   : > { %598 = vmatmul.mubr.bf16.gmra.mxu0 %v308_v41  ;;  %726 = vmatmul.mubr.bf16.gmra.mxu1 %v340_v42  ;;  %v206_v41 = vld [vmem:[%s1191_s26 + $0xe0] sm:$0xff]  ;;  %v208_v42 = vld [vmem:[%s1191_s26 + $0xf0] sm:$0xff] }
  0x3d   : > { %1054 = vmatprep.mubr.msk.bf16.mxu0 %vm453_vm0, %v311_v43  ;;  %1070 = vmatprep.mubr.msk.bf16.mxu1 %vm453_vm0, %v343_v44  ;;  %v270_v43 = vld [vmem:[%s1191_s26 + $0x2e0] sm:$0xff]  ;;  %v272_v44 = vld [vmem:[%s1191_s26 + $0x2f0] sm:$0xff]  ;;  %v320_v49 = vpack.c.bf16 %v208_v42, %v206_v41  ;;  %v231_v41 = vld [vmem:[%s1191_s26 + $0x1a8] sm:$0xff] }
  0x3e   : > { %v352_v50 = vpack.c.bf16 %v272_v44, %v270_v43  ;;  %v233_v42 = vld [vmem:[%s1191_s26 + $0x1b8] sm:$0xff]  ;;  %v295_v43 = vld [vmem:[%s1191_s26 + $0x3a8] sm:$0xff] }
  0x3f   : > { %v297_v44 = vld [vmem:[%s1191_s26 + $0x3b8] sm:$0xff]  ;;  %v333_v47 = vpack.c.bf16 %v233_v42, %v231_v41 }
  0x40   : > { %v365_v48 = vpack.c.bf16 %v297_v44, %v295_v43 }
  0x44   : > { %606 = vmatmul.mubr.bf16.gmra.mxu0 %v310_v53  ;;  %734 = vmatmul.mubr.bf16.gmra.mxu1 %v342_v54  ;;  %v210_v53 = vld [vmem:[%s1191_s26 + $0x100] sm:$0xff]  ;;  %v212_v54 = vld [vmem:[%s1191_s26 + $0x110] sm:$0xff] }
  0x45   : > { %1055 = vmatprep.mubr.msk.bf16.mxu0 %vm453_vm0, %v313_v55  ;;  %1071 = vmatprep.mubr.msk.bf16.mxu1 %vm453_vm0, %v345_v56  ;;  %v274_v55 = vld [vmem:[%s1191_s26 + $0x300] sm:$0xff]  ;;  %v276_v56 = vld [vmem:[%s1191_s26 + $0x310] sm:$0xff]  ;;  %v322_v61 = vpack.c.bf16 %v212_v54, %v210_v53  ;;  %v235_v53 = vld [vmem:[%s1191_s26 + $0x1c8] sm:$0xff] }
  0x46   : > { %v354_v62 = vpack.c.bf16 %v276_v56, %v274_v55  ;;  %v237_v54 = vld [vmem:[%s1191_s26 + $0x1d8] sm:$0xff]  ;;  %v299_v55 = vld [vmem:[%s1191_s26 + $0x3c8] sm:$0xff] }
  0x47   : > { %v301_v56 = vld [vmem:[%s1191_s26 + $0x3d8] sm:$0xff]  ;;  %v335_v59 = vpack.c.bf16 %v237_v54, %v235_v53 }
  0x48   : > { %v367_v60 = vpack.c.bf16 %v301_v56, %v299_v55 }
  0x4c   : > { %614 = vmatmul.mubr.bf16.gmra.mxu0 %v312_v1  ;;  %742 = vmatmul.mubr.bf16.gmra.mxu1 %v344_v2  ;;  %v214_v1 = vld [vmem:[%s1191_s26 + $0x120] sm:$0xff]  ;;  %v216_v2 = vld [vmem:[%s1191_s26 + $0x130] sm:$0xff] }
  0x4d   : > { %1056 = vmatprep.mubr.msk.bf16.mxu0 %vm453_vm0, %v315_v3  ;;  %1072 = vmatprep.mubr.msk.bf16.mxu1 %vm453_vm0, %v347_v4  ;;  %v278_v3 = vld [vmem:[%s1191_s26 + $0x320] sm:$0xff]  ;;  %v280_v4 = vld [vmem:[%s1191_s26 + $0x330] sm:$0xff]  ;;  %v324_v9 = vpack.c.bf16 %v216_v2, %v214_v1  ;;  %v239_v1 = vld [vmem:[%s1191_s26 + $0x1e8] sm:$0xff] }
  0x4e   : > { %v356_v10 = vpack.c.bf16 %v280_v4, %v278_v3  ;;  %v241_v2 = vld [vmem:[%s1191_s26 + $0x1f8] sm:$0xff]  ;;  %v303_v3 = vld [vmem:[%s1191_s26 + $0x3e8] sm:$0xff] }
  0x4f   : > { %v305_v4 = vld [vmem:[%s1191_s26 + $0x3f8] sm:$0xff]  ;;  %v337_v7 = vpack.c.bf16 %v241_v2, %v239_v1 }
  0x50   : > { %v369_v8 = vpack.c.bf16 %v305_v4, %v303_v3 }
  0x54   : > { %622 = vmatmul.mubr.bf16.gmra.mxu0 %v314_v13  ;;  %750 = vmatmul.mubr.bf16.gmra.mxu1 %v346_v14  ;;  %v218_v13 = vld [vmem:[%s1191_s26 + $0x140] sm:$0xff]  ;;  %v220_v14 = vld [vmem:[%s1191_s26 + $0x150] sm:$0xff] }
  0x55   : > { %1057 = vmatprep.mubr.msk.bf16.mxu0 %vm453_vm0, %v317_v15  ;;  %1073 = vmatprep.mubr.msk.bf16.mxu1 %vm453_vm0, %v349_v16  ;;  %v282_v15 = vld [vmem:[%s1191_s26 + $0x340] sm:$0xff]  ;;  %v284_v16 = vld [vmem:[%s1191_s26 + $0x350] sm:$0xff]  ;;  %v326_v21 = vpack.c.bf16 %v220_v14, %v218_v13 }
  0x56   : > { %v358_v22 = vpack.c.bf16 %v284_v16, %v282_v15  ;;  %v1386_v15 = vld [vmem:[%s1591_s2] ss:$0 sm:$0xff] }
  0x5c   : > { %630 = vmatmul.mubr.bf16.gmra.mxu0 %v316_v25  ;;  %758 = vmatmul.mubr.bf16.gmra.mxu1 %v348_v26  ;;  %v222_v25 = vld [vmem:[%s1191_s26 + $0x160] sm:$0xff]  ;;  %v224_v26 = vld [vmem:[%s1191_s26 + $0x170] sm:$0xff] }
  0x5d   : > { %1058 = vmatprep.mubr.msk.bf16.mxu0 %vm453_vm0, %v319_v27  ;;  %1074 = vmatprep.mubr.msk.bf16.mxu1 %vm453_vm0, %v351_v28  ;;  %v286_v27 = vld [vmem:[%s1191_s26 + $0x360] sm:$0xff]  ;;  %v288_v28 = vld [vmem:[%s1191_s26 + $0x370] sm:$0xff]  ;;  %v328_v33 = vpack.c.bf16 %v224_v26, %v222_v25 }
  0x5e   : > { %v360_v34 = vpack.c.bf16 %v288_v28, %v286_v27 }
  0x64   : > { %638 = vmatmul.mubr.bf16.gmra.mxu0 %v318_v37  ;;  %766 = vmatmul.mubr.bf16.gmra.mxu1 %v350_v38  ;;  %v226_v37 = vld [vmem:[%s1191_s26 + $0x180] sm:$0xff]  ;;  %v228_v38 = vld [vmem:[%s1191_s26 + $0x190] sm:$0xff] }
  0x65   : > { %1059 = vmatprep.mubr.msk.bf16.mxu0 %vm453_vm0, %v321_v39  ;;  %1075 = vmatprep.mubr.msk.bf16.mxu1 %vm453_vm0, %v353_v40  ;;  %v290_v39 = vld [vmem:[%s1191_s26 + $0x380] sm:$0xff]  ;;  %v292_v40 = vld [vmem:[%s1191_s26 + $0x390] sm:$0xff]  ;;  %v330_v45 = vpack.c.bf16 %v228_v38, %v226_v37 }
  0x66   : > { %v362_v46 = vpack.c.bf16 %v292_v40, %v290_v39 }
  0x6c   : > { %646 = vmatmul.mubr.bf16.gmra.mxu0 %v320_v49  ;;  %774 = vmatmul.mubr.bf16.gmra.mxu1 %v352_v50  ;;  %v230_v49 = vld [vmem:[%s1191_s26 + $0x1a0] sm:$0xff]  ;;  %v232_v50 = vld [vmem:[%s1191_s26 + $0x1b0] sm:$0xff] }
  0x6d   : > { %1060 = vmatprep.mubr.msk.bf16.mxu0 %vm453_vm0, %v323_v51  ;;  %1076 = vmatprep.mubr.msk.bf16.mxu1 %vm453_vm0, %v355_v52  ;;  %v294_v51 = vld [vmem:[%s1191_s26 + $0x3a0] sm:$0xff]  ;;  %v296_v52 = vld [vmem:[%s1191_s26 + $0x3b0] sm:$0xff]  ;;  %v332_v57 = vpack.c.bf16 %v232_v50, %v230_v49 }
  0x6e   : > { %v364_v58 = vpack.c.bf16 %v296_v52, %v294_v51 }
  0x74   : > { %654 = vmatmul.mubr.bf16.gmra.mxu0 %v322_v61  ;;  %782 = vmatmul.mubr.bf16.gmra.mxu1 %v354_v62  ;;  %v234_v61 = vld [vmem:[%s1191_s26 + $0x1c0] sm:$0xff]  ;;  %v236_v62 = vld [vmem:[%s1191_s26 + $0x1d0] sm:$0xff] }
  0x75   : > { %1061 = vmatprep.mubr.msk.bf16.mxu0 %vm453_vm0, %v325_v63  ;;  %1077 = vmatprep.mubr.msk.bf16.mxu1 %vm453_vm0, %v357_v0  ;;  %v298_v63 = vld [vmem:[%s1191_s26 + $0x3c0] sm:$0xff]  ;;  %v300_v0 = vld [vmem:[%s1191_s26 + $0x3d0] sm:$0xff]  ;;  %v334_v5 = vpack.c.bf16 %v236_v62, %v234_v61 }
  0x76   : > { %v366_v6 = vpack.c.bf16 %v300_v0, %v298_v63 }
  0x7c   : > { %662 = vmatmul.mubr.bf16.gmra.mxu0 %v324_v9  ;;  %790 = vmatmul.mubr.bf16.gmra.mxu1 %v356_v10  ;;  %v238_v9 = vld [vmem:[%s1191_s26 + $0x1e0] sm:$0xff]  ;;  %v240_v10 = vld [vmem:[%s1191_s26 + $0x1f0] sm:$0xff] }
  0x7d   : > { %1062 = vmatprep.mubr.msk.bf16.mxu0 %vm453_vm0, %v327_v11  ;;  %1078 = vmatprep.mubr.msk.bf16.mxu1 %vm453_vm0, %v359_v12  ;;  %v302_v11 = vld [vmem:[%s1191_s26 + $0x3e0] sm:$0xff]  ;;  %v304_v12 = vld [vmem:[%s1191_s26 + $0x3f0] sm:$0xff]  ;;  %v336_v13 = vpack.c.bf16 %v240_v10, %v238_v9 }
  0x7e   : > { %v368_v14 = vpack.c.bf16 %v304_v12, %v302_v11 }
  0x84   : > { %670 = vmatmul.mubr.bf16.gmra.mxu0 %v326_v21  ;;  %798 = vmatmul.mubr.bf16.gmra.mxu1 %v358_v22 }
  0x85   : > { %1063 = vmatprep.mubr.msk.bf16.mxu0 %vm453_vm0, %v329_v23  ;;  %1079 = vmatprep.mubr.msk.bf16.mxu1 %vm453_vm0, %v361_v24 }
  0x8c   : > { %678 = vmatmul.mubr.bf16.gmra.mxu0 %v328_v33  ;;  %806 = vmatmul.mubr.bf16.gmra.mxu1 %v360_v34 }
  0x8d   : > { %1064 = vmatprep.mubr.msk.bf16.mxu0 %vm453_vm0, %v331_v35  ;;  %1080 = vmatprep.mubr.msk.bf16.mxu1 %vm453_vm0, %v363_v36 }
  0x94   : > { %686 = vmatmul.mubr.bf16.gmra.mxu0 %v330_v45  ;;  %814 = vmatmul.mubr.bf16.gmra.mxu1 %v362_v46 }
  0x95   : > { %1065 = vmatprep.mubr.msk.bf16.mxu0 %vm453_vm0, %v333_v47  ;;  %1081 = vmatprep.mubr.msk.bf16.mxu1 %vm453_vm0, %v365_v48 }
  0x9c   : > { %694 = vmatmul.mubr.bf16.gmra.mxu0 %v332_v57  ;;  %822 = vmatmul.mubr.bf16.gmra.mxu1 %v364_v58 }
  0x9d   : > { %1066 = vmatprep.mubr.msk.bf16.mxu0 %vm453_vm0, %v335_v59  ;;  %1082 = vmatprep.mubr.msk.bf16.mxu1 %vm453_vm0, %v367_v60 }
  0xa4   : > { %702 = vmatmul.mubr.bf16.gmra.mxu0 %v334_v5  ;;  %830 = vmatmul.mubr.bf16.gmra.mxu1 %v366_v6 }
  0xa5   : > { %1067 = vmatprep.mubr.msk.bf16.mxu0 %vm453_vm0, %v337_v7  ;;  %1083 = vmatprep.mubr.msk.bf16.mxu1 %vm453_vm0, %v369_v8 }
  0xac   : > { %710 = vmatmul.mubr.bf16.gmra.mxu0 %v336_v13  ;;  %838 = vmatmul.mubr.bf16.gmra.mxu1 %v368_v14 }
  0xf4   : > { %v591_v16 = vpop.f32.mrf.mxu0  ;;  %v719_v17 = vpop.f32.mrf.mxu1 }
  0xf5   : > { %v592_v18 = vadd.f32 %v1386_v15, %v591_v16  ;;  %v720_v19 = vadd.f32 %v1386_v15, %v719_v17 }
  0xf6   : > { %v593_v20 = vpop.f32.mrf.mxu0  ;;  %v721_v21 = vpop.f32.mrf.mxu1 }
  0xf7   : > { %v846_v22 = vmax.f32 %v592_v18, 0.0  ;;  %v878_v23 = vmax.f32 %v720_v19, 0.0 }
  0xf8   : > { %v594_v24 = vpop.f32.mrf.mxu0  ;;  %v722_v25 = vpop.f32.mrf.mxu1 }
  0xf9   : > { %911 = vst.msk [vmem:[%s1394_s18] sm:$0xff] %vm910_vm3, %v846_v22  ;;  %943 = vst.msk [vmem:[%s1394_s18 + $0x100] sm:$0xff] %vm910_vm3, %v878_v23  ;;  %v595_v26 = vadd.f32 %v1386_v15, %v594_v24  ;;  %v723_v27 = vadd.f32 %v1386_v15, %v722_v25 }
  0xfa   : > { %v596_v28 = vpop.f32.mrf.mxu0  ;;  %v724_v29 = vpop.f32.mrf.mxu1 }
  0xfb   : > { %v847_v30 = vmax.f32 %v595_v26, 0.0  ;;  %v879_v31 = vmax.f32 %v723_v27, 0.0 }
  0xfc   : > { %v599_v32 = vpop.f32.mrf.mxu0  ;;  %v727_v33 = vpop.f32.mrf.mxu1 }
  0xfd   : > { %912 = vst.msk [vmem:[%s1394_s18 + $0x8] sm:$0xff] %vm910_vm3, %v847_v30  ;;  %944 = vst.msk [vmem:[%s1394_s18 + $0x108] sm:$0xff] %vm910_vm3, %v879_v31  ;;  %v600_v34 = vadd.f32 %v1386_v15, %v599_v32  ;;  %v728_v35 = vadd.f32 %v1386_v15, %v727_v33 }
  0xfe   : > { %v601_v36 = vpop.f32.mrf.mxu0  ;;  %v729_v37 = vpop.f32.mrf.mxu1 }
  0xff   : > { %v848_v38 = vmax.f32 %v600_v34, 0.0  ;;  %v880_v39 = vmax.f32 %v728_v35, 0.0 }
 0x100   : > { %v602_v40 = vpop.f32.mrf.mxu0  ;;  %v730_v41 = vpop.f32.mrf.mxu1 }
 0x101   : > { %913 = vst.msk [vmem:[%s1394_s18 + $0x10] sm:$0xff] %vm910_vm3, %v848_v38  ;;  %945 = vst.msk [vmem:[%s1394_s18 + $0x110] sm:$0xff] %vm910_vm3, %v880_v39  ;;  %v603_v42 = vadd.f32 %v1386_v15, %v602_v40  ;;  %v731_v43 = vadd.f32 %v1386_v15, %v730_v41 }
 0x102   : > { %v604_v44 = vpop.f32.mrf.mxu0  ;;  %v732_v45 = vpop.f32.mrf.mxu1 }
 0x103   : > { %v849_v46 = vmax.f32 %v603_v42, 0.0  ;;  %v881_v47 = vmax.f32 %v731_v43, 0.0 }
 0x104   : > { %v607_v48 = vpop.f32.mrf.mxu0  ;;  %v735_v49 = vpop.f32.mrf.mxu1 }
 0x105   : > { %914 = vst.msk [vmem:[%s1394_s18 + $0x18] sm:$0xff] %vm910_vm3, %v849_v46  ;;  %946 = vst.msk [vmem:[%s1394_s18 + $0x118] sm:$0xff] %vm910_vm3, %v881_v47  ;;  %v608_v50 = vadd.f32 %v1386_v15, %v607_v48  ;;  %v736_v51 = vadd.f32 %v1386_v15, %v735_v49 }
 0x106   : > { %v609_v52 = vpop.f32.mrf.mxu0  ;;  %v737_v53 = vpop.f32.mrf.mxu1 }
 0x107   : > { %v850_v54 = vmax.f32 %v608_v50, 0.0  ;;  %v882_v55 = vmax.f32 %v736_v51, 0.0 }
 0x108   : > { %v610_v56 = vpop.f32.mrf.mxu0  ;;  %v738_v57 = vpop.f32.mrf.mxu1 }
 0x109   : > { %915 = vst.msk [vmem:[%s1394_s18 + $0x20] sm:$0xff] %vm910_vm3, %v850_v54  ;;  %947 = vst.msk [vmem:[%s1394_s18 + $0x120] sm:$0xff] %vm910_vm3, %v882_v55  ;;  %v611_v58 = vadd.f32 %v1386_v15, %v610_v56  ;;  %v739_v59 = vadd.f32 %v1386_v15, %v738_v57 }
 0x10a   : > { %v612_v60 = vpop.f32.mrf.mxu0  ;;  %v740_v61 = vpop.f32.mrf.mxu1 }
 0x10b   : > { %v851_v62 = vmax.f32 %v611_v58, 0.0  ;;  %v883_v63 = vmax.f32 %v739_v59, 0.0 }
 0x10c   : > { %v615_v0 = vpop.f32.mrf.mxu0  ;;  %v743_v1 = vpop.f32.mrf.mxu1 }
 0x10d   : > { %916 = vst.msk [vmem:[%s1394_s18 + $0x28] sm:$0xff] %vm910_vm3, %v851_v62  ;;  %948 = vst.msk [vmem:[%s1394_s18 + $0x128] sm:$0xff] %vm910_vm3, %v883_v63  ;;  %v616_v2 = vadd.f32 %v1386_v15, %v615_v0  ;;  %v744_v3 = vadd.f32 %v1386_v15, %v743_v1 }
 0x10e   : > { %v617_v4 = vpop.f32.mrf.mxu0  ;;  %v745_v5 = vpop.f32.mrf.mxu1 }
 0x10f   : > { %v852_v6 = vmax.f32 %v616_v2, 0.0  ;;  %v884_v7 = vmax.f32 %v744_v3, 0.0 }
 0x110   : > { %v618_v8 = vpop.f32.mrf.mxu0  ;;  %v746_v9 = vpop.f32.mrf.mxu1 }
 0x111   : > { %917 = vst.msk [vmem:[%s1394_s18 + $0x30] sm:$0xff] %vm910_vm3, %v852_v6  ;;  %949 = vst.msk [vmem:[%s1394_s18 + $0x130] sm:$0xff] %vm910_vm3, %v884_v7  ;;  %v619_v10 = vadd.f32 %v1386_v15, %v618_v8  ;;  %v747_v11 = vadd.f32 %v1386_v15, %v746_v9 }
 0x112   : > { %v620_v12 = vpop.f32.mrf.mxu0  ;;  %v748_v13 = vpop.f32.mrf.mxu1 }
 0x113   : > { %v853_v14 = vmax.f32 %v619_v10, 0.0  ;;  %v885_v16 = vmax.f32 %v747_v11, 0.0 }
 0x114   : > { %v623_v17 = vpop.f32.mrf.mxu0  ;;  %v751_v18 = vpop.f32.mrf.mxu1 }
 0x115   : > { %918 = vst.msk [vmem:[%s1394_s18 + $0x38] sm:$0xff] %vm910_vm3, %v853_v14  ;;  %950 = vst.msk [vmem:[%s1394_s18 + $0x138] sm:$0xff] %vm910_vm3, %v885_v16  ;;  %v624_v19 = vadd.f32 %v1386_v15, %v623_v17  ;;  %v752_v20 = vadd.f32 %v1386_v15, %v751_v18 }
 0x116   : > { %v625_v21 = vpop.f32.mrf.mxu0  ;;  %v753_v22 = vpop.f32.mrf.mxu1 }
 0x117   : > { %v854_v23 = vmax.f32 %v624_v19, 0.0  ;;  %v886_v24 = vmax.f32 %v752_v20, 0.0 }
 0x118   : > { %v626_v25 = vpop.f32.mrf.mxu0  ;;  %v754_v26 = vpop.f32.mrf.mxu1 }
 0x119   : > { %919 = vst.msk [vmem:[%s1394_s18 + $0x40] sm:$0xff] %vm910_vm3, %v854_v23  ;;  %951 = vst.msk [vmem:[%s1394_s18 + $0x140] sm:$0xff] %vm910_vm3, %v886_v24  ;;  %v627_v27 = vadd.f32 %v1386_v15, %v626_v25  ;;  %v755_v28 = vadd.f32 %v1386_v15, %v754_v26 }
 0x11a   : > { %v628_v29 = vpop.f32.mrf.mxu0  ;;  %v756_v30 = vpop.f32.mrf.mxu1 }
 0x11b   : > { %v855_v31 = vmax.f32 %v627_v27, 0.0  ;;  %v887_v32 = vmax.f32 %v755_v28, 0.0 }
 0x11c   : > { %v631_v33 = vpop.f32.mrf.mxu0  ;;  %v759_v34 = vpop.f32.mrf.mxu1 }
 0x11d   : > { %920 = vst.msk [vmem:[%s1394_s18 + $0x48] sm:$0xff] %vm910_vm3, %v855_v31  ;;  %952 = vst.msk [vmem:[%s1394_s18 + $0x148] sm:$0xff] %vm910_vm3, %v887_v32  ;;  %v632_v35 = vadd.f32 %v1386_v15, %v631_v33  ;;  %v760_v36 = vadd.f32 %v1386_v15, %v759_v34 }
 0x11e   : > { %v633_v37 = vpop.f32.mrf.mxu0  ;;  %v761_v38 = vpop.f32.mrf.mxu1 }
 0x11f   : > { %v856_v39 = vmax.f32 %v632_v35, 0.0  ;;  %v888_v40 = vmax.f32 %v760_v36, 0.0 }
 0x120   : > { %v634_v41 = vpop.f32.mrf.mxu0  ;;  %v762_v42 = vpop.f32.mrf.mxu1 }
 0x121   : > { %921 = vst.msk [vmem:[%s1394_s18 + $0x50] sm:$0xff] %vm910_vm3, %v856_v39  ;;  %953 = vst.msk [vmem:[%s1394_s18 + $0x150] sm:$0xff] %vm910_vm3, %v888_v40  ;;  %v635_v43 = vadd.f32 %v1386_v15, %v634_v41  ;;  %v763_v44 = vadd.f32 %v1386_v15, %v762_v42 }
 0x122   : > { %v636_v45 = vpop.f32.mrf.mxu0  ;;  %v764_v46 = vpop.f32.mrf.mxu1 }
 0x123   : > { %v857_v47 = vmax.f32 %v635_v43, 0.0  ;;  %v889_v48 = vmax.f32 %v763_v44, 0.0 }
 0x124   : > { %v639_v49 = vpop.f32.mrf.mxu0  ;;  %v767_v50 = vpop.f32.mrf.mxu1 }
 0x125   : > { %922 = vst.msk [vmem:[%s1394_s18 + $0x58] sm:$0xff] %vm910_vm3, %v857_v47  ;;  %954 = vst.msk [vmem:[%s1394_s18 + $0x158] sm:$0xff] %vm910_vm3, %v889_v48  ;;  %v640_v51 = vadd.f32 %v1386_v15, %v639_v49  ;;  %v768_v52 = vadd.f32 %v1386_v15, %v767_v50 }
 0x126   : > { %v641_v53 = vpop.f32.mrf.mxu0  ;;  %v769_v54 = vpop.f32.mrf.mxu1 }
 0x127   : > { %v858_v55 = vmax.f32 %v640_v51, 0.0  ;;  %v890_v56 = vmax.f32 %v768_v52, 0.0 }
 0x128   : > { %v642_v57 = vpop.f32.mrf.mxu0  ;;  %v770_v58 = vpop.f32.mrf.mxu1 }
 0x129   : > { %923 = vst.msk [vmem:[%s1394_s18 + $0x60] sm:$0xff] %vm910_vm3, %v858_v55  ;;  %955 = vst.msk [vmem:[%s1394_s18 + $0x160] sm:$0xff] %vm910_vm3, %v890_v56  ;;  %v643_v59 = vadd.f32 %v1386_v15, %v642_v57  ;;  %v771_v60 = vadd.f32 %v1386_v15, %v770_v58 }
 0x12a   : > { %v644_v61 = vpop.f32.mrf.mxu0  ;;  %v772_v62 = vpop.f32.mrf.mxu1 }
 0x12b   : > { %v859_v63 = vmax.f32 %v643_v59, 0.0  ;;  %v891_v0 = vmax.f32 %v771_v60, 0.0 }
 0x12c   : > { %v647_v1 = vpop.f32.mrf.mxu0  ;;  %v775_v2 = vpop.f32.mrf.mxu1 }
 0x12d   : > { %924 = vst.msk [vmem:[%s1394_s18 + $0x68] sm:$0xff] %vm910_vm3, %v859_v63  ;;  %956 = vst.msk [vmem:[%s1394_s18 + $0x168] sm:$0xff] %vm910_vm3, %v891_v0  ;;  %v648_v3 = vadd.f32 %v1386_v15, %v647_v1  ;;  %v776_v4 = vadd.f32 %v1386_v15, %v775_v2 }
 0x12e   : > { %v649_v5 = vpop.f32.mrf.mxu0  ;;  %v777_v6 = vpop.f32.mrf.mxu1 }
 0x12f   : > { %v860_v7 = vmax.f32 %v648_v3, 0.0  ;;  %v892_v8 = vmax.f32 %v776_v4, 0.0 }
 0x130   : > { %v650_v9 = vpop.f32.mrf.mxu0  ;;  %v778_v10 = vpop.f32.mrf.mxu1 }
 0x131   : > { %925 = vst.msk [vmem:[%s1394_s18 + $0x70] sm:$0xff] %vm910_vm3, %v860_v7  ;;  %957 = vst.msk [vmem:[%s1394_s18 + $0x170] sm:$0xff] %vm910_vm3, %v892_v8  ;;  %v651_v11 = vadd.f32 %v1386_v15, %v650_v9  ;;  %v779_v12 = vadd.f32 %v1386_v15, %v778_v10 }
 0x132   : > { %v652_v13 = vpop.f32.mrf.mxu0  ;;  %v780_v14 = vpop.f32.mrf.mxu1 }
 0x133   : > { %v861_v16 = vmax.f32 %v651_v11, 0.0  ;;  %v893_v17 = vmax.f32 %v779_v12, 0.0 }
 0x134   : > { %v655_v18 = vpop.f32.mrf.mxu0  ;;  %v783_v19 = vpop.f32.mrf.mxu1 }
 0x135   : > { %926 = vst.msk [vmem:[%s1394_s18 + $0x78] sm:$0xff] %vm910_vm3, %v861_v16  ;;  %958 = vst.msk [vmem:[%s1394_s18 + $0x178] sm:$0xff] %vm910_vm3, %v893_v17  ;;  %v656_v20 = vadd.f32 %v1386_v15, %v655_v18  ;;  %v784_v21 = vadd.f32 %v1386_v15, %v783_v19 }
 0x136   : > { %v657_v22 = vpop.f32.mrf.mxu0  ;;  %v785_v23 = vpop.f32.mrf.mxu1 }
 0x137   : > { %v862_v24 = vmax.f32 %v656_v20, 0.0  ;;  %v894_v25 = vmax.f32 %v784_v21, 0.0 }
 0x138   : > { %v658_v26 = vpop.f32.mrf.mxu0  ;;  %v786_v27 = vpop.f32.mrf.mxu1 }
 0x139   : > { %927 = vst.msk [vmem:[%s1394_s18 + $0x80] sm:$0xff] %vm910_vm3, %v862_v24  ;;  %959 = vst.msk [vmem:[%s1394_s18 + $0x180] sm:$0xff] %vm910_vm3, %v894_v25  ;;  %v659_v28 = vadd.f32 %v1386_v15, %v658_v26  ;;  %v787_v29 = vadd.f32 %v1386_v15, %v786_v27 }
 0x13a   : > { %v660_v30 = vpop.f32.mrf.mxu0  ;;  %v788_v31 = vpop.f32.mrf.mxu1 }
 0x13b   : > { %v863_v32 = vmax.f32 %v659_v28, 0.0  ;;  %v895_v33 = vmax.f32 %v787_v29, 0.0 }
 0x13c   : > { %v663_v34 = vpop.f32.mrf.mxu0  ;;  %v791_v35 = vpop.f32.mrf.mxu1 }
 0x13d   : > { %928 = vst.msk [vmem:[%s1394_s18 + $0x88] sm:$0xff] %vm910_vm3, %v863_v32  ;;  %960 = vst.msk [vmem:[%s1394_s18 + $0x188] sm:$0xff] %vm910_vm3, %v895_v33  ;;  %v664_v36 = vadd.f32 %v1386_v15, %v663_v34  ;;  %v792_v37 = vadd.f32 %v1386_v15, %v791_v35 }
 0x13e   : > { %v665_v38 = vpop.f32.mrf.mxu0  ;;  %v793_v39 = vpop.f32.mrf.mxu1 }
 0x13f   : > { %v864_v40 = vmax.f32 %v664_v36, 0.0  ;;  %v896_v41 = vmax.f32 %v792_v37, 0.0 }
 0x140   : > { %v666_v42 = vpop.f32.mrf.mxu0  ;;  %v794_v43 = vpop.f32.mrf.mxu1 }
 0x141   : > { %929 = vst.msk [vmem:[%s1394_s18 + $0x90] sm:$0xff] %vm910_vm3, %v864_v40  ;;  %961 = vst.msk [vmem:[%s1394_s18 + $0x190] sm:$0xff] %vm910_vm3, %v896_v41  ;;  %v667_v44 = vadd.f32 %v1386_v15, %v666_v42  ;;  %v795_v45 = vadd.f32 %v1386_v15, %v794_v43 }
 0x142   : > { %v668_v46 = vpop.f32.mrf.mxu0  ;;  %v796_v47 = vpop.f32.mrf.mxu1 }
 0x143   : > { %v865_v48 = vmax.f32 %v667_v44, 0.0  ;;  %v897_v49 = vmax.f32 %v795_v45, 0.0 }
 0x144   : > { %v671_v50 = vpop.f32.mrf.mxu0  ;;  %v799_v51 = vpop.f32.mrf.mxu1 }
 0x145   : > { %930 = vst.msk [vmem:[%s1394_s18 + $0x98] sm:$0xff] %vm910_vm3, %v865_v48  ;;  %962 = vst.msk [vmem:[%s1394_s18 + $0x198] sm:$0xff] %vm910_vm3, %v897_v49  ;;  %v672_v52 = vadd.f32 %v1386_v15, %v671_v50  ;;  %v800_v53 = vadd.f32 %v1386_v15, %v799_v51 }
 0x146   : > { %v673_v54 = vpop.f32.mrf.mxu0  ;;  %v801_v55 = vpop.f32.mrf.mxu1 }
 0x147   : > { %v866_v56 = vmax.f32 %v672_v52, 0.0  ;;  %v898_v57 = vmax.f32 %v800_v53, 0.0 }
 0x148   : > { %v674_v58 = vpop.f32.mrf.mxu0  ;;  %v802_v59 = vpop.f32.mrf.mxu1 }
 0x149   : > { %931 = vst.msk [vmem:[%s1394_s18 + $0xa0] sm:$0xff] %vm910_vm3, %v866_v56  ;;  %963 = vst.msk [vmem:[%s1394_s18 + $0x1a0] sm:$0xff] %vm910_vm3, %v898_v57  ;;  %v675_v60 = vadd.f32 %v1386_v15, %v674_v58  ;;  %v803_v61 = vadd.f32 %v1386_v15, %v802_v59 }
 0x14a   : > { %v676_v62 = vpop.f32.mrf.mxu0  ;;  %v804_v63 = vpop.f32.mrf.mxu1 }
 0x14b   : > { %v867_v0 = vmax.f32 %v675_v60, 0.0  ;;  %v899_v1 = vmax.f32 %v803_v61, 0.0 }
 0x14c   : > { %v679_v2 = vpop.f32.mrf.mxu0  ;;  %v807_v3 = vpop.f32.mrf.mxu1 }
 0x14d   : > { %932 = vst.msk [vmem:[%s1394_s18 + $0xa8] sm:$0xff] %vm910_vm3, %v867_v0  ;;  %964 = vst.msk [vmem:[%s1394_s18 + $0x1a8] sm:$0xff] %vm910_vm3, %v899_v1  ;;  %v680_v4 = vadd.f32 %v1386_v15, %v679_v2  ;;  %v808_v5 = vadd.f32 %v1386_v15, %v807_v3 }
 0x14e   : > { %v681_v6 = vpop.f32.mrf.mxu0  ;;  %v809_v7 = vpop.f32.mrf.mxu1 }
 0x14f   : > { %v868_v8 = vmax.f32 %v680_v4, 0.0  ;;  %v900_v9 = vmax.f32 %v808_v5, 0.0 }
 0x150   : > { %v682_v10 = vpop.f32.mrf.mxu0  ;;  %v810_v11 = vpop.f32.mrf.mxu1 }
 0x151   : > { %933 = vst.msk [vmem:[%s1394_s18 + $0xb0] sm:$0xff] %vm910_vm3, %v868_v8  ;;  %965 = vst.msk [vmem:[%s1394_s18 + $0x1b0] sm:$0xff] %vm910_vm3, %v900_v9  ;;  %v683_v12 = vadd.f32 %v1386_v15, %v682_v10  ;;  %v811_v13 = vadd.f32 %v1386_v15, %v810_v11 }
 0x152   : > { %v684_v14 = vpop.f32.mrf.mxu0  ;;  %v812_v16 = vpop.f32.mrf.mxu1 }
 0x153   : > { %v869_v17 = vmax.f32 %v683_v12, 0.0  ;;  %v901_v18 = vmax.f32 %v811_v13, 0.0 }
 0x154   : > { %v687_v19 = vpop.f32.mrf.mxu0  ;;  %v815_v20 = vpop.f32.mrf.mxu1 }
 0x155   : > { %934 = vst.msk [vmem:[%s1394_s18 + $0xb8] sm:$0xff] %vm910_vm3, %v869_v17  ;;  %966 = vst.msk [vmem:[%s1394_s18 + $0x1b8] sm:$0xff] %vm910_vm3, %v901_v18  ;;  %v688_v21 = vadd.f32 %v1386_v15, %v687_v19  ;;  %v816_v22 = vadd.f32 %v1386_v15, %v815_v20 }
 0x156   : > { %v689_v23 = vpop.f32.mrf.mxu0  ;;  %v817_v24 = vpop.f32.mrf.mxu1 }
 0x157   : > { %v870_v25 = vmax.f32 %v688_v21, 0.0  ;;  %v902_v26 = vmax.f32 %v816_v22, 0.0 }
 0x158   : > { %v690_v27 = vpop.f32.mrf.mxu0  ;;  %v818_v28 = vpop.f32.mrf.mxu1 }
 0x159   : > { %935 = vst.msk [vmem:[%s1394_s18 + $0xc0] sm:$0xff] %vm910_vm3, %v870_v25  ;;  %967 = vst.msk [vmem:[%s1394_s18 + $0x1c0] sm:$0xff] %vm910_vm3, %v902_v26  ;;  %v691_v29 = vadd.f32 %v1386_v15, %v690_v27  ;;  %v819_v30 = vadd.f32 %v1386_v15, %v818_v28 }
 0x15a   : > { %v692_v31 = vpop.f32.mrf.mxu0  ;;  %v820_v32 = vpop.f32.mrf.mxu1 }
 0x15b   : > { %v871_v33 = vmax.f32 %v691_v29, 0.0  ;;  %v903_v34 = vmax.f32 %v819_v30, 0.0 }
 0x15c   : > { %v695_v35 = vpop.f32.mrf.mxu0  ;;  %v823_v36 = vpop.f32.mrf.mxu1 }
 0x15d   : > { %936 = vst.msk [vmem:[%s1394_s18 + $0xc8] sm:$0xff] %vm910_vm3, %v871_v33  ;;  %968 = vst.msk [vmem:[%s1394_s18 + $0x1c8] sm:$0xff] %vm910_vm3, %v903_v34  ;;  %v696_v37 = vadd.f32 %v1386_v15, %v695_v35  ;;  %v824_v38 = vadd.f32 %v1386_v15, %v823_v36 }
 0x15e   : > { %v697_v39 = vpop.f32.mrf.mxu0  ;;  %v825_v40 = vpop.f32.mrf.mxu1 }
 0x15f   : > { %v872_v41 = vmax.f32 %v696_v37, 0.0  ;;  %v904_v42 = vmax.f32 %v824_v38, 0.0 }
 0x160   : > { %v698_v43 = vpop.f32.mrf.mxu0  ;;  %v826_v44 = vpop.f32.mrf.mxu1 }
 0x161   : > { %937 = vst.msk [vmem:[%s1394_s18 + $0xd0] sm:$0xff] %vm910_vm3, %v872_v41  ;;  %969 = vst.msk [vmem:[%s1394_s18 + $0x1d0] sm:$0xff] %vm910_vm3, %v904_v42  ;;  %v699_v45 = vadd.f32 %v1386_v15, %v698_v43  ;;  %v827_v46 = vadd.f32 %v1386_v15, %v826_v44 }
 0x162   : > { %v700_v47 = vpop.f32.mrf.mxu0  ;;  %v828_v48 = vpop.f32.mrf.mxu1 }
 0x163   : > { %v873_v49 = vmax.f32 %v699_v45, 0.0  ;;  %v905_v50 = vmax.f32 %v827_v46, 0.0 }
 0x164   : > { %v703_v51 = vpop.f32.mrf.mxu0  ;;  %v831_v52 = vpop.f32.mrf.mxu1 }
 0x165   : > { %938 = vst.msk [vmem:[%s1394_s18 + $0xd8] sm:$0xff] %vm910_vm3, %v873_v49  ;;  %970 = vst.msk [vmem:[%s1394_s18 + $0x1d8] sm:$0xff] %vm910_vm3, %v905_v50  ;;  %v704_v53 = vadd.f32 %v1386_v15, %v703_v51  ;;  %v832_v54 = vadd.f32 %v1386_v15, %v831_v52 }
 0x166   : > { %v705_v55 = vpop.f32.mrf.mxu0  ;;  %v833_v56 = vpop.f32.mrf.mxu1 }
 0x167   : > { %v874_v57 = vmax.f32 %v704_v53, 0.0  ;;  %v906_v58 = vmax.f32 %v832_v54, 0.0 }
 0x168   : > { %v706_v59 = vpop.f32.mrf.mxu0  ;;  %v834_v60 = vpop.f32.mrf.mxu1 }
 0x169   : > { %939 = vst.msk [vmem:[%s1394_s18 + $0xe0] sm:$0xff] %vm910_vm3, %v874_v57  ;;  %971 = vst.msk [vmem:[%s1394_s18 + $0x1e0] sm:$0xff] %vm910_vm3, %v906_v58  ;;  %v707_v61 = vadd.f32 %v1386_v15, %v706_v59  ;;  %v835_v62 = vadd.f32 %v1386_v15, %v834_v60 }
 0x16a   : > { %v708_v63 = vpop.f32.mrf.mxu0  ;;  %v836_v0 = vpop.f32.mrf.mxu1 }
 0x16b   : > { %v875_v1 = vmax.f32 %v707_v61, 0.0  ;;  %v907_v2 = vmax.f32 %v835_v62, 0.0 }
 0x16c   : > { %v711_v3 = vpop.f32.mrf.mxu0  ;;  %v839_v4 = vpop.f32.mrf.mxu1 }
 0x16d   : > { %940 = vst.msk [vmem:[%s1394_s18 + $0xe8] sm:$0xff] %vm910_vm3, %v875_v1  ;;  %972 = vst.msk [vmem:[%s1394_s18 + $0x1e8] sm:$0xff] %vm910_vm3, %v907_v2  ;;  %v712_v5 = vadd.f32 %v1386_v15, %v711_v3  ;;  %v840_v6 = vadd.f32 %v1386_v15, %v839_v4 }
 0x16e   : > { %v713_v7 = vpop.f32.mrf.mxu0  ;;  %v841_v8 = vpop.f32.mrf.mxu1 }
 0x16f   : > { %v876_v9 = vmax.f32 %v712_v5, 0.0  ;;  %v908_v10 = vmax.f32 %v840_v6, 0.0 }
 0x170   : > { %v714_v11 = vpop.f32.mrf.mxu0  ;;  %v842_v12 = vpop.f32.mrf.mxu1 }
 0x171   : > { %941 = vst.msk [vmem:[%s1394_s18 + $0xf0] sm:$0xff] %vm910_vm3, %v876_v9  ;;  %973 = vst.msk [vmem:[%s1394_s18 + $0x1f0] sm:$0xff] %vm910_vm3, %v908_v10  ;;  %v715_v13 = vadd.f32 %v1386_v15, %v714_v11  ;;  %v843_v14 = vadd.f32 %v1386_v15, %v842_v12 }
 0x172   : > { %v716_v16 = vpop.f32.mrf.mxu0  ;;  %v844_v17 = vpop.f32.mrf.mxu1 }
 0x173   : > { %v877_v18 = vmax.f32 %v715_v13, 0.0  ;;  %v909_v19 = vmax.f32 %v843_v14, 0.0 }
 0x175   : > { %942 = vst.msk [vmem:[%s1394_s18 + $0xf8] sm:$0xff] %vm910_vm3, %v877_v18  ;;  %974 = vst.msk [vmem:[%s1394_s18 + $0x1f8] sm:$0xff] %vm910_vm3, %v909_v19 }
 0x176 PF: > { %s13_s12 = sadd.s32 1, %s1133_s12  }
 0x177   : > { %p10_p4 = scmp.ge.s32.totalorder %s13_s12, 11  }
 0x179   :  { %12 = sbr.rel (!%p10_p4) target bundleno = 1 (0x1), region = 62 }

// kernel: clasic_forward.12
= control target key start
LH: loop header
LB: loop body
LE: loop exit
PB: predicated region body
PF: predicated region fallthrough
CT: control target
= control target key end

     0   :  { %s429_s6 = smov 0   ;;  %s670_s0 = inlined_call_operand.vmem [shape: f32[2,12,2,12,128], index: 0, kind: input, shape index: {}]   ;;  %s671_s1 = inlined_call_operand.vmem [shape: f32[2,12,12,64], index: 1, kind: output, shape index: {}]  }
   0x1 LB: > { %s390_s7 = sadd.s32 4294967295, %s416_s6   ;;  %p394_p0 = scmp.ge.s32.totalorder %s416_s6, 1  ;;  %s416_s6 = sphi %s429_s6, %s11_s6  }
   0x2   : > { %p87_p1 = scmp.lt.s32.totalorder %s416_s6, 3 }
   0x4   : > { %p88_p2 = pnand %p394_p0, %p87_p1 }
   0x5   : > { %p107_p3 = scmp.lt.s32.totalorder (!%p88_p2), %s390_s7, 1  ;;  %s418_s12 = smov (!%p88_p2), 64  }
   0x6   : > { %91 = sbr.rel (%p88_p2) target bundleno = 181 (0xb5), region = 24 }
   0xb   : > { %s673_s7 = smov (!%p107_p3, %s390_s7), 1  ;;  %vm309_vm0 = vcmask 523264   ;;  %vm311_vm1 = vcmask 519168  }
   0xc   : > { %s399_s8 = smul.u32 384, %s673_s7 }
   0xd   : > { %s400_s13 = smul.u32 192, %s673_s7 }
   0xe   : > { %s443_s11 = scalar_lea.vmem %s670_s0, %s399_s8 }
   0xf   : > { %v121_v0 = vld [vmem:[%s443_s11 + $0x20] sm:$0xff]  ;;  %v123_v1 = vld [vmem:[%s443_s11 + $0x30] sm:$0xff]  ;;  %v122_v5 = vld [vmem:[%s443_s11 + $0x28] sm:$0xf]  ;;  %s593_s16 = scalar_lea.vmem %s671_s1, %s400_s13 }
  0x10   : > { %v117_v2 = vld [vmem:[%s443_s11] sm:$0xff]  ;;  %v448_v3 = vmax.f32 %v121_v0, %v123_v1  ;;  %v119_v4 = vld [vmem:[%s443_s11 + $0x10] sm:$0xff]  ;;  %v124_v6 = vld [vmem:[%s443_s11 + $0x38] sm:$0xf] }
  0x11   : > { %v453_v7 = vmax.f32 %v117_v2, %v119_v4  ;;  %v118_v8 = vld [vmem:[%s443_s11 + $0x8] sm:$0xf]  ;;  %v120_v9 = vld [vmem:[%s443_s11 + $0x18] sm:$0xf]  ;;  %v459_v10 = vmax.f32 %v122_v5, %v124_v6  ;;  %v125_v14 = vld [vmem:[%s443_s11 + $0x40] sm:$0xff] }
  0x12   : > { %217 = vrot.lane.b32.xlu1 %v448_v3, %s418_s12  ;;  %v463_v11 = vmax.f32 %v118_v8, %v120_v9  ;;  %v126_v12 = vld [vmem:[%s443_s11 + $0x48] sm:$0xf]  ;;  %v128_v13 = vld [vmem:[%s443_s11 + $0x58] sm:$0xf]  ;;  %v127_v15 = vld [vmem:[%s443_s11 + $0x50] sm:$0xff] }
  0x13   : > { %213 = vrot.lane.b32.xlu0 %v453_v7, %s418_s12  ;;  %v471_v16 = vmax.f32 %v126_v12, %v128_v13  ;;  %v475_v17 = vmax.f32 %v125_v14, %v127_v15  ;;  %v130_v18 = vld [vmem:[%s443_s11 + $0x68] sm:$0xf]  ;;  %v132_v19 = vld [vmem:[%s443_s11 + $0x78] sm:$0xf]  ;;  %v129_v20 = vld [vmem:[%s443_s11 + $0x60] sm:$0xff] }
  0x14   : > { %v131_v21 = vld [vmem:[%s443_s11 + $0x70] sm:$0xff]  ;;  %v483_v22 = vmax.f32 %v130_v18, %v132_v19  ;;  %v134_v24 = vld [vmem:[%s443_s11 + $0x88] sm:$0xf]  ;;  %v136_v25 = vld [vmem:[%s443_s11 + $0x98] sm:$0xf] }
  0x15   : > { %v487_v23 = vmax.f32 %v129_v20, %v131_v21  ;;  %v133_v26 = vld [vmem:[%s443_s11 + $0x80] sm:$0xff]  ;;  %v135_v27 = vld [vmem:[%s443_s11 + $0x90] sm:$0xff]  ;;  %v495_v28 = vmax.f32 %v134_v24, %v136_v25  ;;  %v138_v30 = vld [vmem:[%s443_s11 + $0xa8] sm:$0xf] }
  0x16   : > { %219 = vrot.lane.b32.xlu1 %v459_v10, %s418_s12  ;;  %v499_v29 = vmax.f32 %v133_v26, %v135_v27  ;;  %v140_v31 = vld [vmem:[%s443_s11 + $0xb8] sm:$0xf]  ;;  %v137_v32 = vld [vmem:[%s443_s11 + $0xa0] sm:$0xff]  ;;  %v139_v33 = vld [vmem:[%s443_s11 + $0xb0] sm:$0xff] }
  0x17   : > { %215 = vrot.lane.b32.xlu0 %v463_v11, %s418_s12  ;;  %v507_v34 = vmax.f32 %v138_v30, %v140_v31  ;;  %v511_v35 = vmax.f32 %v137_v32, %v139_v33  ;;  %v142_v36 = vld [vmem:[%s443_s11 + $0xc8] sm:$0xf]  ;;  %v144_v37 = vld [vmem:[%s443_s11 + $0xd8] sm:$0xf]  ;;  %v141_v38 = vld [vmem:[%s443_s11 + $0xc0] sm:$0xff] }
  0x18   : > { %v143_v39 = vld [vmem:[%s443_s11 + $0xd0] sm:$0xff]  ;;  %v519_v40 = vmax.f32 %v142_v36, %v144_v37  ;;  %v146_v42 = vld [vmem:[%s443_s11 + $0xe8] sm:$0xf]  ;;  %v148_v43 = vld [vmem:[%s443_s11 + $0xf8] sm:$0xf] }
  0x19   : > { %v523_v41 = vmax.f32 %v141_v38, %v143_v39  ;;  %v145_v44 = vld [vmem:[%s443_s11 + $0xe0] sm:$0xff]  ;;  %v147_v45 = vld [vmem:[%s443_s11 + $0xf0] sm:$0xff]  ;;  %v531_v46 = vmax.f32 %v146_v42, %v148_v43  ;;  %v150_v48 = vld [vmem:[%s443_s11 + $0x108] sm:$0xf] }
  0x1a   : > { %223 = vrot.lane.b32.xlu1 %v471_v16, %s418_s12  ;;  %v535_v47 = vmax.f32 %v145_v44, %v147_v45  ;;  %v152_v49 = vld [vmem:[%s443_s11 + $0x118] sm:$0xf]  ;;  %v149_v50 = vld [vmem:[%s443_s11 + $0x100] sm:$0xff]  ;;  %v151_v51 = vld [vmem:[%s443_s11 + $0x110] sm:$0xff] }
  0x1b   : > { %221 = vrot.lane.b32.xlu0 %v475_v17, %s418_s12  ;;  %v543_v52 = vmax.f32 %v150_v48, %v152_v49  ;;  %v547_v53 = vmax.f32 %v149_v50, %v151_v51  ;;  %v154_v54 = vld [vmem:[%s443_s11 + $0x128] sm:$0xf]  ;;  %v156_v55 = vld [vmem:[%s443_s11 + $0x138] sm:$0xf]  ;;  %v153_v56 = vld [vmem:[%s443_s11 + $0x120] sm:$0xff] }
  0x1c   : > { %v155_v57 = vld [vmem:[%s443_s11 + $0x130] sm:$0xff]  ;;  %v555_v58 = vmax.f32 %v154_v54, %v156_v55  ;;  %v158_v60 = vld [vmem:[%s443_s11 + $0x148] sm:$0xf]  ;;  %v160_v61 = vld [vmem:[%s443_s11 + $0x158] sm:$0xf] }
  0x1d   : > { %v559_v59 = vmax.f32 %v153_v56, %v155_v57  ;;  %v157_v62 = vld [vmem:[%s443_s11 + $0x140] sm:$0xff]  ;;  %v159_v63 = vld [vmem:[%s443_s11 + $0x150] sm:$0xff]  ;;  %v567_v0 = vmax.f32 %v158_v60, %v160_v61  ;;  %v162_v2 = vld [vmem:[%s443_s11 + $0x168] sm:$0xf] }
  0x1e   : > { %227 = vrot.lane.b32.xlu1 %v483_v22, %s418_s12  ;;  %v571_v1 = vmax.f32 %v157_v62, %v159_v63  ;;  %v164_v4 = vld [vmem:[%s443_s11 + $0x178] sm:$0xf]  ;;  %v161_v5 = vld [vmem:[%s443_s11 + $0x160] sm:$0xff]  ;;  %v163_v6 = vld [vmem:[%s443_s11 + $0x170] sm:$0xff] }
  0x1f   : > { %225 = vrot.lane.b32.xlu0 %v487_v23, %s418_s12  ;;  %v579_v8 = vmax.f32 %v162_v2, %v164_v4  ;;  %v583_v9 = vmax.f32 %v161_v5, %v163_v6 }
  0x22   : > { %231 = vrot.lane.b32.xlu1 %v495_v28, %s418_s12 }
  0x23   : > { %229 = vrot.lane.b32.xlu0 %v499_v29, %s418_s12 }
  0x26   : > { %235 = vrot.lane.b32.xlu1 %v507_v34, %s418_s12 }
  0x27   : > { %233 = vrot.lane.b32.xlu0 %v511_v35, %s418_s12 }
  0x2a   : > { %239 = vrot.lane.b32.xlu1 %v519_v40, %s418_s12 }
  0x2b   : > { %237 = vrot.lane.b32.xlu0 %v523_v41, %s418_s12 }
  0x2e   : > { %243 = vrot.lane.b32.xlu1 %v531_v46, %s418_s12 }
  0x2f   : > { %241 = vrot.lane.b32.xlu0 %v535_v47, %s418_s12 }
  0x32   : > { %247 = vrot.lane.b32.xlu1 %v543_v52, %s418_s12 }
  0x33   : > { %245 = vrot.lane.b32.xlu0 %v547_v53, %s418_s12 }
  0x36   : > { %251 = vrot.lane.b32.xlu1 %v555_v58, %s418_s12 }
  0x37   : > { %249 = vrot.lane.b32.xlu0 %v559_v59, %s418_s12 }
  0x3a   : > { %255 = vrot.lane.b32.xlu1 %v567_v0, %s418_s12 }
  0x3b   : > { %253 = vrot.lane.b32.xlu0 %v571_v1, %s418_s12 }
  0x3e   : > { %259 = vrot.lane.b32.xlu1 %v579_v8, %s418_s12 }
  0x3f   : > { %257 = vrot.lane.b32.xlu0 %v583_v9, %s418_s12 }
  0x84   : > { %v218_v12 = vpop.permute.xlu1 %217 }
  0x85   : > { %v287_v13 = vmax.f32 %v448_v3, %v218_v12  ;;  %v214_v14 = vpop.permute.xlu0 %213 }
  0x86   : > { %v285_v15 = vmax.f32 %v453_v7, %v214_v14 }
  0x87   : > { %313 = vst.msk [vmem:[%s593_s16 + $0x10] sm:$0xff] %vm309_vm0, %v287_v13 }
  0x88   : > { %310 = vst.msk [vmem:[%s593_s16] sm:$0xff] %vm309_vm0, %v285_v15  ;;  %v220_v18 = vpop.permute.xlu1 %219 }
  0x89   : > { %v288_v19 = vmax.f32 %v459_v10, %v220_v18  ;;  %v216_v20 = vpop.permute.xlu0 %215 }
  0x8a   : > { %v286_v21 = vmax.f32 %v463_v11, %v216_v20 }
  0x8b   : > { %314 = vst.msk [vmem:[%s593_s16 + $0x18] sm:$0xf] %vm311_vm1, %v288_v19 }
  0x8c   : > { %312 = vst.msk [vmem:[%s593_s16 + $0x8] sm:$0xf] %vm311_vm1, %v286_v21  ;;  %v224_v3 = vpop.permute.xlu1 %223 }
  0x8d   : > { %v290_v7 = vmax.f32 %v471_v16, %v224_v3  ;;  %v222_v24 = vpop.permute.xlu0 %221 }
  0x8e   : > { %v289_v25 = vmax.f32 %v475_v17, %v222_v24 }
  0x8f   : > { %316 = vst.msk [vmem:[%s593_s16 + $0x28] sm:$0xf] %vm311_vm1, %v290_v7 }
  0x90   : > { %315 = vst.msk [vmem:[%s593_s16 + $0x20] sm:$0xff] %vm309_vm0, %v289_v25  ;;  %v228_v10 = vpop.permute.xlu1 %227 }
  0x91   : > { %v292_v11 = vmax.f32 %v483_v22, %v228_v10  ;;  %v226_v26 = vpop.permute.xlu0 %225 }
  0x92   : > { %v291_v27 = vmax.f32 %v487_v23, %v226_v26 }
  0x93   : > { %318 = vst.msk [vmem:[%s593_s16 + $0x38] sm:$0xf] %vm311_vm1, %v292_v11 }
  0x94   : > { %317 = vst.msk [vmem:[%s593_s16 + $0x30] sm:$0xff] %vm309_vm0, %v291_v27  ;;  %v232_v16 = vpop.permute.xlu1 %231 }
  0x95   : > { %v294_v17 = vmax.f32 %v495_v28, %v232_v16  ;;  %v230_v30 = vpop.permute.xlu0 %229 }
  0x96   : > { %v293_v31 = vmax.f32 %v499_v29, %v230_v30 }
  0x97   : > { %320 = vst.msk [vmem:[%s593_s16 + $0x48] sm:$0xf] %vm311_vm1, %v294_v17 }
  0x98   : > { %319 = vst.msk [vmem:[%s593_s16 + $0x40] sm:$0xff] %vm309_vm0, %v293_v31  ;;  %v236_v22 = vpop.permute.xlu1 %235 }
  0x99   : > { %v296_v23 = vmax.f32 %v507_v34, %v236_v22  ;;  %v234_v32 = vpop.permute.xlu0 %233 }
  0x9a   : > { %v295_v33 = vmax.f32 %v511_v35, %v234_v32 }
  0x9b   : > { %322 = vst.msk [vmem:[%s593_s16 + $0x58] sm:$0xf] %vm311_vm1, %v296_v23 }
  0x9c   : > { %321 = vst.msk [vmem:[%s593_s16 + $0x50] sm:$0xff] %vm309_vm0, %v295_v33  ;;  %v240_v28 = vpop.permute.xlu1 %239 }
  0x9d   : > { %v298_v29 = vmax.f32 %v519_v40, %v240_v28  ;;  %v238_v36 = vpop.permute.xlu0 %237 }
  0x9e   : > { %v297_v37 = vmax.f32 %v523_v41, %v238_v36 }
  0x9f   : > { %324 = vst.msk [vmem:[%s593_s16 + $0x68] sm:$0xf] %vm311_vm1, %v298_v29 }
  0xa0   : > { %323 = vst.msk [vmem:[%s593_s16 + $0x60] sm:$0xff] %vm309_vm0, %v297_v37  ;;  %v244_v34 = vpop.permute.xlu1 %243 }
  0xa1   : > { %v300_v35 = vmax.f32 %v531_v46, %v244_v34  ;;  %v242_v38 = vpop.permute.xlu0 %241 }
  0xa2   : > { %v299_v39 = vmax.f32 %v535_v47, %v242_v38 }
  0xa3   : > { %326 = vst.msk [vmem:[%s593_s16 + $0x78] sm:$0xf] %vm311_vm1, %v300_v35 }
  0xa4   : > { %325 = vst.msk [vmem:[%s593_s16 + $0x70] sm:$0xff] %vm309_vm0, %v299_v39  ;;  %v248_v40 = vpop.permute.xlu1 %247 }
  0xa5   : > { %v302_v41 = vmax.f32 %v543_v52, %v248_v40  ;;  %v246_v42 = vpop.permute.xlu0 %245 }
  0xa6   : > { %v301_v43 = vmax.f32 %v547_v53, %v246_v42 }
  0xa7   : > { %328 = vst.msk [vmem:[%s593_s16 + $0x88] sm:$0xf] %vm311_vm1, %v302_v41 }
  0xa8   : > { %327 = vst.msk [vmem:[%s593_s16 + $0x80] sm:$0xff] %vm309_vm0, %v301_v43  ;;  %v252_v44 = vpop.permute.xlu1 %251 }
  0xa9   : > { %v304_v45 = vmax.f32 %v555_v58, %v252_v44  ;;  %v250_v46 = vpop.permute.xlu0 %249 }
  0xaa   : > { %v303_v47 = vmax.f32 %v559_v59, %v250_v46 }
  0xab   : > { %330 = vst.msk [vmem:[%s593_s16 + $0x98] sm:$0xf] %vm311_vm1, %v304_v45 }
  0xac   : > { %329 = vst.msk [vmem:[%s593_s16 + $0x90] sm:$0xff] %vm309_vm0, %v303_v47  ;;  %v256_v48 = vpop.permute.xlu1 %255 }
  0xad   : > { %v306_v49 = vmax.f32 %v567_v0, %v256_v48  ;;  %v254_v50 = vpop.permute.xlu0 %253 }
  0xae   : > { %v305_v51 = vmax.f32 %v571_v1, %v254_v50 }
  0xaf   : > { %332 = vst.msk [vmem:[%s593_s16 + $0xa8] sm:$0xf] %vm311_vm1, %v306_v49 }
  0xb0   : > { %331 = vst.msk [vmem:[%s593_s16 + $0xa0] sm:$0xff] %vm309_vm0, %v305_v51  ;;  %v260_v52 = vpop.permute.xlu1 %259 }
  0xb1   : > { %v308_v53 = vmax.f32 %v579_v8, %v260_v52  ;;  %v258_v54 = vpop.permute.xlu0 %257 }
  0xb2   : > { %v307_v55 = vmax.f32 %v583_v9, %v258_v54 }
  0xb3   : > { %334 = vst.msk [vmem:[%s593_s16 + $0xb8] sm:$0xf] %vm311_vm1, %v308_v53 }
  0xb4   : > { %333 = vst.msk [vmem:[%s593_s16 + $0xb0] sm:$0xff] %vm309_vm0, %v307_v55 }
  0xb5 PF: > { %s11_s6 = sadd.s32 1, %s416_s6  }
  0xb6   : > { %p8_p4 = scmp.ge.s32.totalorder %s11_s6, 4  }
  0xb8   :  { %10 = sbr.rel (!%p8_p4) target bundleno = 1 (0x1), region = 54 }

// kernel: clasic_forward.11
= control target key start
LH: loop header
LB: loop body
LE: loop exit
PB: predicated region body
PF: predicated region fallthrough
CT: control target
= control target key end

     0   :  { %s2499_s12 = smov 0   ;;  %s3444_s0 = inlined_call_operand.vmem [shape: f32[1152,800], index: 0, kind: input, shape index: {}]   ;;  %s3445_s1 = inlined_call_operand.vmem [shape: bf16[800,64], index: 1, kind: input, shape index: {}]   ;;  %s3446_s2 = inlined_call_operand.vmem [shape: f32[1,64], index: 2, kind: input, shape index: {}]   ;;  %s3447_s3 = inlined_call_operand.vmem [shape: f32[1152,64], index: 3, kind: output, shape index: {}]  }
   0x1 LB: > { %s2215_s13 = sadd.s32 4294967295, %s2476_s12   ;;  %p2219_p0 = scmp.ge.s32.totalorder %s2476_s12, 1  ;;  %s2476_s12 = sphi %s2499_s12, %s13_s12  }
   0x2   : > { %p139_p1 = scmp.lt.s32.totalorder %s2476_s12, 4 }
   0x4   : > { %p140_p2 = pnand %p2219_p0, %p139_p1 }
   0x6   : > { %143 = sbr.rel (%p140_p2) target bundleno = 608 (0x260), region = 32 }
   0xb   : > { %v2419_v0 = vld [vmem:[%s3445_s1 + $0x38] sm:$0xff]   ;;  %v2478_v1 = vmov 0   ;;  %v2421_v3 = vld [vmem:[%s3445_s1 + $0x30] sm:$0xff]   ;;  %v2423_v5 = vld [vmem:[%s3445_s1 + $0x28] sm:$0xff]   ;;  %s164_s30 = smul.u32 48, %s2215_s13  ;;  %vm1089_vm0 = vcmask 261120  }
   0xc   : > { %1162 = vmatprep.subr.bf16.mxu0 %v2478_v1  ;;  %1387 = vmatprep.subr.bf16.mxu1 %v2478_v1  ;;  %v2420_v2 = vld [vmem:[%s3445_s1 + $0xb8] sm:$0xff]   ;;  %v2422_v4 = vld [vmem:[%s3445_s1 + $0xb0] sm:$0xff]   ;;  %v2424_v6 = vld [vmem:[%s3445_s1 + $0xa8] sm:$0xff]   ;;  %vm2110_vm1 = vcmask 523264  }
   0xd   : > { %1163 = vmatpush1.bf16.msra.mxu0 %v2419_v0  ;;  %1388 = vmatpush1.bf16.msra.mxu1 %v2420_v2  ;;  %v2425_v7 = vld [vmem:[%s3445_s1 + $0x20] sm:$0xff]   ;;  %v2427_v9 = vld [vmem:[%s3445_s1 + $0x18] sm:$0xff]   ;;  %p165_p3 = scmp.lt.s32.totalorder %s164_s30, 143  ;;  %v2429_v11 = vld [vmem:[%s3445_s1 + $0x10] sm:$0xff]  }
   0xe   : > { %1164 = vmatprep.subr.bf16.mxu0 %v2478_v1  ;;  %1389 = vmatprep.subr.bf16.mxu1 %v2478_v1  ;;  %v2426_v8 = vld [vmem:[%s3445_s1 + $0xa0] sm:$0xff]   ;;  %v2428_v10 = vld [vmem:[%s3445_s1 + $0x98] sm:$0xff]   ;;  %v2430_v12 = vld [vmem:[%s3445_s1 + $0x90] sm:$0xff]  }
   0xf   : > { %s3469_s30 = smov (!%p165_p3, %s164_s30), 143  ;;  %v2431_v13 = vld [vmem:[%s3445_s1 + $0x8] sm:$0xff]   ;;  %v2433_v15 = vld [vmem:[%s3445_s1] sm:$0xff]   ;;  %v2435_v17 = vld [vmem:[%s3445_s1 + $0x78] sm:$0xff]  }
  0x10   : > { %v2432_v14 = vld [vmem:[%s3445_s1 + $0x88] sm:$0xff]   ;;  %s2409_s17 = smul.u32 56, %s3469_s30  ;;  %v2434_v16 = vld [vmem:[%s3445_s1 + $0x80] sm:$0xff]   ;;  %v2436_v18 = vld [vmem:[%s3445_s1 + $0xf8] sm:$0xff]   ;;  %s2221_s23 = sshll.u32 %s3469_s30, 3 }
  0x11   : > { %1165 = vmatpush1.bf16.msra.mxu0 %v2421_v3  ;;  %1390 = vmatpush1.bf16.msra.mxu1 %v2422_v4  ;;  %v2437_v24 = vld [vmem:[%s3445_s1 + $0x70] sm:$0xff]   ;;  %v2439_v27 = vld [vmem:[%s3445_s1 + $0x68] sm:$0xff]   ;;  %v2441_v29 = vld [vmem:[%s3445_s1 + $0x60] sm:$0xff]   ;;  %s3282_s27 = scalar_lea.vmem %s3447_s3, %s2221_s23 }
  0x12   : > { %1166 = vmatprep.subr.bf16.mxu0 %v2478_v1  ;;  %1391 = vmatprep.subr.bf16.mxu1 %v2478_v1  ;;  %s2577_s24 = scalar_lea.vmem %s3444_s0, %s2409_s17  ;;  %v2438_v26 = vld [vmem:[%s3445_s1 + $0xf0] sm:$0xff]   ;;  %v2440_v28 = vld [vmem:[%s3445_s1 + $0xe8] sm:$0xff]   ;;  %v2442_v30 = vld [vmem:[%s3445_s1 + $0xe0] sm:$0xff]  }
  0x13   : > { %v179_v19 = vld [vmem:[%s2577_s24 + $0x8] sm:$0xff]  ;;  %v186_v20 = vld [vmem:[%s2577_s24 + $0x40] sm:$0xff]  ;;  %v181_v21 = vld [vmem:[%s2577_s24 + $0x18] sm:$0xff] }
  0x14   : > { %v515_v22 = vpack.c.bf16 %v186_v20, %v179_v19  ;;  %v188_v23 = vld [vmem:[%s2577_s24 + $0x50] sm:$0xff]  ;;  %v2443_v31 = vld [vmem:[%s3445_s1 + $0x58] sm:$0xff]   ;;  %v2447_v35 = vld [vmem:[%s3445_s1 + $0x48] sm:$0xff]  }
  0x15   : > { %1167 = vmatpush1.bf16.msra.mxu0 %v2423_v5  ;;  %1392 = vmatpush1.bf16.msra.mxu1 %v2424_v6  ;;  %v517_v25 = vpack.c.bf16 %v188_v23, %v181_v21  ;;  %v2444_v32 = vld [vmem:[%s3445_s1 + $0xd8] sm:$0xff]   ;;  %v2445_v33 = vld [vmem:[%s3445_s1 + $0x50] sm:$0xff]   ;;  %v2448_v36 = vld [vmem:[%s3445_s1 + $0xc8] sm:$0xff]  }
  0x16   : > { %1168 = vmatprep.subr.bf16.mxu0 %v2478_v1  ;;  %1393 = vmatprep.subr.bf16.mxu1 %v2478_v1  ;;  %v2446_v34 = vld [vmem:[%s3445_s1 + $0xd0] sm:$0xff]   ;;  %v2449_v37 = vld [vmem:[%s3445_s1 + $0x40] sm:$0xff]   ;;  %v185_v39 = vld [vmem:[%s2577_s24 + $0x38] sm:$0xff] }
  0x17   : > { %1194 = vmatprep.mubr.bf16.mxu0 %v515_v22  ;;  %1419 = vmatprep.mubr.bf16.mxu1 %v517_v25  ;;  %v178_v38 = vld [vmem:[%s2577_s24] sm:$0xff]  ;;  %v180_v41 = vld [vmem:[%s2577_s24 + $0x10] sm:$0xff]  ;;  %v187_v42 = vld [vmem:[%s2577_s24 + $0x48] sm:$0xff] }
  0x18   : > { %v2450_v40 = vld [vmem:[%s3445_s1 + $0xc0] sm:$0xff]   ;;  %v193_v43 = vld [vmem:[%s2577_s24 + $0x78] sm:$0xff]  ;;  %v200_v44 = vld [vmem:[%s2577_s24 + $0xb0] sm:$0xff]  ;;  %v514_v45 = vpack.c.bf16 %v185_v39, %v178_v38  ;;  %v516_v48 = vpack.c.bf16 %v187_v42, %v180_v41 }
  0x19   : > { %1169 = vmatpush1.bf16.msra.mxu0 %v2425_v7  ;;  %1394 = vmatpush1.bf16.msra.mxu1 %v2426_v8  ;;  %v195_v46 = vld [vmem:[%s2577_s24 + $0x88] sm:$0xff]  ;;  %v202_v47 = vld [vmem:[%s2577_s24 + $0xc0] sm:$0xff]  ;;  %v2451_v49 = vld [vmem:[%s3445_s1 + $0x138] sm:$0xff]   ;;  %v522_v50 = vpack.c.bf16 %v200_v44, %v193_v43 }
  0x1a   : > { %1170 = vmatprep.subr.bf16.mxu0 %v2478_v1  ;;  %1395 = vmatprep.subr.bf16.mxu1 %v2478_v1  ;;  %v524_v51 = vpack.c.bf16 %v202_v47, %v195_v46  ;;  %v192_v52 = vld [vmem:[%s2577_s24 + $0x70] sm:$0xff]  ;;  %v199_v53 = vld [vmem:[%s2577_s24 + $0xa8] sm:$0xff]  ;;  %v194_v54 = vld [vmem:[%s2577_s24 + $0x80] sm:$0xff] }
  0x1b   : > { %v201_v55 = vld [vmem:[%s2577_s24 + $0xb8] sm:$0xff]  ;;  %v2452_v56 = vld [vmem:[%s3445_s1 + $0x130] sm:$0xff]   ;;  %v207_v57 = vld [vmem:[%s2577_s24 + $0xe8] sm:$0xff]  ;;  %v521_v61 = vpack.c.bf16 %v199_v53, %v192_v52 }
  0x1c   : > { %v214_v58 = vld [vmem:[%s2577_s24 + $0x120] sm:$0xff]  ;;  %v209_v59 = vld [vmem:[%s2577_s24 + $0xf8] sm:$0xff]  ;;  %v216_v60 = vld [vmem:[%s2577_s24 + $0x130] sm:$0xff]  ;;  %v523_v62 = vpack.c.bf16 %v201_v55, %v194_v54 }
  0x1d   : > { %1171 = vmatpush1.bf16.msra.mxu0 %v2427_v9  ;;  %1396 = vmatpush1.bf16.msra.mxu1 %v2428_v10  ;;  %v529_v63 = vpack.c.bf16 %v214_v58, %v207_v57  ;;  %v531_v0 = vpack.c.bf16 %v216_v60, %v209_v59  ;;  %v2453_v2 = vld [vmem:[%s3445_s1 + $0x128] sm:$0xff]   ;;  %v206_v3 = vld [vmem:[%s2577_s24 + $0xe0] sm:$0xff]  ;;  %v213_v4 = vld [vmem:[%s2577_s24 + $0x118] sm:$0xff] }
  0x1e   : > { %1172 = vmatprep.subr.bf16.mxu0 %v2478_v1  ;;  %1397 = vmatprep.subr.bf16.mxu1 %v2478_v1  ;;  %v208_v5 = vld [vmem:[%s2577_s24 + $0xf0] sm:$0xff]  ;;  %v215_v6 = vld [vmem:[%s2577_s24 + $0x128] sm:$0xff]  ;;  %v221_v7 = vld [vmem:[%s2577_s24 + $0x158] sm:$0xff] }
  0x1f   : > { %v228_v8 = vld [vmem:[%s2577_s24 + $0x190] sm:$0xff]  ;;  %v2454_v9 = vld [vmem:[%s3445_s1 + $0x120] sm:$0xff]   ;;  %v223_v10 = vld [vmem:[%s2577_s24 + $0x168] sm:$0xff] }
  0x20   : > { %v222_v19 = vld [vmem:[%s2577_s24 + $0x160] sm:$0xff]  ;;  %v229_v20 = vld [vmem:[%s2577_s24 + $0x198] sm:$0xff]  ;;  %v235_v21 = vld [vmem:[%s2577_s24 + $0x1c8] sm:$0xff] }
  0x21   : > { %1173 = vmatpush1.bf16.msra.mxu0 %v2429_v11  ;;  %1398 = vmatpush1.bf16.msra.mxu1 %v2430_v12  ;;  %v230_v11 = vld [vmem:[%s2577_s24 + $0x1a0] sm:$0xff]  ;;  %v528_v12 = vpack.c.bf16 %v213_v4, %v206_v3  ;;  %v2456_v23 = vld [vmem:[%s3445_s1 + $0x110] sm:$0xff]   ;;  %v251_v38 = vld [vmem:[%s2577_s24 + $0x248] sm:$0xff] }
  0x22   : > { %1174 = vmatprep.subr.bf16.mxu0 %v2478_v1  ;;  %1399 = vmatprep.subr.bf16.mxu1 %v2478_v1  ;;  %v242_v22 = vld [vmem:[%s2577_s24 + $0x200] sm:$0xff]  ;;  %v244_v25 = vld [vmem:[%s2577_s24 + $0x210] sm:$0xff]  ;;  %v2459_v44 = vld [vmem:[%s3445_s1 + $0x178] sm:$0xff]  }
  0x23   : > { %v258_v39 = vld [vmem:[%s2577_s24 + $0x280] sm:$0xff]  ;;  %v255_v46 = vld [vmem:[%s2577_s24 + $0x268] sm:$0xff]  ;;  %v265_v52 = vld [vmem:[%s2577_s24 + $0x2b8] sm:$0xff] }
  0x24   : > { %v552_v43 = vpack.c.bf16 %v258_v39, %v251_v38  ;;  %v250_v47 = vld [vmem:[%s2577_s24 + $0x240] sm:$0xff]  ;;  %v272_v53 = vld [vmem:[%s2577_s24 + $0x2f0] sm:$0xff]  ;;  %v2461_v58 = vld [vmem:[%s3445_s1 + $0x168] sm:$0xff]  }
  0x25   : > { %1175 = vmatpush1.bf16.msra.mxu0 %v2431_v13  ;;  %1400 = vmatpush1.bf16.msra.mxu1 %v2432_v14  ;;  %v530_v13 = vpack.c.bf16 %v215_v6, %v208_v5  ;;  %v536_v14 = vpack.c.bf16 %v228_v8, %v221_v7  ;;  %v559_v57 = vpack.c.bf16 %v272_v53, %v265_v52  ;;  %v262_v59 = vld [vmem:[%s2577_s24 + $0x2a0] sm:$0xff]  ;;  %v269_v60 = vld [vmem:[%s2577_s24 + $0x2d8] sm:$0xff]  ;;  %v311_v38 = vld [vmem:[%s2577_s24 + $0x428] sm:$0xff] }
  0x26   : > { %1176 = vmatprep.subr.bf16.mxu0 %v2478_v1  ;;  %1401 = vmatprep.subr.bf16.mxu1 %v2478_v1  ;;  %v2462_v3 = vld [vmem:[%s3445_s1 + $0x160] sm:$0xff]   ;;  %v556_v5 = vpack.c.bf16 %v269_v60, %v262_v59  ;;  %v327_v52 = vld [vmem:[%s2577_s24 + $0x4a8] sm:$0xff]  ;;  %v333_v53 = vld [vmem:[%s2577_s24 + $0x4d8] sm:$0xff] }
  0x27   : > { %v286_v4 = vld [vmem:[%s2577_s24 + $0x360] sm:$0xff] }
  0x28   : > { %v306_v39 = vld [vmem:[%s2577_s24 + $0x400] sm:$0xff] }
  0x29   : > { %1177 = vmatpush1.bf16.msra.mxu0 %v2433_v15  ;;  %1402 = vmatpush1.bf16.msra.mxu1 %v2434_v16  ;;  %v538_v15 = vpack.c.bf16 %v230_v11, %v223_v10  ;;  %v2455_v16 = vld [vmem:[%s3445_s1 + $0x118] sm:$0xff]   ;;  %v276_v10 = vld [vmem:[%s2577_s24 + $0x310] sm:$0xff]  ;;  %v283_v11 = vld [vmem:[%s2577_s24 + $0x348] sm:$0xff] }
  0x2a   : > { %1178 = vmatprep.subr.bf16.mxu0 %v2478_v1  ;;  %1403 = vmatprep.subr.bf16.mxu1 %v2478_v1 }
  0x2d   : > { %1179 = vmatpush2.bf16.msra.mxu0 %v2435_v17  ;;  %1404 = vmatpush2.bf16.msra.mxu1 %v2436_v18  ;;  %v220_v17 = vld [vmem:[%s2577_s24 + $0x150] sm:$0xff]  ;;  %v227_v18 = vld [vmem:[%s2577_s24 + $0x188] sm:$0xff] }
  0x2e   : > { %1180 = vmatprep.subr.bf16.mxu0 %v2478_v1  ;;  %1405 = vmatprep.subr.bf16.mxu1 %v2478_v1 }
  0x31   : > { %1181 = vmatpush2.bf16.msra.mxu0 %v2437_v24  ;;  %1406 = vmatpush2.bf16.msra.mxu1 %v2438_v26  ;;  %v237_v24 = vld [vmem:[%s2577_s24 + $0x1d8] sm:$0xff]  ;;  %v535_v26 = vpack.c.bf16 %v227_v18, %v220_v17  ;;  %v300_v18 = vld [vmem:[%s2577_s24 + $0x3d0] sm:$0xff] }
  0x32   : > { %1182 = vmatprep.subr.bf16.mxu0 %v2478_v1  ;;  %1407 = vmatprep.subr.bf16.mxu1 %v2478_v1  ;;  %v293_v17 = vld [vmem:[%s2577_s24 + $0x398] sm:$0xff] }
  0x35   : > { %1183 = vmatpush2.bf16.msra.mxu0 %v2439_v27  ;;  %1408 = vmatpush2.bf16.msra.mxu1 %v2440_v28  ;;  %v537_v27 = vpack.c.bf16 %v229_v20, %v222_v19  ;;  %v543_v28 = vpack.c.bf16 %v242_v22, %v235_v21  ;;  %v563_v19 = vpack.c.bf16 %v283_v11, %v276_v10  ;;  %v346_v10 = vld [vmem:[%s2577_s24 + $0x540] sm:$0xff]  ;;  %v353_v11 = vld [vmem:[%s2577_s24 + $0x578] sm:$0xff] }
  0x36   : > { %1184 = vmatprep.subr.bf16.mxu0 %v2478_v1  ;;  %1409 = vmatprep.subr.bf16.mxu1 %v2478_v1  ;;  %v573_v22 = vpack.c.bf16 %v300_v18, %v293_v17  ;;  %v370_v17 = vld [vmem:[%s2577_s24 + $0x600] sm:$0xff]  ;;  %v598_v18 = vpack.c.bf16 %v353_v11, %v346_v10  ;;  %v425_v10 = vld [vmem:[%s2577_s24 + $0x7b8] sm:$0xff]  ;;  %v431_v11 = vld [vmem:[%s2577_s24 + $0x7e8] sm:$0xff] }
  0x39   : > { %1185 = vmatpush2.bf16.msra.mxu0 %v2441_v29  ;;  %1410 = vmatpush2.bf16.msra.mxu1 %v2442_v30  ;;  %v545_v29 = vpack.c.bf16 %v244_v25, %v237_v24  ;;  %v2457_v30 = vld [vmem:[%s3445_s1 + $0x108] sm:$0xff]   ;;  %v290_v24 = vld [vmem:[%s2577_s24 + $0x380] sm:$0xff]  ;;  %v297_v25 = vld [vmem:[%s2577_s24 + $0x3b8] sm:$0xff] }
  0x3a   : > { %1186 = vmatprep.subr.bf16.mxu0 %v2478_v1  ;;  %1411 = vmatprep.subr.bf16.mxu1 %v2478_v1 }
  0x3d   : > { %1187 = vmatpush2.bf16.msra.mxu0 %v2443_v31  ;;  %1412 = vmatpush2.bf16.msra.mxu1 %v2444_v32  ;;  %v234_v31 = vld [vmem:[%s2577_s24 + $0x1c0] sm:$0xff]  ;;  %v241_v32 = vld [vmem:[%s2577_s24 + $0x1f8] sm:$0xff] }
  0x3e   : > { %1188 = vmatprep.subr.bf16.mxu0 %v2478_v1  ;;  %1413 = vmatprep.subr.bf16.mxu1 %v2478_v1 }
  0x41   : > { %1189 = vmatpush2.bf16.msra.mxu0 %v2445_v33  ;;  %1414 = vmatpush2.bf16.msra.mxu1 %v2446_v34  ;;  %v236_v33 = vld [vmem:[%s2577_s24 + $0x1d0] sm:$0xff]  ;;  %v243_v34 = vld [vmem:[%s2577_s24 + $0x208] sm:$0xff] }
  0x42   : > { %1190 = vmatprep.subr.bf16.mxu0 %v2478_v1  ;;  %1415 = vmatprep.subr.bf16.mxu1 %v2478_v1  ;;  %v544_v41 = vpack.c.bf16 %v243_v34, %v236_v33  ;;  %v570_v33 = vpack.c.bf16 %v297_v25, %v290_v24  ;;  %v362_v24 = vld [vmem:[%s2577_s24 + $0x5c0] sm:$0xff]  ;;  %v369_v25 = vld [vmem:[%s2577_s24 + $0x5f8] sm:$0xff] }
  0x45   : > { %1191 = vmatpush2.bf16.msra.mxu0 %v2447_v35  ;;  %1416 = vmatpush2.bf16.msra.mxu1 %v2448_v36  ;;  %v249_v35 = vld [vmem:[%s2577_s24 + $0x238] sm:$0xff]  ;;  %v256_v36 = vld [vmem:[%s2577_s24 + $0x270] sm:$0xff] }
  0x46   : > { %1192 = vmatprep.subr.bf16.mxu0 %v2478_v1  ;;  %1417 = vmatprep.subr.bf16.mxu1 %v2478_v1  ;;  %v550_v42 = vpack.c.bf16 %v256_v36, %v249_v35 }
  0x49   : > { %1193 = vmatpush2.bf16.msra.mxu0 %v2449_v37  ;;  %1418 = vmatpush2.bf16.msra.mxu1 %v2450_v40  ;;  %v2458_v37 = vld [vmem:[%s3445_s1 + $0x100] sm:$0xff]   ;;  %v542_v40 = vpack.c.bf16 %v241_v32, %v234_v31  ;;  %v307_v31 = vld [vmem:[%s2577_s24 + $0x408] sm:$0xff] }
  0x4a   : > { %1612 = vmatprep.subr.bf16.mxu0 %v2478_v1  ;;  %2377 = vmatprep.subr.bf16.mxu1 %v2478_v1  ;;  %v314_v32 = vld [vmem:[%s2577_s24 + $0x440] sm:$0xff] }
  0x4b   : > { %v580_v36 = vpack.c.bf16 %v314_v32, %v307_v31  ;;  %v607_v31 = vpack.c.bf16 %v369_v25, %v362_v24  ;;  %v452_v24 = vld [vmem:[%s2577_s24 + $0x890] sm:$0xff]  ;;  %v447_v25 = vld [vmem:[%s2577_s24 + $0x868] sm:$0xff] }
  0x4c   : > { %1195 = vmatmul.mubr.bf16.vlgmr.msra.gmra.mxu0 %v514_v45  ;;  %1420 = vmatmul.mubr.bf16.vlgmr.msra.gmra.mxu1 %v516_v48  ;;  %v248_v45 = vld [vmem:[%s2577_s24 + $0x230] sm:$0xff]  ;;  %v257_v48 = vld [vmem:[%s2577_s24 + $0x278] sm:$0xff] }
  0x4d   : > { %1613 = vmatpush1.bf16.msra.mxu0 %v2451_v49  ;;  %2393 = vmatpush1.bf16.msra.mxu1 %v2451_v49  ;;  %v263_v49 = vld [vmem:[%s2577_s24 + $0x2a8] sm:$0xff]  ;;  %v549_v54 = vpack.c.bf16 %v255_v46, %v248_v45  ;;  %v551_v55 = vpack.c.bf16 %v257_v48, %v250_v47 }
  0x4e   : > { %1202 = vmatprep.mubr.bf16.mxu0 %v522_v50  ;;  %1427 = vmatprep.mubr.bf16.mxu1 %v524_v51  ;;  %v270_v50 = vld [vmem:[%s2577_s24 + $0x2e0] sm:$0xff]  ;;  %v2460_v51 = vld [vmem:[%s3445_s1 + $0x170] sm:$0xff]  }
  0x4f   : > { %1614 = vmatprep.subr.bf16.mxu0 %v2478_v1  ;;  %2378 = vmatprep.subr.bf16.mxu1 %v2478_v1 }
  0x51   : > { %1615 = vmatpush1.bf16.msra.mxu0 %v2452_v56  ;;  %2394 = vmatpush1.bf16.msra.mxu1 %v2452_v56  ;;  %v557_v56 = vpack.c.bf16 %v270_v50, %v263_v49  ;;  %v318_v49 = vld [vmem:[%s2577_s24 + $0x460] sm:$0xff]  ;;  %v325_v50 = vld [vmem:[%s2577_s24 + $0x498] sm:$0xff] }
  0x52   : > { %1616 = vmatprep.subr.bf16.mxu0 %v2478_v1  ;;  %2379 = vmatprep.subr.bf16.mxu1 %v2478_v1 }
  0x54   : > { %1203 = vmatmul.mubr.bf16.gmra.mxu0 %v521_v61  ;;  %1428 = vmatmul.mubr.bf16.gmra.mxu1 %v523_v62  ;;  %v264_v61 = vld [vmem:[%s2577_s24 + $0x2b0] sm:$0xff]  ;;  %v271_v62 = vld [vmem:[%s2577_s24 + $0x2e8] sm:$0xff] }
  0x55   : > { %1210 = vmatprep.mubr.bf16.mxu0 %v529_v63  ;;  %1435 = vmatprep.mubr.bf16.mxu1 %v531_v0  ;;  %v277_v63 = vld [vmem:[%s2577_s24 + $0x318] sm:$0xff]  ;;  %v284_v0 = vld [vmem:[%s2577_s24 + $0x350] sm:$0xff]  ;;  %v558_v6 = vpack.c.bf16 %v271_v62, %v264_v61  ;;  %v339_v62 = vld [vmem:[%s2577_s24 + $0x508] sm:$0xff] }
  0x56   : > { %1617 = vmatpush1.bf16.msra.mxu0 %v2453_v2  ;;  %2395 = vmatpush1.bf16.msra.mxu1 %v2453_v2  ;;  %v279_v2 = vld [vmem:[%s2577_s24 + $0x328] sm:$0xff]  ;;  %v564_v7 = vpack.c.bf16 %v284_v0, %v277_v63  ;;  %v332_v61 = vld [vmem:[%s2577_s24 + $0x4d0] sm:$0xff]  ;;  %v334_v63 = vld [vmem:[%s2577_s24 + $0x4e0] sm:$0xff] }
  0x57   : > { %1618 = vmatprep.subr.bf16.mxu0 %v2478_v1  ;;  %2380 = vmatprep.subr.bf16.mxu1 %v2478_v1  ;;  %v566_v8 = vpack.c.bf16 %v286_v4, %v279_v2  ;;  %v341_v0 = vld [vmem:[%s2577_s24 + $0x518] sm:$0xff]  ;;  %v347_v2 = vld [vmem:[%s2577_s24 + $0x548] sm:$0xff] }
  0x58   : > { %v349_v4 = vld [vmem:[%s2577_s24 + $0x558] sm:$0xff] }
  0x5a   : > { %1619 = vmatpush1.bf16.msra.mxu0 %v2454_v9  ;;  %2396 = vmatpush1.bf16.msra.mxu1 %v2454_v9  ;;  %v2463_v9 = vld [vmem:[%s3445_s1 + $0x158] sm:$0xff]  }
  0x5b   : > { %1620 = vmatprep.subr.bf16.mxu0 %v2478_v1  ;;  %2381 = vmatprep.subr.bf16.mxu1 %v2478_v1 }
  0x5c   : > { %1211 = vmatmul.mubr.bf16.gmra.mxu0 %v528_v12  ;;  %1436 = vmatmul.mubr.bf16.gmra.mxu1 %v530_v13  ;;  %v278_v12 = vld [vmem:[%s2577_s24 + $0x320] sm:$0xff]  ;;  %v285_v13 = vld [vmem:[%s2577_s24 + $0x358] sm:$0xff] }
  0x5d   : > { %1218 = vmatprep.mubr.bf16.mxu0 %v536_v14  ;;  %1443 = vmatprep.mubr.bf16.mxu1 %v538_v15  ;;  %v291_v14 = vld [vmem:[%s2577_s24 + $0x388] sm:$0xff]  ;;  %v298_v15 = vld [vmem:[%s2577_s24 + $0x3c0] sm:$0xff]  ;;  %v565_v20 = vpack.c.bf16 %v285_v13, %v278_v12  ;;  %v348_v12 = vld [vmem:[%s2577_s24 + $0x550] sm:$0xff] }
  0x5e   : > { %1621 = vmatpush1.bf16.msra.mxu0 %v2455_v16  ;;  %2397 = vmatpush1.bf16.msra.mxu1 %v2455_v16  ;;  %v2464_v16 = vld [vmem:[%s3445_s1 + $0x150] sm:$0xff]   ;;  %v571_v21 = vpack.c.bf16 %v298_v15, %v291_v14  ;;  %v355_v13 = vld [vmem:[%s2577_s24 + $0x588] sm:$0xff]  ;;  %v361_v14 = vld [vmem:[%s2577_s24 + $0x5b8] sm:$0xff] }
  0x5f   : > { %1622 = vmatprep.subr.bf16.mxu0 %v2478_v1  ;;  %2382 = vmatprep.subr.bf16.mxu1 %v2478_v1  ;;  %v368_v15 = vld [vmem:[%s2577_s24 + $0x5f0] sm:$0xff] }
  0x62   : > { %1623 = vmatpush1.bf16.msra.mxu0 %v2456_v23  ;;  %2398 = vmatpush1.bf16.msra.mxu1 %v2456_v23  ;;  %v2465_v23 = vld [vmem:[%s3445_s1 + $0x148] sm:$0xff]  }
  0x63   : > { %1624 = vmatprep.subr.bf16.mxu0 %v2478_v1  ;;  %2383 = vmatprep.subr.bf16.mxu1 %v2478_v1 }
  0x64   : > { %1219 = vmatmul.mubr.bf16.gmra.mxu0 %v535_v26  ;;  %1444 = vmatmul.mubr.bf16.gmra.mxu1 %v537_v27  ;;  %v292_v26 = vld [vmem:[%s2577_s24 + $0x390] sm:$0xff]  ;;  %v299_v27 = vld [vmem:[%s2577_s24 + $0x3c8] sm:$0xff] }
  0x65   : > { %1226 = vmatprep.mubr.bf16.mxu0 %v543_v28  ;;  %1451 = vmatprep.mubr.bf16.mxu1 %v545_v29  ;;  %v305_v28 = vld [vmem:[%s2577_s24 + $0x3f8] sm:$0xff]  ;;  %v312_v29 = vld [vmem:[%s2577_s24 + $0x430] sm:$0xff]  ;;  %v572_v34 = vpack.c.bf16 %v299_v27, %v292_v26  ;;  %v375_v26 = vld [vmem:[%s2577_s24 + $0x628] sm:$0xff] }
  0x66   : > { %1625 = vmatpush1.bf16.msra.mxu0 %v2457_v30  ;;  %2399 = vmatpush1.bf16.msra.mxu1 %v2457_v30  ;;  %v2466_v30 = vld [vmem:[%s3445_s1 + $0x140] sm:$0xff]   ;;  %v578_v35 = vpack.c.bf16 %v312_v29, %v305_v28  ;;  %v377_v28 = vld [vmem:[%s2577_s24 + $0x638] sm:$0xff]  ;;  %v384_v29 = vld [vmem:[%s2577_s24 + $0x670] sm:$0xff] }
  0x67   : > { %1626 = vmatprep.subr.bf16.mxu0 %v2478_v1  ;;  %2384 = vmatprep.subr.bf16.mxu1 %v2478_v1  ;;  %v382_v27 = vld [vmem:[%s2577_s24 + $0x660] sm:$0xff] }
  0x68   : > { %v613_v32 = vpack.c.bf16 %v382_v27, %v375_v26  ;;  %v454_v26 = vld [vmem:[%s2577_s24 + $0x8a0] sm:$0xff] }
  0x6a   : > { %1627 = vmatpush1.bf16.msra.mxu0 %v2458_v37  ;;  %2400 = vmatpush1.bf16.msra.mxu1 %v2458_v37  ;;  %v304_v37 = vld [vmem:[%s2577_s24 + $0x3f0] sm:$0xff] }
  0x6b   : > { %1628 = vmatprep.subr.bf16.mxu0 %v2478_v1  ;;  %2385 = vmatprep.subr.bf16.mxu1 %v2478_v1  ;;  %v577_v45 = vpack.c.bf16 %v311_v38, %v304_v37  ;;  %v383_v37 = vld [vmem:[%s2577_s24 + $0x668] sm:$0xff]  ;;  %v389_v38 = vld [vmem:[%s2577_s24 + $0x698] sm:$0xff] }
  0x6c   : > { %1227 = vmatmul.mubr.bf16.gmra.mxu0 %v542_v40  ;;  %1452 = vmatmul.mubr.bf16.gmra.mxu1 %v544_v41  ;;  %v313_v40 = vld [vmem:[%s2577_s24 + $0x438] sm:$0xff]  ;;  %v319_v41 = vld [vmem:[%s2577_s24 + $0x468] sm:$0xff] }
  0x6d   : > { %1234 = vmatprep.mubr.bf16.mxu0 %v550_v42  ;;  %1459 = vmatprep.mubr.bf16.mxu1 %v552_v43  ;;  %v321_v42 = vld [vmem:[%s2577_s24 + $0x478] sm:$0xff]  ;;  %v328_v43 = vld [vmem:[%s2577_s24 + $0x4b0] sm:$0xff]  ;;  %v579_v46 = vpack.c.bf16 %v313_v40, %v306_v39  ;;  %v391_v40 = vld [vmem:[%s2577_s24 + $0x6a8] sm:$0xff] }
  0x6e   : > { %1629 = vmatpush2.bf16.msra.mxu0 %v2459_v44  ;;  %2401 = vmatpush2.bf16.msra.mxu1 %v2459_v44  ;;  %v2810_v44 = vld [vmem:[%s3445_s1 + $0x188] sm:$0xff]   ;;  %v587_v48 = vpack.c.bf16 %v328_v43, %v321_v42  ;;  %v396_v39 = vld [vmem:[%s2577_s24 + $0x6d0] sm:$0xff] }
  0x6f   : > { %1630 = vmatprep.subr.bf16.mxu0 %v2478_v1  ;;  %2386 = vmatprep.subr.bf16.mxu1 %v2478_v1  ;;  %v620_v43 = vpack.c.bf16 %v396_v39, %v389_v38  ;;  %v468_v38 = vld [vmem:[%s2577_s24 + $0x910] sm:$0xff] }
  0x72   : > { %1631 = vmatpush2.bf16.msra.mxu0 %v2460_v51  ;;  %2402 = vmatpush2.bf16.msra.mxu1 %v2460_v51  ;;  %v320_v51 = vld [vmem:[%s2577_s24 + $0x470] sm:$0xff] }
  0x73   : > { %1632 = vmatprep.subr.bf16.mxu0 %v2478_v1  ;;  %2387 = vmatprep.subr.bf16.mxu1 %v2478_v1 }
  0x74   : > { %1235 = vmatmul.mubr.bf16.gmra.mxu0 %v549_v54  ;;  %1460 = vmatmul.mubr.bf16.gmra.mxu1 %v551_v55  ;;  %v340_v54 = vld [vmem:[%s2577_s24 + $0x510] sm:$0xff]  ;;  %v335_v55 = vld [vmem:[%s2577_s24 + $0x4e8] sm:$0xff] }
  0x75   : > { %1242 = vmatprep.mubr.bf16.mxu0 %v557_v56  ;;  %1467 = vmatprep.mubr.bf16.mxu1 %v559_v57  ;;  %v342_v56 = vld [vmem:[%s2577_s24 + $0x520] sm:$0xff]  ;;  %v584_v57 = vpack.c.bf16 %v325_v50, %v318_v49  ;;  %v592_v59 = vpack.c.bf16 %v340_v54, %v333_v53  ;;  %v397_v49 = vld [vmem:[%s2577_s24 + $0x6d8] sm:$0xff]  ;;  %v403_v50 = vld [vmem:[%s2577_s24 + $0x708] sm:$0xff] }
  0x76   : > { %1633 = vmatpush2.bf16.msra.mxu0 %v2461_v58  ;;  %2403 = vmatpush2.bf16.msra.mxu1 %v2461_v58  ;;  %v586_v58 = vpack.c.bf16 %v327_v52, %v320_v51  ;;  %v594_v60 = vpack.c.bf16 %v342_v56, %v335_v55  ;;  %v410_v51 = vld [vmem:[%s2577_s24 + $0x740] sm:$0xff]  ;;  %v405_v52 = vld [vmem:[%s2577_s24 + $0x718] sm:$0xff]  ;;  %v412_v53 = vld [vmem:[%s2577_s24 + $0x750] sm:$0xff] }
  0x77   : > { %1634 = vmatprep.subr.bf16.mxu0 %v2478_v1  ;;  %2388 = vmatprep.subr.bf16.mxu1 %v2478_v1  ;;  %v627_v56 = vpack.c.bf16 %v410_v51, %v403_v50  ;;  %v482_v50 = vld [vmem:[%s2577_s24 + $0x980] sm:$0xff] }
  0x7a   : > { %1635 = vmatpush2.bf16.msra.mxu0 %v2462_v3  ;;  %2404 = vmatpush2.bf16.msra.mxu1 %v2462_v3  ;;  %v354_v3 = vld [vmem:[%s2577_s24 + $0x580] sm:$0xff] }
  0x7b   : > { %1636 = vmatprep.subr.bf16.mxu0 %v2478_v1  ;;  %2389 = vmatprep.subr.bf16.mxu1 %v2478_v1 }
  0x7c   : > { %1243 = vmatmul.mubr.bf16.gmra.mxu0 %v556_v5  ;;  %1468 = vmatmul.mubr.bf16.gmra.mxu1 %v558_v6  ;;  %v356_v5 = vld [vmem:[%s2577_s24 + $0x590] sm:$0xff]  ;;  %v591_v6 = vpack.c.bf16 %v339_v62, %v332_v61  ;;  %v411_v61 = vld [vmem:[%s2577_s24 + $0x748] sm:$0xff]  ;;  %v417_v62 = vld [vmem:[%s2577_s24 + $0x778] sm:$0xff] }
  0x7d   : > { %1250 = vmatprep.mubr.bf16.mxu0 %v564_v7  ;;  %1475 = vmatprep.mubr.bf16.mxu1 %v566_v8  ;;  %v593_v7 = vpack.c.bf16 %v341_v0, %v334_v63  ;;  %v599_v8 = vpack.c.bf16 %v354_v3, %v347_v2  ;;  %v424_v63 = vld [vmem:[%s2577_s24 + $0x7b0] sm:$0xff]  ;;  %v419_v0 = vld [vmem:[%s2577_s24 + $0x788] sm:$0xff]  ;;  %v426_v2 = vld [vmem:[%s2577_s24 + $0x7c0] sm:$0xff] }
  0x7e   : > { %1637 = vmatpush2.bf16.msra.mxu0 %v2463_v9  ;;  %2405 = vmatpush2.bf16.msra.mxu1 %v2463_v9  ;;  %v601_v9 = vpack.c.bf16 %v356_v5, %v349_v4  ;;  %v634_v5 = vpack.c.bf16 %v424_v63, %v417_v62  ;;  %v496_v62 = vld [vmem:[%s2577_s24 + $0x9f0] sm:$0xff] }
  0x7f   : > { %1638 = vmatprep.subr.bf16.mxu0 %v2478_v1  ;;  %2390 = vmatprep.subr.bf16.mxu1 %v2478_v1 }
  0x82   : > { %1639 = vmatpush2.bf16.msra.mxu0 %v2464_v16  ;;  %2406 = vmatpush2.bf16.msra.mxu1 %v2464_v16  ;;  %v363_v16 = vld [vmem:[%s2577_s24 + $0x5c8] sm:$0xff] }
  0x83   : > { %1640 = vmatprep.subr.bf16.mxu0 %v2478_v1  ;;  %2391 = vmatprep.subr.bf16.mxu1 %v2478_v1 }
  0x84   : > { %1251 = vmatmul.mubr.bf16.gmra.mxu0 %v563_v19  ;;  %1476 = vmatmul.mubr.bf16.gmra.mxu1 %v565_v20  ;;  %v600_v19 = vpack.c.bf16 %v355_v13, %v348_v12  ;;  %v606_v20 = vpack.c.bf16 %v368_v15, %v361_v14  ;;  %v438_v12 = vld [vmem:[%s2577_s24 + $0x820] sm:$0xff]  ;;  %v433_v13 = vld [vmem:[%s2577_s24 + $0x7f8] sm:$0xff]  ;;  %v440_v14 = vld [vmem:[%s2577_s24 + $0x830] sm:$0xff] }
  0x85   : > { %1258 = vmatprep.mubr.bf16.mxu0 %v571_v21  ;;  %1483 = vmatprep.mubr.bf16.mxu1 %v573_v22  ;;  %v608_v21 = vpack.c.bf16 %v370_v17, %v363_v16  ;;  %v360_v22 = vld [vmem:[%s2577_s24 + $0x5b0] sm:$0xff]  ;;  %v641_v17 = vpack.c.bf16 %v438_v12, %v431_v11  ;;  %v510_v11 = vld [vmem:[%s2577_s24 + $0xa60] sm:$0xff] }
  0x86   : > { %1641 = vmatpush2.bf16.msra.mxu0 %v2465_v23  ;;  %2407 = vmatpush2.bf16.msra.mxu1 %v2465_v23  ;;  %v367_v23 = vld [vmem:[%s2577_s24 + $0x5e8] sm:$0xff] }
  0x87   : > { %1642 = vmatprep.subr.bf16.mxu0 %v2478_v1  ;;  %2392 = vmatprep.subr.bf16.mxu1 %v2478_v1  ;;  %v326_v1 = vld [vmem:[%s2577_s24 + $0x4a0] sm:$0xff] }
  0x88   : > { %v585_v47 = vpack.c.bf16 %v326_v1, %v319_v41  ;;  %v398_v41 = vld [vmem:[%s2577_s24 + $0x6e0] sm:$0xff] }
  0x8a   : > { %1643 = vmatpush2.bf16.msra.mxu0 %v2466_v30  ;;  %2408 = vmatpush2.bf16.msra.mxu1 %v2466_v30  ;;  %v605_v30 = vpack.c.bf16 %v367_v23, %v360_v22  ;;  %v439_v22 = vld [vmem:[%s2577_s24 + $0x828] sm:$0xff]  ;;  %v445_v23 = vld [vmem:[%s2577_s24 + $0x858] sm:$0xff] }
  0x8b   : > { %2325 = vmatprep.subr.bf16.mxu1 %v2810_v44 }
  0x8c   : > { %1259 = vmatmul.mubr.bf16.gmra.mxu0 %v570_v33  ;;  %1484 = vmatmul.mubr.bf16.gmra.mxu1 %v572_v34  ;;  %v615_v33 = vpack.c.bf16 %v384_v29, %v377_v28  ;;  %v374_v34 = vld [vmem:[%s2577_s24 + $0x620] sm:$0xff]  ;;  %v648_v29 = vpack.c.bf16 %v452_v24, %v445_v23 }
  0x8d   : > { %1266 = vmatprep.mubr.bf16.mxu0 %v578_v35  ;;  %1491 = vmatprep.mubr.bf16.mxu1 %v580_v36  ;;  %v381_v35 = vld [vmem:[%s2577_s24 + $0x658] sm:$0xff]  ;;  %v376_v36 = vld [vmem:[%s2577_s24 + $0x630] sm:$0xff]  ;;  %v442_v23 = vld [vmem:[%s2577_s24 + $0x840] sm:$0xff] }
  0x8e   : > { %v612_v1 = vpack.c.bf16 %v381_v35, %v374_v34  ;;  %v614_v42 = vpack.c.bf16 %v383_v37, %v376_v36  ;;  %v453_v34 = vld [vmem:[%s2577_s24 + $0x898] sm:$0xff]  ;;  %v459_v35 = vld [vmem:[%s2577_s24 + $0x8c8] sm:$0xff]  ;;  %v466_v36 = vld [vmem:[%s2577_s24 + $0x900] sm:$0xff] }
  0x8f   : > { %v461_v37 = vld [vmem:[%s2577_s24 + $0x8d8] sm:$0xff] }
  0x94   : > { %1267 = vmatmul.mubr.bf16.gmra.mxu0 %v577_v45  ;;  %1492 = vmatmul.mubr.bf16.gmra.mxu1 %v579_v46  ;;  %v622_v45 = vpack.c.bf16 %v398_v41, %v391_v40  ;;  %v388_v46 = vld [vmem:[%s2577_s24 + $0x690] sm:$0xff]  ;;  %v655_v41 = vpack.c.bf16 %v466_v36, %v459_v35 }
  0x95   : > { %1274 = vmatprep.mubr.bf16.mxu0 %v585_v47  ;;  %1499 = vmatprep.mubr.bf16.mxu1 %v587_v48  ;;  %v395_v47 = vld [vmem:[%s2577_s24 + $0x6c8] sm:$0xff]  ;;  %v390_v48 = vld [vmem:[%s2577_s24 + $0x6a0] sm:$0xff]  ;;  %v456_v35 = vld [vmem:[%s2577_s24 + $0x8b0] sm:$0xff] }
  0x96   : > { %v619_v54 = vpack.c.bf16 %v395_v47, %v388_v46  ;;  %v621_v55 = vpack.c.bf16 %v397_v49, %v390_v48  ;;  %v467_v46 = vld [vmem:[%s2577_s24 + $0x908] sm:$0xff]  ;;  %v473_v47 = vld [vmem:[%s2577_s24 + $0x938] sm:$0xff]  ;;  %v480_v48 = vld [vmem:[%s2577_s24 + $0x970] sm:$0xff] }
  0x97   : > { %v475_v49 = vld [vmem:[%s2577_s24 + $0x948] sm:$0xff] }
  0x9c   : > { %1275 = vmatmul.mubr.bf16.gmra.mxu0 %v584_v57  ;;  %1500 = vmatmul.mubr.bf16.gmra.mxu1 %v586_v58  ;;  %v629_v57 = vpack.c.bf16 %v412_v53, %v405_v52  ;;  %v402_v58 = vld [vmem:[%s2577_s24 + $0x700] sm:$0xff]  ;;  %v662_v53 = vpack.c.bf16 %v480_v48, %v473_v47  ;;  %v448_v47 = vld [vmem:[%s2577_s24 + $0x870] sm:$0xff] }
  0x9d   : > { %1282 = vmatprep.mubr.bf16.mxu0 %v592_v59  ;;  %1507 = vmatprep.mubr.bf16.mxu1 %v594_v60  ;;  %v409_v59 = vld [vmem:[%s2577_s24 + $0x738] sm:$0xff]  ;;  %v404_v60 = vld [vmem:[%s2577_s24 + $0x710] sm:$0xff] }
  0x9e   : > { %v626_v3 = vpack.c.bf16 %v409_v59, %v402_v58  ;;  %v628_v4 = vpack.c.bf16 %v411_v61, %v404_v60  ;;  %v481_v58 = vld [vmem:[%s2577_s24 + $0x978] sm:$0xff]  ;;  %v487_v59 = vld [vmem:[%s2577_s24 + $0x9a8] sm:$0xff]  ;;  %v494_v60 = vld [vmem:[%s2577_s24 + $0x9e0] sm:$0xff] }
  0x9f   : > { %v489_v61 = vld [vmem:[%s2577_s24 + $0x9b8] sm:$0xff] }
  0xa4   : > { %1283 = vmatmul.mubr.bf16.gmra.mxu0 %v591_v6  ;;  %1508 = vmatmul.mubr.bf16.gmra.mxu1 %v593_v7  ;;  %v636_v6 = vpack.c.bf16 %v426_v2, %v419_v0  ;;  %v416_v7 = vld [vmem:[%s2577_s24 + $0x770] sm:$0xff]  ;;  %v669_v2 = vpack.c.bf16 %v494_v60, %v487_v59 }
  0xa5   : > { %1290 = vmatprep.mubr.bf16.mxu0 %v599_v8  ;;  %1515 = vmatprep.mubr.bf16.mxu1 %v601_v9  ;;  %v423_v8 = vld [vmem:[%s2577_s24 + $0x7a8] sm:$0xff]  ;;  %v418_v9 = vld [vmem:[%s2577_s24 + $0x780] sm:$0xff] }
  0xa6   : > { %v633_v15 = vpack.c.bf16 %v423_v8, %v416_v7  ;;  %v635_v16 = vpack.c.bf16 %v425_v10, %v418_v9  ;;  %v495_v7 = vld [vmem:[%s2577_s24 + $0x9e8] sm:$0xff]  ;;  %v501_v8 = vld [vmem:[%s2577_s24 + $0xa18] sm:$0xff]  ;;  %v508_v9 = vld [vmem:[%s2577_s24 + $0xa50] sm:$0xff] }
  0xa7   : > { %v503_v10 = vld [vmem:[%s2577_s24 + $0xa28] sm:$0xff] }
  0xac   : > { %1291 = vmatmul.mubr.bf16.gmra.mxu0 %v598_v18  ;;  %1516 = vmatmul.mubr.bf16.gmra.mxu1 %v600_v19  ;;  %v643_v18 = vpack.c.bf16 %v440_v14, %v433_v13  ;;  %v430_v19 = vld [vmem:[%s2577_s24 + $0x7e0] sm:$0xff]  ;;  %v676_v14 = vpack.c.bf16 %v508_v9, %v501_v8  ;;  %v469_v9 = vld [vmem:[%s2577_s24 + $0x918] sm:$0xff] }
  0xad   : > { %1298 = vmatprep.mubr.bf16.mxu0 %v606_v20  ;;  %1523 = vmatprep.mubr.bf16.mxu1 %v608_v21  ;;  %v437_v20 = vld [vmem:[%s2577_s24 + $0x818] sm:$0xff]  ;;  %v432_v21 = vld [vmem:[%s2577_s24 + $0x7f0] sm:$0xff] }
  0xae   : > { %v640_v27 = vpack.c.bf16 %v437_v20, %v430_v19  ;;  %v642_v28 = vpack.c.bf16 %v439_v22, %v432_v21  ;;  %v509_v19 = vld [vmem:[%s2577_s24 + $0xa58] sm:$0xff]  ;;  %v183_v20 = vld [vmem:[%s2577_s24 + $0x28] sm:$0xff]  ;;  %v190_v21 = vld [vmem:[%s2577_s24 + $0x60] sm:$0xff] }
  0xaf   : > { %v435_v22 = vld [vmem:[%s2577_s24 + $0x808] sm:$0xff] }
  0xb4   : > { %1299 = vmatmul.mubr.bf16.gmra.mxu0 %v605_v30  ;;  %1524 = vmatmul.mubr.bf16.gmra.mxu1 %v607_v31  ;;  %v650_v30 = vpack.c.bf16 %v454_v26, %v447_v25  ;;  %v444_v31 = vld [vmem:[%s2577_s24 + $0x850] sm:$0xff]  ;;  %v519_v26 = vpack.c.bf16 %v190_v21, %v183_v20 }
  0xb5   : > { %1306 = vmatprep.mubr.bf16.mxu0 %v613_v32  ;;  %1531 = vmatprep.mubr.bf16.mxu1 %v615_v33  ;;  %v451_v32 = vld [vmem:[%s2577_s24 + $0x888] sm:$0xff]  ;;  %v446_v33 = vld [vmem:[%s2577_s24 + $0x860] sm:$0xff] }
  0xb6   : > { %v647_v39 = vpack.c.bf16 %v451_v32, %v444_v31  ;;  %v649_v40 = vpack.c.bf16 %v453_v34, %v446_v33  ;;  %v441_v31 = vld [vmem:[%s2577_s24 + $0x838] sm:$0xff]  ;;  %v204_v33 = vld [vmem:[%s2577_s24 + $0xd0] sm:$0xff] }
  0xb7   : > { %v197_v32 = vld [vmem:[%s2577_s24 + $0x98] sm:$0xff] }
  0xb8   : > { %v449_v34 = vld [vmem:[%s2577_s24 + $0x878] sm:$0xff] }
  0xbc   : > { %1307 = vmatmul.mubr.bf16.gmra.mxu0 %v612_v1  ;;  %1532 = vmatmul.mubr.bf16.gmra.mxu1 %v614_v42  ;;  %v657_v1 = vpack.c.bf16 %v468_v38, %v461_v37  ;;  %v458_v42 = vld [vmem:[%s2577_s24 + $0x8c0] sm:$0xff]  ;;  %v526_v38 = vpack.c.bf16 %v204_v33, %v197_v32  ;;  %v483_v33 = vld [vmem:[%s2577_s24 + $0x988] sm:$0xff] }
  0xbd   : > { %1314 = vmatprep.mubr.bf16.mxu0 %v620_v43  ;;  %1539 = vmatprep.mubr.bf16.mxu1 %v622_v45  ;;  %v465_v43 = vld [vmem:[%s2577_s24 + $0x8f8] sm:$0xff]  ;;  %v460_v45 = vld [vmem:[%s2577_s24 + $0x8d0] sm:$0xff] }
  0xbe   : > { %v654_v51 = vpack.c.bf16 %v465_v43, %v458_v42  ;;  %v656_v52 = vpack.c.bf16 %v467_v46, %v460_v45  ;;  %v196_v45 = vld [vmem:[%s2577_s24 + $0x90] sm:$0xff]  ;;  %v203_v46 = vld [vmem:[%s2577_s24 + $0xc8] sm:$0xff] }
  0xc4   : > { %1315 = vmatmul.mubr.bf16.gmra.mxu0 %v619_v54  ;;  %1540 = vmatmul.mubr.bf16.gmra.mxu1 %v621_v55  ;;  %v664_v54 = vpack.c.bf16 %v482_v50, %v475_v49  ;;  %v472_v55 = vld [vmem:[%s2577_s24 + $0x930] sm:$0xff]  ;;  %v455_v49 = vld [vmem:[%s2577_s24 + $0x8a8] sm:$0xff] }
  0xc5   : > { %1322 = vmatprep.mubr.bf16.mxu0 %v627_v56  ;;  %1547 = vmatprep.mubr.bf16.mxu1 %v629_v57  ;;  %v479_v56 = vld [vmem:[%s2577_s24 + $0x968] sm:$0xff]  ;;  %v474_v57 = vld [vmem:[%s2577_s24 + $0x940] sm:$0xff] }
  0xc6   : > { %v661_v63 = vpack.c.bf16 %v479_v56, %v472_v55  ;;  %v663_v0 = vpack.c.bf16 %v481_v58, %v474_v57  ;;  %v211_v50 = vld [vmem:[%s2577_s24 + $0x108] sm:$0xff]  ;;  %v470_v55 = vld [vmem:[%s2577_s24 + $0x920] sm:$0xff]  ;;  %v525_v57 = vpack.c.bf16 %v203_v46, %v196_v45 }
  0xcc   : > { %1323 = vmatmul.mubr.bf16.gmra.mxu0 %v626_v3  ;;  %1548 = vmatmul.mubr.bf16.gmra.mxu1 %v628_v4  ;;  %v671_v3 = vpack.c.bf16 %v496_v62, %v489_v61  ;;  %v486_v4 = vld [vmem:[%s2577_s24 + $0x9a0] sm:$0xff] }
  0xcd   : > { %1330 = vmatprep.mubr.bf16.mxu0 %v634_v5  ;;  %1555 = vmatprep.mubr.bf16.mxu1 %v636_v6  ;;  %v493_v5 = vld [vmem:[%s2577_s24 + $0x9d8] sm:$0xff]  ;;  %v488_v6 = vld [vmem:[%s2577_s24 + $0x9b0] sm:$0xff] }
  0xce   : > { %v668_v12 = vpack.c.bf16 %v493_v5, %v486_v4  ;;  %v670_v13 = vpack.c.bf16 %v495_v7, %v488_v6  ;;  %v210_v5 = vld [vmem:[%s2577_s24 + $0x100] sm:$0xff]  ;;  %v217_v6 = vld [vmem:[%s2577_s24 + $0x138] sm:$0xff] }
  0xcf   : > { %v462_v7 = vld [vmem:[%s2577_s24 + $0x8e0] sm:$0xff] }
  0xd0   : > { %v658_v20 = vpack.c.bf16 %v469_v9, %v462_v7 }
  0xd4   : > { %1331 = vmatmul.mubr.bf16.gmra.mxu0 %v633_v15  ;;  %1556 = vmatmul.mubr.bf16.gmra.mxu1 %v635_v16  ;;  %v678_v15 = vpack.c.bf16 %v510_v11, %v503_v10  ;;  %v500_v16 = vld [vmem:[%s2577_s24 + $0xa10] sm:$0xff]  ;;  %v225_v10 = vld [vmem:[%s2577_s24 + $0x178] sm:$0xff] }
  0xd5   : > { %1338 = vmatprep.mubr.bf16.mxu0 %v641_v17  ;;  %1563 = vmatprep.mubr.bf16.mxu1 %v643_v18  ;;  %v507_v17 = vld [vmem:[%s2577_s24 + $0xa48] sm:$0xff]  ;;  %v502_v18 = vld [vmem:[%s2577_s24 + $0xa20] sm:$0xff]  ;;  %v232_v11 = vld [vmem:[%s2577_s24 + $0x1b0] sm:$0xff] }
  0xd6   : > { %v675_v24 = vpack.c.bf16 %v507_v17, %v500_v16  ;;  %v677_v25 = vpack.c.bf16 %v509_v19, %v502_v18  ;;  %v532_v17 = vpack.c.bf16 %v217_v6, %v210_v5  ;;  %v540_v21 = vpack.c.bf16 %v232_v11, %v225_v10 }
  0xdc   : > { %1339 = vmatmul.mubr.bf16.gmra.mxu0 %v640_v27  ;;  %1564 = vmatmul.mubr.bf16.gmra.mxu1 %v642_v28  ;;  %v645_v27 = vpack.c.bf16 %v442_v23, %v435_v22  ;;  %v182_v28 = vld [vmem:[%s2577_s24 + $0x20] sm:$0xff] }
  0xdd   : > { %1346 = vmatprep.mubr.bf16.mxu0 %v648_v29  ;;  %1571 = vmatprep.mubr.bf16.mxu1 %v650_v30  ;;  %v189_v29 = vld [vmem:[%s2577_s24 + $0x58] sm:$0xff]  ;;  %v434_v30 = vld [vmem:[%s2577_s24 + $0x800] sm:$0xff] }
  0xde   : > { %v518_v36 = vpack.c.bf16 %v189_v29, %v182_v28  ;;  %v644_v37 = vpack.c.bf16 %v441_v31, %v434_v30  ;;  %v224_v29 = vld [vmem:[%s2577_s24 + $0x170] sm:$0xff]  ;;  %v231_v30 = vld [vmem:[%s2577_s24 + $0x1a8] sm:$0xff] }
  0xdf   : > { %v476_v31 = vld [vmem:[%s2577_s24 + $0x950] sm:$0xff] }
  0xe0   : > { %v665_v45 = vpack.c.bf16 %v483_v33, %v476_v31 }
  0xe4   : > { %1347 = vmatmul.mubr.bf16.gmra.mxu0 %v647_v39  ;;  %1572 = vmatmul.mubr.bf16.gmra.mxu1 %v649_v40  ;;  %v2936_v39 = vld [vmem:[%s3446_s2] ss:$0 sm:$0xff]  ;;  %v652_v40 = vpack.c.bf16 %v456_v35, %v449_v34  ;;  %v239_v34 = vld [vmem:[%s2577_s24 + $0x1e8] sm:$0xff] }
  0xe5   : > { %1354 = vmatprep.mubr.bf16.mxu0 %v655_v41  ;;  %1579 = vmatprep.mubr.bf16.mxu1 %v657_v1  ;;  %v2468_v41 = vld [vmem:[%s3445_s1 + $0x180] sm:$0xff]  }
  0xe6   : > { %v246_v35 = vld [vmem:[%s2577_s24 + $0x220] sm:$0xff] }
  0xe7   : > { %v547_v46 = vpack.c.bf16 %v246_v35, %v239_v34 }
  0xec   : > { %1355 = vmatmul.mubr.bf16.gmra.mxu0 %v654_v51  ;;  %1580 = vmatmul.mubr.bf16.gmra.mxu1 %v656_v52  ;;  %v218_v51 = vld [vmem:[%s2577_s24 + $0x140] sm:$0xff] }
  0xed   : > { %1362 = vmatprep.mubr.bf16.mxu0 %v662_v53  ;;  %1587 = vmatprep.mubr.bf16.mxu1 %v664_v54  ;;  %v463_v54 = vld [vmem:[%s2577_s24 + $0x8e8] sm:$0xff]  ;;  %v533_v60 = vpack.c.bf16 %v218_v51, %v211_v50 }
  0xee   : > { %v659_v62 = vpack.c.bf16 %v470_v55, %v463_v54  ;;  %v238_v55 = vld [vmem:[%s2577_s24 + $0x1e0] sm:$0xff] }
  0xf4   : > { %1363 = vmatmul.mubr.bf16.gmra.mxu0 %v661_v63  ;;  %1588 = vmatmul.mubr.bf16.gmra.mxu1 %v663_v0 }
  0xf5   : > { %1370 = vmatprep.mubr.bf16.mxu0 %v669_v2  ;;  %1595 = vmatprep.mubr.bf16.mxu1 %v671_v3 }
  0xfc   : > { %1371 = vmatmul.mubr.bf16.gmra.mxu0 %v668_v12  ;;  %1596 = vmatmul.mubr.bf16.gmra.mxu1 %v670_v13 }
  0xfd   : > { %1378 = vmatprep.mubr.bf16.mxu0 %v676_v14  ;;  %1603 = vmatprep.mubr.bf16.mxu1 %v678_v15  ;;  %v477_v14 = vld [vmem:[%s2577_s24 + $0x958] sm:$0xff]  ;;  %v484_v15 = vld [vmem:[%s2577_s24 + $0x990] sm:$0xff] }
  0xfe   : > { %v666_v23 = vpack.c.bf16 %v484_v15, %v477_v14 }
 0x104   : > { %1379 = vmatmul.mubr.bf16.gmra.mxu0 %v675_v24  ;;  %1604 = vmatmul.mubr.bf16.gmra.mxu1 %v677_v25 }
 0x105   : > { %1644 = vmatprep.mubr.bf16.mxu0 %v519_v26  ;;  %1788 = vmatprep.mubr.bf16.mxu1 %v645_v27 }
 0x10c   : > { %v1196_v1 = vpop.f32.mrf.mxu0  ;;  %1645 = vmatmul.mubr.bf16.vlgmr.msra.gmra.mxu0 %v518_v36  ;;  %v1421_v43 = vpop.f32.mrf.mxu1  ;;  %1789 = vmatmul.mubr.bf16.vlgmr.msra.gmra.mxu1 %v644_v37 }
 0x10d   : > { %v1197_v42 = vadd.f32 %v2936_v39, %v1196_v1  ;;  %1652 = vmatprep.mubr.bf16.mxu0 %v526_v38  ;;  %2326 = vmatpush3.bf16.msra.mxu1 %v2810_v44  ;;  %v651_v44 = vpack.c.bf16 %v455_v49, %v448_v47  ;;  %v491_v38 = vld [vmem:[%s2577_s24 + $0x9c8] sm:$0xff]  ;;  %v539_v1 = vpack.c.bf16 %v231_v30, %v224_v29 }
 0x10e   : > { %v1198_v48 = vpop.f32.mrf.mxu0  ;;  %1796 = vmatprep.mubr.bf16.mxu1 %v652_v40  ;;  %v1423_v53 = vpop.f32.mrf.mxu1  ;;  %2327 = vmatprep.subr.bf16.mxu1 %v2468_v41  ;;  %v498_v40 = vld [vmem:[%s2577_s24 + $0xa00] sm:$0xff] }
 0x10f   : > { %v2949_v52 = vadd.f32 %v1421_v43, %v1197_v42  ;;  %v673_v48 = vpack.c.bf16 %v498_v40, %v491_v38 }
 0x110   : > { %v1199_v56 = vpop.f32.mrf.mxu0  ;;  %v1424_v59 = vpop.f32.mrf.mxu1 }
 0x111   : > { %v1200_v58 = vadd.f32 %v2936_v39, %v1199_v56  ;;  %2328 = vmatpush3.bf16.msra.mxu1 %v2468_v41  ;;  %v245_v56 = vld [vmem:[%s2577_s24 + $0x218] sm:$0xff] }
 0x112   : > { %v1201_v61 = vpop.f32.mrf.mxu0  ;;  %v1426_v0 = vpop.f32.mrf.mxu1 }
 0x113   : > { %v2954_v63 = vadd.f32 %v1424_v59, %v1200_v58  ;;  %v497_v59 = vld [vmem:[%s2577_s24 + $0x9f8] sm:$0xff] }
 0x114   : > { %v1204_v2 = vpop.f32.mrf.mxu0  ;;  %1653 = vmatmul.mubr.bf16.gmra.mxu0 %v525_v57  ;;  %v1429_v4 = vpop.f32.mrf.mxu1  ;;  %1797 = vmatmul.mubr.bf16.gmra.mxu1 %v651_v44  ;;  %v490_v57 = vld [vmem:[%s2577_s24 + $0x9c0] sm:$0xff]  ;;  %v253_v44 = vld [vmem:[%s2577_s24 + $0x258] sm:$0xff] }
 0x115   : > { %v1205_v3 = vadd.f32 %v2936_v39, %v1204_v2  ;;  %1660 = vmatprep.mubr.bf16.mxu0 %v533_v60  ;;  %1804 = vmatprep.mubr.bf16.mxu1 %v659_v62  ;;  %v260_v60 = vld [vmem:[%s2577_s24 + $0x290] sm:$0xff]  ;;  %v505_v0 = vld [vmem:[%s2577_s24 + $0xa38] sm:$0xff]  ;;  %v672_v7 = vpack.c.bf16 %v497_v59, %v490_v57 }
 0x116   : > { %v1206_v8 = vpop.f32.mrf.mxu0  ;;  %v1431_v13 = vpop.f32.mrf.mxu1  ;;  %v512_v2 = vld [vmem:[%s2577_s24 + $0xa70] sm:$0xff] }
 0x117   : > { %v2963_v12 = vadd.f32 %v1429_v4, %v1205_v3  ;;  %v546_v4 = vpack.c.bf16 %v245_v56, %v238_v55  ;;  %v554_v8 = vpack.c.bf16 %v260_v60, %v253_v44  ;;  %v680_v10 = vpack.c.bf16 %v512_v2, %v505_v0  ;;  %v212_v55 = vld [vmem:[%s2577_s24 + $0x110] sm:$0xff]  ;;  %v219_v56 = vld [vmem:[%s2577_s24 + $0x148] sm:$0xff] }
 0x118   : > { %v1207_v16 = vpop.f32.mrf.mxu0  ;;  %v1432_v19 = vpop.f32.mrf.mxu1  ;;  %v534_v2 = vpack.c.bf16 %v219_v56, %v212_v55 }
 0x119   : > { %v1208_v18 = vadd.f32 %v2936_v39, %v1207_v16 }
 0x11a   : > { %v1209_v22 = vpop.f32.mrf.mxu0  ;;  %v1434_v25 = vpop.f32.mrf.mxu1 }
 0x11b   : > { %v2968_v24 = vadd.f32 %v1432_v19, %v1208_v18  ;;  %v259_v18 = vld [vmem:[%s2577_s24 + $0x288] sm:$0xff]  ;;  %v504_v19 = vld [vmem:[%s2577_s24 + $0xa30] sm:$0xff] }
 0x11c   : > { %v1212_v26 = vpop.f32.mrf.mxu0  ;;  %1661 = vmatmul.mubr.bf16.gmra.mxu0 %v532_v17  ;;  %v1437_v28 = vpop.f32.mrf.mxu1  ;;  %1805 = vmatmul.mubr.bf16.gmra.mxu1 %v658_v20  ;;  %v252_v17 = vld [vmem:[%s2577_s24 + $0x250] sm:$0xff]  ;;  %v267_v22 = vld [vmem:[%s2577_s24 + $0x2c8] sm:$0xff] }
 0x11d   : > { %v1213_v27 = vadd.f32 %v2936_v39, %v1212_v26  ;;  %1668 = vmatprep.mubr.bf16.mxu0 %v540_v21  ;;  %1812 = vmatprep.mubr.bf16.mxu1 %v666_v23  ;;  %v511_v21 = vld [vmem:[%s2577_s24 + $0xa68] sm:$0xff]  ;;  %v274_v23 = vld [vmem:[%s2577_s24 + $0x300] sm:$0xff]  ;;  %v553_v30 = vpack.c.bf16 %v259_v18, %v252_v17 }
 0x11e   : > { %v1214_v32 = vpop.f32.mrf.mxu0  ;;  %v1439_v37 = vpop.f32.mrf.mxu1  ;;  %v679_v33 = vpack.c.bf16 %v511_v21, %v504_v19  ;;  %v561_v34 = vpack.c.bf16 %v274_v23, %v267_v22  ;;  %v240_v19 = vld [vmem:[%s2577_s24 + $0x1f0] sm:$0xff] }
 0x11f   : > { %v2977_v36 = vadd.f32 %v1437_v28, %v1213_v27  ;;  %v184_v27 = vld [vmem:[%s2577_s24 + $0x30] sm:$0xff]  ;;  %v191_v28 = vld [vmem:[%s2577_s24 + $0x68] sm:$0xff] }
 0x120   : > { %v1215_v41 = vpop.f32.mrf.mxu0  ;;  %v1440_v43 = vpop.f32.mrf.mxu1  ;;  %v520_v37 = vpack.c.bf16 %v191_v28, %v184_v27 }
 0x121   : > { %v1216_v42 = vadd.f32 %v2936_v39, %v1215_v41 }
 0x122   : > { %v1217_v47 = vpop.f32.mrf.mxu0  ;;  %v1442_v50 = vpop.f32.mrf.mxu1 }
 0x123   : > { %v2982_v49 = vadd.f32 %v1440_v43, %v1216_v42  ;;  %v266_v43 = vld [vmem:[%s2577_s24 + $0x2c0] sm:$0xff]  ;;  %v281_v50 = vld [vmem:[%s2577_s24 + $0x338] sm:$0xff] }
 0x124   : > { %v1220_v51 = vpop.f32.mrf.mxu0  ;;  %1669 = vmatmul.mubr.bf16.gmra.mxu0 %v539_v1  ;;  %v1445_v54 = vpop.f32.mrf.mxu1  ;;  %1813 = vmatmul.mubr.bf16.gmra.mxu1 %v665_v45  ;;  %v273_v45 = vld [vmem:[%s2577_s24 + $0x2f8] sm:$0xff] }
 0x125   : > { %v1221_v53 = vadd.f32 %v2936_v39, %v1220_v51  ;;  %1676 = vmatprep.mubr.bf16.mxu0 %v547_v46  ;;  %1820 = vmatprep.mubr.bf16.mxu1 %v673_v48  ;;  %v198_v46 = vld [vmem:[%s2577_s24 + $0xa0] sm:$0xff]  ;;  %v205_v48 = vld [vmem:[%s2577_s24 + $0xd8] sm:$0xff]  ;;  %v288_v51 = vld [vmem:[%s2577_s24 + $0x370] sm:$0xff] }
 0x126   : > { %v1222_v58 = vpop.f32.mrf.mxu0  ;;  %v1447_v62 = vpop.f32.mrf.mxu1  ;;  %v527_v60 = vpack.c.bf16 %v205_v48, %v198_v46  ;;  %v268_v48 = vld [vmem:[%s2577_s24 + $0x2d0] sm:$0xff] }
 0x127   : > { %v2991_v61 = vadd.f32 %v1445_v54, %v1221_v53  ;;  %v560_v58 = vpack.c.bf16 %v273_v45, %v266_v43  ;;  %v568_v62 = vpack.c.bf16 %v288_v51, %v281_v50  ;;  %v309_v43 = vld [vmem:[%s2577_s24 + $0x418] sm:$0xff]  ;;  %v316_v45 = vld [vmem:[%s2577_s24 + $0x450] sm:$0xff]  ;;  %v275_v50 = vld [vmem:[%s2577_s24 + $0x308] sm:$0xff] }
 0x128   : > { %v1223_v3 = vpop.f32.mrf.mxu0  ;;  %v1448_v6 = vpop.f32.mrf.mxu1 }
 0x129   : > { %v1224_v5 = vadd.f32 %v2936_v39, %v1223_v3 }
 0x12a   : > { %v1225_v9 = vpop.f32.mrf.mxu0  ;;  %v1450_v13 = vpop.f32.mrf.mxu1 }
 0x12b   : > { %v2996_v11 = vadd.f32 %v1448_v6, %v1224_v5  ;;  %v287_v9 = vld [vmem:[%s2577_s24 + $0x368] sm:$0xff] }
 0x12c   : > { %v1228_v14 = vpop.f32.mrf.mxu0  ;;  %1677 = vmatmul.mubr.bf16.gmra.mxu0 %v546_v4  ;;  %v1453_v16 = vpop.f32.mrf.mxu1  ;;  %1821 = vmatmul.mubr.bf16.gmra.mxu1 %v672_v7 }
 0x12d   : > { %v1229_v15 = vadd.f32 %v2936_v39, %v1228_v14  ;;  %1684 = vmatprep.mubr.bf16.mxu0 %v554_v8  ;;  %1828 = vmatprep.mubr.bf16.mxu1 %v680_v10  ;;  %v280_v8 = vld [vmem:[%s2577_s24 + $0x330] sm:$0xff]  ;;  %v226_v10 = vld [vmem:[%s2577_s24 + $0x180] sm:$0xff]  ;;  %v233_v14 = vld [vmem:[%s2577_s24 + $0x1b8] sm:$0xff] }
 0x12e   : > { %v1230_v20 = vpop.f32.mrf.mxu0  ;;  %v1455_v26 = vpop.f32.mrf.mxu1  ;;  %v567_v22 = vpack.c.bf16 %v287_v9, %v280_v8  ;;  %v541_v27 = vpack.c.bf16 %v233_v14, %v226_v10  ;;  %v289_v9 = vld [vmem:[%s2577_s24 + $0x378] sm:$0xff]  ;;  %v323_v10 = vld [vmem:[%s2577_s24 + $0x488] sm:$0xff] }
 0x12f   : > { %v3005_v25 = vadd.f32 %v1453_v16, %v1229_v15  ;;  %v295_v15 = vld [vmem:[%s2577_s24 + $0x3a8] sm:$0xff]  ;;  %v302_v16 = vld [vmem:[%s2577_s24 + $0x3e0] sm:$0xff] }
 0x130   : > { %v1231_v29 = vpop.f32.mrf.mxu0  ;;  %v1456_v32 = vpop.f32.mrf.mxu1  ;;  %v247_v20 = vld [vmem:[%s2577_s24 + $0x228] sm:$0xff]  ;;  %v575_v28 = vpack.c.bf16 %v302_v16, %v295_v15  ;;  %v296_v16 = vld [vmem:[%s2577_s24 + $0x3b0] sm:$0xff] }
 0x131   : > { %v1232_v31 = vadd.f32 %v2936_v39, %v1231_v29 }
 0x132   : > { %v1233_v35 = vpop.f32.mrf.mxu0  ;;  %v1458_v40 = vpop.f32.mrf.mxu1 }
 0x133   : > { %v3010_v38 = vadd.f32 %v1456_v32, %v1232_v31  ;;  %v301_v40 = vld [vmem:[%s2577_s24 + $0x3d8] sm:$0xff] }
 0x134   : > { %v1236_v41 = vpop.f32.mrf.mxu0  ;;  %1685 = vmatmul.mubr.bf16.gmra.mxu0 %v553_v30  ;;  %v1461_v42 = vpop.f32.mrf.mxu1  ;;  %1829 = vmatmul.mubr.bf16.gmra.mxu1 %v679_v33  ;;  %v548_v30 = vpack.c.bf16 %v247_v20, %v240_v19 }
 0x135   : > { %v1237_v1 = vadd.f32 %v2936_v39, %v1236_v41  ;;  %1692 = vmatprep.mubr.bf16.mxu0 %v561_v34  ;;  %2329 = vmatprep.mubr.msk.bf16.mxu1 %vm1089_vm0, %v520_v37  ;;  %v294_v37 = vld [vmem:[%s2577_s24 + $0x3a0] sm:$0xff] }
 0x136   : > { %v1238_v47 = vpop.f32.mrf.mxu0  ;;  %v1463_v54 = vpop.f32.mrf.mxu1  ;;  %v254_v41 = vld [vmem:[%s2577_s24 + $0x260] sm:$0xff] }
 0x137   : > { %v3020_v53 = vadd.f32 %v1461_v42, %v1237_v1  ;;  %v261_v42 = vld [vmem:[%s2577_s24 + $0x298] sm:$0xff]  ;;  %v574_v54 = vpack.c.bf16 %v301_v40, %v294_v37  ;;  %v310_v40 = vld [vmem:[%s2577_s24 + $0x420] sm:$0xff] }
 0x138   : > { %v1239_v57 = vpop.f32.mrf.mxu0  ;;  %v1464_v44 = vpop.f32.mrf.mxu1  ;;  %v329_v37 = vld [vmem:[%s2577_s24 + $0x4b8] sm:$0xff] }
 0x139   : > { %v1240_v59 = vadd.f32 %v2936_v39, %v1239_v57  ;;  %v555_v57 = vpack.c.bf16 %v261_v42, %v254_v41  ;;  %v337_v42 = vld [vmem:[%s2577_s24 + $0x4f8] sm:$0xff] }
 0x13a   : > { %v1241_v0 = vpop.f32.mrf.mxu0  ;;  %v1466_v4 = vpop.f32.mrf.mxu1 }
 0x13b   : > { %v3025_v3 = vadd.f32 %v1464_v44, %v1240_v59  ;;  %v562_v44 = vpack.c.bf16 %v275_v50, %v268_v48  ;;  %v324_v48 = vld [vmem:[%s2577_s24 + $0x490] sm:$0xff]  ;;  %v331_v50 = vld [vmem:[%s2577_s24 + $0x4c8] sm:$0xff] }
 0x13c   : > { %v1244_v5 = vpop.f32.mrf.mxu0  ;;  %1693 = vmatmul.mubr.bf16.gmra.mxu0 %v560_v58  ;;  %v1469_v7 = vpop.f32.mrf.mxu1  ;;  %2330 = vmatmul.mubr.msk.bf16.vlgmr.msra.gmra.mxu1 %vm1089_vm0, %v527_v60  ;;  %v582_v58 = vpack.c.bf16 %v316_v45, %v309_v43  ;;  %v344_v43 = vld [vmem:[%s2577_s24 + $0x530] sm:$0xff] }
 0x13d   : > { %v1245_v6 = vadd.f32 %v2936_v39, %v1244_v5  ;;  %1700 = vmatprep.mubr.bf16.mxu0 %v568_v62  ;;  %2333 = vmatprep.mubr.msk.bf16.mxu1 %vm1089_vm0, %v534_v2  ;;  %v308_v5 = vld [vmem:[%s2577_s24 + $0x410] sm:$0xff] }
 0x13e   : > { %v1246_v13 = vpop.f32.mrf.mxu0  ;;  %v1471_v18 = vpop.f32.mrf.mxu1 }
 0x13f   : > { %v3036_v17 = vadd.f32 %v1469_v7, %v1245_v6  ;;  %v315_v6 = vld [vmem:[%s2577_s24 + $0x448] sm:$0xff]  ;;  %v282_v7 = vld [vmem:[%s2577_s24 + $0x340] sm:$0xff] }
 0x140   : > { %v1247_v21 = vpop.f32.mrf.mxu0  ;;  %v1472_v26 = vpop.f32.mrf.mxu1  ;;  %v330_v13 = vld [vmem:[%s2577_s24 + $0x4c0] sm:$0xff]  ;;  %v303_v18 = vld [vmem:[%s2577_s24 + $0x3e8] sm:$0xff]  ;;  %v581_v20 = vpack.c.bf16 %v315_v6, %v308_v5  ;;  %v336_v6 = vld [vmem:[%s2577_s24 + $0x4f0] sm:$0xff] }
 0x141   : > { %v1248_v23 = vadd.f32 %v2936_v39, %v1247_v21 }
 0x142   : > { %v1249_v29 = vpop.f32.mrf.mxu0  ;;  %v1474_v32 = vpop.f32.mrf.mxu1 }
 0x143   : > { %v3041_v31 = vadd.f32 %v1472_v26, %v1248_v23  ;;  %v569_v23 = vpack.c.bf16 %v289_v9, %v282_v7  ;;  %v589_v26 = vpack.c.bf16 %v330_v13, %v323_v10  ;;  %v343_v7 = vld [vmem:[%s2577_s24 + $0x528] sm:$0xff]  ;;  %v345_v10 = vld [vmem:[%s2577_s24 + $0x538] sm:$0xff] }
 0x144   : > { %v1252_v33 = vpop.f32.mrf.mxu0  ;;  %1701 = vmatmul.mubr.bf16.gmra.mxu0 %v567_v22  ;;  %v1477_v35 = vpop.f32.mrf.mxu1  ;;  %2334 = vmatmul.mubr.msk.bf16.gmra.mxu1 %vm1089_vm0, %v541_v27  ;;  %v351_v13 = vld [vmem:[%s2577_s24 + $0x568] sm:$0xff] }
 0x145   : > { %v1253_v34 = vadd.f32 %v2936_v39, %v1252_v33  ;;  %1708 = vmatprep.mubr.bf16.mxu0 %v575_v28  ;;  %2337 = vmatprep.mubr.msk.bf16.mxu1 %vm1089_vm0, %v548_v30  ;;  %v576_v28 = vpack.c.bf16 %v303_v18, %v296_v16 }
 0x146   : > { %v1254_v1 = vpop.f32.mrf.mxu0  ;;  %v1479_v47 = vpop.f32.mrf.mxu1 }
 0x147   : > { %v3052_v46 = vadd.f32 %v1477_v35, %v1253_v34  ;;  %v322_v35 = vld [vmem:[%s2577_s24 + $0x480] sm:$0xff]  ;;  %v317_v1 = vld [vmem:[%s2577_s24 + $0x458] sm:$0xff] }
 0x148   : > { %v1255_v51 = vpop.f32.mrf.mxu0  ;;  %v1480_v56 = vpop.f32.mrf.mxu1 }
 0x149   : > { %v1256_v55 = vadd.f32 %v2936_v39, %v1255_v51 }
 0x14a   : > { %v1257_v59 = vpop.f32.mrf.mxu0  ;;  %v1482_v62 = vpop.f32.mrf.mxu1 }
 0x14b   : > { %v3057_v60 = vadd.f32 %v1480_v56, %v1256_v55 }
 0x14c   : > { %v1260_v0 = vpop.f32.mrf.mxu0  ;;  %1709 = vmatmul.mubr.bf16.gmra.mxu0 %v574_v54  ;;  %v1485_v4 = vpop.f32.mrf.mxu1  ;;  %2338 = vmatmul.mubr.msk.bf16.gmra.mxu1 %vm1089_vm0, %v555_v57  ;;  %v588_v54 = vpack.c.bf16 %v329_v37, %v322_v35  ;;  %v583_v57 = vpack.c.bf16 %v317_v1, %v310_v40  ;;  %v357_v1 = vld [vmem:[%s2577_s24 + $0x598] sm:$0xff] }
 0x14d   : > { %v1261_v2 = vadd.f32 %v2936_v39, %v1260_v0  ;;  %1716 = vmatprep.mubr.bf16.mxu0 %v582_v58  ;;  %2341 = vmatprep.mubr.msk.bf16.mxu1 %vm1089_vm0, %v562_v44  ;;  %v596_v58 = vpack.c.bf16 %v344_v43, %v337_v42  ;;  %v590_v44 = vpack.c.bf16 %v331_v50, %v324_v48  ;;  %v366_v42 = vld [vmem:[%s2577_s24 + $0x5e0] sm:$0xff]  ;;  %v365_v48 = vld [vmem:[%s2577_s24 + $0x5d8] sm:$0xff]  ;;  %v372_v50 = vld [vmem:[%s2577_s24 + $0x610] sm:$0xff] }
 0x14e   : > { %v1262_v8 = vpop.f32.mrf.mxu0  ;;  %v1487_v15 = vpop.f32.mrf.mxu1 }
 0x14f   : > { %v3068_v14 = vadd.f32 %v1485_v4, %v1261_v2  ;;  %v338_v8 = vld [vmem:[%s2577_s24 + $0x500] sm:$0xff] }
 0x150   : > { %v1263_v19 = vpop.f32.mrf.mxu0  ;;  %v1488_v22 = vpop.f32.mrf.mxu1  ;;  %v358_v15 = vld [vmem:[%s2577_s24 + $0x5a0] sm:$0xff] }
 0x151   : > { %v1264_v21 = vadd.f32 %v2936_v39, %v1263_v19  ;;  %v352_v19 = vld [vmem:[%s2577_s24 + $0x570] sm:$0xff] }
 0x152   : > { %v1265_v27 = vpop.f32.mrf.mxu0  ;;  %v1490_v30 = vpop.f32.mrf.mxu1 }
 0x153   : > { %v3073_v29 = vadd.f32 %v1488_v22, %v1264_v21  ;;  %v595_v22 = vpack.c.bf16 %v343_v7, %v336_v6  ;;  %v597_v27 = vpack.c.bf16 %v345_v10, %v338_v8 }
 0x154   : > { %v1268_v32 = vpop.f32.mrf.mxu0  ;;  %1717 = vmatmul.mubr.bf16.gmra.mxu0 %v581_v20  ;;  %v1493_v34 = vpop.f32.mrf.mxu1  ;;  %2342 = vmatmul.mubr.msk.bf16.gmra.mxu1 %vm1089_vm0, %v569_v23  ;;  %v359_v20 = vld [vmem:[%s2577_s24 + $0x5a8] sm:$0xff] }
 0x155   : > { %v1269_v33 = vadd.f32 %v2936_v39, %v1268_v32  ;;  %1724 = vmatprep.mubr.bf16.mxu0 %v589_v26  ;;  %2345 = vmatprep.mubr.msk.bf16.mxu1 %vm1089_vm0, %v576_v28  ;;  %v603_v28 = vpack.c.bf16 %v358_v15, %v351_v13  ;;  %v604_v32 = vpack.c.bf16 %v359_v20, %v352_v19  ;;  %v364_v13 = vld [vmem:[%s2577_s24 + $0x5d0] sm:$0xff]  ;;  %v371_v15 = vld [vmem:[%s2577_s24 + $0x608] sm:$0xff]  ;;  %v401_v20 = vld [vmem:[%s2577_s24 + $0x6f8] sm:$0xff] }
 0x156   : > { %v1270_v41 = vpop.f32.mrf.mxu0  ;;  %v1495_v47 = vpop.f32.mrf.mxu1 }
 0x157   : > { %v3084_v45 = vadd.f32 %v1493_v34, %v1269_v33  ;;  %v350_v41 = vld [vmem:[%s2577_s24 + $0x560] sm:$0xff]  ;;  %v373_v47 = vld [vmem:[%s2577_s24 + $0x618] sm:$0xff] }
 0x158   : > { %v1271_v51 = vpop.f32.mrf.mxu0  ;;  %v1496_v56 = vpop.f32.mrf.mxu1 }
 0x159   : > { %v1272_v55 = vadd.f32 %v2936_v39, %v1271_v51 }
 0x15a   : > { %v1273_v59 = vpop.f32.mrf.mxu0  ;;  %v1498_v0 = vpop.f32.mrf.mxu1 }
 0x15b   : > { %v3089_v62 = vadd.f32 %v1496_v56, %v1272_v55  ;;  %v380_v55 = vld [vmem:[%s2577_s24 + $0x650] sm:$0xff]  ;;  %v387_v56 = vld [vmem:[%s2577_s24 + $0x688] sm:$0xff]  ;;  %v611_v0 = vpack.c.bf16 %v373_v47, %v366_v42 }
 0x15c   : > { %v1276_v2 = vpop.f32.mrf.mxu0  ;;  %1725 = vmatmul.mubr.bf16.gmra.mxu0 %v588_v54  ;;  %v1501_v5 = vpop.f32.mrf.mxu1  ;;  %2346 = vmatmul.mubr.msk.bf16.gmra.mxu1 %vm1089_vm0, %v583_v57 }
 0x15d   : > { %v1277_v4 = vadd.f32 %v2936_v39, %v1276_v2  ;;  %1732 = vmatprep.mubr.bf16.mxu0 %v596_v58  ;;  %2349 = vmatprep.mubr.msk.bf16.mxu1 %vm1089_vm0, %v590_v44  ;;  %v602_v58 = vpack.c.bf16 %v357_v1, %v350_v41  ;;  %v610_v2 = vpack.c.bf16 %v372_v50, %v365_v48 }
 0x15e   : > { %v1278_v9 = vpop.f32.mrf.mxu0  ;;  %v1503_v18 = vpop.f32.mrf.mxu1 }
 0x15f   : > { %v3100_v16 = vadd.f32 %v1501_v5, %v1277_v4  ;;  %v618_v5 = vpack.c.bf16 %v387_v56, %v380_v55  ;;  %v394_v18 = vld [vmem:[%s2577_s24 + $0x6c0] sm:$0xff]  ;;  %v385_v55 = vld [vmem:[%s2577_s24 + $0x678] sm:$0xff] }
 0x160   : > { %v1279_v21 = vpop.f32.mrf.mxu0  ;;  %v1504_v26 = vpop.f32.mrf.mxu1  ;;  %v422_v56 = vld [vmem:[%s2577_s24 + $0x7a0] sm:$0xff] }
 0x161   : > { %v1280_v23 = vadd.f32 %v2936_v39, %v1279_v21  ;;  %v379_v21 = vld [vmem:[%s2577_s24 + $0x648] sm:$0xff] }
 0x162   : > { %v1281_v30 = vpop.f32.mrf.mxu0  ;;  %v1506_v34 = vpop.f32.mrf.mxu1 }
 0x163   : > { %v3105_v33 = vadd.f32 %v1504_v26, %v1280_v23 }
 0x164   : > { %v1284_v35 = vpop.f32.mrf.mxu0  ;;  %1733 = vmatmul.mubr.bf16.gmra.mxu0 %v595_v22  ;;  %v1509_v40 = vpop.f32.mrf.mxu1  ;;  %2350 = vmatmul.mubr.msk.bf16.gmra.mxu1 %vm1089_vm0, %v597_v27  ;;  %v386_v22 = vld [vmem:[%s2577_s24 + $0x680] sm:$0xff]  ;;  %v408_v27 = vld [vmem:[%s2577_s24 + $0x730] sm:$0xff] }
 0x165   : > { %v1285_v37 = vadd.f32 %v2936_v39, %v1284_v35  ;;  %1740 = vmatprep.mubr.bf16.mxu0 %v603_v28  ;;  %2353 = vmatprep.mubr.msk.bf16.mxu1 %vm1089_vm0, %v604_v32  ;;  %v415_v28 = vld [vmem:[%s2577_s24 + $0x768] sm:$0xff]  ;;  %v609_v32 = vpack.c.bf16 %v371_v15, %v364_v13 }
 0x166   : > { %v1286_v43 = vpop.f32.mrf.mxu0  ;;  %v1511_v54 = vpop.f32.mrf.mxu1  ;;  %v632_v1 = vpack.c.bf16 %v415_v28, %v408_v27  ;;  %v392_v28 = vld [vmem:[%s2577_s24 + $0x6b0] sm:$0xff] }
 0x167   : > { %v3116_v51 = vadd.f32 %v1509_v40, %v1285_v37  ;;  %v625_v37 = vpack.c.bf16 %v401_v20, %v394_v18  ;;  %v617_v40 = vpack.c.bf16 %v386_v22, %v379_v21  ;;  %v378_v54 = vld [vmem:[%s2577_s24 + $0x640] sm:$0xff] }
 0x168   : > { %v1287_v57 = vpop.f32.mrf.mxu0  ;;  %v1512_v44 = vpop.f32.mrf.mxu1 }
 0x169   : > { %v1288_v59 = vadd.f32 %v2936_v39, %v1287_v57 }
 0x16a   : > { %v1289_v4 = vpop.f32.mrf.mxu0  ;;  %v1514_v7 = vpop.f32.mrf.mxu1 }
 0x16b   : > { %v3121_v6 = vadd.f32 %v1512_v44, %v1288_v59  ;;  %v393_v59 = vld [vmem:[%s2577_s24 + $0x6b8] sm:$0xff]  ;;  %v400_v44 = vld [vmem:[%s2577_s24 + $0x6f0] sm:$0xff] }
 0x16c   : > { %v1292_v8 = vpop.f32.mrf.mxu0  ;;  %1741 = vmatmul.mubr.bf16.gmra.mxu0 %v602_v58  ;;  %v1517_v10 = vpop.f32.mrf.mxu1  ;;  %2354 = vmatmul.mubr.msk.bf16.gmra.mxu1 %vm1089_vm0, %v611_v0  ;;  %v429_v58 = vld [vmem:[%s2577_s24 + $0x7d8] sm:$0xff]  ;;  %v436_v4 = vld [vmem:[%s2577_s24 + $0x810] sm:$0xff]  ;;  %v624_v15 = vpack.c.bf16 %v400_v44, %v393_v59 }
 0x16d   : > { %v1293_v9 = vadd.f32 %v2936_v39, %v1292_v8  ;;  %1748 = vmatprep.mubr.bf16.mxu0 %v610_v2  ;;  %2357 = vmatprep.mubr.msk.bf16.mxu1 %vm1089_vm0, %v618_v5  ;;  %v443_v5 = vld [vmem:[%s2577_s24 + $0x848] sm:$0xff]  ;;  %v616_v8 = vpack.c.bf16 %v385_v55, %v378_v54  ;;  %v639_v13 = vpack.c.bf16 %v429_v58, %v422_v56 }
 0x16e   : > { %v1294_v19 = vpop.f32.mrf.mxu0  ;;  %v1519_v26 = vpop.f32.mrf.mxu1 }
 0x16f   : > { %v3132_v23 = vadd.f32 %v1517_v10, %v1293_v9  ;;  %v646_v19 = vpack.c.bf16 %v443_v5, %v436_v4 }
 0x170   : > { %v1295_v30 = vpop.f32.mrf.mxu0  ;;  %v1520_v35 = vpop.f32.mrf.mxu1 }
 0x171   : > { %v1296_v34 = vadd.f32 %v2936_v39, %v1295_v30  ;;  %v399_v30 = vld [vmem:[%s2577_s24 + $0x6e8] sm:$0xff] }
 0x172   : > { %v1297_v41 = vpop.f32.mrf.mxu0  ;;  %v1522_v43 = vpop.f32.mrf.mxu1 }
 0x173   : > { %v3137_v42 = vadd.f32 %v1520_v35, %v1296_v34  ;;  %v457_v35 = vld [vmem:[%s2577_s24 + $0x8b8] sm:$0xff]  ;;  %v464_v43 = vld [vmem:[%s2577_s24 + $0x8f0] sm:$0xff] }
 0x174   : > { %v1300_v47 = vpop.f32.mrf.mxu0  ;;  %1749 = vmatmul.mubr.bf16.gmra.mxu0 %v609_v32  ;;  %v1525_v50 = vpop.f32.mrf.mxu1  ;;  %2358 = vmatmul.mubr.msk.bf16.gmra.mxu1 %vm1089_vm0, %v625_v37  ;;  %v450_v32 = vld [vmem:[%s2577_s24 + $0x880] sm:$0xff]  ;;  %v407_v37 = vld [vmem:[%s2577_s24 + $0x728] sm:$0xff] }
 0x175   : > { %v1301_v48 = vadd.f32 %v2936_v39, %v1300_v47  ;;  %1756 = vmatprep.mubr.bf16.mxu0 %v617_v40  ;;  %2361 = vmatprep.mubr.msk.bf16.mxu1 %vm1089_vm0, %v632_v1  ;;  %v414_v40 = vld [vmem:[%s2577_s24 + $0x760] sm:$0xff]  ;;  %v471_v47 = vld [vmem:[%s2577_s24 + $0x928] sm:$0xff]  ;;  %v653_v56 = vpack.c.bf16 %v457_v35, %v450_v32 }
 0x176   : > { %v1302_v57 = vpop.f32.mrf.mxu0  ;;  %v1527_v2 = vpop.f32.mrf.mxu1  ;;  %v660_v59 = vpack.c.bf16 %v471_v47, %v464_v43 }
 0x177   : > { %v3148_v0 = vadd.f32 %v1525_v50, %v1301_v48  ;;  %v623_v50 = vpack.c.bf16 %v399_v30, %v392_v28  ;;  %v631_v57 = vpack.c.bf16 %v414_v40, %v407_v37 }
 0x178   : > { %v1303_v7 = vpop.f32.mrf.mxu0  ;;  %v1528_v10 = vpop.f32.mrf.mxu1 }
 0x179   : > { %v1304_v9 = vadd.f32 %v2936_v39, %v1303_v7 }
 0x17a   : > { %v1305_v18 = vpop.f32.mrf.mxu0  ;;  %v1530_v21 = vpop.f32.mrf.mxu1 }
 0x17b   : > { %v3153_v20 = vadd.f32 %v1528_v10, %v1304_v9  ;;  %v413_v9 = vld [vmem:[%s2577_s24 + $0x758] sm:$0xff]  ;;  %v478_v10 = vld [vmem:[%s2577_s24 + $0x960] sm:$0xff] }
 0x17c   : > { %v1308_v22 = vpop.f32.mrf.mxu0  ;;  %1757 = vmatmul.mubr.bf16.gmra.mxu0 %v616_v8  ;;  %v1533_v27 = vpop.f32.mrf.mxu1  ;;  %2362 = vmatmul.mubr.msk.bf16.gmra.mxu1 %vm1089_vm0, %v639_v13  ;;  %v406_v8 = vld [vmem:[%s2577_s24 + $0x720] sm:$0xff]  ;;  %v421_v18 = vld [vmem:[%s2577_s24 + $0x798] sm:$0xff] }
 0x17d   : > { %v1309_v26 = vadd.f32 %v2936_v39, %v1308_v22  ;;  %1764 = vmatprep.mubr.bf16.mxu0 %v624_v15  ;;  %2365 = vmatprep.mubr.msk.bf16.mxu1 %vm1089_vm0, %v646_v19  ;;  %v485_v15 = vld [vmem:[%s2577_s24 + $0x998] sm:$0xff]  ;;  %v428_v19 = vld [vmem:[%s2577_s24 + $0x7d0] sm:$0xff]  ;;  %v630_v30 = vpack.c.bf16 %v413_v9, %v406_v8 }
 0x17e   : > { %v1310_v34 = vpop.f32.mrf.mxu0  ;;  %v1535_v1 = vpop.f32.mrf.mxu1  ;;  %v667_v35 = vpack.c.bf16 %v485_v15, %v478_v10  ;;  %v638_v37 = vpack.c.bf16 %v428_v19, %v421_v18 }
 0x17f   : > { %v3164_v41 = vadd.f32 %v1533_v27, %v1309_v26  ;;  %v492_v26 = vld [vmem:[%s2577_s24 + $0x9d0] sm:$0xff]  ;;  %v499_v27 = vld [vmem:[%s2577_s24 + $0xa08] sm:$0xff] }
 0x180   : > { %v1311_v48 = vpop.f32.mrf.mxu0  ;;  %v1536_v55 = vpop.f32.mrf.mxu1  ;;  %v674_v1 = vpack.c.bf16 %v499_v27, %v492_v26 }
 0x181   : > { %v1312_v54 = vadd.f32 %v2936_v39, %v1311_v48 }
 0x182   : > { %v1313_v58 = vpop.f32.mrf.mxu0  ;;  %v1538_v2 = vpop.f32.mrf.mxu1 }
 0x183   : > { %v3169_v44 = vadd.f32 %v1536_v55, %v1312_v54  ;;  %v420_v55 = vld [vmem:[%s2577_s24 + $0x790] sm:$0xff]  ;;  %v506_v58 = vld [vmem:[%s2577_s24 + $0xa40] sm:$0xff] }
 0x184   : > { %v1316_v4 = vpop.f32.mrf.mxu0  ;;  %1765 = vmatmul.mubr.bf16.gmra.mxu0 %v623_v50  ;;  %v1541_v7 = vpop.f32.mrf.mxu1  ;;  %2366 = vmatmul.mubr.msk.bf16.gmra.mxu1 %vm1089_vm0, %v653_v56  ;;  %v427_v56 = vld [vmem:[%s2577_s24 + $0x7c8] sm:$0xff] }
 0x185   : > { %v1317_v5 = vadd.f32 %v2936_v39, %v1316_v4  ;;  %1772 = vmatprep.mubr.bf16.mxu0 %v631_v57  ;;  %2369 = vmatprep.mubr.msk.bf16.mxu1 %vm1089_vm0, %v660_v59  ;;  %v513_v59 = vld [vmem:[%s2577_s24 + $0xa78] sm:$0xff] }
 0x186   : > { %v1318_v13 = vpop.f32.mrf.mxu0  ;;  %v1543_v22 = vpop.f32.mrf.mxu1  ;;  %v681_v10 = vpack.c.bf16 %v513_v59, %v506_v58 }
 0x187   : > { %v3180_v21 = vadd.f32 %v1541_v7, %v1317_v5  ;;  %v637_v7 = vpack.c.bf16 %v427_v56, %v420_v55 }
 0x188   : > { %v1319_v28 = vpop.f32.mrf.mxu0  ;;  %v1544_v34 = vpop.f32.mrf.mxu1 }
 0x189   : > { %v1320_v32 = vadd.f32 %v2936_v39, %v1319_v28 }
 0x18a   : > { %v1321_v40 = vpop.f32.mrf.mxu0  ;;  %v1546_v47 = vpop.f32.mrf.mxu1 }
 0x18b   : > { %v3185_v43 = vadd.f32 %v1544_v34, %v1320_v32 }
 0x18c   : > { %v1324_v48 = vpop.f32.mrf.mxu0  ;;  %1773 = vmatmul.mubr.bf16.gmra.mxu0 %v630_v30  ;;  %v1549_v54 = vpop.f32.mrf.mxu1  ;;  %2370 = vmatmul.mubr.msk.bf16.gmra.mxu1 %vm1089_vm0, %v667_v35 }
 0x18d   : > { %v1325_v50 = vadd.f32 %v2936_v39, %v1324_v48  ;;  %1780 = vmatprep.mubr.bf16.mxu0 %v638_v37  ;;  %2373 = vmatprep.mubr.msk.bf16.mxu1 %vm1089_vm0, %v674_v1 }
 0x18e   : > { %v1326_v57 = vpop.f32.mrf.mxu0  ;;  %v1551_v4 = vpop.f32.mrf.mxu1 }
 0x18f   : > { %v3194_v2 = vadd.f32 %v1549_v54, %v1325_v50 }
 0x190   : > { %v1327_v5 = vpop.f32.mrf.mxu0  ;;  %v1552_v9 = vpop.f32.mrf.mxu1 }
 0x191   : > { %3448 = vst [vmem:[#allocation2_spill] sm:$0xff] %v3194_v2  ;;  %v1328_v8 = vadd.f32 %v2936_v39, %v1327_v5 }
 0x192   : > { %v1329_v13 = vpop.f32.mrf.mxu0  ;;  %v1554_v18 = vpop.f32.mrf.mxu1 }
 0x193   : > { %v3197_v15 = vadd.f32 %v1552_v9, %v1328_v8 }
 0x194   : > { %v1332_v19 = vpop.f32.mrf.mxu0  ;;  %1781 = vmatmul.mubr.bf16.gmra.mxu0 %v637_v7  ;;  %v1557_v26 = vpop.f32.mrf.mxu1  ;;  %2374 = vmatmul.mubr.msk.bf16.gmra.mxu1 %vm1089_vm0, %v681_v10 }
 0x195   : > { %3449 = vst [vmem:[#allocation3_spill] sm:$0xff] %v3197_v15  ;;  %v1333_v22 = vadd.f32 %v2936_v39, %v1332_v19 }
 0x196   : > { %v1334_v27 = vpop.f32.mrf.mxu0  ;;  %v1559_v30 = vpop.f32.mrf.mxu1 }
 0x197   : > { %v3201_v28 = vadd.f32 %v1557_v26, %v1333_v22 }
 0x198   : > { %v1335_v32 = vpop.f32.mrf.mxu0  ;;  %v1560_v35 = vpop.f32.mrf.mxu1 }
 0x199   : > { %3450 = vst [vmem:[#allocation4_spill] sm:$0xff] %v3201_v28  ;;  %v1336_v34 = vadd.f32 %v2936_v39, %v1335_v32 }
 0x19a   : > { %v1337_v37 = vpop.f32.mrf.mxu0  ;;  %v1562_v1 = vpop.f32.mrf.mxu1 }
 0x19b   : > { %v3204_v40 = vadd.f32 %v1560_v35, %v1336_v34  ;;  %v2469_v37 = vld [vmem:[%s3446_s2] ss:$0 sm:$0xff] }
 0x19c   : > { %v1340_v47 = vpop.f32.mrf.mxu0  ;;  %v1565_v50 = vpop.f32.mrf.mxu1 }
 0x19d   : > { %3451 = vst [vmem:[#allocation5_spill] sm:$0xff] %v3204_v40  ;;  %v1341_v48 = vadd.f32 %v2936_v39, %v1340_v47 }
 0x19e   : > { %v1342_v54 = vpop.f32.mrf.mxu0  ;;  %v1567_v56 = vpop.f32.mrf.mxu1 }
 0x19f   : > { %v3207_v55 = vadd.f32 %v1565_v50, %v1341_v48 }
 0x1a0   : > { %v1343_v57 = vpop.f32.mrf.mxu0  ;;  %v1568_v59 = vpop.f32.mrf.mxu1 }
 0x1a1   : > { %v1344_v58 = vadd.f32 %v2936_v39, %v1343_v57 }
 0x1a2   : > { %v1345_v4 = vpop.f32.mrf.mxu0  ;;  %v1570_v7 = vpop.f32.mrf.mxu1 }
 0x1a3   : > { %v3210_v5 = vadd.f32 %v1568_v59, %v1344_v58 }
 0x1a4   : > { %v1348_v8 = vpop.f32.mrf.mxu0  ;;  %v1573_v10 = vpop.f32.mrf.mxu1 }
 0x1a5   : > { %v1349_v9 = vadd.f32 %v2936_v39, %v1348_v8 }
 0x1a6   : > { %v1350_v13 = vpop.f32.mrf.mxu0  ;;  %v1575_v19 = vpop.f32.mrf.mxu1 }
 0x1a7   : > { %v3213_v18 = vadd.f32 %v1573_v10, %v1349_v9 }
 0x1a8   : > { %v1351_v22 = vpop.f32.mrf.mxu0  ;;  %v1576_v27 = vpop.f32.mrf.mxu1 }
 0x1a9   : > { %v1352_v26 = vadd.f32 %v2936_v39, %v1351_v22 }
 0x1aa   : > { %v1353_v30 = vpop.f32.mrf.mxu0  ;;  %v1578_v34 = vpop.f32.mrf.mxu1 }
 0x1ab   : > { %v3216_v32 = vadd.f32 %v1576_v27, %v1352_v26 }
 0x1ac   : > { %v1356_v35 = vpop.f32.mrf.mxu0  ;;  %v1581_v47 = vpop.f32.mrf.mxu1 }
 0x1ad   : > { %v1357_v1 = vadd.f32 %v2469_v37, %v1356_v35 }
 0x1ae   : > { %v1358_v48 = vpop.f32.mrf.mxu0  ;;  %v1583_v54 = vpop.f32.mrf.mxu1 }
 0x1af   : > { %v3221_v50 = vadd.f32 %v1581_v47, %v1357_v1 }
 0x1b0   : > { %v1359_v56 = vpop.f32.mrf.mxu0  ;;  %v1584_v58 = vpop.f32.mrf.mxu1 }
 0x1b1   : > { %v1360_v57 = vadd.f32 %v2469_v37, %v1359_v56 }
 0x1b2   : > { %v1361_v39 = vpop.f32.mrf.mxu0  ;;  %v1586_v4 = vpop.f32.mrf.mxu1 }
 0x1b3   : > { %v3223_v59 = vadd.f32 %v1584_v58, %v1360_v57 }
 0x1b4   : > { %v1364_v7 = vpop.f32.mrf.mxu0  ;;  %v1589_v9 = vpop.f32.mrf.mxu1 }
 0x1b5   : > { %v1365_v8 = vadd.f32 %v2469_v37, %v1364_v7 }
 0x1b6   : > { %v1366_v10 = vpop.f32.mrf.mxu0  ;;  %v1591_v19 = vpop.f32.mrf.mxu1 }
 0x1b7   : > { %v3225_v13 = vadd.f32 %v1589_v9, %v1365_v8 }
 0x1b8   : > { %v1367_v22 = vpop.f32.mrf.mxu0  ;;  %v1592_v27 = vpop.f32.mrf.mxu1 }
 0x1b9   : > { %v1368_v26 = vadd.f32 %v2469_v37, %v1367_v22 }
 0x1ba   : > { %v1369_v30 = vpop.f32.mrf.mxu0  ;;  %v1594_v35 = vpop.f32.mrf.mxu1 }
 0x1bb   : > { %v3227_v34 = vadd.f32 %v1592_v27, %v1368_v26 }
 0x1bc   : > { %v1372_v1 = vpop.f32.mrf.mxu0  ;;  %v1597_v48 = vpop.f32.mrf.mxu1 }
 0x1bd   : > { %v1373_v47 = vadd.f32 %v2469_v37, %v1372_v1 }
 0x1be   : > { %v1374_v54 = vpop.f32.mrf.mxu0  ;;  %v1599_v57 = vpop.f32.mrf.mxu1 }
 0x1bf   : > { %v1598_v56 = vadd.f32 %v1597_v48, %v1373_v47 }
 0x1c0   : > { %v1375_v58 = vpop.f32.mrf.mxu0  ;;  %v1600_v4 = vpop.f32.mrf.mxu1 }
 0x1c1   : > { %v1376_v39 = vadd.f32 %v2469_v37, %v1375_v58 }
 0x1c2   : > { %v1377_v7 = vpop.f32.mrf.mxu0  ;;  %v1602_v9 = vpop.f32.mrf.mxu1 }
 0x1c3   : > { %v1601_v8 = vadd.f32 %v1600_v4, %v1376_v39 }
 0x1c4   : > { %v1380_v10 = vpop.f32.mrf.mxu0  ;;  %v1605_v22 = vpop.f32.mrf.mxu1 }
 0x1c5   : > { %v1381_v19 = vadd.f32 %v2469_v37, %v1380_v10 }
 0x1c6   : > { %v1382_v40 = vpop.f32.mrf.mxu0  ;;  %v1607_v26 = vpop.f32.mrf.mxu1 }
 0x1c7   : > { %v1606_v30 = vadd.f32 %v1605_v22, %v1381_v19 }
 0x1c8   : > { %v1383_v27 = vpop.f32.mrf.mxu0  ;;  %v1608_v28 = vpop.f32.mrf.mxu1 }
 0x1c9   : > { %v1384_v35 = vadd.f32 %v2469_v37, %v1383_v27 }
 0x1ca   : > { %v1385_v1 = vpop.f32.mrf.mxu0  ;;  %v1610_v54 = vpop.f32.mrf.mxu1 }
 0x1cb   : > { %v1609_v15 = vadd.f32 %v1608_v28, %v1384_v35 }
 0x1cc   : > { %v3229_v47 = vpop.f32.mrf.mxu0  ;;  %v1790_v48 = vpop.f32.mrf.mxu1 }
 0x1cd   : > { %v3232_v57 = vadd.f32 %v1790_v48, %v3207_v55 }
 0x1ce   : > { %v1648_v58 = vpop.f32.mrf.mxu0  ;;  %v1792_v39 = vpop.f32.mrf.mxu1 }
 0x1d0   : > { %v3234_v4 = vpop.f32.mrf.mxu0  ;;  %v1793_v7 = vpop.f32.mrf.mxu1 }
 0x1d1   : > { %v3237_v40 = vadd.f32 %v1793_v7, %v3210_v5 }
 0x1d2   : > { %v1651_v9 = vpop.f32.mrf.mxu0  ;;  %v1795_v37 = vpop.f32.mrf.mxu1 }
 0x1d3   : > { %3452 = vst [vmem:[#allocation6_spill] sm:$0xff] %v3237_v40 }
 0x1d4   : > { %v1654_v10 = vpop.f32.mrf.mxu0  ;;  %v1798_v19 = vpop.f32.mrf.mxu1 }
 0x1d5   : > { %v3240_v28 = vadd.f32 %v1798_v19, %v3213_v18 }
 0x1d6   : > { %v1656_v22 = vpop.f32.mrf.mxu0  ;;  %v1800_v26 = vpop.f32.mrf.mxu1 }
 0x1d8   : > { %v1657_v27 = vpop.f32.mrf.mxu0  ;;  %v1801_v55 = vpop.f32.mrf.mxu1 }
 0x1d9   : > { %v3243_v35 = vadd.f32 %v1801_v55, %v3216_v32 }
 0x1da   : > { %v1659_v1 = vpop.f32.mrf.mxu0  ;;  %v1803_v54 = vpop.f32.mrf.mxu1 }
 0x1dc   : > { %v3245_v48 = vpop.f32.mrf.mxu0  ;;  %v1806_v5 = vpop.f32.mrf.mxu1 }
 0x1dd   : > { %v3248_v58 = vadd.f32 %v1806_v5, %v3221_v50 }
 0x1de   : > { %v1664_v39 = vpop.f32.mrf.mxu0  ;;  %v1808_v7 = vpop.f32.mrf.mxu1 }
 0x1df   : > { %3453 = vst [vmem:[#allocation7_spill] sm:$0xff] %v3248_v58 }
 0x1e0   : > { %v3250_v9 = vpop.f32.mrf.mxu0  ;;  %v1809_v18 = vpop.f32.mrf.mxu1 }
 0x1e1   : > { %v3253_v37 = vadd.f32 %v1809_v18, %v3223_v59 }
 0x1e2   : > { %v1667_v19 = vpop.f32.mrf.mxu0  ;;  %v1811_v22 = vpop.f32.mrf.mxu1 }
 0x1e3   : > { %3454 = vst [vmem:[#allocation8_spill] sm:$0xff] %v3253_v37 }
 0x1e4   : > { %v1670_v32 = vpop.f32.mrf.mxu0  ;;  %v1814_v26 = vpop.f32.mrf.mxu1 }
 0x1e5   : > { %v3256_v55 = vadd.f32 %v1814_v26, %v3225_v13 }
 0x1e6   : > { %v1672_v1 = vpop.f32.mrf.mxu0  ;;  %v1816_v54 = vpop.f32.mrf.mxu1 }
 0x1e7   : > { %3455 = vst [vmem:[#allocation9_spill] sm:$0xff] %v3256_v55 }
 0x1e8   : > { %v1673_v2 = vpop.f32.mrf.mxu0  ;;  %v1817_v50 = vpop.f32.mrf.mxu1 }
 0x1e9   : > { %v3259_v5 = vadd.f32 %v1817_v50, %v3227_v34 }
 0x1ea   : > { %v1675_v39 = vpop.f32.mrf.mxu0  ;;  %v1819_v7 = vpop.f32.mrf.mxu1 }
 0x1eb   : > { %3456 = vst [vmem:[#allocation10_spill] sm:$0xff] %v3259_v5 }
 0x1ec   : > { %v3261_v58 = vpop.f32.mrf.mxu0  ;;  %v1822_v59 = vpop.f32.mrf.mxu1 }
 0x1ed   : > { %v3263_v18 = vadd.f32 %v1822_v59, %v1598_v56 }
 0x1ee   : > { %v1680_v19 = vpop.f32.mrf.mxu0  ;;  %v1824_v22 = vpop.f32.mrf.mxu1 }
 0x1ef   : > { %3457 = vst [vmem:[#allocation11_spill] sm:$0xff] %v3263_v18  ;;  %v1655_v22 = vadd.f32 %v1654_v10, %v2963_v12  ;;  %v1658_v12 = vadd.f32 %v1657_v27, %v2968_v24 }
 0x1f0   : > { %v3265_v37 = vpop.f32.mrf.mxu0  ;;  %v1825_v13 = vpop.f32.mrf.mxu1 }
 0x1f1   : > { %v3267_v26 = vadd.f32 %v1825_v13, %v1601_v8  ;;  %v1647_v13 = vadd.f32 %v3229_v47, %v2949_v52  ;;  %v1650_v52 = vadd.f32 %v3234_v4, %v2954_v63 }
 0x1f2   : > { %v1683_v1 = vpop.f32.mrf.mxu0  ;;  %v1827_v54 = vpop.f32.mrf.mxu1 }
 0x1f4   : > { %v1686_v55 = vpop.f32.mrf.mxu0  ;;  %v1830_v34 = vpop.f32.mrf.mxu1 }
 0x1f5   : > { %v3269_v50 = vadd.f32 %v1830_v34, %v1606_v30 }
 0x1f6   : > { %v1688_v39 = vpop.f32.mrf.mxu0  ;;  %v1832_v7 = vpop.f32.mrf.mxu1 }
 0x1f8   : > { %v1689_v5 = vpop.f32.mrf.mxu0  ;;  %v1833_v40 = vpop.f32.mrf.mxu1 }
 0x1f9   : > { %v3271_v56 = vadd.f32 %v1833_v40, %v1609_v15 }
 0x1fa   : > { %v1691_v59 = vpop.f32.mrf.mxu0  ;;  %v1835_v19 = vpop.f32.mrf.mxu1 }
 0x1fb   : > { %v1671_v19 = vadd.f32 %v1670_v32, %v2991_v61 }
 0x1fc   : > { %v3274_v18 = vpop.f32.mrf.mxu0  ;;  %v2331_v8 = vpop.f32.mrf.mxu1 }
 0x1fd   : > { %v1880_v1 = vadd.f32 %v2331_v8, %v1655_v22 }
 0x1fe   : > { %v1696_v30 = vpop.f32.mrf.mxu0  ;;  %v1871_v15 = vpop.f32.mrf.mxu1 }
 0x1ff   : > { %v2064_v40 = vmax.f32 %v1880_v1, 0.0  ;;  %v1872_v10 = vadd.f32 %v1871_v15, %v1647_v13  ;;  %v1663_v13 = vadd.f32 %v3245_v48, %v2977_v36  ;;  %v1674_v15 = vadd.f32 %v1673_v2, %v2996_v11 }
 0x200   : > { %v3285_v54 = vpop.f32.mrf.mxu0  ;;  %v2332_v34 = vpop.f32.mrf.mxu1 }
 0x201   : > { %2113 = vst.msk [vmem:[%s3282_s27 + $0x10] sm:$0xff] %vm2110_vm1, %v2064_v40  ;;  %v2062_v47 = vmax.f32 %v1872_v10, 0.0  ;;  %v1883_v39 = vadd.f32 %v2332_v34, %v1658_v12  ;;  %v1666_v10 = vadd.f32 %v3250_v9, %v2982_v49 }
 0x202   : > { %v1699_v7 = vpop.f32.mrf.mxu0  ;;  %v1874_v59 = vpop.f32.mrf.mxu1 }
 0x203   : > { %2111 = vst.msk [vmem:[%s3282_s27] sm:$0xff] %vm2110_vm1, %v2062_v47  ;;  %v2065_v24 = vmax.f32 %v1883_v39, 0.0  ;;  %v1875_v27 = vadd.f32 %v1874_v59, %v1650_v52  ;;  %v1687_v47 = vadd.f32 %v1686_v55, %v3020_v53  ;;  %v1679_v59 = vadd.f32 %v3261_v58, %v3005_v25 }
 0x204   : > { %v1702_v22 = vpop.f32.mrf.mxu0  ;;  %v2335_v8 = vpop.f32.mrf.mxu1 }
 0x205   : > { %2114 = vst.msk [vmem:[%s3282_s27 + $0x18] sm:$0xff] %vm2110_vm1, %v2065_v24  ;;  %v2063_v63 = vmax.f32 %v1875_v27, 0.0  ;;  %v1896_v4 = vadd.f32 %v2335_v8, %v1671_v19  ;;  %v1690_v27 = vadd.f32 %v1689_v5, %v3025_v3 }
 0x206   : > { %v1704_v1 = vpop.f32.mrf.mxu0  ;;  %v1887_v30 = vpop.f32.mrf.mxu1 }
 0x207   : > { %2112 = vst.msk [vmem:[%s3282_s27 + $0x8] sm:$0xff] %vm2110_vm1, %v2063_v63  ;;  %v2068_v61 = vmax.f32 %v1896_v4, 0.0  ;;  %v1888_v32 = vadd.f32 %v1887_v30, %v1663_v13  ;;  %v1682_v63 = vadd.f32 %v3265_v37, %v3010_v38  ;;  %v1703_v30 = vadd.f32 %v1702_v22, %v3052_v46 }
 0x208   : > { %v1705_v12 = vpop.f32.mrf.mxu0  ;;  %v2336_v40 = vpop.f32.mrf.mxu1 }
 0x209   : > { %2117 = vst.msk [vmem:[%s3282_s27 + $0x30] sm:$0xff] %vm2110_vm1, %v2068_v61  ;;  %v2066_v36 = vmax.f32 %v1888_v32, 0.0  ;;  %v1899_v48 = vadd.f32 %v2336_v40, %v1674_v15  ;;  %v1695_v32 = vadd.f32 %v3274_v18, %v3036_v17 }
 0x20a   : > { %v1707_v34 = vpop.f32.mrf.mxu0  ;;  %v1890_v52 = vpop.f32.mrf.mxu1 }
 0x20b   : > { %2115 = vst.msk [vmem:[%s3282_s27 + $0x20] sm:$0xff] %vm2110_vm1, %v2066_v36  ;;  %v2069_v11 = vmax.f32 %v1899_v48, 0.0  ;;  %v1891_v2 = vadd.f32 %v1890_v52, %v1666_v10  ;;  %v1706_v36 = vadd.f32 %v1705_v12, %v3057_v60  ;;  %v1698_v52 = vadd.f32 %v3285_v54, %v3041_v31 }
 0x20c   : > { %v1710_v39 = vpop.f32.mrf.mxu0  ;;  %v2339_v7 = vpop.f32.mrf.mxu1 }
 0x20d   : > { %2118 = vst.msk [vmem:[%s3282_s27 + $0x38] sm:$0xff] %vm2110_vm1, %v2069_v11  ;;  %v2067_v49 = vmax.f32 %v1891_v2, 0.0  ;;  %v1912_v9 = vadd.f32 %v2339_v7, %v1687_v47 }
 0x20e   : > { %v1712_v19 = vpop.f32.mrf.mxu0  ;;  %v1903_v24 = vpop.f32.mrf.mxu1 }
 0x20f   : > { %2116 = vst.msk [vmem:[%s3282_s27 + $0x28] sm:$0xff] %vm2110_vm1, %v2067_v49  ;;  %v2072_v53 = vmax.f32 %v1912_v9, 0.0  ;;  %v1904_v55 = vadd.f32 %v1903_v24, %v1679_v59  ;;  %v1711_v49 = vadd.f32 %v1710_v39, %v3068_v14 }
 0x210   : > { %v1713_v8 = vpop.f32.mrf.mxu0  ;;  %v2340_v13 = vpop.f32.mrf.mxu1 }
 0x211   : > { %2121 = vst.msk [vmem:[%s3282_s27 + $0x50] sm:$0xff] %vm2110_vm1, %v2072_v53  ;;  %v2070_v25 = vmax.f32 %v1904_v55, 0.0  ;;  %v1915_v58 = vadd.f32 %v2340_v13, %v1690_v27  ;;  %v1714_v13 = vadd.f32 %v1713_v8, %v3073_v29 }
 0x212   : > { %v1715_v4 = vpop.f32.mrf.mxu0  ;;  %v1906_v1 = vpop.f32.mrf.mxu1 }
 0x213   : > { %2119 = vst.msk [vmem:[%s3282_s27 + $0x40] sm:$0xff] %vm2110_vm1, %v2070_v25  ;;  %v2073_v3 = vmax.f32 %v1915_v58, 0.0  ;;  %v1907_v5 = vadd.f32 %v1906_v1, %v1682_v63 }
 0x214   : > { %v1718_v15 = vpop.f32.mrf.mxu0  ;;  %v2343_v61 = vpop.f32.mrf.mxu1 }
 0x215   : > { %2122 = vst.msk [vmem:[%s3282_s27 + $0x58] sm:$0xff] %vm2110_vm1, %v2073_v3  ;;  %v2071_v38 = vmax.f32 %v1907_v5, 0.0  ;;  %v1928_v37 = vadd.f32 %v2343_v61, %v1703_v30  ;;  %v1719_v2 = vadd.f32 %v1718_v15, %v3084_v45 }
 0x216   : > { %v1720_v40 = vpop.f32.mrf.mxu0  ;;  %v1919_v10 = vpop.f32.mrf.mxu1 }
 0x217   : > { %2120 = vst.msk [vmem:[%s3282_s27 + $0x48] sm:$0xff] %vm2110_vm1, %v2071_v38  ;;  %v2076_v46 = vmax.f32 %v1928_v37, 0.0  ;;  %v1920_v22 = vadd.f32 %v1919_v10, %v1695_v32 }
 0x218   : > { %v1721_v48 = vpop.f32.mrf.mxu0  ;;  %v2344_v34 = vpop.f32.mrf.mxu1 }
 0x219   : > { %2125 = vst.msk [vmem:[%s3282_s27 + $0x70] sm:$0xff] %vm2110_vm1, %v2076_v46  ;;  %v2074_v17 = vmax.f32 %v1920_v22, 0.0  ;;  %v1931_v18 = vadd.f32 %v2344_v34, %v1706_v36  ;;  %v1722_v24 = vadd.f32 %v1721_v48, %v3089_v62 }
 0x21a   : > { %v1723_v47 = vpop.f32.mrf.mxu0  ;;  %v1922_v11 = vpop.f32.mrf.mxu1 }
 0x21b   : > { %2123 = vst.msk [vmem:[%s3282_s27 + $0x60] sm:$0xff] %vm2110_vm1, %v2074_v17  ;;  %v2077_v60 = vmax.f32 %v1931_v18, 0.0  ;;  %v1923_v12 = vadd.f32 %v1922_v11, %v1698_v52 }
 0x21c   : > { %v1726_v7 = vpop.f32.mrf.mxu0  ;;  %v2347_v59 = vpop.f32.mrf.mxu1 }
 0x21d   : > { %2126 = vst.msk [vmem:[%s3282_s27 + $0x78] sm:$0xff] %vm2110_vm1, %v2077_v60  ;;  %v2075_v31 = vmax.f32 %v1923_v12, 0.0  ;;  %v1944_v54 = vadd.f32 %v2347_v59, %v1719_v2  ;;  %v1727_v3 = vadd.f32 %v1726_v7, %v3100_v16 }
 0x21e   : > { %v1728_v9 = vpop.f32.mrf.mxu0  ;;  %v1935_v19 = vpop.f32.mrf.mxu1 }
 0x21f   : > { %2124 = vst.msk [vmem:[%s3282_s27 + $0x68] sm:$0xff] %vm2110_vm1, %v2075_v31  ;;  %v2080_v45 = vmax.f32 %v1944_v54, 0.0  ;;  %v1936_v27 = vadd.f32 %v1935_v19, %v1711_v49 }
 0x220   : > { %v1729_v53 = vpop.f32.mrf.mxu0  ;;  %v2348_v55 = vpop.f32.mrf.mxu1 }
 0x221   : > { %2129 = vst.msk [vmem:[%s3282_s27 + $0x90] sm:$0xff] %vm2110_vm1, %v2080_v45  ;;  %v2078_v14 = vmax.f32 %v1936_v27, 0.0  ;;  %v1947_v39 = vadd.f32 %v2348_v55, %v1722_v24  ;;  %v1730_v40 = vadd.f32 %v1729_v53, %v3105_v33 }
 0x222   : > { %v1731_v63 = vpop.f32.mrf.mxu0  ;;  %v1938_v25 = vpop.f32.mrf.mxu1 }
 0x223   : > { %2127 = vst.msk [vmem:[%s3282_s27 + $0x80] sm:$0xff] %vm2110_vm1, %v2078_v14  ;;  %v2081_v58 = vmax.f32 %v1947_v39, 0.0  ;;  %v1939_v62 = vadd.f32 %v1938_v25, %v1714_v13 }
 0x224   : > { %v1734_v4 = vpop.f32.mrf.mxu0  ;;  %v2351_v30 = vpop.f32.mrf.mxu1 }
 0x225   : > { %v1735_v1 = vadd.f32 %v1734_v4, %v3116_v51  ;;  %2130 = vst.msk [vmem:[%s3282_s27 + $0x98] sm:$0xff] %vm2110_vm1, %v2081_v58  ;;  %v2079_v29 = vmax.f32 %v1939_v62, 0.0 }
 0x226   : > { %v1736_v8 = vpop.f32.mrf.mxu0  ;;  %v1951_v15 = vpop.f32.mrf.mxu1 }
 0x227   : > { %v1960_v5 = vadd.f32 %v2351_v30, %v1735_v1  ;;  %2128 = vst.msk [vmem:[%s3282_s27 + $0x88] sm:$0xff] %vm2110_vm1, %v2079_v29  ;;  %v1952_v61 = vadd.f32 %v1951_v15, %v1727_v3 }
 0x228   : > { %v1737_v32 = vpop.f32.mrf.mxu0  ;;  %v2352_v51 = vpop.f32.mrf.mxu1 }
 0x229   : > { %v2084_v38 = vmax.f32 %v1960_v5, 0.0  ;;  %v1738_v37 = vadd.f32 %v1737_v32, %v3121_v6  ;;  %v2082_v16 = vmax.f32 %v1952_v61, 0.0 }
 0x22a   : > { %v1739_v10 = vpop.f32.mrf.mxu0  ;;  %v1954_v46 = vpop.f32.mrf.mxu1 }
 0x22b   : > { %2133 = vst.msk [vmem:[%s3282_s27 + $0xb0] sm:$0xff] %vm2110_vm1, %v2084_v38  ;;  %v1963_v36 = vadd.f32 %v2352_v51, %v1738_v37  ;;  %2131 = vst.msk [vmem:[%s3282_s27 + $0xa0] sm:$0xff] %vm2110_vm1, %v2082_v16  ;;  %v1955_v22 = vadd.f32 %v1954_v46, %v1730_v40 }
 0x22c   : > { %v1742_v48 = vpop.f32.mrf.mxu0  ;;  %v2355_v6 = vpop.f32.mrf.mxu1 }
 0x22d   : > { %v2085_v34 = vmax.f32 %v1963_v36, 0.0  ;;  %v1743_v52 = vadd.f32 %v1742_v48, %v3132_v23  ;;  %v2083_v17 = vmax.f32 %v1955_v22, 0.0 }
 0x22e   : > { %v1744_v18 = vpop.f32.mrf.mxu0  ;;  %v1967_v33 = vpop.f32.mrf.mxu1 }
 0x22f   : > { %2134 = vst.msk [vmem:[%s3282_s27 + $0xb8] sm:$0xff] %vm2110_vm1, %v2085_v34  ;;  %2132 = vst.msk [vmem:[%s3282_s27 + $0xa8] sm:$0xff] %vm2110_vm1, %v2083_v17  ;;  %v1968_v47 = vadd.f32 %v1967_v33, %v1743_v52  ;;  %v3458_v17 = vld [vmem:[#allocation6_spill] sm:$0xff] }
 0x230   : > { %v1745_v11 = vpop.f32.mrf.mxu0  ;;  %v2356_v60 = vpop.f32.mrf.mxu1 }
 0x231   : > { %v1746_v2 = vadd.f32 %v1745_v11, %v3137_v42  ;;  %v2086_v12 = vmax.f32 %v1968_v47, 0.0  ;;  %v3459_v47 = vld [vmem:[#allocation2_spill] sm:$0xff] }
 0x232   : > { %v1747_v7 = vpop.f32.mrf.mxu0  ;;  %v1970_v59 = vpop.f32.mrf.mxu1 }
 0x233   : > { %2135 = vst.msk [vmem:[%s3282_s27 + $0xc0] sm:$0xff] %vm2110_vm1, %v2086_v12  ;;  %v1971_v23 = vadd.f32 %v1970_v59, %v1746_v2 }
 0x234   : > { %v1750_v49 = vpop.f32.mrf.mxu0  ;;  %v2359_v54 = vpop.f32.mrf.mxu1 }
 0x235   : > { %v1751_v31 = vadd.f32 %v1750_v49, %v3148_v0  ;;  %v2087_v9 = vmax.f32 %v1971_v23, 0.0 }
 0x236   : > { %v1752_v19 = vpop.f32.mrf.mxu0  ;;  %v1983_v45 = vpop.f32.mrf.mxu1 }
 0x237   : > { %v1976_v24 = vadd.f32 %v2355_v6, %v1751_v31  ;;  %2136 = vst.msk [vmem:[%s3282_s27 + $0xc8] sm:$0xff] %vm2110_vm1, %v2087_v9  ;;  %v3461_v31 = vld [vmem:[#allocation7_spill] sm:$0xff] }
 0x238   : > { %v1753_v42 = vpop.f32.mrf.mxu0  ;;  %v2360_v55 = vpop.f32.mrf.mxu1 }
 0x239   : > { %v2088_v27 = vmax.f32 %v1976_v24, 0.0  ;;  %v1754_v53 = vadd.f32 %v1753_v42, %v3153_v20  ;;  %v3462_v24 = vld [vmem:[#allocation3_spill] sm:$0xff] }
 0x23a   : > { %v1755_v13 = vpop.f32.mrf.mxu0  ;;  %v1986_v39 = vpop.f32.mrf.mxu1 }
 0x23b   : > { %2137 = vst.msk [vmem:[%s3282_s27 + $0xd0] sm:$0xff] %vm2110_vm1, %v2088_v27  ;;  %v1979_v14 = vadd.f32 %v2356_v60, %v1754_v53  ;;  %v3460_v60 = vld [vmem:[#allocation9_spill] sm:$0xff]  ;;  %v3463_v53 = vld [vmem:[#allocation10_spill] sm:$0xff] }
 0x23c   : > { %v1758_v0 = vpop.f32.mrf.mxu0  ;;  %v3374_v58 = vpop.f32.mrf.mxu1 }
 0x23d   : > { %v2089_v63 = vmax.f32 %v1979_v14, 0.0  ;;  %v1759_v25 = vadd.f32 %v1758_v0, %v3164_v41 }
 0x23e   : > { %v1760_v62 = vpop.f32.mrf.mxu0  ;;  %v1999_v1 = vpop.f32.mrf.mxu1 }
 0x23f   : > { %2138 = vst.msk [vmem:[%s3282_s27 + $0xd8] sm:$0xff] %vm2110_vm1, %v2089_v63  ;;  %v1984_v4 = vadd.f32 %v1983_v45, %v1759_v25  ;;  %v3464_v63 = vld [vmem:[#allocation8_spill] sm:$0xff] }
 0x240   : > { %v1761_v20 = vpop.f32.mrf.mxu0  ;;  %v3379_v29 = vpop.f32.mrf.mxu1 }
 0x241   : > { %v2090_v30 = vmax.f32 %v1984_v4, 0.0  ;;  %v1762_v3 = vadd.f32 %v1761_v20, %v3169_v44 }
 0x242   : > { %v1763_v8 = vpop.f32.mrf.mxu0  ;;  %v2002_v15 = vpop.f32.mrf.mxu1 }
 0x243   : > { %2139 = vst.msk [vmem:[%s3282_s27 + $0xe0] sm:$0xff] %vm2110_vm1, %v2090_v30  ;;  %v1987_v5 = vadd.f32 %v1986_v39, %v1762_v3 }
 0x244   : > { %v1766_v41 = vpop.f32.mrf.mxu0  ;;  %v2367_v38 = vpop.f32.mrf.mxu1 }
 0x245   : > { %v2091_v61 = vmax.f32 %v1987_v5, 0.0  ;;  %v1767_v32 = vadd.f32 %v1766_v41, %v3180_v21  ;;  %v2024_v37 = vadd.f32 %v2367_v38, %v3240_v28 }
 0x246   : > { %v1768_v51 = vpop.f32.mrf.mxu0  ;;  %v2015_v40 = vpop.f32.mrf.mxu1 }
 0x247   : > { %2140 = vst.msk [vmem:[%s3282_s27 + $0xe8] sm:$0xff] %vm2110_vm1, %v2091_v61  ;;  %v1992_v44 = vadd.f32 %v2359_v54, %v1767_v32  ;;  %v2100_v16 = vmax.f32 %v2024_v37, 0.0  ;;  %v2016_v10 = vadd.f32 %v2015_v40, %v3232_v57  ;;  %v3466_v32 = vld [vmem:[#allocation11_spill] sm:$0xff] }
 0x248   : > { %v1769_v36 = vpop.f32.mrf.mxu0  ;;  %v2368_v48 = vpop.f32.mrf.mxu1 }
 0x249   : > { %v2092_v46 = vmax.f32 %v1992_v44, 0.0  ;;  %v1770_v22 = vadd.f32 %v1769_v36, %v3185_v43  ;;  %2149 = vst.msk [vmem:[%s3282_s27 + $0x130] sm:$0xff] %vm2110_vm1, %v2100_v16  ;;  %v2098_v21 = vmax.f32 %v2016_v10, 0.0  ;;  %v2027_v28 = vadd.f32 %v2368_v48, %v3243_v35  ;;  %v3467_v44 = vld [vmem:[#allocation5_spill] sm:$0xff] }
 0x24a   : > { %v1771_v34 = vpop.f32.mrf.mxu0  ;;  %v2018_v6 = vpop.f32.mrf.mxu1 }
 0x24b   : > { %2141 = vst.msk [vmem:[%s3282_s27 + $0xf0] sm:$0xff] %vm2110_vm1, %v2092_v46  ;;  %v1995_v52 = vadd.f32 %v2360_v55, %v1770_v22  ;;  %2147 = vst.msk [vmem:[%s3282_s27 + $0x120] sm:$0xff] %vm2110_vm1, %v2098_v21  ;;  %v2101_v57 = vmax.f32 %v2027_v28, 0.0  ;;  %v2019_v18 = vadd.f32 %v2018_v6, %v3458_v17 }
 0x24c   : > { %v1774_v43 = vpop.f32.mrf.mxu0  ;;  %v2371_v2 = vpop.f32.mrf.mxu1 }
 0x24d   : > { %v2093_v33 = vmax.f32 %v1995_v52, 0.0  ;;  %v1775_v11 = vadd.f32 %v1774_v43, %v3459_v47  ;;  %2150 = vst.msk [vmem:[%s3282_s27 + $0x138] sm:$0xff] %vm2110_vm1, %v2101_v57  ;;  %v2099_v35 = vmax.f32 %v2019_v18, 0.0  ;;  %v2040_v12 = vadd.f32 %v2371_v2, %v3460_v60 }
 0x24e   : > { %v1776_v7 = vpop.f32.mrf.mxu0  ;;  %v2031_v23 = vpop.f32.mrf.mxu1 }
 0x24f   : > { %2142 = vst.msk [vmem:[%s3282_s27 + $0xf8] sm:$0xff] %vm2110_vm1, %v2093_v33  ;;  %v2000_v59 = vadd.f32 %v1999_v1, %v1775_v11  ;;  %2148 = vst.msk [vmem:[%s3282_s27 + $0x128] sm:$0xff] %vm2110_vm1, %v2099_v35  ;;  %v2104_v49 = vmax.f32 %v2040_v12, 0.0  ;;  %v2032_v54 = vadd.f32 %v2031_v23, %v3461_v31  ;;  %v3465_v1 = vld [vmem:[#allocation4_spill] sm:$0xff] }
 0x250   : > { %v1777_v9 = vpop.f32.mrf.mxu0  ;;  %v2372_v42 = vpop.f32.mrf.mxu1 }
 0x251   : > { %v2094_v19 = vmax.f32 %v2000_v59, 0.0  ;;  %v1778_v45 = vadd.f32 %v1777_v9, %v3462_v24  ;;  %2153 = vst.msk [vmem:[%s3282_s27 + $0x150] sm:$0xff] %vm2110_vm1, %v2104_v49  ;;  %v2102_v27 = vmax.f32 %v2032_v54, 0.0  ;;  %v2043_v55 = vadd.f32 %v2372_v42, %v3463_v53 }
 0x252   : > { %v1779_v13 = vpop.f32.mrf.mxu0  ;;  %v2034_v39 = vpop.f32.mrf.mxu1 }
 0x253   : > { %2143 = vst.msk [vmem:[%s3282_s27 + $0x100] sm:$0xff] %vm2110_vm1, %v2094_v19  ;;  %v2003_v14 = vadd.f32 %v2002_v15, %v1778_v45  ;;  %2151 = vst.msk [vmem:[%s3282_s27 + $0x140] sm:$0xff] %vm2110_vm1, %v2102_v27  ;;  %v2105_v0 = vmax.f32 %v2043_v55, 0.0  ;;  %v2035_v25 = vadd.f32 %v2034_v39, %v3464_v63 }
 0x254   : > { %v1782_v62 = vpop.f32.mrf.mxu0  ;;  %v2375_v30 = vpop.f32.mrf.mxu1 }
 0x255   : > { %v2095_v4 = vmax.f32 %v2003_v14, 0.0  ;;  %v1783_v20 = vadd.f32 %v1782_v62, %v3465_v1  ;;  %2154 = vst.msk [vmem:[%s3282_s27 + $0x158] sm:$0xff] %vm2110_vm1, %v2105_v0  ;;  %v2103_v3 = vmax.f32 %v2035_v25, 0.0  ;;  %v2056_v8 = vadd.f32 %v2375_v30, %v3269_v50 }
 0x256   : > { %v1784_v5 = vpop.f32.mrf.mxu0  ;;  %v2047_v41 = vpop.f32.mrf.mxu1 }
 0x257   : > { %2144 = vst.msk [vmem:[%s3282_s27 + $0x108] sm:$0xff] %vm2110_vm1, %v2095_v4  ;;  %v2008_v15 = vadd.f32 %v3374_v58, %v1783_v20  ;;  %2152 = vst.msk [vmem:[%s3282_s27 + $0x148] sm:$0xff] %vm2110_vm1, %v2103_v3  ;;  %v2108_v61 = vmax.f32 %v2056_v8, 0.0  ;;  %v2048_v38 = vadd.f32 %v2047_v41, %v3466_v32 }
 0x258   : > { %v1785_v37 = vpop.f32.mrf.mxu0  ;;  %v2376_v50 = vpop.f32.mrf.mxu1 }
 0x259   : > { %v2096_v51 = vmax.f32 %v2008_v15, 0.0  ;;  %v1786_v40 = vadd.f32 %v1785_v37, %v3467_v44  ;;  %2157 = vst.msk [vmem:[%s3282_s27 + $0x170] sm:$0xff] %vm2110_vm1, %v2108_v61  ;;  %v2106_v16 = vmax.f32 %v2048_v38, 0.0  ;;  %v2059_v58 = vadd.f32 %v2376_v50, %v3271_v56 }
 0x25a   : > { %v1787_v10 = vpop.f32.mrf.mxu0  ;;  %v2050_v46 = vpop.f32.mrf.mxu1 }
 0x25b   : > { %2145 = vst.msk [vmem:[%s3282_s27 + $0x110] sm:$0xff] %vm2110_vm1, %v2096_v51  ;;  %v2011_v36 = vadd.f32 %v3379_v29, %v1786_v40  ;;  %2155 = vst.msk [vmem:[%s3282_s27 + $0x160] sm:$0xff] %vm2110_vm1, %v2106_v16  ;;  %v2109_v22 = vmax.f32 %v2059_v58, 0.0  ;;  %v2051_v48 = vadd.f32 %v2050_v46, %v3267_v26 }
 0x25d   : > { %v2097_v21 = vmax.f32 %v2011_v36, 0.0  ;;  %2158 = vst.msk [vmem:[%s3282_s27 + $0x178] sm:$0xff] %vm2110_vm1, %v2109_v22  ;;  %v2107_v28 = vmax.f32 %v2051_v48, 0.0 }
 0x25f   : > { %2146 = vst.msk [vmem:[%s3282_s27 + $0x118] sm:$0xff] %vm2110_vm1, %v2097_v21  ;;  %2156 = vst.msk [vmem:[%s3282_s27 + $0x168] sm:$0xff] %vm2110_vm1, %v2107_v28 }
 0x260 PF: > { %s13_s12 = sadd.s32 1, %s2476_s12  }
 0x261   : > { %p10_p4 = scmp.ge.s32.totalorder %s13_s12, 5  }
 0x263   :  { %12 = sbr.rel (!%p10_p4) target bundleno = 1 (0x1), region = 62 }

// kernel: clasic_forward.14
= control target key start
LH: loop header
LB: loop body
LE: loop exit
PB: predicated region body
PF: predicated region fallthrough
CT: control target
= control target key end

     0   :  { %s257_s6 = smov 0   ;;  %s308_s0 = inlined_call_operand.vmem [shape: f32[2,6,2,6,256], index: 0, kind: input, shape index: {}]   ;;  %s309_s1 = inlined_call_operand.vmem [shape: f32[2,6,6,128], index: 1, kind: output, shape index: {}]  }
   0x1 LB: > { %s220_s7 = sadd.s32 4294967295, %s245_s6   ;;  %p224_p0 = scmp.ge.s32.totalorder %s245_s6, 1  ;;  %s245_s6 = sphi %s257_s6, %s11_s6  }
   0x2   : > { %p87_p1 = scmp.lt.s32.totalorder %s245_s6, 3 }
   0x4   : > { %p88_p2 = pnand %p224_p0, %p87_p1 }
   0x5   : > { %p107_p3 = scmp.lt.s32.totalorder (!%p88_p2), %s220_s7, 1 }
   0x6   : > { %91 = sbr.rel (%p88_p2) target bundleno = 29 (0x1d), region = 24 }
   0xb   : > { %s311_s7 = smov (!%p107_p3, %s220_s7), 1 }
   0xc   : > { %s229_s8 = smul.u32 192, %s311_s7 }
   0xd   : > { %s230_s12 = smul.u32 48, %s311_s7 }
   0xe   : > { %s268_s11 = scalar_lea.vmem %s308_s0, %s229_s8 }
   0xf   : > { %v117_v0 = vld [vmem:[%s268_s11] sm:$0x3f]  ;;  %v118_v1 = vld [vmem:[%s268_s11 + $0x8] sm:$0x3f]  ;;  %v119_v2 = vld [vmem:[%s268_s11 + $0x10] sm:$0x3f]  ;;  %s282_s15 = scalar_lea.vmem %s309_s1, %s230_s12 }
  0x10   : > { %v120_v3 = vld [vmem:[%s268_s11 + $0x18] sm:$0x3f]  ;;  %v141_v4 = vmax.f32 %v117_v0, %v119_v2  ;;  %v121_v5 = vld [vmem:[%s268_s11 + $0x20] sm:$0x3f]  ;;  %v122_v6 = vld [vmem:[%s268_s11 + $0x28] sm:$0x3f] }
  0x11   : > { %v142_v7 = vmax.f32 %v118_v1, %v120_v3  ;;  %v123_v8 = vld [vmem:[%s268_s11 + $0x30] sm:$0x3f]  ;;  %v124_v9 = vld [vmem:[%s268_s11 + $0x38] sm:$0x3f]  ;;  %v125_v10 = vld [vmem:[%s268_s11 + $0x40] sm:$0x3f] }
  0x12   : > { %v143_v11 = vmax.f32 %v121_v5, %v123_v8  ;;  %v144_v12 = vmax.f32 %v122_v6, %v124_v9  ;;  %v126_v13 = vld [vmem:[%s268_s11 + $0x48] sm:$0x3f]  ;;  %v127_v14 = vld [vmem:[%s268_s11 + $0x50] sm:$0x3f]  ;;  %v128_v15 = vld [vmem:[%s268_s11 + $0x58] sm:$0x3f] }
  0x13   : > { %v153_v16 = vmax.f32 %v141_v4, %v142_v7  ;;  %v145_v17 = vmax.f32 %v125_v10, %v127_v14  ;;  %v146_v18 = vmax.f32 %v126_v13, %v128_v15  ;;  %v129_v19 = vld [vmem:[%s268_s11 + $0x60] sm:$0x3f]  ;;  %v130_v20 = vld [vmem:[%s268_s11 + $0x68] sm:$0x3f]  ;;  %v131_v21 = vld [vmem:[%s268_s11 + $0x70] sm:$0x3f] }
  0x14   : > { %v154_v22 = vmax.f32 %v143_v11, %v144_v12  ;;  %v132_v23 = vld [vmem:[%s268_s11 + $0x78] sm:$0x3f]  ;;  %v147_v24 = vmax.f32 %v129_v19, %v131_v21  ;;  %v133_v25 = vld [vmem:[%s268_s11 + $0x80] sm:$0x3f]  ;;  %v134_v26 = vld [vmem:[%s268_s11 + $0x88] sm:$0x3f] }
  0x15   : > { %159 = vst [vmem:[%s282_s15] sm:$0x3f] %v153_v16  ;;  %v155_v27 = vmax.f32 %v145_v17, %v146_v18  ;;  %v148_v28 = vmax.f32 %v130_v20, %v132_v23  ;;  %v135_v29 = vld [vmem:[%s268_s11 + $0x90] sm:$0x3f]  ;;  %v136_v30 = vld [vmem:[%s268_s11 + $0x98] sm:$0x3f] }
  0x16   : > { %v137_v31 = vld [vmem:[%s268_s11 + $0xa0] sm:$0x3f]  ;;  %160 = vst [vmem:[%s282_s15 + $0x8] sm:$0x3f] %v154_v22  ;;  %v149_v32 = vmax.f32 %v133_v25, %v135_v29  ;;  %v150_v33 = vmax.f32 %v134_v26, %v136_v30  ;;  %v138_v34 = vld [vmem:[%s268_s11 + $0xa8] sm:$0x3f] }
  0x17   : > { %v139_v35 = vld [vmem:[%s268_s11 + $0xb0] sm:$0x3f]  ;;  %v140_v36 = vld [vmem:[%s268_s11 + $0xb8] sm:$0x3f]  ;;  %161 = vst [vmem:[%s282_s15 + $0x10] sm:$0x3f] %v155_v27  ;;  %v156_v37 = vmax.f32 %v147_v24, %v148_v28 }
  0x18   : > { %v151_v38 = vmax.f32 %v137_v31, %v139_v35  ;;  %v152_v39 = vmax.f32 %v138_v34, %v140_v36  ;;  %v157_v40 = vmax.f32 %v149_v32, %v150_v33 }
  0x19   : > { %162 = vst [vmem:[%s282_s15 + $0x18] sm:$0x3f] %v156_v37 }
  0x1a   : > { %v158_v41 = vmax.f32 %v151_v38, %v152_v39  ;;  %163 = vst [vmem:[%s282_s15 + $0x20] sm:$0x3f] %v157_v40 }
  0x1c   : > { %164 = vst [vmem:[%s282_s15 + $0x28] sm:$0x3f] %v158_v41 }
  0x1d PF: > { %s11_s6 = sadd.s32 1, %s245_s6  }
  0x1e   : > { %p8_p4 = scmp.ge.s32.totalorder %s11_s6, 4  }
  0x20   :  { %10 = sbr.rel (!%p8_p4) target bundleno = 1 (0x1), region = 54 }

// kernel: clasic_forward.13
= control target key start
LH: loop header
LB: loop body
LE: loop exit
PB: predicated region body
PF: predicated region fallthrough
CT: control target
= control target key end

     0   :  { %v1408_v0 = vmov 0   ;;  %vm580_vm0 = vcmask 523264   ;;  %s2420_s1 = inlined_call_operand.vmem [shape: bf16[576,128], index: 1, kind: input, shape index: {}]   ;;  %s2421_s0 = inlined_call_operand.vmem [shape: f32[288,576], index: 0, kind: input, shape index: {}]   ;;  %s2422_s2 = inlined_call_operand.vmem [shape: f32[1,128], index: 2, kind: input, shape index: {}]   ;;  %s2423_s3 = inlined_call_operand.vmem [shape: f32[288,128], index: 3, kind: output, shape index: {}]  }
   0x1   :  { %635 = vmatprep.subr.bf16.mxu0 %v1408_v0  ;;  %812 = vmatprep.subr.bf16.mxu1 %v1408_v0  ;;  %v1372_v1 = vld [vmem:[%s2420_s1 + $0x38] sm:$0xff]   ;;  %v1374_v3 = vld [vmem:[%s2420_s1 + $0x30] sm:$0xff]   ;;  %v1376_v5 = vld [vmem:[%s2420_s1 + $0x28] sm:$0xff]  }
   0x2   :  { %v1373_v2 = vld [vmem:[%s2420_s1 + $0xb8] sm:$0xff]   ;;  %636 = vmatpush1.bf16.msra.mxu0 %v1372_v1  ;;  %v1375_v4 = vld [vmem:[%s2420_s1 + $0xb0] sm:$0xff]   ;;  %v1377_v6 = vld [vmem:[%s2420_s1 + $0xa8] sm:$0xff]  }
   0x3   :  { %813 = vmatpush1.bf16.msra.mxu1 %v1373_v2  ;;  %637 = vmatprep.subr.bf16.mxu0 %v1408_v0  ;;  %v1378_v7 = vld [vmem:[%s2420_s1 + $0x20] sm:$0xff]   ;;  %v1380_v9 = vld [vmem:[%s2420_s1 + $0x18] sm:$0xff]   ;;  %v1382_v11 = vld [vmem:[%s2420_s1 + $0x10] sm:$0xff]  }
   0x4   :  { %814 = vmatprep.subr.bf16.mxu1 %v1408_v0  ;;  %v1379_v8 = vld [vmem:[%s2420_s1 + $0xa0] sm:$0xff]   ;;  %v1381_v10 = vld [vmem:[%s2420_s1 + $0x98] sm:$0xff]   ;;  %v1383_v12 = vld [vmem:[%s2420_s1 + $0x90] sm:$0xff]  }
   0x5   :  { %v1384_v13 = vld [vmem:[%s2420_s1 + $0x8] sm:$0xff]   ;;  %v1386_v15 = vld [vmem:[%s2420_s1] sm:$0xff]   ;;  %v1388_v17 = vld [vmem:[%s2420_s1 + $0x78] sm:$0xff]  }
   0x6   :  { %638 = vmatpush1.bf16.msra.mxu0 %v1374_v3  ;;  %v1385_v14 = vld [vmem:[%s2420_s1 + $0x88] sm:$0xff]   ;;  %v1387_v16 = vld [vmem:[%s2420_s1 + $0x80] sm:$0xff]   ;;  %v1389_v18 = vld [vmem:[%s2420_s1 + $0xf8] sm:$0xff]  }
   0x7   :  { %815 = vmatpush1.bf16.msra.mxu1 %v1375_v4  ;;  %639 = vmatprep.subr.bf16.mxu0 %v1408_v0  ;;  %v16_v19 = vld [vmem:[%s2421_s0 + $0x8] sm:$0xff]  ;;  %v21_v20 = vld [vmem:[%s2421_s0 + $0x30] sm:$0xff]  ;;  %v18_v21 = vld [vmem:[%s2421_s0 + $0x18] sm:$0xff] }
   0x8   :  { %816 = vmatprep.subr.bf16.mxu1 %v1408_v0  ;;  %v196_v22 = vpack.c.bf16 %v21_v20, %v16_v19  ;;  %v23_v23 = vld [vmem:[%s2421_s0 + $0x40] sm:$0xff]  ;;  %v1390_v24 = vld [vmem:[%s2420_s1 + $0x70] sm:$0xff]   ;;  %v1392_v27 = vld [vmem:[%s2420_s1 + $0x68] sm:$0xff]  }
   0x9   :  { %v198_v25 = vpack.c.bf16 %v23_v23, %v18_v21  ;;  %v1391_v26 = vld [vmem:[%s2420_s1 + $0xf0] sm:$0xff]   ;;  %v1393_v28 = vld [vmem:[%s2420_s1 + $0xe8] sm:$0xff]   ;;  %v1394_v29 = vld [vmem:[%s2420_s1 + $0x60] sm:$0xff]  }
   0xa   :  { %640 = vmatpush1.bf16.msra.mxu0 %v1376_v5  ;;  %667 = vmatprep.mubr.bf16.mxu0 %v196_v22  ;;  %v1395_v30 = vld [vmem:[%s2420_s1 + $0xe0] sm:$0xff]   ;;  %v1396_v31 = vld [vmem:[%s2420_s1 + $0x58] sm:$0xff]   ;;  %v1398_v33 = vld [vmem:[%s2420_s1 + $0x50] sm:$0xff]  }
   0xb   :  { %817 = vmatpush1.bf16.msra.mxu1 %v1377_v6  ;;  %641 = vmatprep.subr.bf16.mxu0 %v1408_v0  ;;  %v1397_v32 = vld [vmem:[%s2420_s1 + $0xd8] sm:$0xff]   ;;  %v1399_v34 = vld [vmem:[%s2420_s1 + $0xd0] sm:$0xff]   ;;  %v1400_v35 = vld [vmem:[%s2420_s1 + $0x48] sm:$0xff]  }
   0xc   :  { %818 = vmatprep.subr.bf16.mxu1 %v1408_v0  ;;  %844 = vmatprep.mubr.bf16.mxu1 %v198_v25  ;;  %v1401_v36 = vld [vmem:[%s2420_s1 + $0xc8] sm:$0xff]   ;;  %v1402_v37 = vld [vmem:[%s2420_s1 + $0x40] sm:$0xff]   ;;  %v17_v41 = vld [vmem:[%s2421_s0 + $0x10] sm:$0xff] }
   0xd   :  { %v1403_v38 = vld [vmem:[%s2420_s1 + $0xc0] sm:$0xff]   ;;  %v20_v40 = vld [vmem:[%s2421_s0 + $0x28] sm:$0xff]  ;;  %v22_v42 = vld [vmem:[%s2421_s0 + $0x38] sm:$0xff] }
   0xe   :  { %642 = vmatpush1.bf16.msra.mxu0 %v1378_v7  ;;  %v15_v39 = vld [vmem:[%s2421_s0] sm:$0xff]  ;;  %v1404_v43 = vld [vmem:[%s2420_s1 + $0x118] sm:$0xff]   ;;  %v28_v46 = vld [vmem:[%s2421_s0 + $0x68] sm:$0xff]  ;;  %v197_v49 = vpack.c.bf16 %v22_v42, %v17_v41 }
   0xf   :  { %819 = vmatpush1.bf16.msra.mxu1 %v1379_v8  ;;  %643 = vmatprep.subr.bf16.mxu0 %v1408_v0  ;;  %v26_v44 = vld [vmem:[%s2421_s0 + $0x58] sm:$0xff]  ;;  %v31_v45 = vld [vmem:[%s2421_s0 + $0x80] sm:$0xff]  ;;  %v33_v47 = vld [vmem:[%s2421_s0 + $0x90] sm:$0xff]  ;;  %v195_v48 = vpack.c.bf16 %v20_v40, %v15_v39 }
  0x10   :  { %820 = vmatprep.subr.bf16.mxu1 %v1408_v0  ;;  %v201_v50 = vpack.c.bf16 %v31_v45, %v26_v44  ;;  %v203_v51 = vpack.c.bf16 %v33_v47, %v28_v46  ;;  %v1405_v52 = vld [vmem:[%s2420_s1 + $0x110] sm:$0xff]   ;;  %v30_v54 = vld [vmem:[%s2421_s0 + $0x78] sm:$0xff]  ;;  %v27_v55 = vld [vmem:[%s2421_s0 + $0x60] sm:$0xff] }
  0x11   :  { %v25_v53 = vld [vmem:[%s2421_s0 + $0x50] sm:$0xff]  ;;  %v32_v56 = vld [vmem:[%s2421_s0 + $0x88] sm:$0xff]  ;;  %v38_v60 = vld [vmem:[%s2421_s0 + $0xb8] sm:$0xff] }
  0x12   :  { %644 = vmatpush1.bf16.msra.mxu0 %v1380_v9  ;;  %v36_v57 = vld [vmem:[%s2421_s0 + $0xa8] sm:$0xff]  ;;  %v41_v58 = vld [vmem:[%s2421_s0 + $0xd0] sm:$0xff]  ;;  %v43_v61 = vld [vmem:[%s2421_s0 + $0xe0] sm:$0xff]  ;;  %v200_v62 = vpack.c.bf16 %v30_v54, %v25_v53  ;;  %v202_v63 = vpack.c.bf16 %v32_v56, %v27_v55 }
  0x13   :  { %821 = vmatpush1.bf16.msra.mxu1 %v1381_v10  ;;  %645 = vmatprep.subr.bf16.mxu0 %v1408_v0  ;;  %v1406_v59 = vld [vmem:[%s2420_s1 + $0x108] sm:$0xff]   ;;  %v208_v1 = vpack.c.bf16 %v43_v61, %v38_v60  ;;  %v1407_v2 = vld [vmem:[%s2420_s1 + $0x100] sm:$0xff]   ;;  %v37_v5 = vld [vmem:[%s2421_s0 + $0xb0] sm:$0xff] }
  0x14   :  { %822 = vmatprep.subr.bf16.mxu1 %v1408_v0  ;;  %v35_v3 = vld [vmem:[%s2421_s0 + $0xa0] sm:$0xff]  ;;  %v40_v4 = vld [vmem:[%s2421_s0 + $0xc8] sm:$0xff]  ;;  %v42_v6 = vld [vmem:[%s2421_s0 + $0xd8] sm:$0xff] }
  0x15   :  { %v46_v7 = vld [vmem:[%s2421_s0 + $0xf8] sm:$0xff]  ;;  %v51_v8 = vld [vmem:[%s2421_s0 + $0x120] sm:$0xff]  ;;  %v48_v9 = vld [vmem:[%s2421_s0 + $0x108] sm:$0xff] }
  0x16   :  { %646 = vmatpush1.bf16.msra.mxu0 %v1382_v11  ;;  %v53_v10 = vld [vmem:[%s2421_s0 + $0x130] sm:$0xff]  ;;  %v205_v11 = vpack.c.bf16 %v40_v4, %v35_v3  ;;  %v56_v19 = vld [vmem:[%s2421_s0 + $0x148] sm:$0xff]  ;;  %v58_v21 = vld [vmem:[%s2421_s0 + $0x158] sm:$0xff] }
  0x17   :  { %823 = vmatpush1.bf16.msra.mxu1 %v1383_v12  ;;  %647 = vmatprep.subr.bf16.mxu0 %v1408_v0  ;;  %v207_v12 = vpack.c.bf16 %v42_v6, %v37_v5  ;;  %v61_v20 = vld [vmem:[%s2421_s0 + $0x170] sm:$0xff]  ;;  %v63_v22 = vld [vmem:[%s2421_s0 + $0x180] sm:$0xff]  ;;  %v70_v40 = vld [vmem:[%s2421_s0 + $0x1b8] sm:$0xff] }
  0x18   :  { %824 = vmatprep.subr.bf16.mxu1 %v1408_v0  ;;  %v216_v25 = vpack.c.bf16 %v61_v20, %v56_v19  ;;  %v65_v39 = vld [vmem:[%s2421_s0 + $0x190] sm:$0xff]  ;;  %v67_v41 = vld [vmem:[%s2421_s0 + $0x1a0] sm:$0xff]  ;;  %v72_v42 = vld [vmem:[%s2421_s0 + $0x1c8] sm:$0xff] }
  0x19   :  { %v81_v44 = vld [vmem:[%s2421_s0 + $0x210] sm:$0xff]  ;;  %v78_v45 = vld [vmem:[%s2421_s0 + $0x1f8] sm:$0xff]  ;;  %v83_v46 = vld [vmem:[%s2421_s0 + $0x220] sm:$0xff]  ;;  %v220_v47 = vpack.c.bf16 %v70_v40, %v65_v39 }
  0x1a   :  { %648 = vmatpush1.bf16.msra.mxu0 %v1384_v13  ;;  %v211_v13 = vpack.c.bf16 %v51_v8, %v46_v7  ;;  %v77_v53 = vld [vmem:[%s2421_s0 + $0x1f0] sm:$0xff]  ;;  %v82_v54 = vld [vmem:[%s2421_s0 + $0x218] sm:$0xff]  ;;  %v91_v56 = vld [vmem:[%s2421_s0 + $0x260] sm:$0xff] }
  0x1b   :  { %825 = vmatpush1.bf16.msra.mxu1 %v1385_v14  ;;  %649 = vmatprep.subr.bf16.mxu0 %v1408_v0  ;;  %v213_v14 = vpack.c.bf16 %v53_v10, %v48_v9  ;;  %v86_v55 = vld [vmem:[%s2421_s0 + $0x238] sm:$0xff]  ;;  %v227_v60 = vpack.c.bf16 %v82_v54, %v77_v53  ;;  %v96_v3 = vld [vmem:[%s2421_s0 + $0x288] sm:$0xff]  ;;  %v101_v4 = vld [vmem:[%s2421_s0 + $0x2b0] sm:$0xff] }
  0x1c   :  { %826 = vmatprep.subr.bf16.mxu1 %v1408_v0  ;;  %v231_v61 = vpack.c.bf16 %v91_v56, %v86_v55  ;;  %v98_v5 = vld [vmem:[%s2421_s0 + $0x298] sm:$0xff]  ;;  %v103_v6 = vld [vmem:[%s2421_s0 + $0x2c0] sm:$0xff]  ;;  %v236_v9 = vpack.c.bf16 %v101_v4, %v96_v3 }
  0x1d   :  { %v238_v10 = vpack.c.bf16 %v103_v6, %v98_v5  ;;  %v126_v39 = vld [vmem:[%s2421_s0 + $0x378] sm:$0xff]  ;;  %v131_v40 = vld [vmem:[%s2421_s0 + $0x3a0] sm:$0xff] }
  0x1e   :  { %650 = vmatpush1.bf16.msra.mxu0 %v1386_v15  ;;  %v45_v15 = vld [vmem:[%s2421_s0 + $0xf0] sm:$0xff]  ;;  %v138_v53 = vld [vmem:[%s2421_s0 + $0x3d8] sm:$0xff]  ;;  %v143_v54 = vld [vmem:[%s2421_s0 + $0x400] sm:$0xff] }
  0x1f   :  { %827 = vmatpush1.bf16.msra.mxu1 %v1387_v16  ;;  %651 = vmatprep.subr.bf16.mxu0 %v1408_v0  ;;  %v50_v16 = vld [vmem:[%s2421_s0 + $0x118] sm:$0xff] }
  0x20   :  { %828 = vmatprep.subr.bf16.mxu1 %v1408_v0  ;;  %v210_v23 = vpack.c.bf16 %v50_v16, %v45_v15  ;;  %v106_v15 = vld [vmem:[%s2421_s0 + $0x2d8] sm:$0xff]  ;;  %v111_v16 = vld [vmem:[%s2421_s0 + $0x300] sm:$0xff] }
  0x22   :  { %652 = vmatpush2.bf16.msra.mxu0 %v1388_v17  ;;  %v47_v17 = vld [vmem:[%s2421_s0 + $0x100] sm:$0xff] }
  0x23   :  { %829 = vmatpush2.bf16.msra.mxu1 %v1389_v18  ;;  %653 = vmatprep.subr.bf16.mxu0 %v1408_v0  ;;  %v52_v18 = vld [vmem:[%s2421_s0 + $0x128] sm:$0xff] }
  0x24   :  { %830 = vmatprep.subr.bf16.mxu1 %v1408_v0 }
  0x26   :  { %654 = vmatpush2.bf16.msra.mxu0 %v1390_v24  ;;  %v212_v24 = vpack.c.bf16 %v52_v18, %v47_v17  ;;  %v108_v17 = vld [vmem:[%s2421_s0 + $0x2e8] sm:$0xff]  ;;  %v113_v18 = vld [vmem:[%s2421_s0 + $0x310] sm:$0xff] }
  0x27   :  { %831 = vmatpush2.bf16.msra.mxu1 %v1391_v26  ;;  %655 = vmatprep.subr.bf16.mxu0 %v1408_v0  ;;  %v218_v26 = vpack.c.bf16 %v63_v22, %v58_v21  ;;  %v241_v21 = vpack.c.bf16 %v111_v16, %v106_v15  ;;  %v243_v22 = vpack.c.bf16 %v113_v18, %v108_v17 }
  0x28   :  { %832 = vmatprep.subr.bf16.mxu1 %v1408_v0 }
  0x2a   :  { %656 = vmatpush2.bf16.msra.mxu0 %v1392_v27  ;;  %v55_v27 = vld [vmem:[%s2421_s0 + $0x140] sm:$0xff] }
  0x2b   :  { %833 = vmatpush2.bf16.msra.mxu1 %v1393_v28  ;;  %657 = vmatprep.subr.bf16.mxu0 %v1408_v0  ;;  %v60_v28 = vld [vmem:[%s2421_s0 + $0x168] sm:$0xff] }
  0x2c   :  { %834 = vmatprep.subr.bf16.mxu1 %v1408_v0 }
  0x2e   :  { %658 = vmatpush2.bf16.msra.mxu0 %v1394_v29  ;;  %v57_v29 = vld [vmem:[%s2421_s0 + $0x150] sm:$0xff] }
  0x2f   :  { %835 = vmatpush2.bf16.msra.mxu1 %v1395_v30  ;;  %659 = vmatprep.subr.bf16.mxu0 %v1408_v0  ;;  %v62_v30 = vld [vmem:[%s2421_s0 + $0x178] sm:$0xff] }
  0x30   :  { %836 = vmatprep.subr.bf16.mxu1 %v1408_v0 }
  0x32   :  { %660 = vmatpush2.bf16.msra.mxu0 %v1396_v31  ;;  %v66_v31 = vld [vmem:[%s2421_s0 + $0x198] sm:$0xff] }
  0x33   :  { %837 = vmatpush2.bf16.msra.mxu1 %v1397_v32  ;;  %661 = vmatprep.subr.bf16.mxu0 %v1408_v0  ;;  %v71_v32 = vld [vmem:[%s2421_s0 + $0x1c0] sm:$0xff] }
  0x34   :  { %838 = vmatprep.subr.bf16.mxu1 %v1408_v0 }
  0x36   :  { %662 = vmatpush2.bf16.msra.mxu0 %v1398_v33  ;;  %v68_v33 = vld [vmem:[%s2421_s0 + $0x1a8] sm:$0xff] }
  0x37   :  { %839 = vmatpush2.bf16.msra.mxu1 %v1399_v34  ;;  %663 = vmatprep.subr.bf16.mxu0 %v1408_v0  ;;  %v73_v34 = vld [vmem:[%s2421_s0 + $0x1d0] sm:$0xff] }
  0x38   :  { %840 = vmatprep.subr.bf16.mxu1 %v1408_v0 }
  0x3a   :  { %664 = vmatpush2.bf16.msra.mxu0 %v1400_v35  ;;  %v215_v35 = vpack.c.bf16 %v60_v28, %v55_v27  ;;  %v116_v27 = vld [vmem:[%s2421_s0 + $0x328] sm:$0xff]  ;;  %v121_v28 = vld [vmem:[%s2421_s0 + $0x350] sm:$0xff] }
  0x3b   :  { %841 = vmatpush2.bf16.msra.mxu1 %v1401_v36  ;;  %665 = vmatprep.subr.bf16.mxu0 %v1408_v0  ;;  %v217_v36 = vpack.c.bf16 %v62_v30, %v57_v29  ;;  %v118_v29 = vld [vmem:[%s2421_s0 + $0x338] sm:$0xff]  ;;  %v123_v30 = vld [vmem:[%s2421_s0 + $0x360] sm:$0xff] }
  0x3c   :  { %842 = vmatprep.subr.bf16.mxu1 %v1408_v0  ;;  %v206_v0 = vpack.c.bf16 %v41_v58, %v36_v57  ;;  %v88_v57 = vld [vmem:[%s2421_s0 + $0x248] sm:$0xff]  ;;  %v93_v58 = vld [vmem:[%s2421_s0 + $0x270] sm:$0xff] }
  0x3e   :  { %666 = vmatpush2.bf16.msra.mxu0 %v1402_v37  ;;  %v221_v37 = vpack.c.bf16 %v71_v32, %v66_v31 }
  0x3f   :  { %843 = vmatpush2.bf16.msra.mxu1 %v1403_v38  ;;  %1319 = vmatprep.subr.bf16.mxu0 %v1404_v43  ;;  %v223_v38 = vpack.c.bf16 %v73_v34, %v68_v33  ;;  %v246_v33 = vpack.c.bf16 %v121_v28, %v116_v27  ;;  %v248_v34 = vpack.c.bf16 %v123_v30, %v118_v29 }
  0x40   :  { %1363 = vmatprep.subr.bf16.mxu1 %v1404_v43 }
  0x41   :  { %668 = vmatmul.mubr.bf16.vlgmr.msra.gmra.mxu0 %v195_v48  ;;  %v222_v48 = vpack.c.bf16 %v72_v42, %v67_v41  ;;  %v128_v41 = vld [vmem:[%s2421_s0 + $0x388] sm:$0xff]  ;;  %v133_v42 = vld [vmem:[%s2421_s0 + $0x3b0] sm:$0xff] }
  0x42   :  { %845 = vmatmul.mubr.bf16.vlgmr.msra.gmra.mxu1 %v197_v49  ;;  %1320 = vmatpush3.bf16.msra.mxu0 %v1404_v43 }
  0x43   :  { %675 = vmatprep.mubr.bf16.mxu0 %v201_v50  ;;  %852 = vmatprep.mubr.bf16.mxu1 %v203_v51  ;;  %v228_v50 = vpack.c.bf16 %v83_v46, %v78_v45  ;;  %v75_v51 = vld [vmem:[%s2421_s0 + $0x1e0] sm:$0xff]  ;;  %v251_v45 = vpack.c.bf16 %v131_v40, %v126_v39  ;;  %v253_v46 = vpack.c.bf16 %v133_v42, %v128_v41 }
  0x44   :  { %1367 = vmatpush3.bf16.msra.mxu1 %v1404_v43  ;;  %1321 = vmatprep.subr.bf16.mxu0 %v1405_v52  ;;  %v76_v43 = vld [vmem:[%s2421_s0 + $0x1e8] sm:$0xff] }
  0x45   :  { %1364 = vmatprep.subr.bf16.mxu1 %v1405_v52  ;;  %v226_v49 = vpack.c.bf16 %v81_v44, %v76_v43 }
  0x46   :  { %1322 = vmatpush3.bf16.msra.mxu0 %v1405_v52 }
  0x47   :  { %1323 = vmatprep.subr.bf16.mxu0 %v1406_v59 }
  0x48   :  { %1368 = vmatpush3.bf16.msra.mxu1 %v1405_v52  ;;  %v80_v52 = vld [vmem:[%s2421_s0 + $0x208] sm:$0xff] }
  0x49   :  { %676 = vmatmul.mubr.bf16.gmra.mxu0 %v200_v62  ;;  %1365 = vmatprep.subr.bf16.mxu1 %v1406_v59  ;;  %v233_v62 = vpack.c.bf16 %v93_v58, %v88_v57  ;;  %v258_v58 = vpack.c.bf16 %v143_v54, %v138_v53 }
  0x4a   :  { %853 = vmatmul.mubr.bf16.gmra.mxu1 %v202_v63  ;;  %683 = vmatprep.mubr.bf16.mxu0 %v206_v0  ;;  %v85_v63 = vld [vmem:[%s2421_s0 + $0x230] sm:$0xff]  ;;  %v90_v0 = vld [vmem:[%s2421_s0 + $0x258] sm:$0xff] }
  0x4b   :  { %860 = vmatprep.mubr.bf16.mxu1 %v208_v1  ;;  %1324 = vmatpush3.bf16.msra.mxu0 %v1406_v59  ;;  %v87_v1 = vld [vmem:[%s2421_s0 + $0x240] sm:$0xff]  ;;  %v230_v7 = vpack.c.bf16 %v90_v0, %v85_v63  ;;  %v146_v63 = vld [vmem:[%s2421_s0 + $0x418] sm:$0xff] }
  0x4c   :  { %1369 = vmatpush3.bf16.msra.mxu1 %v1406_v59  ;;  %1325 = vmatprep.subr.bf16.mxu0 %v1407_v2  ;;  %v225_v59 = vpack.c.bf16 %v80_v52, %v75_v51  ;;  %v136_v51 = vld [vmem:[%s2421_s0 + $0x3c8] sm:$0xff]  ;;  %v141_v52 = vld [vmem:[%s2421_s0 + $0x3f0] sm:$0xff]  ;;  %v151_v0 = vld [vmem:[%s2421_s0 + $0x440] sm:$0xff] }
  0x4d   :  { %1366 = vmatprep.subr.bf16.mxu1 %v1407_v2  ;;  %v256_v57 = vpack.c.bf16 %v141_v52, %v136_v51  ;;  %v261_v5 = vpack.c.bf16 %v151_v0, %v146_v63 }
  0x4f   :  { %1326 = vmatpush3.bf16.msra.mxu0 %v1407_v2 }
  0x50   :  { %1370 = vmatpush3.bf16.msra.mxu1 %v1407_v2  ;;  %v92_v2 = vld [vmem:[%s2421_s0 + $0x268] sm:$0xff] }
  0x51   :  { %684 = vmatmul.mubr.bf16.gmra.mxu0 %v205_v11  ;;  %v232_v8 = vpack.c.bf16 %v92_v2, %v87_v1  ;;  %v95_v11 = vld [vmem:[%s2421_s0 + $0x280] sm:$0xff]  ;;  %v148_v1 = vld [vmem:[%s2421_s0 + $0x428] sm:$0xff]  ;;  %v153_v2 = vld [vmem:[%s2421_s0 + $0x450] sm:$0xff] }
  0x52   :  { %861 = vmatmul.mubr.bf16.gmra.mxu1 %v207_v12  ;;  %691 = vmatprep.mubr.bf16.mxu0 %v211_v13  ;;  %v100_v12 = vld [vmem:[%s2421_s0 + $0x2a8] sm:$0xff]  ;;  %v97_v13 = vld [vmem:[%s2421_s0 + $0x290] sm:$0xff]  ;;  %v263_v6 = vpack.c.bf16 %v153_v2, %v148_v1 }
  0x53   :  { %868 = vmatprep.mubr.bf16.mxu1 %v213_v14  ;;  %v102_v14 = vld [vmem:[%s2421_s0 + $0x2b8] sm:$0xff]  ;;  %v235_v19 = vpack.c.bf16 %v100_v12, %v95_v11  ;;  %v156_v11 = vld [vmem:[%s2421_s0 + $0x468] sm:$0xff]  ;;  %v161_v12 = vld [vmem:[%s2421_s0 + $0x490] sm:$0xff] }
  0x54   :  { %v237_v20 = vpack.c.bf16 %v102_v14, %v97_v13  ;;  %v158_v13 = vld [vmem:[%s2421_s0 + $0x478] sm:$0xff]  ;;  %v163_v14 = vld [vmem:[%s2421_s0 + $0x4a0] sm:$0xff]  ;;  %v266_v17 = vpack.c.bf16 %v161_v12, %v156_v11 }
  0x55   :  { %v268_v18 = vpack.c.bf16 %v163_v14, %v158_v13 }
  0x59   :  { %692 = vmatmul.mubr.bf16.gmra.mxu0 %v210_v23  ;;  %v105_v23 = vld [vmem:[%s2421_s0 + $0x2d0] sm:$0xff] }
  0x5a   :  { %869 = vmatmul.mubr.bf16.gmra.mxu1 %v212_v24  ;;  %699 = vmatprep.mubr.bf16.mxu0 %v216_v25  ;;  %v110_v24 = vld [vmem:[%s2421_s0 + $0x2f8] sm:$0xff]  ;;  %v107_v25 = vld [vmem:[%s2421_s0 + $0x2e0] sm:$0xff] }
  0x5b   :  { %876 = vmatprep.mubr.bf16.mxu1 %v218_v26  ;;  %v112_v26 = vld [vmem:[%s2421_s0 + $0x308] sm:$0xff]  ;;  %v240_v31 = vpack.c.bf16 %v110_v24, %v105_v23  ;;  %v166_v23 = vld [vmem:[%s2421_s0 + $0x4b8] sm:$0xff]  ;;  %v171_v24 = vld [vmem:[%s2421_s0 + $0x4e0] sm:$0xff] }
  0x5c   :  { %v242_v32 = vpack.c.bf16 %v112_v26, %v107_v25  ;;  %v168_v25 = vld [vmem:[%s2421_s0 + $0x4c8] sm:$0xff]  ;;  %v173_v26 = vld [vmem:[%s2421_s0 + $0x4f0] sm:$0xff]  ;;  %v271_v29 = vpack.c.bf16 %v171_v24, %v166_v23 }
  0x5d   :  { %v273_v30 = vpack.c.bf16 %v173_v26, %v168_v25 }
  0x61   :  { %700 = vmatmul.mubr.bf16.gmra.mxu0 %v215_v35  ;;  %v115_v35 = vld [vmem:[%s2421_s0 + $0x320] sm:$0xff] }
  0x62   :  { %877 = vmatmul.mubr.bf16.gmra.mxu1 %v217_v36  ;;  %707 = vmatprep.mubr.bf16.mxu0 %v221_v37  ;;  %v120_v36 = vld [vmem:[%s2421_s0 + $0x348] sm:$0xff]  ;;  %v117_v37 = vld [vmem:[%s2421_s0 + $0x330] sm:$0xff] }
  0x63   :  { %884 = vmatprep.mubr.bf16.mxu1 %v223_v38  ;;  %v122_v38 = vld [vmem:[%s2421_s0 + $0x358] sm:$0xff]  ;;  %v245_v43 = vpack.c.bf16 %v120_v36, %v115_v35  ;;  %v176_v35 = vld [vmem:[%s2421_s0 + $0x508] sm:$0xff]  ;;  %v181_v36 = vld [vmem:[%s2421_s0 + $0x530] sm:$0xff] }
  0x64   :  { %v247_v44 = vpack.c.bf16 %v122_v38, %v117_v37  ;;  %v178_v37 = vld [vmem:[%s2421_s0 + $0x518] sm:$0xff]  ;;  %v183_v38 = vld [vmem:[%s2421_s0 + $0x540] sm:$0xff]  ;;  %v276_v41 = vpack.c.bf16 %v181_v36, %v176_v35 }
  0x65   :  { %v278_v42 = vpack.c.bf16 %v183_v38, %v178_v37 }
  0x69   :  { %708 = vmatmul.mubr.bf16.gmra.mxu0 %v220_v47  ;;  %v125_v47 = vld [vmem:[%s2421_s0 + $0x370] sm:$0xff] }
  0x6a   :  { %885 = vmatmul.mubr.bf16.gmra.mxu1 %v222_v48  ;;  %715 = vmatprep.mubr.bf16.mxu0 %v226_v49  ;;  %v130_v48 = vld [vmem:[%s2421_s0 + $0x398] sm:$0xff]  ;;  %v127_v49 = vld [vmem:[%s2421_s0 + $0x380] sm:$0xff] }
  0x6b   :  { %892 = vmatprep.mubr.bf16.mxu1 %v228_v50  ;;  %v132_v50 = vld [vmem:[%s2421_s0 + $0x3a8] sm:$0xff]  ;;  %v250_v55 = vpack.c.bf16 %v130_v48, %v125_v47  ;;  %v186_v47 = vld [vmem:[%s2421_s0 + $0x558] sm:$0xff]  ;;  %v191_v48 = vld [vmem:[%s2421_s0 + $0x580] sm:$0xff] }
  0x6c   :  { %v252_v56 = vpack.c.bf16 %v132_v50, %v127_v49  ;;  %v188_v49 = vld [vmem:[%s2421_s0 + $0x568] sm:$0xff]  ;;  %v193_v50 = vld [vmem:[%s2421_s0 + $0x590] sm:$0xff]  ;;  %v281_v53 = vpack.c.bf16 %v191_v48, %v186_v47 }
  0x6d   :  { %v283_v54 = vpack.c.bf16 %v193_v50, %v188_v49  ;;  %v109_v48 = vld [vmem:[%s2421_s0 + $0x2f0] sm:$0xff]  ;;  %v114_v49 = vld [vmem:[%s2421_s0 + $0x318] sm:$0xff] }
  0x6e   :  { %v244_v50 = vpack.c.bf16 %v114_v49, %v109_v48 }
  0x71   :  { %716 = vmatmul.mubr.bf16.gmra.mxu0 %v225_v59  ;;  %v135_v59 = vld [vmem:[%s2421_s0 + $0x3c0] sm:$0xff] }
  0x72   :  { %893 = vmatmul.mubr.bf16.gmra.mxu1 %v227_v60  ;;  %723 = vmatprep.mubr.bf16.mxu0 %v231_v61  ;;  %v140_v60 = vld [vmem:[%s2421_s0 + $0x3e8] sm:$0xff]  ;;  %v137_v61 = vld [vmem:[%s2421_s0 + $0x3d0] sm:$0xff] }
  0x73   :  { %900 = vmatprep.mubr.bf16.mxu1 %v233_v62  ;;  %v142_v62 = vld [vmem:[%s2421_s0 + $0x3f8] sm:$0xff]  ;;  %v255_v3 = vpack.c.bf16 %v140_v60, %v135_v59  ;;  %v19_v59 = vld [vmem:[%s2421_s0 + $0x20] sm:$0xff]  ;;  %v24_v60 = vld [vmem:[%s2421_s0 + $0x48] sm:$0xff] }
  0x74   :  { %v257_v4 = vpack.c.bf16 %v142_v62, %v137_v61  ;;  %v119_v61 = vld [vmem:[%s2421_s0 + $0x340] sm:$0xff]  ;;  %v124_v62 = vld [vmem:[%s2421_s0 + $0x368] sm:$0xff]  ;;  %v199_v1 = vpack.c.bf16 %v24_v60, %v19_v59 }
  0x75   :  { %v249_v2 = vpack.c.bf16 %v124_v62, %v119_v61 }
  0x79   :  { %724 = vmatmul.mubr.bf16.gmra.mxu0 %v230_v7  ;;  %v145_v7 = vld [vmem:[%s2421_s0 + $0x410] sm:$0xff] }
  0x7a   :  { %901 = vmatmul.mubr.bf16.gmra.mxu1 %v232_v8  ;;  %731 = vmatprep.mubr.bf16.mxu0 %v236_v9  ;;  %v150_v8 = vld [vmem:[%s2421_s0 + $0x438] sm:$0xff]  ;;  %v147_v9 = vld [vmem:[%s2421_s0 + $0x420] sm:$0xff] }
  0x7b   :  { %908 = vmatprep.mubr.bf16.mxu1 %v238_v10  ;;  %v152_v10 = vld [vmem:[%s2421_s0 + $0x448] sm:$0xff]  ;;  %v260_v15 = vpack.c.bf16 %v150_v8, %v145_v7  ;;  %v39_v7 = vld [vmem:[%s2421_s0 + $0xc0] sm:$0xff] }
  0x7c   :  { %v262_v16 = vpack.c.bf16 %v152_v10, %v147_v9  ;;  %v44_v8 = vld [vmem:[%s2421_s0 + $0xe8] sm:$0xff]  ;;  %v139_v9 = vld [vmem:[%s2421_s0 + $0x3e0] sm:$0xff] }
  0x7d   :  { %v144_v10 = vld [vmem:[%s2421_s0 + $0x408] sm:$0xff]  ;;  %v209_v13 = vpack.c.bf16 %v44_v8, %v39_v7 }
  0x7e   :  { %v259_v14 = vpack.c.bf16 %v144_v10, %v139_v9 }
  0x81   :  { %732 = vmatmul.mubr.bf16.gmra.mxu0 %v235_v19  ;;  %v155_v19 = vld [vmem:[%s2421_s0 + $0x460] sm:$0xff] }
  0x82   :  { %909 = vmatmul.mubr.bf16.gmra.mxu1 %v237_v20  ;;  %739 = vmatprep.mubr.bf16.mxu0 %v241_v21  ;;  %v160_v20 = vld [vmem:[%s2421_s0 + $0x488] sm:$0xff]  ;;  %v157_v21 = vld [vmem:[%s2421_s0 + $0x470] sm:$0xff] }
  0x83   :  { %916 = vmatprep.mubr.bf16.mxu1 %v243_v22  ;;  %v162_v22 = vld [vmem:[%s2421_s0 + $0x498] sm:$0xff]  ;;  %v265_v27 = vpack.c.bf16 %v160_v20, %v155_v19  ;;  %v59_v19 = vld [vmem:[%s2421_s0 + $0x160] sm:$0xff]  ;;  %v64_v20 = vld [vmem:[%s2421_s0 + $0x188] sm:$0xff] }
  0x84   :  { %v267_v28 = vpack.c.bf16 %v162_v22, %v157_v21  ;;  %v159_v21 = vld [vmem:[%s2421_s0 + $0x480] sm:$0xff]  ;;  %v164_v22 = vld [vmem:[%s2421_s0 + $0x4a8] sm:$0xff]  ;;  %v219_v25 = vpack.c.bf16 %v64_v20, %v59_v19 }
  0x85   :  { %v269_v26 = vpack.c.bf16 %v164_v22, %v159_v21 }
  0x89   :  { %740 = vmatmul.mubr.bf16.gmra.mxu0 %v240_v31  ;;  %v165_v31 = vld [vmem:[%s2421_s0 + $0x4b0] sm:$0xff] }
  0x8a   :  { %917 = vmatmul.mubr.bf16.gmra.mxu1 %v242_v32  ;;  %747 = vmatprep.mubr.bf16.mxu0 %v246_v33  ;;  %v170_v32 = vld [vmem:[%s2421_s0 + $0x4d8] sm:$0xff]  ;;  %v167_v33 = vld [vmem:[%s2421_s0 + $0x4c0] sm:$0xff] }
  0x8b   :  { %924 = vmatprep.mubr.bf16.mxu1 %v248_v34  ;;  %v172_v34 = vld [vmem:[%s2421_s0 + $0x4e8] sm:$0xff]  ;;  %v270_v39 = vpack.c.bf16 %v170_v32, %v165_v31  ;;  %v79_v31 = vld [vmem:[%s2421_s0 + $0x200] sm:$0xff] }
  0x8c   :  { %v272_v40 = vpack.c.bf16 %v172_v34, %v167_v33  ;;  %v84_v32 = vld [vmem:[%s2421_s0 + $0x228] sm:$0xff]  ;;  %v179_v33 = vld [vmem:[%s2421_s0 + $0x520] sm:$0xff] }
  0x8d   :  { %v184_v34 = vld [vmem:[%s2421_s0 + $0x548] sm:$0xff]  ;;  %v229_v37 = vpack.c.bf16 %v84_v32, %v79_v31 }
  0x8e   :  { %v279_v38 = vpack.c.bf16 %v184_v34, %v179_v33 }
  0x91   :  { %748 = vmatmul.mubr.bf16.gmra.mxu0 %v245_v43  ;;  %v175_v43 = vld [vmem:[%s2421_s0 + $0x500] sm:$0xff] }
  0x92   :  { %925 = vmatmul.mubr.bf16.gmra.mxu1 %v247_v44  ;;  %755 = vmatprep.mubr.bf16.mxu0 %v251_v45  ;;  %v180_v44 = vld [vmem:[%s2421_s0 + $0x528] sm:$0xff]  ;;  %v177_v45 = vld [vmem:[%s2421_s0 + $0x510] sm:$0xff] }
  0x93   :  { %932 = vmatprep.mubr.bf16.mxu1 %v253_v46  ;;  %v182_v46 = vld [vmem:[%s2421_s0 + $0x538] sm:$0xff]  ;;  %v275_v51 = vpack.c.bf16 %v180_v44, %v175_v43  ;;  %v99_v43 = vld [vmem:[%s2421_s0 + $0x2a0] sm:$0xff]  ;;  %v104_v44 = vld [vmem:[%s2421_s0 + $0x2c8] sm:$0xff] }
  0x94   :  { %v277_v52 = vpack.c.bf16 %v182_v46, %v177_v45  ;;  %v239_v47 = vpack.c.bf16 %v104_v44, %v99_v43 }
  0x99   :  { %756 = vmatmul.mubr.bf16.gmra.mxu0 %v250_v55  ;;  %v185_v55 = vld [vmem:[%s2421_s0 + $0x550] sm:$0xff] }
  0x9a   :  { %933 = vmatmul.mubr.bf16.gmra.mxu1 %v252_v56  ;;  %763 = vmatprep.mubr.bf16.mxu0 %v256_v57  ;;  %v190_v56 = vld [vmem:[%s2421_s0 + $0x578] sm:$0xff]  ;;  %v187_v57 = vld [vmem:[%s2421_s0 + $0x560] sm:$0xff] }
  0x9b   :  { %940 = vmatprep.mubr.bf16.mxu1 %v258_v58  ;;  %v192_v58 = vld [vmem:[%s2421_s0 + $0x588] sm:$0xff]  ;;  %v280_v63 = vpack.c.bf16 %v190_v56, %v185_v55 }
  0x9c   :  { %v282_v0 = vpack.c.bf16 %v192_v58, %v187_v57 }
  0xa1   :  { %764 = vmatmul.mubr.bf16.gmra.mxu0 %v255_v3  ;;  %v29_v3 = vld [vmem:[%s2421_s0 + $0x70] sm:$0xff] }
  0xa2   :  { %941 = vmatmul.mubr.bf16.gmra.mxu1 %v257_v4  ;;  %771 = vmatprep.mubr.bf16.mxu0 %v261_v5  ;;  %v34_v4 = vld [vmem:[%s2421_s0 + $0x98] sm:$0xff]  ;;  %v129_v5 = vld [vmem:[%s2421_s0 + $0x390] sm:$0xff] }
  0xa3   :  { %948 = vmatprep.mubr.bf16.mxu1 %v263_v6  ;;  %v134_v6 = vld [vmem:[%s2421_s0 + $0x3b8] sm:$0xff]  ;;  %v204_v11 = vpack.c.bf16 %v34_v4, %v29_v3 }
  0xa4   :  { %v254_v12 = vpack.c.bf16 %v134_v6, %v129_v5 }
  0xa9   :  { %772 = vmatmul.mubr.bf16.gmra.mxu0 %v260_v15  ;;  %v49_v15 = vld [vmem:[%s2421_s0 + $0x110] sm:$0xff] }
  0xaa   :  { %949 = vmatmul.mubr.bf16.gmra.mxu1 %v262_v16  ;;  %779 = vmatprep.mubr.bf16.mxu0 %v266_v17  ;;  %v54_v16 = vld [vmem:[%s2421_s0 + $0x138] sm:$0xff]  ;;  %v149_v17 = vld [vmem:[%s2421_s0 + $0x430] sm:$0xff] }
  0xab   :  { %956 = vmatprep.mubr.bf16.mxu1 %v268_v18  ;;  %v154_v18 = vld [vmem:[%s2421_s0 + $0x458] sm:$0xff]  ;;  %v214_v23 = vpack.c.bf16 %v54_v16, %v49_v15 }
  0xac   :  { %v264_v24 = vpack.c.bf16 %v154_v18, %v149_v17 }
  0xb1   :  { %780 = vmatmul.mubr.bf16.gmra.mxu0 %v265_v27  ;;  %v69_v27 = vld [vmem:[%s2421_s0 + $0x1b0] sm:$0xff] }
  0xb2   :  { %957 = vmatmul.mubr.bf16.gmra.mxu1 %v267_v28  ;;  %787 = vmatprep.mubr.bf16.mxu0 %v271_v29  ;;  %v74_v28 = vld [vmem:[%s2421_s0 + $0x1d8] sm:$0xff]  ;;  %v169_v29 = vld [vmem:[%s2421_s0 + $0x4d0] sm:$0xff] }
  0xb3   :  { %964 = vmatprep.mubr.bf16.mxu1 %v273_v30  ;;  %v174_v30 = vld [vmem:[%s2421_s0 + $0x4f8] sm:$0xff]  ;;  %v224_v35 = vpack.c.bf16 %v74_v28, %v69_v27 }
  0xb4   :  { %v274_v36 = vpack.c.bf16 %v174_v30, %v169_v29 }
  0xb9   :  { %788 = vmatmul.mubr.bf16.gmra.mxu0 %v270_v39  ;;  %v89_v39 = vld [vmem:[%s2421_s0 + $0x250] sm:$0xff] }
  0xba   :  { %965 = vmatmul.mubr.bf16.gmra.mxu1 %v272_v40  ;;  %795 = vmatprep.mubr.bf16.mxu0 %v276_v41  ;;  %v94_v40 = vld [vmem:[%s2421_s0 + $0x278] sm:$0xff]  ;;  %v189_v41 = vld [vmem:[%s2421_s0 + $0x570] sm:$0xff] }
  0xbb   :  { %972 = vmatprep.mubr.bf16.mxu1 %v278_v42  ;;  %v194_v42 = vld [vmem:[%s2421_s0 + $0x598] sm:$0xff]  ;;  %v234_v45 = vpack.c.bf16 %v94_v40, %v89_v39 }
  0xbc   :  { %v284_v46 = vpack.c.bf16 %v194_v42, %v189_v41 }
  0xc1   :  { %796 = vmatmul.mubr.bf16.gmra.mxu0 %v275_v51  ;;  %v2130_v51 = vld [vmem:[%s2422_s2] ss:$0 sm:$0xff] }
  0xc2   :  { %973 = vmatmul.mubr.bf16.gmra.mxu1 %v277_v52  ;;  %803 = vmatprep.mubr.bf16.mxu0 %v281_v53 }
  0xc3   :  { %980 = vmatprep.mubr.bf16.mxu1 %v283_v54 }
  0xc9   :  { %804 = vmatmul.mubr.bf16.gmra.mxu0 %v280_v63 }
  0xca   :  { %981 = vmatmul.mubr.bf16.gmra.mxu1 %v282_v0  ;;  %1327 = vmatprep.mubr.msk.bf16.mxu0 %vm580_vm0, %v199_v1 }
  0xcb   :  { %1347 = vmatprep.mubr.msk.bf16.mxu1 %vm580_vm0, %v249_v2 }
  0xd1   :  { %1328 = vmatmul.mubr.msk.bf16.vlgmr.msra.gmra.mxu0 %vm580_vm0, %v204_v11 }
  0xd2   :  { %1348 = vmatmul.mubr.msk.bf16.vlgmr.msra.gmra.mxu1 %vm580_vm0, %v254_v12  ;;  %1331 = vmatprep.mubr.msk.bf16.mxu0 %vm580_vm0, %v209_v13 }
  0xd3   :  { %1351 = vmatprep.mubr.msk.bf16.mxu1 %vm580_vm0, %v259_v14 }
  0xd9   :  { %1332 = vmatmul.mubr.msk.bf16.gmra.mxu0 %vm580_vm0, %v214_v23 }
  0xda   :  { %1352 = vmatmul.mubr.msk.bf16.gmra.mxu1 %vm580_vm0, %v264_v24  ;;  %1335 = vmatprep.mubr.msk.bf16.mxu0 %vm580_vm0, %v219_v25 }
  0xdb   :  { %1355 = vmatprep.mubr.msk.bf16.mxu1 %vm580_vm0, %v269_v26 }
  0xe1   :  { %1336 = vmatmul.mubr.msk.bf16.gmra.mxu0 %vm580_vm0, %v224_v35 }
  0xe2   :  { %1356 = vmatmul.mubr.msk.bf16.gmra.mxu1 %vm580_vm0, %v274_v36  ;;  %1339 = vmatprep.mubr.msk.bf16.mxu0 %vm580_vm0, %v229_v37 }
  0xe3   :  { %1359 = vmatprep.mubr.msk.bf16.mxu1 %vm580_vm0, %v279_v38 }
  0xe9   :  { %1340 = vmatmul.mubr.msk.bf16.gmra.mxu0 %vm580_vm0, %v234_v45 }
  0xea   :  { %1360 = vmatmul.mubr.msk.bf16.gmra.mxu1 %vm580_vm0, %v284_v46  ;;  %1343 = vmatprep.mubr.msk.bf16.mxu0 %vm580_vm0, %v239_v47 }
  0xf1   :  { %1344 = vmatmul.mubr.msk.bf16.gmra.mxu0 %vm580_vm0, %v244_v50 }
 0x101   :  { %v669_v52 = vpop.f32.mrf.mxu0 }
 0x102   :  { %v670_v53 = vadd.f32 %v2130_v51, %v669_v52  ;;  %v846_v54 = vpop.f32.mrf.mxu1 }
 0x103   :  { %v671_v55 = vpop.f32.mrf.mxu0 }
 0x104   :  { %v2133_v56 = vadd.f32 %v846_v54, %v670_v53  ;;  %v848_v57 = vpop.f32.mrf.mxu1 }
 0x105   :  { %v672_v58 = vpop.f32.mrf.mxu0 }
 0x106   :  { %v673_v59 = vadd.f32 %v2130_v51, %v672_v58  ;;  %v849_v60 = vpop.f32.mrf.mxu1 }
 0x107   :  { %v674_v61 = vpop.f32.mrf.mxu0 }
 0x108   :  { %v2136_v62 = vadd.f32 %v849_v60, %v673_v59  ;;  %v851_v63 = vpop.f32.mrf.mxu1 }
 0x109   :  { %v677_v0 = vpop.f32.mrf.mxu0 }
 0x10a   :  { %v678_v1 = vadd.f32 %v2130_v51, %v677_v0  ;;  %v854_v2 = vpop.f32.mrf.mxu1 }
 0x10b   :  { %v679_v3 = vpop.f32.mrf.mxu0 }
 0x10c   :  { %v2139_v4 = vadd.f32 %v854_v2, %v678_v1  ;;  %v856_v5 = vpop.f32.mrf.mxu1 }
 0x10d   :  { %v680_v6 = vpop.f32.mrf.mxu0 }
 0x10e   :  { %v681_v7 = vadd.f32 %v2130_v51, %v680_v6  ;;  %v857_v8 = vpop.f32.mrf.mxu1 }
 0x10f   :  { %v682_v9 = vpop.f32.mrf.mxu0 }
 0x110   :  { %v2142_v10 = vadd.f32 %v857_v8, %v681_v7  ;;  %v859_v11 = vpop.f32.mrf.mxu1 }
 0x111   :  { %v685_v12 = vpop.f32.mrf.mxu0 }
 0x112   :  { %v686_v13 = vadd.f32 %v2130_v51, %v685_v12  ;;  %v862_v14 = vpop.f32.mrf.mxu1 }
 0x113   :  { %v687_v15 = vpop.f32.mrf.mxu0 }
 0x114   :  { %v2145_v16 = vadd.f32 %v862_v14, %v686_v13  ;;  %v864_v17 = vpop.f32.mrf.mxu1 }
 0x115   :  { %v688_v18 = vpop.f32.mrf.mxu0 }
 0x116   :  { %v689_v19 = vadd.f32 %v2130_v51, %v688_v18  ;;  %v865_v20 = vpop.f32.mrf.mxu1 }
 0x117   :  { %v690_v21 = vpop.f32.mrf.mxu0 }
 0x118   :  { %v2148_v22 = vadd.f32 %v865_v20, %v689_v19  ;;  %v867_v23 = vpop.f32.mrf.mxu1 }
 0x119   :  { %v693_v24 = vpop.f32.mrf.mxu0 }
 0x11a   :  { %v694_v25 = vadd.f32 %v2130_v51, %v693_v24  ;;  %v870_v26 = vpop.f32.mrf.mxu1 }
 0x11b   :  { %v695_v27 = vpop.f32.mrf.mxu0 }
 0x11c   :  { %v2151_v28 = vadd.f32 %v870_v26, %v694_v25  ;;  %v872_v29 = vpop.f32.mrf.mxu1 }
 0x11d   :  { %v696_v30 = vpop.f32.mrf.mxu0 }
 0x11e   :  { %v697_v31 = vadd.f32 %v2130_v51, %v696_v30  ;;  %v873_v32 = vpop.f32.mrf.mxu1 }
 0x11f   :  { %v698_v33 = vpop.f32.mrf.mxu0 }
 0x120   :  { %v2154_v34 = vadd.f32 %v873_v32, %v697_v31  ;;  %v875_v35 = vpop.f32.mrf.mxu1 }
 0x121   :  { %v701_v36 = vpop.f32.mrf.mxu0 }
 0x122   :  { %v702_v37 = vadd.f32 %v2130_v51, %v701_v36  ;;  %v878_v38 = vpop.f32.mrf.mxu1 }
 0x123   :  { %v703_v39 = vpop.f32.mrf.mxu0 }
 0x124   :  { %v2157_v40 = vadd.f32 %v878_v38, %v702_v37  ;;  %v880_v41 = vpop.f32.mrf.mxu1 }
 0x125   :  { %v704_v42 = vpop.f32.mrf.mxu0 }
 0x126   :  { %v705_v43 = vadd.f32 %v2130_v51, %v704_v42  ;;  %v881_v44 = vpop.f32.mrf.mxu1 }
 0x127   :  { %v706_v45 = vpop.f32.mrf.mxu0 }
 0x128   :  { %v2160_v46 = vadd.f32 %v881_v44, %v705_v43  ;;  %v883_v47 = vpop.f32.mrf.mxu1 }
 0x129   :  { %v709_v48 = vpop.f32.mrf.mxu0 }
 0x12a   :  { %v710_v49 = vadd.f32 %v2130_v51, %v709_v48  ;;  %v886_v50 = vpop.f32.mrf.mxu1 }
 0x12b   :  { %v711_v52 = vpop.f32.mrf.mxu0 }
 0x12c   :  { %v2163_v53 = vadd.f32 %v886_v50, %v710_v49  ;;  %v888_v54 = vpop.f32.mrf.mxu1 }
 0x12d   :  { %v712_v55 = vpop.f32.mrf.mxu0 }
 0x12e   :  { %v713_v57 = vadd.f32 %v2130_v51, %v712_v55  ;;  %v889_v58 = vpop.f32.mrf.mxu1 }
 0x12f   :  { %v714_v59 = vpop.f32.mrf.mxu0 }
 0x130   :  { %v2166_v60 = vadd.f32 %v889_v58, %v713_v57  ;;  %v891_v61 = vpop.f32.mrf.mxu1 }
 0x131   :  { %v717_v63 = vpop.f32.mrf.mxu0 }
 0x132   :  { %v718_v0 = vadd.f32 %v2130_v51, %v717_v63  ;;  %v894_v1 = vpop.f32.mrf.mxu1 }
 0x133   :  { %v719_v2 = vpop.f32.mrf.mxu0 }
 0x134   :  { %v2169_v3 = vadd.f32 %v894_v1, %v718_v0  ;;  %v896_v5 = vpop.f32.mrf.mxu1 }
 0x135   :  { %v720_v6 = vpop.f32.mrf.mxu0 }
 0x136   :  { %v721_v7 = vadd.f32 %v2130_v51, %v720_v6  ;;  %v897_v8 = vpop.f32.mrf.mxu1 }
 0x137   :  { %v722_v9 = vpop.f32.mrf.mxu0 }
 0x138   :  { %v2172_v11 = vadd.f32 %v897_v8, %v721_v7  ;;  %v899_v12 = vpop.f32.mrf.mxu1 }
 0x139   :  { %v725_v13 = vpop.f32.mrf.mxu0 }
 0x13a   :  { %v726_v14 = vadd.f32 %v2130_v51, %v725_v13  ;;  %v902_v15 = vpop.f32.mrf.mxu1 }
 0x13b   :  { %v727_v17 = vpop.f32.mrf.mxu0 }
 0x13c   :  { %v2175_v18 = vadd.f32 %v902_v15, %v726_v14  ;;  %v904_v19 = vpop.f32.mrf.mxu1 }
 0x13d   :  { %v728_v20 = vpop.f32.mrf.mxu0 }
 0x13e   :  { %v729_v21 = vadd.f32 %v2130_v51, %v728_v20  ;;  %v905_v23 = vpop.f32.mrf.mxu1 }
 0x13f   :  { %v730_v24 = vpop.f32.mrf.mxu0 }
 0x140   :  { %v2178_v25 = vadd.f32 %v905_v23, %v729_v21  ;;  %v907_v26 = vpop.f32.mrf.mxu1 }
 0x141   :  { %v733_v27 = vpop.f32.mrf.mxu0 }
 0x142   :  { %v734_v29 = vadd.f32 %v2130_v51, %v733_v27  ;;  %v910_v30 = vpop.f32.mrf.mxu1 }
 0x143   :  { %v735_v31 = vpop.f32.mrf.mxu0 }
 0x144   :  { %v2181_v32 = vadd.f32 %v910_v30, %v734_v29  ;;  %v912_v33 = vpop.f32.mrf.mxu1 }
 0x145   :  { %v736_v35 = vpop.f32.mrf.mxu0 }
 0x146   :  { %2424 = vst [vmem:[#allocation2_spill] sm:$0xff] %v2181_v32  ;;  %v737_v36 = vadd.f32 %v2130_v51, %v736_v35  ;;  %v913_v37 = vpop.f32.mrf.mxu1 }
 0x147   :  { %v738_v38 = vpop.f32.mrf.mxu0 }
 0x148   :  { %v2184_v39 = vadd.f32 %v913_v37, %v737_v36  ;;  %v915_v41 = vpop.f32.mrf.mxu1 }
 0x149   :  { %v741_v42 = vpop.f32.mrf.mxu0 }
 0x14a   :  { %2425 = vst [vmem:[#allocation3_spill] sm:$0xff] %v2184_v39  ;;  %v742_v43 = vadd.f32 %v2130_v51, %v741_v42  ;;  %v918_v44 = vpop.f32.mrf.mxu1 }
 0x14b   :  { %v743_v45 = vpop.f32.mrf.mxu0 }
 0x14c   :  { %v2187_v47 = vadd.f32 %v918_v44, %v742_v43  ;;  %v920_v48 = vpop.f32.mrf.mxu1 }
 0x14d   :  { %v744_v49 = vpop.f32.mrf.mxu0 }
 0x14e   :  { %v745_v50 = vadd.f32 %v2130_v51, %v744_v49  ;;  %v921_v52 = vpop.f32.mrf.mxu1 }
 0x14f   :  { %v746_v54 = vpop.f32.mrf.mxu0 }
 0x150   :  { %v2190_v55 = vadd.f32 %v921_v52, %v745_v50  ;;  %v923_v57 = vpop.f32.mrf.mxu1 }
 0x151   :  { %v2192_v58 = vpop.f32.mrf.mxu0 }
 0x152   :  { %2426 = vst [vmem:[#allocation4_spill] sm:$0xff] %v2190_v55  ;;  %v2194_v59 = vpop.f32.mrf.mxu1 }
 0x153   :  { %v751_v61 = vpop.f32.mrf.mxu0 }
 0x154   :  { %v928_v63 = vpop.f32.mrf.mxu1 }
 0x155   :  { %v2196_v0 = vpop.f32.mrf.mxu0 }
 0x156   :  { %v2198_v1 = vpop.f32.mrf.mxu1 }
 0x157   :  { %v754_v2 = vpop.f32.mrf.mxu0 }
 0x158   :  { %v931_v5 = vpop.f32.mrf.mxu1 }
 0x159   :  { %v757_v6 = vpop.f32.mrf.mxu0 }
 0x15a   :  { %v934_v7 = vpop.f32.mrf.mxu1 }
 0x15b   :  { %v759_v8 = vpop.f32.mrf.mxu0 }
 0x15c   :  { %v936_v9 = vpop.f32.mrf.mxu1 }
 0x15d   :  { %v760_v12 = vpop.f32.mrf.mxu0 }
 0x15e   :  { %v2200_v13 = vpop.f32.mrf.mxu1 }
 0x15f   :  { %v762_v14 = vpop.f32.mrf.mxu0 }
 0x160   :  { %v939_v15 = vpop.f32.mrf.mxu1 }
 0x161   :  { %v2202_v17 = vpop.f32.mrf.mxu0 }
 0x162   :  { %v2204_v19 = vpop.f32.mrf.mxu1 }
 0x163   :  { %v767_v20 = vpop.f32.mrf.mxu0 }
 0x164   :  { %v944_v21 = vpop.f32.mrf.mxu1 }
 0x165   :  { %v2206_v23 = vpop.f32.mrf.mxu0 }
 0x166   :  { %v2208_v24 = vpop.f32.mrf.mxu1 }
 0x167   :  { %v770_v26 = vpop.f32.mrf.mxu0 }
 0x168   :  { %v947_v27 = vpop.f32.mrf.mxu1 }
 0x169   :  { %v773_v29 = vpop.f32.mrf.mxu0 }
 0x16a   :  { %v2210_v30 = vpop.f32.mrf.mxu1 }
 0x16b   :  { %v775_v31 = vpop.f32.mrf.mxu0 }
 0x16c   :  { %v952_v33 = vpop.f32.mrf.mxu1 }
 0x16d   :  { %v2212_v35 = vpop.f32.mrf.mxu0 }
 0x16e   :  { %v2214_v36 = vpop.f32.mrf.mxu1 }
 0x16f   :  { %v778_v37 = vpop.f32.mrf.mxu0 }
 0x170   :  { %v955_v38 = vpop.f32.mrf.mxu1 }
 0x171   :  { %v2216_v41 = vpop.f32.mrf.mxu0 }
 0x172   :  { %v2218_v42 = vpop.f32.mrf.mxu1 }
 0x173   :  { %v783_v43 = vpop.f32.mrf.mxu0 }
 0x174   :  { %v960_v44 = vpop.f32.mrf.mxu1 }
 0x175   :  { %v2220_v45 = vpop.f32.mrf.mxu0  ;;  %v758_v44 = vadd.f32 %v2130_v51, %v757_v6  ;;  %v753_v6 = vadd.f32 %v2130_v51, %v2196_v0 }
 0x176   :  { %v2222_v48 = vpop.f32.mrf.mxu1 }
 0x177   :  { %v786_v49 = vpop.f32.mrf.mxu0 }
 0x178   :  { %v963_v50 = vpop.f32.mrf.mxu1 }
 0x179   :  { %v2224_v52 = vpop.f32.mrf.mxu0 }
 0x17a   :  { %v2226_v54 = vpop.f32.mrf.mxu1 }
 0x17b   :  { %v791_v57 = vpop.f32.mrf.mxu0 }
 0x17c   :  { %v968_v61 = vpop.f32.mrf.mxu1  ;;  %v750_v57 = vadd.f32 %v2130_v51, %v2192_v58 }
 0x17d   :  { %v2228_v63 = vpop.f32.mrf.mxu0 }
 0x17e   :  { %v2230_v2 = vpop.f32.mrf.mxu1 }
 0x17f   :  { %v794_v5 = vpop.f32.mrf.mxu0 }
 0x180   :  { %v971_v8 = vpop.f32.mrf.mxu1 }
 0x181   :  { %v2232_v9 = vpop.f32.mrf.mxu0  ;;  %v935_v8 = vadd.f32 %v934_v7, %v758_v44  ;;  %v774_v7 = vadd.f32 %v2130_v51, %v773_v29 }
 0x182   :  { %v2234_v14 = vpop.f32.mrf.mxu1 }
 0x183   :  { %v799_v15 = vpop.f32.mrf.mxu0 }
 0x184   :  { %v976_v20 = vpop.f32.mrf.mxu1  ;;  %v761_v15 = vadd.f32 %v2130_v51, %v760_v12 }
 0x185   :  { %v2236_v21 = vpop.f32.mrf.mxu0 }
 0x186   :  { %v2238_v26 = vpop.f32.mrf.mxu1 }
 0x187   :  { %v802_v27 = vpop.f32.mrf.mxu0 }
 0x188   :  { %v979_v31 = vpop.f32.mrf.mxu1 }
 0x189   :  { %v2240_v33 = vpop.f32.mrf.mxu0 }
 0x18a   :  { %v2242_v37 = vpop.f32.mrf.mxu1 }
 0x18b   :  { %v807_v38 = vpop.f32.mrf.mxu0 }
 0x18c   :  { %v984_v43 = vpop.f32.mrf.mxu1  ;;  %v927_v38 = vadd.f32 %v2194_v59, %v750_v57  ;;  %v930_v57 = vadd.f32 %v2198_v1, %v753_v6  ;;  %v951_v1 = vadd.f32 %v2210_v30, %v774_v7 }
 0x18d   :  { %v2245_v49 = vpop.f32.mrf.mxu0 }
 0x18e   :  { %v2247_v50 = vpop.f32.mrf.mxu1 }
 0x18f   :  { %v810_v61 = vpop.f32.mrf.mxu0 }
 0x190   :  { %v987_v5 = vpop.f32.mrf.mxu1  ;;  %v938_v61 = vadd.f32 %v2200_v13, %v761_v15 }
 0x191   :  { %v1329_v20 = vpop.f32.mrf.mxu0 }
 0x192   :  { %v1032_v27 = vadd.f32 %v1329_v20, %v2139_v4  ;;  %v1349_v31 = vpop.f32.mrf.mxu1 }
 0x193   :  { %v1112_v43 = vadd.f32 %v1349_v31, %v935_v8  ;;  %v1023_v39 = vpop.f32.mrf.mxu0 }
 0x194   :  { %v1168_v55 = vmax.f32 %v1032_v27, 0.0  ;;  %v1024_v32 = vadd.f32 %v1023_v39, %v2133_v56  ;;  %v1103_v58 = vpop.f32.mrf.mxu1  ;;  %v766_v56 = vadd.f32 %v2130_v51, %v2202_v17  ;;  %v777_v17 = vadd.f32 %v2130_v51, %v2212_v35 }
 0x195   :  { %v1188_v12 = vmax.f32 %v1112_v43, 0.0  ;;  %v1104_v44 = vadd.f32 %v1103_v58, %v927_v38  ;;  %v1330_v5 = vpop.f32.mrf.mxu0  ;;  %v769_v35 = vadd.f32 %v2130_v51, %v2206_v23  ;;  %v790_v23 = vadd.f32 %v2130_v51, %v2224_v52 }
 0x196   :  { %1204 = vst [vmem:[%s2423_s3 + $0x10] sm:$0xff] %v1168_v55  ;;  %v1166_v4 = vmax.f32 %v1024_v32, 0.0  ;;  %v1035_v59 = vadd.f32 %v1330_v5, %v2142_v10  ;;  %v1350_v0 = vpop.f32.mrf.mxu1  ;;  %v943_v30 = vadd.f32 %v2204_v19, %v766_v56  ;;  %v954_v19 = vadd.f32 %v2214_v36, %v777_v17 }
 0x197   :  { %1224 = vst [vmem:[%s2423_s3 + $0xb0] sm:$0xff] %v1188_v12  ;;  %v1186_v39 = vmax.f32 %v1104_v44, 0.0  ;;  %v1115_v13 = vadd.f32 %v1350_v0, %v938_v61  ;;  %v1026_v29 = vpop.f32.mrf.mxu0  ;;  %v946_v36 = vadd.f32 %v2208_v24, %v769_v35  ;;  %v782_v52 = vadd.f32 %v2130_v51, %v2216_v41 }
 0x198   :  { %1202 = vst [vmem:[%s2423_s3] sm:$0xff] %v1166_v4  ;;  %v1169_v32 = vmax.f32 %v1035_v59, 0.0  ;;  %v1027_v10 = vadd.f32 %v1026_v29, %v2136_v62  ;;  %v1106_v55 = vpop.f32.mrf.mxu1  ;;  %v967_v24 = vadd.f32 %v2226_v54, %v790_v23  ;;  %v793_v41 = vadd.f32 %v2130_v51, %v2228_v63 }
 0x199   :  { %1222 = vst [vmem:[%s2423_s3 + $0xa0] sm:$0xff] %v1186_v39  ;;  %v1189_v8 = vmax.f32 %v1115_v13, 0.0  ;;  %v1107_v15 = vadd.f32 %v1106_v55, %v930_v57  ;;  %v1333_v20 = vpop.f32.mrf.mxu0  ;;  %v959_v54 = vadd.f32 %v2218_v42, %v782_v52  ;;  %v785_v63 = vadd.f32 %v2130_v51, %v2220_v45 }
 0x19a   :  { %1205 = vst [vmem:[%s2423_s3 + $0x18] sm:$0xff] %v1169_v32  ;;  %v1167_v27 = vmax.f32 %v1027_v10, 0.0  ;;  %v1048_v62 = vadd.f32 %v1333_v20, %v2151_v28  ;;  %v1353_v31 = vpop.f32.mrf.mxu1  ;;  %v970_v42 = vadd.f32 %v2230_v2, %v793_v41  ;;  %v806_v45 = vadd.f32 %v2130_v51, %v2240_v33 }
 0x19b   :  { %1225 = vst [vmem:[%s2423_s3 + $0xb8] sm:$0xff] %v1189_v8  ;;  %v1187_v38 = vmax.f32 %v1107_v15, 0.0  ;;  %v1128_v6 = vadd.f32 %v1353_v31, %v951_v1  ;;  %v1039_v43 = vpop.f32.mrf.mxu0  ;;  %v962_v2 = vadd.f32 %v2222_v48, %v785_v63  ;;  %v798_v33 = vadd.f32 %v2130_v51, %v2232_v9 }
 0x19c   :  { %1203 = vst [vmem:[%s2423_s3 + $0x8] sm:$0xff] %v1167_v27  ;;  %v1172_v58 = vmax.f32 %v1048_v62, 0.0  ;;  %v1040_v28 = vadd.f32 %v1039_v43, %v2145_v16  ;;  %v1119_v61 = vpop.f32.mrf.mxu1  ;;  %v983_v48 = vadd.f32 %v2242_v37, %v806_v45  ;;  %v809_v9 = vadd.f32 %v2130_v51, %v2245_v49 }
 0x19d   :  { %1223 = vst [vmem:[%s2423_s3 + $0xa8] sm:$0xff] %v1187_v38  ;;  %v1192_v7 = vmax.f32 %v1128_v6, 0.0  ;;  %v1120_v12 = vadd.f32 %v1119_v61, %v943_v30  ;;  %v1334_v44 = vpop.f32.mrf.mxu0  ;;  %v975_v37 = vadd.f32 %v2234_v14, %v798_v33  ;;  %v801_v49 = vadd.f32 %v2130_v51, %v2236_v21 }
 0x19e   :  { %1208 = vst [vmem:[%s2423_s3 + $0x30] sm:$0xff] %v1172_v58  ;;  %v1170_v5 = vmax.f32 %v1040_v28, 0.0  ;;  %v1051_v16 = vadd.f32 %v1334_v44, %v2154_v34  ;;  %v1354_v4 = vpop.f32.mrf.mxu1  ;;  %v986_v14 = vadd.f32 %v2247_v50, %v809_v9 }
 0x19f   :  { %1228 = vst [vmem:[%s2423_s3 + $0xd0] sm:$0xff] %v1192_v7  ;;  %v1190_v59 = vmax.f32 %v1120_v12, 0.0  ;;  %v1131_v0 = vadd.f32 %v1354_v4, %v954_v19  ;;  %v1042_v57 = vpop.f32.mrf.mxu0 }
 0x1a0   :  { %1206 = vst [vmem:[%s2423_s3 + $0x20] sm:$0xff] %v1170_v5  ;;  %v1173_v56 = vmax.f32 %v1051_v16, 0.0  ;;  %v1043_v34 = vadd.f32 %v1042_v57, %v2148_v22  ;;  %v1122_v39 = vpop.f32.mrf.mxu1 }
 0x1a1   :  { %1226 = vst [vmem:[%s2423_s3 + $0xc0] sm:$0xff] %v1190_v59  ;;  %v1193_v13 = vmax.f32 %v1131_v0, 0.0  ;;  %v1123_v29 = vadd.f32 %v1122_v39, %v946_v36  ;;  %v1337_v32 = vpop.f32.mrf.mxu0 }
 0x1a2   :  { %1209 = vst [vmem:[%s2423_s3 + $0x38] sm:$0xff] %v1173_v56  ;;  %v1171_v10 = vmax.f32 %v1043_v34, 0.0  ;;  %v1064_v22 = vadd.f32 %v1337_v32, %v2163_v53  ;;  %v1357_v55 = vpop.f32.mrf.mxu1 }
 0x1a3   :  { %1229 = vst [vmem:[%s2423_s3 + $0xd8] sm:$0xff] %v1193_v13  ;;  %v1191_v1 = vmax.f32 %v1123_v29, 0.0  ;;  %v1144_v17 = vadd.f32 %v1357_v55, %v967_v24  ;;  %v1055_v8 = vpop.f32.mrf.mxu0  ;;  %v2427_v55 = vld [vmem:[#allocation2_spill] sm:$0xff] }
 0x1a4   :  { %1207 = vst [vmem:[%s2423_s3 + $0x28] sm:$0xff] %v1171_v10  ;;  %v1176_v15 = vmax.f32 %v1064_v22, 0.0  ;;  %v1056_v53 = vadd.f32 %v1055_v8, %v2157_v40  ;;  %v1135_v20 = vpop.f32.mrf.mxu1 }
 0x1a5   :  { %1227 = vst [vmem:[%s2423_s3 + $0xc8] sm:$0xff] %v1191_v1  ;;  %v1196_v27 = vmax.f32 %v1144_v17, 0.0  ;;  %v1136_v62 = vadd.f32 %v1135_v20, %v959_v54  ;;  %v1338_v31 = vpop.f32.mrf.mxu0  ;;  %v2428_v1 = vld [vmem:[#allocation4_spill] sm:$0xff] }
 0x1a6   :  { %1212 = vst [vmem:[%s2423_s3 + $0x50] sm:$0xff] %v1176_v15  ;;  %v1174_v30 = vmax.f32 %v1056_v53, 0.0  ;;  %v1067_v40 = vadd.f32 %v1338_v31, %v2166_v60  ;;  %v1358_v35 = vpop.f32.mrf.mxu1  ;;  %v2429_v53 = vld [vmem:[#allocation3_spill] sm:$0xff] }
 0x1a7   :  { %1232 = vst [vmem:[%s2423_s3 + $0xf0] sm:$0xff] %v1196_v27  ;;  %v1194_v38 = vmax.f32 %v1136_v62, 0.0  ;;  %v1147_v6 = vadd.f32 %v1358_v35, %v970_v42  ;;  %v1058_v43 = vpop.f32.mrf.mxu0 }
 0x1a8   :  { %1210 = vst [vmem:[%s2423_s3 + $0x40] sm:$0xff] %v1174_v30  ;;  %v1177_v58 = vmax.f32 %v1067_v40, 0.0  ;;  %v1059_v60 = vadd.f32 %v1058_v43, %v2160_v46  ;;  %v1138_v28 = vpop.f32.mrf.mxu1 }
 0x1a9   :  { %1230 = vst [vmem:[%s2423_s3 + $0xe0] sm:$0xff] %v1194_v38  ;;  %v1197_v61 = vmax.f32 %v1147_v6, 0.0  ;;  %v1139_v19 = vadd.f32 %v1138_v28, %v962_v2  ;;  %v1341_v23 = vpop.f32.mrf.mxu0 }
 0x1aa   :  { %1213 = vst [vmem:[%s2423_s3 + $0x58] sm:$0xff] %v1177_v58  ;;  %v1175_v7 = vmax.f32 %v1059_v60, 0.0  ;;  %v1080_v46 = vadd.f32 %v1341_v23, %v2175_v18  ;;  %v1361_v12 = vpop.f32.mrf.mxu1 }
 0x1ab   :  { %1233 = vst [vmem:[%s2423_s3 + $0xf8] sm:$0xff] %v1197_v61  ;;  %v1195_v44 = vmax.f32 %v1139_v19, 0.0  ;;  %v1160_v5 = vadd.f32 %v1361_v12, %v983_v48  ;;  %v1071_v16 = vpop.f32.mrf.mxu0 }
 0x1ac   :  { %1211 = vst [vmem:[%s2423_s3 + $0x48] sm:$0xff] %v1175_v7  ;;  %v1180_v4 = vmax.f32 %v1080_v46, 0.0  ;;  %v1072_v18 = vadd.f32 %v1071_v16, %v2169_v3  ;;  %v1151_v36 = vpop.f32.mrf.mxu1  ;;  %v978_v3 = vadd.f32 %v2238_v26, %v801_v49 }
 0x1ad   :  { %1231 = vst [vmem:[%s2423_s3 + $0xe8] sm:$0xff] %v1195_v44  ;;  %v1200_v51 = vmax.f32 %v1160_v5, 0.0  ;;  %v1152_v21 = vadd.f32 %v1151_v36, %v975_v37  ;;  %v1342_v52 = vpop.f32.mrf.mxu0 }
 0x1ae   :  { %1216 = vst [vmem:[%s2423_s3 + $0x70] sm:$0xff] %v1180_v4  ;;  %v1178_v59 = vmax.f32 %v1072_v18, 0.0  ;;  %v1083_v0 = vadd.f32 %v1342_v52, %v2178_v25  ;;  %v1362_v57 = vpop.f32.mrf.mxu1 }
 0x1af   :  { %1236 = vst [vmem:[%s2423_s3 + $0x110] sm:$0xff] %v1200_v51  ;;  %v1198_v50 = vmax.f32 %v1152_v21, 0.0  ;;  %v1163_v56 = vadd.f32 %v1362_v57, %v986_v14  ;;  %v1074_v34 = vpop.f32.mrf.mxu0 }
 0x1b0   :  { %1214 = vst [vmem:[%s2423_s3 + $0x60] sm:$0xff] %v1178_v59  ;;  %v1181_v39 = vmax.f32 %v1083_v0, 0.0  ;;  %v1075_v24 = vadd.f32 %v1074_v34, %v2172_v11  ;;  %v1154_v41 = vpop.f32.mrf.mxu1 }
 0x1b1   :  { %1234 = vst [vmem:[%s2423_s3 + $0x100] sm:$0xff] %v1198_v50  ;;  %v1201_v25 = vmax.f32 %v1163_v56, 0.0  ;;  %v1155_v26 = vadd.f32 %v1154_v41, %v978_v3  ;;  %v1345_v13 = vpop.f32.mrf.mxu0 }
 0x1b2   :  { %1217 = vst [vmem:[%s2423_s3 + $0x78] sm:$0xff] %v1181_v39  ;;  %v1179_v29 = vmax.f32 %v1075_v24, 0.0  ;;  %v1096_v32 = vadd.f32 %v1345_v13, %v2187_v47 }
 0x1b3   :  { %1237 = vst [vmem:[%s2423_s3 + $0x118] sm:$0xff] %v1201_v25  ;;  %v1199_v11 = vmax.f32 %v1155_v26, 0.0  ;;  %v1087_v10 = vpop.f32.mrf.mxu0 }
 0x1b4   :  { %1215 = vst [vmem:[%s2423_s3 + $0x68] sm:$0xff] %v1179_v29  ;;  %v1184_v22 = vmax.f32 %v1096_v32, 0.0  ;;  %v1088_v54 = vadd.f32 %v1087_v10, %v2427_v55 }
 0x1b5   :  { %1235 = vst [vmem:[%s2423_s3 + $0x108] sm:$0xff] %v1199_v11  ;;  %v1346_v63 = vpop.f32.mrf.mxu0 }
 0x1b6   :  { %1220 = vst [vmem:[%s2423_s3 + $0x90] sm:$0xff] %v1184_v22  ;;  %v1182_v47 = vmax.f32 %v1088_v54, 0.0  ;;  %v1099_v17 = vadd.f32 %v1346_v63, %v2428_v1 }
 0x1b7   :  { %v1090_v8 = vpop.f32.mrf.mxu0 }
 0x1b8   :  { %1218 = vst [vmem:[%s2423_s3 + $0x80] sm:$0xff] %v1182_v47  ;;  %v1185_v15 = vmax.f32 %v1099_v17, 0.0  ;;  %v1091_v20 = vadd.f32 %v1090_v8, %v2429_v53 }
 0x1ba   :  { %1221 = vst [vmem:[%s2423_s3 + $0x98] sm:$0xff] %v1185_v15  ;;  %v1183_v42 = vmax.f32 %v1091_v20, 0.0 }
 0x1bc   :  { %1219 = vst [vmem:[%s2423_s3 + $0x88] sm:$0xff] %v1183_v42 }

// kernel: clasic_forward.15
= control target key start
LH: loop header
LB: loop body
LE: loop exit
PB: predicated region body
PF: predicated region fallthrough
CT: control target
= control target key end

     0   :  { %s2690_s12 = smov 0   ;;  %s2692_s13 = smov 0   ;;  %s3066_s0 = inlined_call_operand.vmem [shape: f32[2,4608], index: 0, kind: input, shape index: {}]   ;;  %s3067_s1 = inlined_call_operand.vmem [shape: bf16[4608,1000], index: 1, kind: input, shape index: {}]   ;;  %s3068_s2 = inlined_call_operand.vmem [shape: f32[1,1000], index: 2, kind: input, shape index: {}]   ;;  %s3069_s3 = inlined_call_operand.vmem [shape: f32[2,1000], index: 3, kind: output, shape index: {}]  }
   0x1   :  { %s2694_s14 = smov 0  }
   0x2 LB: > { %s22_s15 = sadd.s32 1, %s2662_s13  ;;  %p2349_p0 = scmp.ge.s32.totalorder %s2666_s14, 1  ;;  %s2666_s14 = sphi %s2694_s14, %s13_s14   ;;  %s2662_s13 = sphi %s2692_s13, %s3073_s13   ;;  %s2658_s12 = sphi %s2690_s12, %s3072_s12  }
   0x3   : > { %p23_p1 = scmp.ge.s32.totalorder %s22_s15, 9  ;;  %p168_p2 = scmp.lt.s32.totalorder %s2666_s14, 10 }
   0x5   : > { %s3075_s15 = smov (%p23_p1, %s22_s15), 0  ;;  %p169_p3 = pnand %p2349_p0, %p168_p2 }
   0x6   : > { %s2350_s16 = sshll.u32 (!%p169_p3), %s2658_s12, 2  ;;  %s2352_s17 = sshll.u32 (!%p169_p3), %s2658_s12, 6 }
   0x7   : > { %172 = sbr.rel (%p169_p3) target bundleno = 510 (0x1fe), region = 32  ;;  %p205_p4 = scmp.lt.s32.totalorder (!%p169_p3), %s2350_s16, 35 }
   0x8   : > { %p213_p5 = scmp.lt.s32.totalorder (!%p169_p3), %s2352_s17, 575  ;;  %p2355_p6 = scmp.ne.s32.totalorder (!%p169_p3), %s2658_s12, 0 }
   0xc   : > { %s3077_s16 = smov (!%p205_p4, %s2350_s16), 35  ;;  %s3079_s17 = smov (!%p213_p5, %s2352_s17), 575 }
   0xd   : > { %s2351_s18 = sshll.u32 %s3077_s16, 1  ;;  %s2616_s22 = sshll.u32 %s3079_s17, 5 }
   0xe   : > { %s2715_s21 = scalar_lea.vmem %s3066_s0, %s2351_s18  ;;  %s2720_s25 = scalar_lea.vmem %s3067_s1, %s2616_s22 }
   0xf   : > { %227 = sbr.rel (%p2355_p6) target bundleno = 25 (0x19), region = 36 }
  0x14   : > { %vm229_vm0 = vcmask 1041408   ;;  %vm230_vm1 = vcmask 1043458   ;;  %vm232_vm2 = vcmask 1045508   ;;  %v2668_v0 = vmov 0.0  }
  0x15   : > { %228 = vst [vmem:[#allocation2] sm:$0xff] %v2668_v0  ;;  %vm231_vm3 = vmor %vm230_vm1, %vm229_vm0  ;;  %vm234_vm4 = vcmask 850950  }
  0x16   : > { %vm233_vm5 = vmor %vm232_vm2, %vm231_vm3 }
  0x17   : > { %vm235_vm6 = vmor %vm234_vm4, %vm233_vm5 }
  0x18   : > { %236 = vst.msk [vmem:[#allocation2 + $0x8] sm:$0xff] %vm235_vm6, %v2668_v0 }
  0x19 PF: > { %v322_v1 = vld [vmem:[%s2720_s25 + $0x1c0] sm:$0xff]  ;;  %v2669_v33 = vmov 1983009808   ;;  %v245_v35 = vlaneseq  ;;  %vm2177_vm7 = vcmask 1041408   ;;  %vm2178_vm8 = vcmask 1043458   ;;  %p2612_p7 = scmp.ne.s32.totalorder %s2658_s12, 8 }
  0x1a   : > { %v326_v2 = vld [vmem:[%s2720_s25 + $0x1e0] sm:$0xff]  ;;  %v243_v34 = vunpack.c.l.s4 %v2669_v33  ;;  %vm2179_vm9 = vmor %vm2178_vm8, %vm2177_vm7  ;;  %vm2180_vm10 = vcmask 1045508   ;;  %vm2182_vm12 = vcmask 850950  }
  0x1b   : > { %v450_v3 = vld [vmem:[%s2720_s25 + $0x5c0] sm:$0xff]  ;;  %v2413_v4 = vcombine.high %v322_v1, %v326_v2  ;;  %v2412_v6 = vcombine.low %v322_v1, %v326_v2  ;;  %v2745_v45 = vshrl.u32 %v245_v35, 7  ;;  %vm2181_vm11 = vmor %vm2180_vm10, %vm2179_vm9 }
  0x1c   : > { %v454_v5 = vld [vmem:[%s2720_s25 + $0x5e0] sm:$0xff]  ;;  %v244_v44 = vunpack.c.0.s8 %v243_v34  ;;  %vm3027_vm13 = vmor %vm2182_vm12, %vm2181_vm11 }
  0x1d   : > { %v314_v7 = vld [vmem:[%s2720_s25 + $0x180] sm:$0xff]  ;;  %v2541_v9 = vcombine.high %v450_v3, %v454_v5  ;;  %v2540_v10 = vcombine.low %v450_v3, %v454_v5  ;;  %1802 = vmatprep.subr.bf16.mxu0 %v2413_v4 }
  0x1e   : > { %v318_v8 = vld [vmem:[%s2720_s25 + $0x1a0] sm:$0xff]  ;;  %1803 = vmatpush1.bf16.msra.mxu0 %v2412_v6  ;;  %v2752_v54 = vsub.s32 %v244_v44, %v2745_v45 }
  0x1f   : > { %v2405_v11 = vcombine.high %v314_v7, %v318_v8  ;;  %v442_v12 = vld [vmem:[%s2720_s25 + $0x580] sm:$0xff]  ;;  %1843 = vmatprep.subr.bf16.mxu1 %v2541_v9  ;;  %v2404_v19 = vcombine.low %v314_v7, %v318_v8 }
  0x20   : > { %v446_v13 = vld [vmem:[%s2720_s25 + $0x5a0] sm:$0xff]  ;;  %1844 = vmatpush1.bf16.msra.mxu1 %v2540_v10 }
  0x21   : > { %v306_v14 = vld [vmem:[%s2720_s25 + $0x140] sm:$0xff]  ;;  %v2533_v15 = vcombine.high %v442_v12, %v446_v13  ;;  %1804 = vmatprep.subr.bf16.mxu0 %v2405_v11  ;;  %v2532_v20 = vcombine.low %v442_v12, %v446_v13 }
  0x22   : > { %v310_v16 = vld [vmem:[%s2720_s25 + $0x160] sm:$0xff]  ;;  %1805 = vmatpush1.bf16.msra.mxu0 %v2404_v19 }
  0x23   : > { %v434_v17 = vld [vmem:[%s2720_s25 + $0x540] sm:$0xff]  ;;  %v2397_v21 = vcombine.high %v306_v14, %v310_v16  ;;  %1845 = vmatprep.subr.bf16.mxu1 %v2533_v15  ;;  %v2396_v27 = vcombine.low %v306_v14, %v310_v16 }
  0x24   : > { %v438_v18 = vld [vmem:[%s2720_s25 + $0x560] sm:$0xff]  ;;  %1846 = vmatpush1.bf16.msra.mxu1 %v2532_v20 }
  0x25   : > { %v2525_v22 = vcombine.high %v434_v17, %v438_v18  ;;  %v298_v23 = vld [vmem:[%s2720_s25 + $0x100] sm:$0xff]  ;;  %1806 = vmatprep.subr.bf16.mxu0 %v2397_v21  ;;  %v2524_v28 = vcombine.low %v434_v17, %v438_v18 }
  0x26   : > { %v302_v24 = vld [vmem:[%s2720_s25 + $0x120] sm:$0xff]  ;;  %1807 = vmatpush1.bf16.msra.mxu0 %v2396_v27 }
  0x27   : > { %v426_v25 = vld [vmem:[%s2720_s25 + $0x500] sm:$0xff]  ;;  %v2389_v29 = vcombine.high %v298_v23, %v302_v24  ;;  %1847 = vmatprep.subr.bf16.mxu1 %v2525_v22  ;;  %v2388_v38 = vcombine.low %v298_v23, %v302_v24 }
  0x28   : > { %v430_v26 = vld [vmem:[%s2720_s25 + $0x520] sm:$0xff]  ;;  %1848 = vmatpush1.bf16.msra.mxu1 %v2524_v28 }
  0x29   : > { %v2517_v30 = vcombine.high %v426_v25, %v430_v26  ;;  %v290_v31 = vld [vmem:[%s2720_s25 + $0xc0] sm:$0xff]  ;;  %1808 = vmatprep.subr.bf16.mxu0 %v2389_v29  ;;  %v2516_v39 = vcombine.low %v426_v25, %v430_v26 }
  0x2a   : > { %v294_v32 = vld [vmem:[%s2720_s25 + $0xe0] sm:$0xff]  ;;  %1809 = vmatpush1.bf16.msra.mxu0 %v2388_v38 }
  0x2b   : > { %v418_v36 = vld [vmem:[%s2720_s25 + $0x4c0] sm:$0xff]  ;;  %v2381_v40 = vcombine.high %v290_v31, %v294_v32  ;;  %1849 = vmatprep.subr.bf16.mxu1 %v2517_v30  ;;  %v2380_v48 = vcombine.low %v290_v31, %v294_v32 }
  0x2c   : > { %v422_v37 = vld [vmem:[%s2720_s25 + $0x4e0] sm:$0xff]  ;;  %1850 = vmatpush1.bf16.msra.mxu1 %v2516_v39 }
  0x2d   : > { %v2509_v41 = vcombine.high %v418_v36, %v422_v37  ;;  %v282_v42 = vld [vmem:[%s2720_s25 + $0x80] sm:$0xff]  ;;  %1810 = vmatprep.subr.bf16.mxu0 %v2381_v40  ;;  %v2508_v49 = vcombine.low %v418_v36, %v422_v37 }
  0x2e   : > { %v286_v43 = vld [vmem:[%s2720_s25 + $0xa0] sm:$0xff]  ;;  %1811 = vmatpush1.bf16.msra.mxu0 %v2380_v48 }
  0x2f   : > { %v410_v46 = vld [vmem:[%s2720_s25 + $0x480] sm:$0xff]  ;;  %v2373_v50 = vcombine.high %v282_v42, %v286_v43  ;;  %1851 = vmatprep.subr.bf16.mxu1 %v2509_v41  ;;  %v2372_v57 = vcombine.low %v282_v42, %v286_v43 }
  0x30   : > { %v414_v47 = vld [vmem:[%s2720_s25 + $0x4a0] sm:$0xff]  ;;  %1852 = vmatpush1.bf16.msra.mxu1 %v2508_v49 }
  0x31   : > { %v2501_v51 = vcombine.high %v410_v46, %v414_v47  ;;  %v274_v52 = vld [vmem:[%s2720_s25 + $0x40] sm:$0xff]  ;;  %1812 = vmatprep.subr.bf16.mxu0 %v2373_v50  ;;  %v2500_v58 = vcombine.low %v410_v46, %v414_v47 }
  0x32   : > { %v278_v53 = vld [vmem:[%s2720_s25 + $0x60] sm:$0xff]  ;;  %1813 = vmatpush1.bf16.msra.mxu0 %v2372_v57 }
  0x33   : > { %v402_v55 = vld [vmem:[%s2720_s25 + $0x440] sm:$0xff]  ;;  %v2365_v59 = vcombine.high %v274_v52, %v278_v53  ;;  %1853 = vmatprep.subr.bf16.mxu1 %v2501_v51  ;;  %v2364_v4 = vcombine.low %v274_v52, %v278_v53 }
  0x34   : > { %v406_v56 = vld [vmem:[%s2720_s25 + $0x460] sm:$0xff]  ;;  %1854 = vmatpush1.bf16.msra.mxu1 %v2500_v58 }
  0x35   : > { %v239_v60 = vld [vmem:[%s2715_s21] sm:$0xff]  ;;  %v2493_v61 = vcombine.high %v402_v55, %v406_v56  ;;  %1814 = vmatprep.subr.bf16.mxu0 %v2365_v59  ;;  %v2492_v7 = vcombine.low %v402_v55, %v406_v56 }
  0x36   : > { %v266_v62 = vld [vmem:[%s2720_s25] sm:$0xff]  ;;  %v2760_v0 = vrot.slane %v239_v60, %v2752_v54  ;;  %v241_v1 = vcombine.high %v239_v60, %v239_v60  ;;  %1815 = vmatpush1.bf16.msra.mxu0 %v2364_v4 }
  0x37   : > { %v270_v63 = vld [vmem:[%s2720_s25 + $0x20] sm:$0xff]  ;;  %1855 = vmatprep.subr.bf16.mxu1 %v2493_v61 }
  0x38   : > { %v394_v2 = vld [vmem:[%s2720_s25 + $0x400] sm:$0xff]  ;;  %v256_v5 = vcombine.high %v2760_v0, %v2760_v0  ;;  %v2767_v6 = vrot.slane %v241_v1, %v2752_v54  ;;  %v2357_v8 = vcombine.high %v266_v62, %v270_v63  ;;  %v2356_v16 = vcombine.low %v266_v62, %v270_v63  ;;  %1856 = vmatpush1.bf16.msra.mxu1 %v2492_v7 }
  0x39   : > { %v398_v3 = vld [vmem:[%s2720_s25 + $0x420] sm:$0xff] }
  0x3a   : > { %v2485_v9 = vcombine.high %v394_v2, %v398_v3  ;;  %v386_v10 = vld [vmem:[%s2720_s25 + $0x3c0] sm:$0xff]  ;;  %v2771_v12 = vpack.c.bf16 %v256_v5, %v256_v5  ;;  %v257_v13 = vcombine.high %v2767_v6, %v2767_v6  ;;  %1816 = vmatprep.subr.bf16.mxu0 %v2357_v8  ;;  %v2484_v18 = vcombine.low %v394_v2, %v398_v3 }
  0x3b   : > { %v390_v11 = vld [vmem:[%s2720_s25 + $0x3e0] sm:$0xff]  ;;  %1817 = vmatpush1.bf16.msra.mxu0 %v2356_v16 }
  0x3c   : > { %v514_v14 = vld [vmem:[%s2720_s25 + $0x7c0] sm:$0xff]  ;;  %1834 = vmatprep.mubr.bf16.mxu0 %v2771_v12  ;;  %v2778_v17 = vpack.c.bf16 %v257_v13, %v257_v13  ;;  %v2477_v19 = vcombine.high %v386_v10, %v390_v11  ;;  %1857 = vmatprep.subr.bf16.mxu1 %v2485_v9  ;;  %v2476_v25 = vcombine.low %v386_v10, %v390_v11 }
  0x3d   : > { %v518_v15 = vld [vmem:[%s2720_s25 + $0x7e0] sm:$0xff]  ;;  %1858 = vmatpush1.bf16.msra.mxu1 %v2484_v18 }
  0x3e   : > { %v2605_v20 = vcombine.high %v514_v14, %v518_v15  ;;  %v378_v21 = vld [vmem:[%s2720_s25 + $0x380] sm:$0xff]  ;;  %1875 = vmatprep.mubr.bf16.mxu1 %v2778_v17  ;;  %1818 = vmatprep.subr.bf16.mxu0 %v2477_v19  ;;  %v2604_v26 = vcombine.low %v514_v14, %v518_v15  ;;  %v323_v19 = vld [vmem:[%s2720_s25 + $0x1c8] sm:$0xff] }
  0x3f   : > { %v382_v22 = vld [vmem:[%s2720_s25 + $0x3a0] sm:$0xff]  ;;  %1819 = vmatpush2.bf16.msra.mxu0 %v2476_v25 }
  0x40   : > { %v506_v23 = vld [vmem:[%s2720_s25 + $0x780] sm:$0xff]  ;;  %v2469_v27 = vcombine.high %v378_v21, %v382_v22  ;;  %1859 = vmatprep.subr.bf16.mxu1 %v2605_v20  ;;  %v2468_v33 = vcombine.low %v378_v21, %v382_v22  ;;  %v327_v20 = vld [vmem:[%s2720_s25 + $0x1e8] sm:$0xff] }
  0x41   : > { %v510_v24 = vld [vmem:[%s2720_s25 + $0x7a0] sm:$0xff]  ;;  %1860 = vmatpush2.bf16.msra.mxu1 %v2604_v26  ;;  %v451_v21 = vld [vmem:[%s2720_s25 + $0x5c8] sm:$0xff]  ;;  %v2415_v25 = vcombine.high %v323_v19, %v327_v20 }
  0x42   : > { %v2597_v28 = vcombine.high %v506_v23, %v510_v24  ;;  %v370_v29 = vld [vmem:[%s2720_s25 + $0x340] sm:$0xff]  ;;  %1820 = vmatprep.subr.bf16.mxu0 %v2469_v27  ;;  %v2596_v34 = vcombine.low %v506_v23, %v510_v24  ;;  %v455_v22 = vld [vmem:[%s2720_s25 + $0x5e8] sm:$0xff] }
  0x43   : > { %v374_v30 = vld [vmem:[%s2720_s25 + $0x360] sm:$0xff]  ;;  %1821 = vmatpush2.bf16.msra.mxu0 %v2468_v33  ;;  %v2543_v26 = vcombine.high %v451_v21, %v455_v22  ;;  %v315_v27 = vld [vmem:[%s2720_s25 + $0x188] sm:$0xff]  ;;  %v2414_v33 = vcombine.low %v323_v19, %v327_v20 }
  0x44   : > { %v498_v31 = vld [vmem:[%s2720_s25 + $0x740] sm:$0xff]  ;;  %v2461_v35 = vcombine.high %v370_v29, %v374_v30  ;;  %1861 = vmatprep.subr.bf16.mxu1 %v2597_v28  ;;  %v2460_v41 = vcombine.low %v370_v29, %v374_v30  ;;  %v319_v28 = vld [vmem:[%s2720_s25 + $0x1a8] sm:$0xff]  ;;  %v2817_v29 = vpack.c.bf16 %v2760_v0, %v2760_v0 }
  0x45   : > { %v502_v32 = vld [vmem:[%s2720_s25 + $0x760] sm:$0xff]  ;;  %1862 = vmatpush2.bf16.msra.mxu1 %v2596_v34  ;;  %v443_v30 = vld [vmem:[%s2720_s25 + $0x588] sm:$0xff]  ;;  %v2542_v34 = vcombine.low %v451_v21, %v455_v22 }
  0x46   : > { %v2589_v36 = vcombine.high %v498_v31, %v502_v32  ;;  %v362_v37 = vld [vmem:[%s2720_s25 + $0x300] sm:$0xff]  ;;  %1822 = vmatprep.subr.bf16.mxu0 %v2461_v35  ;;  %v2588_v42 = vcombine.low %v498_v31, %v502_v32  ;;  %v447_v31 = vld [vmem:[%s2720_s25 + $0x5a8] sm:$0xff]  ;;  %v2823_v32 = vpack.c.bf16 %v2767_v6, %v2767_v6  ;;  %v2407_v35 = vcombine.high %v315_v27, %v319_v28 }
  0x47   : > { %v366_v38 = vld [vmem:[%s2720_s25 + $0x320] sm:$0xff]  ;;  %1823 = vmatpush2.bf16.msra.mxu0 %v2460_v41  ;;  %v311_v0 = vld [vmem:[%s2720_s25 + $0x168] sm:$0xff]  ;;  %v2406_v6 = vcombine.low %v315_v27, %v319_v28 }
  0x48   : > { %v490_v39 = vld [vmem:[%s2720_s25 + $0x700] sm:$0xff]  ;;  %v2453_v43 = vcombine.high %v362_v37, %v366_v38  ;;  %1863 = vmatprep.subr.bf16.mxu1 %v2589_v36  ;;  %v2452_v50 = vcombine.low %v362_v37, %v366_v38  ;;  %v2535_v36 = vcombine.high %v443_v30, %v447_v31  ;;  %v307_v37 = vld [vmem:[%s2720_s25 + $0x148] sm:$0xff] }
  0x49   : > { %v494_v40 = vld [vmem:[%s2720_s25 + $0x720] sm:$0xff]  ;;  %1864 = vmatpush2.bf16.msra.mxu1 %v2588_v42  ;;  %v435_v38 = vld [vmem:[%s2720_s25 + $0x548] sm:$0xff]  ;;  %v2399_v41 = vcombine.high %v307_v37, %v311_v0 }
  0x4a   : > { %v2581_v44 = vcombine.high %v490_v39, %v494_v40  ;;  %v354_v46 = vld [vmem:[%s2720_s25 + $0x2c0] sm:$0xff]  ;;  %1824 = vmatprep.subr.bf16.mxu0 %v2453_v43  ;;  %v2580_v51 = vcombine.low %v490_v39, %v494_v40  ;;  %v439_v39 = vld [vmem:[%s2720_s25 + $0x568] sm:$0xff]  ;;  %v2534_v40 = vcombine.low %v443_v30, %v447_v31 }
  0x4b   : > { %v358_v47 = vld [vmem:[%s2720_s25 + $0x2e0] sm:$0xff]  ;;  %1825 = vmatpush2.bf16.msra.mxu0 %v2452_v50  ;;  %v2527_v42 = vcombine.high %v435_v38, %v439_v39  ;;  %v299_v43 = vld [vmem:[%s2720_s25 + $0x108] sm:$0xff] }
  0x4c   : > { %v482_v48 = vld [vmem:[%s2720_s25 + $0x6c0] sm:$0xff]  ;;  %v2445_v52 = vcombine.high %v354_v46, %v358_v47  ;;  %1865 = vmatprep.subr.bf16.mxu1 %v2581_v44  ;;  %v2444_v59 = vcombine.low %v354_v46, %v358_v47  ;;  %v303_v44 = vld [vmem:[%s2720_s25 + $0x128] sm:$0xff] }
  0x4d   : > { %v486_v49 = vld [vmem:[%s2720_s25 + $0x6e0] sm:$0xff]  ;;  %1866 = vmatpush2.bf16.msra.mxu1 %v2580_v51  ;;  %v427_v46 = vld [vmem:[%s2720_s25 + $0x508] sm:$0xff]  ;;  %v2391_v50 = vcombine.high %v299_v43, %v303_v44 }
  0x4e   : > { %v2573_v53 = vcombine.high %v482_v48, %v486_v49  ;;  %v346_v55 = vld [vmem:[%s2720_s25 + $0x280] sm:$0xff]  ;;  %1826 = vmatprep.subr.bf16.mxu0 %v2445_v52  ;;  %v2572_v60 = vcombine.low %v482_v48, %v486_v49  ;;  %v431_v47 = vld [vmem:[%s2720_s25 + $0x528] sm:$0xff]  ;;  %v2398_v48 = vcombine.low %v307_v37, %v311_v0  ;;  %v2526_v49 = vcombine.low %v435_v38, %v439_v39 }
  0x4f   : > { %v350_v56 = vld [vmem:[%s2720_s25 + $0x2a0] sm:$0xff]  ;;  %1827 = vmatpush2.bf16.msra.mxu0 %v2444_v59  ;;  %v2519_v51 = vcombine.high %v427_v46, %v431_v47  ;;  %v291_v52 = vld [vmem:[%s2720_s25 + $0xc8] sm:$0xff] }
  0x50   : > { %v474_v57 = vld [vmem:[%s2720_s25 + $0x680] sm:$0xff]  ;;  %v2437_v61 = vcombine.high %v346_v55, %v350_v56  ;;  %1867 = vmatprep.subr.bf16.mxu1 %v2573_v53  ;;  %v2436_v4 = vcombine.low %v346_v55, %v350_v56  ;;  %v295_v53 = vld [vmem:[%s2720_s25 + $0xe8] sm:$0xff] }
  0x51   : > { %v478_v58 = vld [vmem:[%s2720_s25 + $0x6a0] sm:$0xff]  ;;  %1868 = vmatpush2.bf16.msra.mxu1 %v2572_v60  ;;  %v419_v55 = vld [vmem:[%s2720_s25 + $0x4c8] sm:$0xff]  ;;  %v2383_v59 = vcombine.high %v291_v52, %v295_v53 }
  0x52   : > { %v2565_v62 = vcombine.high %v474_v57, %v478_v58  ;;  %v338_v63 = vld [vmem:[%s2720_s25 + $0x240] sm:$0xff]  ;;  %1828 = vmatprep.subr.bf16.mxu0 %v2437_v61  ;;  %v2564_v5 = vcombine.low %v474_v57, %v478_v58  ;;  %v423_v56 = vld [vmem:[%s2720_s25 + $0x4e8] sm:$0xff]  ;;  %v2390_v57 = vcombine.low %v299_v43, %v303_v44  ;;  %v2518_v58 = vcombine.low %v427_v46, %v431_v47 }
  0x53   : > { %v342_v1 = vld [vmem:[%s2720_s25 + $0x260] sm:$0xff]  ;;  %1829 = vmatpush2.bf16.msra.mxu0 %v2436_v4  ;;  %v2511_v60 = vcombine.high %v419_v55, %v423_v56  ;;  %v283_v61 = vld [vmem:[%s2720_s25 + $0x88] sm:$0xff] }
  0x54   : > { %v466_v2 = vld [vmem:[%s2720_s25 + $0x640] sm:$0xff]  ;;  %v2429_v7 = vcombine.high %v338_v63, %v342_v1  ;;  %1869 = vmatprep.subr.bf16.mxu1 %v2565_v62  ;;  %v2428_v14 = vcombine.low %v338_v63, %v342_v1  ;;  %v287_v62 = vld [vmem:[%s2720_s25 + $0xa8] sm:$0xff] }
  0x55   : > { %v470_v3 = vld [vmem:[%s2720_s25 + $0x660] sm:$0xff]  ;;  %1870 = vmatpush2.bf16.msra.mxu1 %v2564_v5  ;;  %v411_v63 = vld [vmem:[%s2720_s25 + $0x488] sm:$0xff]  ;;  %v2375_v4 = vcombine.high %v283_v61, %v287_v62 }
  0x56   : > { %v2557_v8 = vcombine.high %v466_v2, %v470_v3  ;;  %v330_v9 = vld [vmem:[%s2720_s25 + $0x200] sm:$0xff]  ;;  %1830 = vmatprep.subr.bf16.mxu0 %v2429_v7  ;;  %v2556_v15 = vcombine.low %v466_v2, %v470_v3  ;;  %v415_v1 = vld [vmem:[%s2720_s25 + $0x4a8] sm:$0xff]  ;;  %v2382_v2 = vcombine.low %v291_v52, %v295_v53  ;;  %v2510_v3 = vcombine.low %v419_v55, %v423_v56 }
  0x57   : > { %v334_v10 = vld [vmem:[%s2720_s25 + $0x220] sm:$0xff]  ;;  %1831 = vmatpush2.bf16.msra.mxu0 %v2428_v14  ;;  %v2503_v5 = vcombine.high %v411_v63, %v415_v1  ;;  %v275_v7 = vld [vmem:[%s2720_s25 + $0x48] sm:$0xff] }
  0x58   : > { %v458_v11 = vld [vmem:[%s2720_s25 + $0x600] sm:$0xff]  ;;  %v2421_v16 = vcombine.high %v330_v9, %v334_v10  ;;  %1871 = vmatprep.subr.bf16.mxu1 %v2557_v8  ;;  %v2420_v23 = vcombine.low %v330_v9, %v334_v10  ;;  %v279_v8 = vld [vmem:[%s2720_s25 + $0x68] sm:$0xff] }
  0x59   : > { %v462_v13 = vld [vmem:[%s2720_s25 + $0x620] sm:$0xff]  ;;  %1872 = vmatpush2.bf16.msra.mxu1 %v2556_v15  ;;  %v403_v9 = vld [vmem:[%s2720_s25 + $0x448] sm:$0xff]  ;;  %v2367_v14 = vcombine.high %v275_v7, %v279_v8  ;;  %v2366_v21 = vcombine.low %v275_v7, %v279_v8 }
  0x5a   : > { %v2549_v18 = vcombine.high %v458_v11, %v462_v13  ;;  %1832 = vmatprep.subr.bf16.mxu0 %v2421_v16  ;;  %v2548_v24 = vcombine.low %v458_v11, %v462_v13  ;;  %v407_v10 = vld [vmem:[%s2720_s25 + $0x468] sm:$0xff]  ;;  %v2374_v11 = vcombine.low %v283_v61, %v287_v62  ;;  %v2502_v13 = vcombine.low %v411_v63, %v415_v1 }
  0x5b   : > { %1833 = vmatpush2.bf16.msra.mxu0 %v2420_v23  ;;  %v2495_v15 = vcombine.high %v403_v9, %v407_v10  ;;  %v267_v16 = vld [vmem:[%s2720_s25 + $0x8] sm:$0xff]  ;;  %v2494_v22 = vcombine.low %v403_v9, %v407_v10 }
  0x5c   : > { %1873 = vmatprep.subr.bf16.mxu1 %v2549_v18  ;;  %1884 = vmatprep.subr.bf16.mxu0 %v2415_v25  ;;  %v271_v18 = vld [vmem:[%s2720_s25 + $0x28] sm:$0xff] }
  0x5d   : > { %1874 = vmatpush2.bf16.msra.mxu1 %v2548_v24  ;;  %v395_v19 = vld [vmem:[%s2720_s25 + $0x408] sm:$0xff]  ;;  %v2359_v23 = vcombine.high %v267_v16, %v271_v18  ;;  %v2358_v30 = vcombine.low %v267_v16, %v271_v18 }
  0x5e   : > { %1925 = vmatprep.subr.bf16.mxu1 %v2543_v26  ;;  %1835 = vmatmul.mubr.bf16.vlgmr.msra.gmra.mxu0 %v2817_v29  ;;  %v399_v20 = vld [vmem:[%s2720_s25 + $0x428] sm:$0xff] }
  0x5f   : > { %1885 = vmatpush1.bf16.msra.mxu0 %v2414_v33  ;;  %1916 = vmatprep.mubr.bf16.mxu0 %v2771_v12  ;;  %v2487_v24 = vcombine.high %v395_v19, %v399_v20  ;;  %v387_v25 = vld [vmem:[%s2720_s25 + $0x3c8] sm:$0xff]  ;;  %v2486_v31 = vcombine.low %v395_v19, %v399_v20 }
  0x60   : > { %1876 = vmatmul.mubr.bf16.vlgmr.msra.gmra.mxu1 %v2823_v32  ;;  %1886 = vmatprep.subr.bf16.mxu0 %v2407_v35  ;;  %v391_v26 = vld [vmem:[%s2720_s25 + $0x3e8] sm:$0xff] }
  0x61   : > { %1926 = vmatpush1.bf16.msra.mxu1 %v2542_v34  ;;  %1957 = vmatprep.mubr.bf16.mxu1 %v2778_v17  ;;  %v515_v27 = vld [vmem:[%s2720_s25 + $0x7c8] sm:$0xff]  ;;  %v2479_v33 = vcombine.high %v387_v25, %v391_v26  ;;  %v2478_v38 = vcombine.low %v387_v25, %v391_v26 }
  0x62   : > { %1927 = vmatprep.subr.bf16.mxu1 %v2535_v36  ;;  %v519_v28 = vld [vmem:[%s2720_s25 + $0x7e8] sm:$0xff] }
  0x63   : > { %1887 = vmatpush1.bf16.msra.mxu0 %v2406_v6  ;;  %v2607_v34 = vcombine.high %v515_v27, %v519_v28  ;;  %v379_v35 = vld [vmem:[%s2720_s25 + $0x388] sm:$0xff]  ;;  %v2606_v39 = vcombine.low %v515_v27, %v519_v28 }
  0x64   : > { %1888 = vmatprep.subr.bf16.mxu0 %v2399_v41  ;;  %v383_v36 = vld [vmem:[%s2720_s25 + $0x3a8] sm:$0xff] }
  0x65   : > { %1928 = vmatpush1.bf16.msra.mxu1 %v2534_v40  ;;  %v507_v37 = vld [vmem:[%s2720_s25 + $0x788] sm:$0xff]  ;;  %v2471_v6 = vcombine.high %v379_v35, %v383_v36  ;;  %v2470_v46 = vcombine.low %v379_v35, %v383_v36  ;;  %v452_v35 = vld [vmem:[%s2720_s25 + $0x5d0] sm:$0xff] }
  0x66   : > { %1929 = vmatprep.subr.bf16.mxu1 %v2527_v42  ;;  %v511_v0 = vld [vmem:[%s2720_s25 + $0x7a8] sm:$0xff]  ;;  %v456_v36 = vld [vmem:[%s2720_s25 + $0x5f0] sm:$0xff] }
  0x67   : > { %1889 = vmatpush1.bf16.msra.mxu0 %v2398_v48  ;;  %v2599_v40 = vcombine.high %v507_v37, %v511_v0  ;;  %v371_v41 = vld [vmem:[%s2720_s25 + $0x348] sm:$0xff]  ;;  %v2598_v47 = vcombine.low %v507_v37, %v511_v0 }
  0x68   : > { %1890 = vmatprep.subr.bf16.mxu0 %v2391_v50  ;;  %v375_v42 = vld [vmem:[%s2720_s25 + $0x368] sm:$0xff] }
  0x69   : > { %1930 = vmatpush1.bf16.msra.mxu1 %v2526_v49  ;;  %v499_v43 = vld [vmem:[%s2720_s25 + $0x748] sm:$0xff]  ;;  %v2463_v48 = vcombine.high %v371_v41, %v375_v42  ;;  %v2462_v55 = vcombine.low %v371_v41, %v375_v42  ;;  %v444_v41 = vld [vmem:[%s2720_s25 + $0x590] sm:$0xff] }
  0x6a   : > { %1931 = vmatprep.subr.bf16.mxu1 %v2519_v51  ;;  %v503_v44 = vld [vmem:[%s2720_s25 + $0x768] sm:$0xff]  ;;  %v448_v42 = vld [vmem:[%s2720_s25 + $0x5b0] sm:$0xff] }
  0x6b   : > { %1891 = vmatpush1.bf16.msra.mxu0 %v2390_v57  ;;  %v2591_v49 = vcombine.high %v499_v43, %v503_v44  ;;  %v363_v50 = vld [vmem:[%s2720_s25 + $0x308] sm:$0xff]  ;;  %v2590_v56 = vcombine.low %v499_v43, %v503_v44  ;;  %v2544_v44 = vcombine.low %v452_v35, %v456_v36 }
  0x6c   : > { %1892 = vmatprep.subr.bf16.mxu0 %v2383_v59  ;;  %v367_v51 = vld [vmem:[%s2720_s25 + $0x328] sm:$0xff] }
  0x6d   : > { %1932 = vmatpush1.bf16.msra.mxu1 %v2518_v58  ;;  %v491_v52 = vld [vmem:[%s2720_s25 + $0x708] sm:$0xff]  ;;  %v2455_v57 = vcombine.high %v363_v50, %v367_v51  ;;  %v2454_v63 = vcombine.low %v363_v50, %v367_v51  ;;  %v436_v50 = vld [vmem:[%s2720_s25 + $0x550] sm:$0xff] }
  0x6e   : > { %1933 = vmatprep.subr.bf16.mxu1 %v2511_v60  ;;  %v495_v53 = vld [vmem:[%s2720_s25 + $0x728] sm:$0xff]  ;;  %v440_v51 = vld [vmem:[%s2720_s25 + $0x570] sm:$0xff] }
  0x6f   : > { %1893 = vmatpush1.bf16.msra.mxu0 %v2382_v2  ;;  %v2583_v58 = vcombine.high %v491_v52, %v495_v53  ;;  %v355_v59 = vld [vmem:[%s2720_s25 + $0x2c8] sm:$0xff]  ;;  %v2582_v1 = vcombine.low %v491_v52, %v495_v53  ;;  %v2536_v53 = vcombine.low %v444_v41, %v448_v42 }
  0x70   : > { %1894 = vmatprep.subr.bf16.mxu0 %v2375_v4  ;;  %v359_v60 = vld [vmem:[%s2720_s25 + $0x2e8] sm:$0xff] }
  0x71   : > { %1934 = vmatpush1.bf16.msra.mxu1 %v2510_v3  ;;  %v483_v61 = vld [vmem:[%s2720_s25 + $0x6c8] sm:$0xff]  ;;  %v2447_v2 = vcombine.high %v355_v59, %v359_v60  ;;  %v2446_v9 = vcombine.low %v355_v59, %v359_v60  ;;  %v428_v59 = vld [vmem:[%s2720_s25 + $0x510] sm:$0xff] }
  0x72   : > { %1935 = vmatprep.subr.bf16.mxu1 %v2503_v5  ;;  %v487_v62 = vld [vmem:[%s2720_s25 + $0x6e8] sm:$0xff]  ;;  %v432_v60 = vld [vmem:[%s2720_s25 + $0x530] sm:$0xff] }
  0x73   : > { %1895 = vmatpush1.bf16.msra.mxu0 %v2374_v11  ;;  %v2575_v3 = vcombine.high %v483_v61, %v487_v62  ;;  %v347_v4 = vld [vmem:[%s2720_s25 + $0x288] sm:$0xff]  ;;  %v2574_v10 = vcombine.low %v483_v61, %v487_v62  ;;  %v2528_v62 = vcombine.low %v436_v50, %v440_v51 }
  0x74   : > { %1896 = vmatprep.subr.bf16.mxu0 %v2367_v14  ;;  %v351_v5 = vld [vmem:[%s2720_s25 + $0x2a8] sm:$0xff] }
  0x75   : > { %1936 = vmatpush1.bf16.msra.mxu1 %v2502_v13  ;;  %v475_v7 = vld [vmem:[%s2720_s25 + $0x688] sm:$0xff]  ;;  %v2439_v11 = vcombine.high %v347_v4, %v351_v5  ;;  %v2438_v19 = vcombine.low %v347_v4, %v351_v5  ;;  %v420_v4 = vld [vmem:[%s2720_s25 + $0x4d0] sm:$0xff] }
  0x76   : > { %1937 = vmatprep.subr.bf16.mxu1 %v2495_v15  ;;  %v479_v8 = vld [vmem:[%s2720_s25 + $0x6a8] sm:$0xff]  ;;  %v424_v5 = vld [vmem:[%s2720_s25 + $0x4f0] sm:$0xff] }
  0x77   : > { %1897 = vmatpush1.bf16.msra.mxu0 %v2366_v21  ;;  %v2567_v13 = vcombine.high %v475_v7, %v479_v8  ;;  %v339_v14 = vld [vmem:[%s2720_s25 + $0x248] sm:$0xff]  ;;  %v2566_v20 = vcombine.low %v475_v7, %v479_v8  ;;  %v2520_v8 = vcombine.low %v428_v59, %v432_v60 }
  0x78   : > { %1898 = vmatprep.subr.bf16.mxu0 %v2359_v23  ;;  %v343_v15 = vld [vmem:[%s2720_s25 + $0x268] sm:$0xff] }
  0x79   : > { %1938 = vmatpush1.bf16.msra.mxu1 %v2494_v22  ;;  %v467_v16 = vld [vmem:[%s2720_s25 + $0x648] sm:$0xff]  ;;  %v2431_v21 = vcombine.high %v339_v14, %v343_v15  ;;  %v2430_v27 = vcombine.low %v339_v14, %v343_v15  ;;  %v412_v14 = vld [vmem:[%s2720_s25 + $0x490] sm:$0xff] }
  0x7a   : > { %1939 = vmatprep.subr.bf16.mxu1 %v2487_v24  ;;  %v471_v18 = vld [vmem:[%s2720_s25 + $0x668] sm:$0xff]  ;;  %v416_v15 = vld [vmem:[%s2720_s25 + $0x4b0] sm:$0xff] }
  0x7b   : > { %1899 = vmatpush1.bf16.msra.mxu0 %v2358_v30  ;;  %v2559_v22 = vcombine.high %v467_v16, %v471_v18  ;;  %v331_v23 = vld [vmem:[%s2720_s25 + $0x208] sm:$0xff]  ;;  %v2558_v28 = vcombine.low %v467_v16, %v471_v18  ;;  %v2512_v18 = vcombine.low %v420_v4, %v424_v5 }
  0x7c   : > { %1900 = vmatprep.subr.bf16.mxu0 %v2479_v33  ;;  %v335_v24 = vld [vmem:[%s2720_s25 + $0x228] sm:$0xff]  ;;  %v324_v33 = vld [vmem:[%s2720_s25 + $0x1d0] sm:$0xff] }
  0x7d   : > { %1940 = vmatpush1.bf16.msra.mxu1 %v2486_v31  ;;  %v459_v25 = vld [vmem:[%s2720_s25 + $0x608] sm:$0xff]  ;;  %v2423_v30 = vcombine.high %v331_v23, %v335_v24  ;;  %v2422_v37 = vcombine.low %v331_v23, %v335_v24  ;;  %v404_v23 = vld [vmem:[%s2720_s25 + $0x450] sm:$0xff] }
  0x7e   : > { %1941 = vmatprep.subr.bf16.mxu1 %v2607_v34  ;;  %v463_v26 = vld [vmem:[%s2720_s25 + $0x628] sm:$0xff]  ;;  %v328_v34 = vld [vmem:[%s2720_s25 + $0x1f0] sm:$0xff] }
  0x7f   : > { %1901 = vmatpush2.bf16.msra.mxu0 %v2478_v38  ;;  %v2551_v31 = vcombine.high %v459_v25, %v463_v26  ;;  %v2550_v0 = vcombine.low %v459_v25, %v463_v26  ;;  %v2417_v38 = vcombine.high %v324_v33, %v328_v34  ;;  %v2416_v43 = vcombine.low %v324_v33, %v328_v34  ;;  %v408_v24 = vld [vmem:[%s2720_s25 + $0x470] sm:$0xff] }
  0x80   : > { %1902 = vmatprep.subr.bf16.mxu0 %v2471_v6  ;;  %v316_v6 = vld [vmem:[%s2720_s25 + $0x190] sm:$0xff]  ;;  %v2504_v26 = vcombine.low %v412_v14, %v416_v15 }
  0x81   : > { %1942 = vmatpush2.bf16.msra.mxu1 %v2606_v39  ;;  %v2545_v39 = vcombine.high %v452_v35, %v456_v36  ;;  %v396_v33 = vld [vmem:[%s2720_s25 + $0x410] sm:$0xff]  ;;  %v2496_v36 = vcombine.low %v404_v23, %v408_v24 }
  0x82   : > { %1943 = vmatprep.subr.bf16.mxu1 %v2599_v40  ;;  %v320_v40 = vld [vmem:[%s2720_s25 + $0x1b0] sm:$0xff] }
  0x83   : > { %1903 = vmatpush2.bf16.msra.mxu0 %v2470_v46  ;;  %v2409_v46 = vcombine.high %v316_v6, %v320_v40  ;;  %v2408_v52 = vcombine.low %v316_v6, %v320_v40  ;;  %v400_v34 = vld [vmem:[%s2720_s25 + $0x430] sm:$0xff] }
  0x84   : > { %1904 = vmatprep.subr.bf16.mxu0 %v2463_v48  ;;  %v308_v48 = vld [vmem:[%s2720_s25 + $0x150] sm:$0xff] }
  0x85   : > { %1944 = vmatpush2.bf16.msra.mxu1 %v2598_v47  ;;  %v2537_v47 = vcombine.high %v444_v41, %v448_v42  ;;  %v516_v6 = vld [vmem:[%s2720_s25 + $0x7d0] sm:$0xff]  ;;  %v2488_v42 = vcombine.low %v396_v33, %v400_v34 }
  0x86   : > { %1945 = vmatprep.subr.bf16.mxu1 %v2591_v49  ;;  %v312_v49 = vld [vmem:[%s2720_s25 + $0x170] sm:$0xff] }
  0x87   : > { %1905 = vmatpush2.bf16.msra.mxu0 %v2462_v55  ;;  %v2401_v55 = vcombine.high %v308_v48, %v312_v49  ;;  %v2400_v61 = vcombine.low %v308_v48, %v312_v49  ;;  %v520_v40 = vld [vmem:[%s2720_s25 + $0x7f0] sm:$0xff] }
  0x88   : > { %1906 = vmatprep.subr.bf16.mxu0 %v2455_v57  ;;  %v300_v57 = vld [vmem:[%s2720_s25 + $0x110] sm:$0xff] }
  0x89   : > { %1946 = vmatpush2.bf16.msra.mxu1 %v2590_v56  ;;  %v2529_v56 = vcombine.high %v436_v50, %v440_v51  ;;  %v508_v48 = vld [vmem:[%s2720_s25 + $0x790] sm:$0xff]  ;;  %v2608_v51 = vcombine.low %v516_v6, %v520_v40 }
  0x8a   : > { %1947 = vmatprep.subr.bf16.mxu1 %v2583_v58  ;;  %v304_v58 = vld [vmem:[%s2720_s25 + $0x130] sm:$0xff] }
  0x8b   : > { %1907 = vmatpush2.bf16.msra.mxu0 %v2454_v63  ;;  %v2393_v63 = vcombine.high %v300_v57, %v304_v58  ;;  %v2392_v7 = vcombine.low %v300_v57, %v304_v58  ;;  %v512_v49 = vld [vmem:[%s2720_s25 + $0x7b0] sm:$0xff] }
  0x8c   : > { %1908 = vmatprep.subr.bf16.mxu0 %v2447_v2  ;;  %v292_v2 = vld [vmem:[%s2720_s25 + $0xd0] sm:$0xff] }
  0x8d   : > { %1948 = vmatpush2.bf16.msra.mxu1 %v2582_v1  ;;  %v2521_v1 = vcombine.high %v428_v59, %v432_v60  ;;  %v500_v57 = vld [vmem:[%s2720_s25 + $0x750] sm:$0xff]  ;;  %v2600_v60 = vcombine.low %v508_v48, %v512_v49 }
  0x8e   : > { %1949 = vmatprep.subr.bf16.mxu1 %v2575_v3  ;;  %v296_v3 = vld [vmem:[%s2720_s25 + $0xf0] sm:$0xff] }
  0x8f   : > { %1909 = vmatpush2.bf16.msra.mxu0 %v2446_v9  ;;  %v2385_v9 = vcombine.high %v292_v2, %v296_v3  ;;  %v2384_v16 = vcombine.low %v292_v2, %v296_v3  ;;  %v504_v58 = vld [vmem:[%s2720_s25 + $0x770] sm:$0xff] }
  0x90   : > { %1910 = vmatprep.subr.bf16.mxu0 %v2439_v11  ;;  %v284_v11 = vld [vmem:[%s2720_s25 + $0x90] sm:$0xff] }
  0x91   : > { %1950 = vmatpush2.bf16.msra.mxu1 %v2574_v10  ;;  %v2513_v10 = vcombine.high %v420_v4, %v424_v5  ;;  %v492_v2 = vld [vmem:[%s2720_s25 + $0x710] sm:$0xff]  ;;  %v2592_v5 = vcombine.low %v500_v57, %v504_v58 }
  0x92   : > { %1951 = vmatprep.subr.bf16.mxu1 %v2567_v13  ;;  %v288_v13 = vld [vmem:[%s2720_s25 + $0xb0] sm:$0xff] }
  0x93   : > { %1911 = vmatpush2.bf16.msra.mxu0 %v2438_v19  ;;  %v2377_v19 = vcombine.high %v284_v11, %v288_v13  ;;  %v2376_v25 = vcombine.low %v284_v11, %v288_v13  ;;  %v496_v3 = vld [vmem:[%s2720_s25 + $0x730] sm:$0xff] }
  0x94   : > { %1912 = vmatprep.subr.bf16.mxu0 %v2431_v21  ;;  %v276_v21 = vld [vmem:[%s2720_s25 + $0x50] sm:$0xff] }
  0x95   : > { %1952 = vmatpush2.bf16.msra.mxu1 %v2566_v20  ;;  %v2505_v20 = vcombine.high %v412_v14, %v416_v15  ;;  %v484_v11 = vld [vmem:[%s2720_s25 + $0x6d0] sm:$0xff]  ;;  %v2584_v15 = vcombine.low %v492_v2, %v496_v3 }
  0x96   : > { %1953 = vmatprep.subr.bf16.mxu1 %v2559_v22  ;;  %v280_v22 = vld [vmem:[%s2720_s25 + $0x70] sm:$0xff] }
  0x97   : > { %1913 = vmatpush2.bf16.msra.mxu0 %v2430_v27  ;;  %v2369_v27 = vcombine.high %v276_v21, %v280_v22  ;;  %v2368_v35 = vcombine.low %v276_v21, %v280_v22  ;;  %v488_v13 = vld [vmem:[%s2720_s25 + $0x6f0] sm:$0xff] }
  0x98   : > { %1914 = vmatprep.subr.bf16.mxu0 %v2423_v30  ;;  %v268_v30 = vld [vmem:[%s2720_s25 + $0x10] sm:$0xff] }
  0x99   : > { %1954 = vmatpush2.bf16.msra.mxu1 %v2558_v28  ;;  %v2497_v28 = vcombine.high %v404_v23, %v408_v24  ;;  %v476_v21 = vld [vmem:[%s2720_s25 + $0x690] sm:$0xff]  ;;  %v2576_v24 = vcombine.low %v484_v11, %v488_v13 }
  0x9a   : > { %1955 = vmatprep.subr.bf16.mxu1 %v2551_v31  ;;  %v272_v31 = vld [vmem:[%s2720_s25 + $0x30] sm:$0xff] }
  0x9b   : > { %1915 = vmatpush2.bf16.msra.mxu0 %v2422_v37  ;;  %v2361_v37 = vcombine.high %v268_v30, %v272_v31  ;;  %v2360_v41 = vcombine.low %v268_v30, %v272_v31  ;;  %v480_v22 = vld [vmem:[%s2720_s25 + $0x6b0] sm:$0xff] }
  0x9c   : > { %1966 = vmatprep.subr.bf16.mxu0 %v2417_v38  ;;  %v388_v38 = vld [vmem:[%s2720_s25 + $0x3d0] sm:$0xff] }
  0x9d   : > { %1956 = vmatpush2.bf16.msra.mxu1 %v2550_v0  ;;  %v2489_v0 = vcombine.high %v396_v33, %v400_v34  ;;  %v468_v30 = vld [vmem:[%s2720_s25 + $0x650] sm:$0xff]  ;;  %v2568_v34 = vcombine.low %v476_v21, %v480_v22 }
  0x9e   : > { %2007 = vmatprep.subr.bf16.mxu1 %v2545_v39  ;;  %1917 = vmatmul.mubr.bf16.vlgmr.msra.gmra.mxu0 %v2817_v29  ;;  %v392_v39 = vld [vmem:[%s2720_s25 + $0x3f0] sm:$0xff] }
  0x9f   : > { %1967 = vmatpush1.bf16.msra.mxu0 %v2416_v43  ;;  %1998 = vmatprep.mubr.bf16.mxu0 %v2771_v12  ;;  %v2481_v43 = vcombine.high %v388_v38, %v392_v39  ;;  %v2480_v50 = vcombine.low %v388_v38, %v392_v39  ;;  %v472_v31 = vld [vmem:[%s2720_s25 + $0x670] sm:$0xff] }
  0xa0   : > { %1958 = vmatmul.mubr.bf16.vlgmr.msra.gmra.mxu1 %v2823_v32  ;;  %1968 = vmatprep.subr.bf16.mxu0 %v2409_v46  ;;  %v380_v46 = vld [vmem:[%s2720_s25 + $0x390] sm:$0xff] }
  0xa1   : > { %2008 = vmatpush1.bf16.msra.mxu1 %v2544_v44  ;;  %2039 = vmatprep.mubr.bf16.mxu1 %v2778_v17  ;;  %v2609_v44 = vcombine.high %v516_v6, %v520_v40  ;;  %v460_v38 = vld [vmem:[%s2720_s25 + $0x610] sm:$0xff]  ;;  %v2560_v40 = vcombine.low %v468_v30, %v472_v31 }
  0xa2   : > { %2009 = vmatprep.subr.bf16.mxu1 %v2537_v47  ;;  %v384_v47 = vld [vmem:[%s2720_s25 + $0x3b0] sm:$0xff] }
  0xa3   : > { %1969 = vmatpush1.bf16.msra.mxu0 %v2408_v52  ;;  %v2473_v52 = vcombine.high %v380_v46, %v384_v47  ;;  %v2472_v59 = vcombine.low %v380_v46, %v384_v47  ;;  %v464_v39 = vld [vmem:[%s2720_s25 + $0x630] sm:$0xff]  ;;  %v453_v46 = vld [vmem:[%s2720_s25 + $0x5d8] sm:$0xff] }
  0xa4   : > { %1970 = vmatprep.subr.bf16.mxu0 %v2401_v55  ;;  %v372_v55 = vld [vmem:[%s2720_s25 + $0x350] sm:$0xff]  ;;  %v457_v47 = vld [vmem:[%s2720_s25 + $0x5f8] sm:$0xff] }
  0xa5   : > { %2010 = vmatpush1.bf16.msra.mxu1 %v2536_v53  ;;  %v2601_v53 = vcombine.high %v508_v48, %v512_v49  ;;  %v2552_v49 = vcombine.low %v460_v38, %v464_v39 }
  0xa6   : > { %2011 = vmatprep.subr.bf16.mxu1 %v2529_v56  ;;  %v376_v56 = vld [vmem:[%s2720_s25 + $0x370] sm:$0xff] }
  0xa7   : > { %1971 = vmatpush1.bf16.msra.mxu0 %v2400_v61  ;;  %v2465_v61 = vcombine.high %v372_v55, %v376_v56  ;;  %v2464_v4 = vcombine.low %v372_v55, %v376_v56  ;;  %v445_v55 = vld [vmem:[%s2720_s25 + $0x598] sm:$0xff] }
  0xa8   : > { %1972 = vmatprep.subr.bf16.mxu0 %v2393_v63  ;;  %v364_v63 = vld [vmem:[%s2720_s25 + $0x310] sm:$0xff]  ;;  %v449_v56 = vld [vmem:[%s2720_s25 + $0x5b8] sm:$0xff] }
  0xa9   : > { %2012 = vmatpush1.bf16.msra.mxu1 %v2528_v62  ;;  %v2593_v62 = vcombine.high %v500_v57, %v504_v58  ;;  %v2546_v58 = vcombine.low %v453_v46, %v457_v47 }
  0xaa   : > { %2013 = vmatprep.subr.bf16.mxu1 %v2521_v1  ;;  %v368_v1 = vld [vmem:[%s2720_s25 + $0x330] sm:$0xff] }
  0xab   : > { %1973 = vmatpush1.bf16.msra.mxu0 %v2392_v7  ;;  %v2457_v7 = vcombine.high %v364_v63, %v368_v1  ;;  %v2456_v14 = vcombine.low %v364_v63, %v368_v1  ;;  %v437_v63 = vld [vmem:[%s2720_s25 + $0x558] sm:$0xff] }
  0xac   : > { %1974 = vmatprep.subr.bf16.mxu0 %v2385_v9  ;;  %v356_v9 = vld [vmem:[%s2720_s25 + $0x2d0] sm:$0xff]  ;;  %v441_v1 = vld [vmem:[%s2720_s25 + $0x578] sm:$0xff] }
  0xad   : > { %2014 = vmatpush1.bf16.msra.mxu1 %v2520_v8  ;;  %v2585_v8 = vcombine.high %v492_v2, %v496_v3  ;;  %v2538_v3 = vcombine.low %v445_v55, %v449_v56 }
  0xae   : > { %2015 = vmatprep.subr.bf16.mxu1 %v2513_v10  ;;  %v360_v10 = vld [vmem:[%s2720_s25 + $0x2f0] sm:$0xff] }
  0xaf   : > { %1975 = vmatpush1.bf16.msra.mxu0 %v2384_v16  ;;  %v2449_v16 = vcombine.high %v356_v9, %v360_v10  ;;  %v2448_v23 = vcombine.low %v356_v9, %v360_v10  ;;  %v429_v9 = vld [vmem:[%s2720_s25 + $0x518] sm:$0xff] }
  0xb0   : > { %1976 = vmatprep.subr.bf16.mxu0 %v2377_v19  ;;  %v348_v19 = vld [vmem:[%s2720_s25 + $0x290] sm:$0xff]  ;;  %v433_v10 = vld [vmem:[%s2720_s25 + $0x538] sm:$0xff] }
  0xb1   : > { %2016 = vmatpush1.bf16.msra.mxu1 %v2512_v18  ;;  %v2577_v18 = vcombine.high %v484_v11, %v488_v13  ;;  %v2530_v13 = vcombine.low %v437_v63, %v441_v1 }
  0xb2   : > { %2017 = vmatprep.subr.bf16.mxu1 %v2505_v20  ;;  %v352_v20 = vld [vmem:[%s2720_s25 + $0x2b0] sm:$0xff] }
  0xb3   : > { %1977 = vmatpush1.bf16.msra.mxu0 %v2376_v25  ;;  %v2441_v25 = vcombine.high %v348_v19, %v352_v20  ;;  %v2440_v33 = vcombine.low %v348_v19, %v352_v20  ;;  %v421_v19 = vld [vmem:[%s2720_s25 + $0x4d8] sm:$0xff] }
  0xb4   : > { %1978 = vmatprep.subr.bf16.mxu0 %v2369_v27  ;;  %v340_v27 = vld [vmem:[%s2720_s25 + $0x250] sm:$0xff] }
  0xb5   : > { %2018 = vmatpush1.bf16.msra.mxu1 %v2504_v26  ;;  %v2569_v26 = vcombine.high %v476_v21, %v480_v22 }
  0xb6   : > { %2019 = vmatprep.subr.bf16.mxu1 %v2497_v28  ;;  %v344_v28 = vld [vmem:[%s2720_s25 + $0x270] sm:$0xff] }
  0xb7   : > { %1979 = vmatpush1.bf16.msra.mxu0 %v2368_v35  ;;  %v2433_v35 = vcombine.high %v340_v27, %v344_v28  ;;  %v2432_v6 = vcombine.low %v340_v27, %v344_v28 }
  0xb8   : > { %1980 = vmatprep.subr.bf16.mxu0 %v2361_v37  ;;  %v332_v37 = vld [vmem:[%s2720_s25 + $0x210] sm:$0xff] }
  0xb9   : > { %2020 = vmatpush1.bf16.msra.mxu1 %v2496_v36  ;;  %v2561_v36 = vcombine.high %v468_v30, %v472_v31 }
  0xba   : > { %2021 = vmatprep.subr.bf16.mxu1 %v2489_v0  ;;  %v336_v0 = vld [vmem:[%s2720_s25 + $0x230] sm:$0xff] }
  0xbb   : > { %1981 = vmatpush1.bf16.msra.mxu0 %v2360_v41  ;;  %v2425_v41 = vcombine.high %v332_v37, %v336_v0  ;;  %v2424_v48 = vcombine.low %v332_v37, %v336_v0 }
  0xbc   : > { %1982 = vmatprep.subr.bf16.mxu0 %v2481_v43  ;;  %v325_v43 = vld [vmem:[%s2720_s25 + $0x1d8] sm:$0xff] }
  0xbd   : > { %2022 = vmatpush1.bf16.msra.mxu1 %v2488_v42  ;;  %v2553_v42 = vcombine.high %v460_v38, %v464_v39 }
  0xbe   : > { %2023 = vmatprep.subr.bf16.mxu1 %v2609_v44  ;;  %v329_v44 = vld [vmem:[%s2720_s25 + $0x1f8] sm:$0xff] }
  0xbf   : > { %1983 = vmatpush2.bf16.msra.mxu0 %v2480_v50  ;;  %v2419_v50 = vcombine.high %v325_v43, %v329_v44  ;;  %v2418_v57 = vcombine.low %v325_v43, %v329_v44 }
  0xc0   : > { %1984 = vmatprep.subr.bf16.mxu0 %v2473_v52  ;;  %v317_v52 = vld [vmem:[%s2720_s25 + $0x198] sm:$0xff] }
  0xc1   : > { %2024 = vmatpush2.bf16.msra.mxu1 %v2608_v51  ;;  %v2547_v51 = vcombine.high %v453_v46, %v457_v47 }
  0xc2   : > { %2025 = vmatprep.subr.bf16.mxu1 %v2601_v53  ;;  %v321_v53 = vld [vmem:[%s2720_s25 + $0x1b8] sm:$0xff] }
  0xc3   : > { %1985 = vmatpush2.bf16.msra.mxu0 %v2472_v59  ;;  %v2411_v59 = vcombine.high %v317_v52, %v321_v53  ;;  %v2410_v2 = vcombine.low %v317_v52, %v321_v53 }
  0xc4   : > { %1986 = vmatprep.subr.bf16.mxu0 %v2465_v61  ;;  %v309_v61 = vld [vmem:[%s2720_s25 + $0x158] sm:$0xff] }
  0xc5   : > { %2026 = vmatpush2.bf16.msra.mxu1 %v2600_v60  ;;  %v2539_v60 = vcombine.high %v445_v55, %v449_v56 }
  0xc6   : > { %2027 = vmatprep.subr.bf16.mxu1 %v2593_v62  ;;  %v313_v62 = vld [vmem:[%s2720_s25 + $0x178] sm:$0xff] }
  0xc7   : > { %1987 = vmatpush2.bf16.msra.mxu0 %v2464_v4  ;;  %v2403_v4 = vcombine.high %v309_v61, %v313_v62  ;;  %v2402_v11 = vcombine.low %v309_v61, %v313_v62 }
  0xc8   : > { %1988 = vmatprep.subr.bf16.mxu0 %v2457_v7  ;;  %v301_v7 = vld [vmem:[%s2720_s25 + $0x118] sm:$0xff] }
  0xc9   : > { %2028 = vmatpush2.bf16.msra.mxu1 %v2592_v5  ;;  %v2531_v5 = vcombine.high %v437_v63, %v441_v1 }
  0xca   : > { %2029 = vmatprep.subr.bf16.mxu1 %v2585_v8  ;;  %v305_v8 = vld [vmem:[%s2720_s25 + $0x138] sm:$0xff] }
  0xcb   : > { %1989 = vmatpush2.bf16.msra.mxu0 %v2456_v14  ;;  %v2395_v14 = vcombine.high %v301_v7, %v305_v8  ;;  %v2394_v20 = vcombine.low %v301_v7, %v305_v8 }
  0xcc   : > { %1990 = vmatprep.subr.bf16.mxu0 %v2449_v16  ;;  %v293_v16 = vld [vmem:[%s2720_s25 + $0xd8] sm:$0xff] }
  0xcd   : > { %2030 = vmatpush2.bf16.msra.mxu1 %v2584_v15  ;;  %v2523_v15 = vcombine.high %v429_v9, %v433_v10 }
  0xce   : > { %2031 = vmatprep.subr.bf16.mxu1 %v2577_v18  ;;  %v297_v18 = vld [vmem:[%s2720_s25 + $0xf8] sm:$0xff] }
  0xcf   : > { %1991 = vmatpush2.bf16.msra.mxu0 %v2448_v23  ;;  %v2387_v21 = vcombine.high %v293_v16, %v297_v18  ;;  %v285_v23 = vld [vmem:[%s2720_s25 + $0x98] sm:$0xff]  ;;  %v2386_v27 = vcombine.low %v293_v16, %v297_v18 }
  0xd0   : > { %1992 = vmatprep.subr.bf16.mxu0 %v2441_v25  ;;  %v413_v25 = vld [vmem:[%s2720_s25 + $0x498] sm:$0xff] }
  0xd1   : > { %2032 = vmatpush2.bf16.msra.mxu1 %v2576_v24  ;;  %v289_v24 = vld [vmem:[%s2720_s25 + $0xb8] sm:$0xff] }
  0xd2   : > { %2033 = vmatprep.subr.bf16.mxu1 %v2569_v26  ;;  %v417_v26 = vld [vmem:[%s2720_s25 + $0x4b8] sm:$0xff]  ;;  %v2379_v30 = vcombine.high %v285_v23, %v289_v24  ;;  %v2378_v37 = vcombine.low %v285_v23, %v289_v24 }
  0xd3   : > { %1993 = vmatpush2.bf16.msra.mxu0 %v2440_v33  ;;  %v2507_v31 = vcombine.high %v413_v25, %v417_v26  ;;  %v277_v33 = vld [vmem:[%s2720_s25 + $0x58] sm:$0xff]  ;;  %v2506_v0 = vcombine.low %v413_v25, %v417_v26 }
  0xd4   : > { %1994 = vmatprep.subr.bf16.mxu0 %v2433_v35  ;;  %v405_v35 = vld [vmem:[%s2720_s25 + $0x458] sm:$0xff] }
  0xd5   : > { %2034 = vmatpush2.bf16.msra.mxu1 %v2568_v34  ;;  %v281_v34 = vld [vmem:[%s2720_s25 + $0x78] sm:$0xff] }
  0xd6   : > { %2035 = vmatprep.subr.bf16.mxu1 %v2561_v36  ;;  %v409_v36 = vld [vmem:[%s2720_s25 + $0x478] sm:$0xff]  ;;  %v2371_v38 = vcombine.high %v277_v33, %v281_v34  ;;  %v2370_v43 = vcombine.low %v277_v33, %v281_v34 }
  0xd7   : > { %1995 = vmatpush2.bf16.msra.mxu0 %v2432_v6  ;;  %v2499_v39 = vcombine.high %v405_v35, %v409_v36  ;;  %v269_v6 = vld [vmem:[%s2720_s25 + $0x18] sm:$0xff]  ;;  %v2498_v44 = vcombine.low %v405_v35, %v409_v36 }
  0xd8   : > { %1996 = vmatprep.subr.bf16.mxu0 %v2425_v41  ;;  %v397_v41 = vld [vmem:[%s2720_s25 + $0x418] sm:$0xff] }
  0xd9   : > { %2036 = vmatpush2.bf16.msra.mxu1 %v2560_v40  ;;  %v273_v40 = vld [vmem:[%s2720_s25 + $0x38] sm:$0xff] }
  0xda   : > { %2037 = vmatprep.subr.bf16.mxu1 %v2553_v42  ;;  %v401_v42 = vld [vmem:[%s2720_s25 + $0x438] sm:$0xff]  ;;  %v2363_v46 = vcombine.high %v269_v6, %v273_v40  ;;  %v2362_v52 = vcombine.low %v269_v6, %v273_v40 }
  0xdb   : > { %1997 = vmatpush2.bf16.msra.mxu0 %v2424_v48  ;;  %v2491_v47 = vcombine.high %v397_v41, %v401_v42  ;;  %v389_v48 = vld [vmem:[%s2720_s25 + $0x3d8] sm:$0xff]  ;;  %v2490_v53 = vcombine.low %v397_v41, %v401_v42 }
  0xdc   : > { %2048 = vmatprep.subr.bf16.mxu0 %v2419_v50  ;;  %v517_v50 = vld [vmem:[%s2720_s25 + $0x7d8] sm:$0xff] }
  0xdd   : > { %2038 = vmatpush2.bf16.msra.mxu1 %v2552_v49  ;;  %v393_v49 = vld [vmem:[%s2720_s25 + $0x3f8] sm:$0xff] }
  0xde   : > { %2089 = vmatprep.subr.bf16.mxu1 %v2547_v51  ;;  %1999 = vmatmul.mubr.bf16.vlgmr.msra.gmra.mxu0 %v2817_v29  ;;  %v521_v51 = vld [vmem:[%s2720_s25 + $0x7f8] sm:$0xff]  ;;  %v2483_v55 = vcombine.high %v389_v48, %v393_v49  ;;  %v2482_v61 = vcombine.low %v389_v48, %v393_v49 }
  0xdf   : > { %2049 = vmatpush1.bf16.msra.mxu0 %v2418_v57  ;;  %2080 = vmatprep.mubr.bf16.mxu0 %v2771_v12  ;;  %v425_v12 = vld [vmem:[%s2720_s25 + $0x4f8] sm:$0xff]  ;;  %v2611_v56 = vcombine.high %v517_v50, %v521_v51  ;;  %v2610_v62 = vcombine.low %v517_v50, %v521_v51 }
  0xe0   : > { %2040 = vmatmul.mubr.bf16.vlgmr.msra.gmra.mxu1 %v2823_v32  ;;  %2050 = vmatprep.subr.bf16.mxu0 %v2411_v59  ;;  %v2515_v22 = vcombine.high %v421_v19, %v425_v12  ;;  %v2514_v28 = vcombine.low %v421_v19, %v425_v12  ;;  %v381_v57 = vld [vmem:[%s2720_s25 + $0x398] sm:$0xff] }
  0xe1   : > { %2090 = vmatpush1.bf16.msra.mxu1 %v2546_v58  ;;  %2121 = vmatprep.mubr.bf16.mxu1 %v2778_v17  ;;  %v2522_v17 = vcombine.low %v429_v9, %v433_v10  ;;  %v385_v58 = vld [vmem:[%s2720_s25 + $0x3b8] sm:$0xff] }
  0xe2   : > { %2091 = vmatprep.subr.bf16.mxu1 %v2539_v60  ;;  %v509_v59 = vld [vmem:[%s2720_s25 + $0x798] sm:$0xff]  ;;  %v2475_v63 = vcombine.high %v381_v57, %v385_v58  ;;  %v2474_v7 = vcombine.low %v381_v57, %v385_v58 }
  0xe3   : > { %2051 = vmatpush1.bf16.msra.mxu0 %v2410_v2  ;;  %v513_v60 = vld [vmem:[%s2720_s25 + $0x7b8] sm:$0xff] }
  0xe4   : > { %2052 = vmatprep.subr.bf16.mxu0 %v2403_v4  ;;  %v2603_v1 = vcombine.high %v509_v59, %v513_v60  ;;  %v373_v2 = vld [vmem:[%s2720_s25 + $0x358] sm:$0xff]  ;;  %v2602_v8 = vcombine.low %v509_v59, %v513_v60 }
  0xe5   : > { %2092 = vmatpush1.bf16.msra.mxu1 %v2538_v3  ;;  %v377_v3 = vld [vmem:[%s2720_s25 + $0x378] sm:$0xff] }
  0xe6   : > { %2093 = vmatprep.subr.bf16.mxu1 %v2531_v5  ;;  %v501_v4 = vld [vmem:[%s2720_s25 + $0x758] sm:$0xff]  ;;  %v2467_v9 = vcombine.high %v373_v2, %v377_v3  ;;  %v2466_v16 = vcombine.low %v373_v2, %v377_v3 }
  0xe7   : > { %2053 = vmatpush1.bf16.msra.mxu0 %v2402_v11  ;;  %v505_v5 = vld [vmem:[%s2720_s25 + $0x778] sm:$0xff] }
  0xe8   : > { %2054 = vmatprep.subr.bf16.mxu0 %v2395_v14  ;;  %v2595_v10 = vcombine.high %v501_v4, %v505_v5  ;;  %v365_v11 = vld [vmem:[%s2720_s25 + $0x318] sm:$0xff]  ;;  %v2594_v18 = vcombine.low %v501_v4, %v505_v5 }
  0xe9   : > { %2094 = vmatpush1.bf16.msra.mxu1 %v2530_v13  ;;  %v369_v13 = vld [vmem:[%s2720_s25 + $0x338] sm:$0xff] }
  0xea   : > { %2095 = vmatprep.subr.bf16.mxu1 %v2523_v15  ;;  %v493_v14 = vld [vmem:[%s2720_s25 + $0x718] sm:$0xff]  ;;  %v2459_v19 = vcombine.high %v365_v11, %v369_v13  ;;  %v2458_v23 = vcombine.low %v365_v11, %v369_v13 }
  0xeb   : > { %2055 = vmatpush1.bf16.msra.mxu0 %v2394_v20  ;;  %v497_v15 = vld [vmem:[%s2720_s25 + $0x738] sm:$0xff] }
  0xec   : > { %2056 = vmatprep.subr.bf16.mxu0 %v2387_v21  ;;  %v2587_v12 = vcombine.high %v493_v14, %v497_v15  ;;  %v357_v20 = vld [vmem:[%s2720_s25 + $0x2d8] sm:$0xff]  ;;  %v2586_v24 = vcombine.low %v493_v14, %v497_v15 }
  0xed   : > { %2096 = vmatpush1.bf16.msra.mxu1 %v2522_v17  ;;  %v361_v17 = vld [vmem:[%s2720_s25 + $0x2f8] sm:$0xff] }
  0xee   : > { %2097 = vmatprep.subr.bf16.mxu1 %v2515_v22  ;;  %v485_v21 = vld [vmem:[%s2720_s25 + $0x6d8] sm:$0xff]  ;;  %v2451_v25 = vcombine.high %v357_v20, %v361_v17  ;;  %v2450_v33 = vcombine.low %v357_v20, %v361_v17 }
  0xef   : > { %2057 = vmatpush1.bf16.msra.mxu0 %v2386_v27  ;;  %v489_v22 = vld [vmem:[%s2720_s25 + $0x6f8] sm:$0xff] }
  0xf0   : > { %2058 = vmatprep.subr.bf16.mxu0 %v2379_v30  ;;  %v2579_v26 = vcombine.high %v485_v21, %v489_v22  ;;  %v349_v27 = vld [vmem:[%s2720_s25 + $0x298] sm:$0xff]  ;;  %v2578_v34 = vcombine.low %v485_v21, %v489_v22 }
  0xf1   : > { %2098 = vmatpush1.bf16.msra.mxu1 %v2514_v28  ;;  %v353_v28 = vld [vmem:[%s2720_s25 + $0x2b8] sm:$0xff] }
  0xf2   : > { %2099 = vmatprep.subr.bf16.mxu1 %v2507_v31  ;;  %v477_v30 = vld [vmem:[%s2720_s25 + $0x698] sm:$0xff]  ;;  %v2443_v35 = vcombine.high %v349_v27, %v353_v28  ;;  %v2442_v6 = vcombine.low %v349_v27, %v353_v28 }
  0xf3   : > { %2059 = vmatpush1.bf16.msra.mxu0 %v2378_v37  ;;  %v481_v31 = vld [vmem:[%s2720_s25 + $0x6b8] sm:$0xff] }
  0xf4   : > { %2060 = vmatprep.subr.bf16.mxu0 %v2371_v38  ;;  %v2571_v36 = vcombine.high %v477_v30, %v481_v31  ;;  %v341_v37 = vld [vmem:[%s2720_s25 + $0x258] sm:$0xff]  ;;  %v2570_v40 = vcombine.low %v477_v30, %v481_v31 }
  0xf5   : > { %2100 = vmatpush1.bf16.msra.mxu1 %v2506_v0  ;;  %v345_v0 = vld [vmem:[%s2720_s25 + $0x278] sm:$0xff] }
  0xf6   : > { %2101 = vmatprep.subr.bf16.mxu1 %v2499_v39  ;;  %v469_v38 = vld [vmem:[%s2720_s25 + $0x658] sm:$0xff]  ;;  %v2435_v41 = vcombine.high %v341_v37, %v345_v0  ;;  %v2434_v48 = vcombine.low %v341_v37, %v345_v0 }
  0xf7   : > { %2061 = vmatpush1.bf16.msra.mxu0 %v2370_v43  ;;  %v473_v39 = vld [vmem:[%s2720_s25 + $0x678] sm:$0xff] }
  0xf8   : > { %2062 = vmatprep.subr.bf16.mxu0 %v2363_v46  ;;  %v2563_v42 = vcombine.high %v469_v38, %v473_v39  ;;  %v333_v43 = vld [vmem:[%s2720_s25 + $0x218] sm:$0xff]  ;;  %v2562_v49 = vcombine.low %v469_v38, %v473_v39 }
  0xf9   : > { %2102 = vmatpush1.bf16.msra.mxu1 %v2498_v44  ;;  %v337_v44 = vld [vmem:[%s2720_s25 + $0x238] sm:$0xff] }
  0xfa   : > { %2103 = vmatprep.subr.bf16.mxu1 %v2491_v47  ;;  %v461_v46 = vld [vmem:[%s2720_s25 + $0x618] sm:$0xff]  ;;  %v2427_v50 = vcombine.high %v333_v43, %v337_v44 }
  0xfb   : > { %2063 = vmatpush1.bf16.msra.mxu0 %v2362_v52  ;;  %v465_v47 = vld [vmem:[%s2720_s25 + $0x638] sm:$0xff]  ;;  %v2426_v52 = vcombine.low %v333_v43, %v337_v44 }
  0xfc   : > { %2064 = vmatprep.subr.bf16.mxu0 %v2483_v55  ;;  %v2555_v51 = vcombine.high %v461_v46, %v465_v47 }
  0xfd   : > { %2104 = vmatpush1.bf16.msra.mxu1 %v2490_v53  ;;  %v2554_v53 = vcombine.low %v461_v46, %v465_v47 }
  0xfe   : > { %2105 = vmatprep.subr.bf16.mxu1 %v2611_v56 }
  0xff   : > { %2065 = vmatpush2.bf16.msra.mxu0 %v2482_v61 }
 0x100   : > { %2066 = vmatprep.subr.bf16.mxu0 %v2475_v63 }
 0x101   : > { %2106 = vmatpush2.bf16.msra.mxu1 %v2610_v62 }
 0x102   : > { %2107 = vmatprep.subr.bf16.mxu1 %v2603_v1 }
 0x103   : > { %2067 = vmatpush2.bf16.msra.mxu0 %v2474_v7 }
 0x104   : > { %2068 = vmatprep.subr.bf16.mxu0 %v2467_v9 }
 0x105   : > { %2108 = vmatpush2.bf16.msra.mxu1 %v2602_v8 }
 0x106   : > { %2109 = vmatprep.subr.bf16.mxu1 %v2595_v10 }
 0x107   : > { %2069 = vmatpush2.bf16.msra.mxu0 %v2466_v16  ;;  %v237_v16 = vld [vmem:[#allocation2] sm:$0xff] }
 0x108   : > { %2070 = vmatprep.subr.bf16.mxu0 %v2459_v19 }
 0x109   : > { %2110 = vmatpush2.bf16.msra.mxu1 %v2594_v18 }
 0x10a   : > { %2111 = vmatprep.subr.bf16.mxu1 %v2587_v12 }
 0x10b   : > { %2071 = vmatpush2.bf16.msra.mxu0 %v2458_v23 }
 0x10c   : > { %2072 = vmatprep.subr.bf16.mxu0 %v2451_v25 }
 0x10d   : > { %2112 = vmatpush2.bf16.msra.mxu1 %v2586_v24 }
 0x10e   : > { %2113 = vmatprep.subr.bf16.mxu1 %v2579_v26 }
 0x10f   : > { %2073 = vmatpush2.bf16.msra.mxu0 %v2450_v33 }
 0x110   : > { %2074 = vmatprep.subr.bf16.mxu0 %v2443_v35 }
 0x111   : > { %2114 = vmatpush2.bf16.msra.mxu1 %v2578_v34 }
 0x112   : > { %2115 = vmatprep.subr.bf16.mxu1 %v2571_v36 }
 0x113   : > { %2075 = vmatpush2.bf16.msra.mxu0 %v2442_v6 }
 0x114   : > { %2076 = vmatprep.subr.bf16.mxu0 %v2435_v41 }
 0x115   : > { %2116 = vmatpush2.bf16.msra.mxu1 %v2570_v40 }
 0x116   : > { %2117 = vmatprep.subr.bf16.mxu1 %v2563_v42  ;;  %v238_v42 = vld [vmem:[#allocation2 + $0x8] sm:$0xff] }
 0x117   : > { %2077 = vmatpush2.bf16.msra.mxu0 %v2434_v48 }
 0x118   : > { %2078 = vmatprep.subr.bf16.mxu0 %v2427_v50 }
 0x119   : > { %2118 = vmatpush2.bf16.msra.mxu1 %v2562_v49 }
 0x11a   : > { %2119 = vmatprep.subr.bf16.mxu1 %v2555_v51 }
 0x11b   : > { %2079 = vmatpush2.bf16.msra.mxu0 %v2426_v52 }
 0x11d   : > { %2120 = vmatpush2.bf16.msra.mxu1 %v2554_v53 }
 0x11e   : > { %v1836_v55 = vpop.f32.mrf.mxu0  ;;  %2081 = vmatmul.mubr.bf16.vlgmr.msra.gmra.mxu0 %v2817_v29 }
 0x120   : > { %v1877_v56 = vpop.f32.mrf.mxu1  ;;  %2122 = vmatmul.mubr.bf16.vlgmr.msra.gmra.mxu1 %v2823_v32  ;;  %v1838_v58 = vpop.f32.mrf.mxu0 }
 0x121   : > { %v1878_v57 = vadd.f32 %v1877_v56, %v1836_v55 }
 0x122   : > { %v1879_v59 = vpop.f32.mrf.mxu1  ;;  %v1840_v61 = vpop.f32.mrf.mxu0 }
 0x123   : > { %v1880_v60 = vadd.f32 %v1879_v59, %v1838_v58 }
 0x124   : > { %v1881_v62 = vpop.f32.mrf.mxu1  ;;  %v1841_v1 = vpop.f32.mrf.mxu0 }
 0x125   : > { %v2138_v63 = vcombine.low %v1878_v57, %v1880_v60 }
 0x126   : > { %v1882_v2 = vpop.f32.mrf.mxu1 }
 0x127   : > { %v2146_v14 = vrot.slane %v2138_v63, %v2752_v54 }
 0x15e   : > { %v1918_v3 = vpop.f32.mrf.mxu0 }
 0x160   : > { %v1959_v4 = vpop.f32.mrf.mxu1  ;;  %v1920_v7 = vpop.f32.mrf.mxu0 }
 0x161   : > { %v1960_v5 = vadd.f32 %v1959_v4, %v1918_v3 }
 0x162   : > { %v1961_v8 = vpop.f32.mrf.mxu1  ;;  %v1922_v10 = vpop.f32.mrf.mxu0 }
 0x163   : > { %v1962_v9 = vadd.f32 %v1961_v8, %v1920_v7 }
 0x164   : > { %v1963_v29 = vpop.f32.mrf.mxu1  ;;  %v1923_v13 = vpop.f32.mrf.mxu0 }
 0x165   : > { %v2139_v11 = vcombine.low %v1960_v5, %v1962_v9 }
 0x166   : > { %v1964_v32 = vpop.f32.mrf.mxu1 }
 0x167   : > { %v2153_v15 = vrot.slane %v2139_v11, %v2752_v54 }
 0x169   : > { %v2154_v18 = vcombine.low %v2146_v14, %v2153_v15 }
 0x16b   : > { %v2174_v19 = vadd.f32 %v2154_v18, %v237_v16 }
 0x16d   : > { %2176 = vst [vmem:[#allocation2] sm:$0xff] %v2174_v19 }
 0x19e   : > { %v2000_v12 = vpop.f32.mrf.mxu0 }
 0x1a0   : > { %v2041_v20 = vpop.f32.mrf.mxu1  ;;  %v2002_v21 = vpop.f32.mrf.mxu0 }
 0x1a1   : > { %v2042_v17 = vadd.f32 %v2041_v20, %v2000_v12 }
 0x1a2   : > { %v2043_v22 = vpop.f32.mrf.mxu1  ;;  %v2004_v24 = vpop.f32.mrf.mxu0 }
 0x1a3   : > { %v2044_v23 = vadd.f32 %v2043_v22, %v2002_v21 }
 0x1a4   : > { %v2045_v25 = vpop.f32.mrf.mxu1  ;;  %v2005_v27 = vpop.f32.mrf.mxu0 }
 0x1a5   : > { %v2155_v26 = vcombine.low %v2042_v17, %v2044_v23 }
 0x1a6   : > { %v2046_v28 = vpop.f32.mrf.mxu1 }
 0x1a7   : > { %v2163_v40 = vrot.slane %v2155_v26, %v2752_v54 }
 0x1de   : > { %v2082_v30 = vpop.f32.mrf.mxu0 }
 0x1e0   : > { %v2123_v31 = vpop.f32.mrf.mxu1  ;;  %v2084_v33 = vpop.f32.mrf.mxu0 }
 0x1e1   : > { %v2124_v35 = vadd.f32 %v2123_v31, %v2082_v30 }
 0x1e2   : > { %v2125_v34 = vpop.f32.mrf.mxu1  ;;  %v2086_v37 = vpop.f32.mrf.mxu0 }
 0x1e3   : > { %v2126_v36 = vadd.f32 %v2125_v34, %v2084_v33 }
 0x1e4   : > { %v2127_v0 = vpop.f32.mrf.mxu1  ;;  %v2087_v39 = vpop.f32.mrf.mxu0 }
 0x1e5   : > { %v2156_v38 = vcombine.low %v2124_v35, %v2126_v36 }
 0x1e6   : > { %v2128_v6 = vpop.f32.mrf.mxu1 }
 0x1e7   : > { %v2170_v41 = vrot.slane %v2156_v38, %v2752_v54 }
 0x1e9   : > { %v2171_v43 = vcombine.low %v2163_v40, %v2170_v41  ;;  %2188 = sbr.rel (%p2612_p7) target bundleno = 510 (0x1fe), region = 40 }
 0x1eb   : > { %v2175_v46 = vadd.f32 %v2171_v43, %v238_v42 }
 0x1ed   : > { %2184 = vst.msk [vmem:[#allocation2 + $0x8] sm:$0xff] %vm3027_vm13, %v2175_v46 }
 0x1ee   : > { %v2191_v47 = vld [vmem:[%s3068_s2] sm:$0xff]  ;;  %v2195_v48 = vsub.s32 0, %v2745_v45  ;;  %v2199_v49 = vsub.s32 1, %v2745_v45  ;;  %v2203_v50 = vsub.s32 2, %v2745_v45  ;;  %v2207_v51 = vsub.s32 3, %v2745_v45 }
 0x1ef   : > { %v2211_v52 = vsub.s32 4, %v2745_v45  ;;  %v2215_v53 = vsub.s32 5, %v2745_v45  ;;  %v2219_v55 = vsub.s32 6, %v2745_v45  ;;  %v2223_v56 = vsub.s32 7, %v2745_v45  ;;  %v2189_v9 = vld [vmem:[#allocation2] sm:$0xff] }
 0x1f0   : > { %v2196_v57 = vrot.slane %v2191_v47, %v2195_v48  ;;  %v2200_v58 = vrot.slane %v2191_v47, %v2199_v49  ;;  %v2204_v59 = vrot.slane %v2191_v47, %v2203_v50  ;;  %v2208_v60 = vrot.slane %v2191_v47, %v2207_v51 }
 0x1f1   : > { %v2212_v61 = vrot.slane %v2191_v47, %v2211_v52  ;;  %v2216_v62 = vrot.slane %v2191_v47, %v2215_v53  ;;  %v2220_v63 = vrot.slane %v2191_v47, %v2219_v55  ;;  %v2224_v1 = vrot.slane %v2191_v47, %v2223_v56 }
 0x1f2   : > { %v2225_v2 = vcombine.low %v2196_v57, %v2200_v58  ;;  %v2226_v3 = vcombine.low %v2204_v59, %v2208_v60 }
 0x1f3   : > { %v2242_v4 = vcombine.low %v2212_v61, %v2216_v62  ;;  %v2243_v5 = vcombine.low %v2220_v63, %v2224_v1 }
 0x1f4   : > { %v2233_v7 = vrot.slane %v2225_v2, %v2752_v54  ;;  %v2240_v8 = vrot.slane %v2226_v3, %v2752_v54  ;;  %v2190_v11 = vld [vmem:[#allocation2 + $0x8] sm:$0xff] }
 0x1f5   : > { %v2250_v10 = vrot.slane %v2242_v4, %v2752_v54  ;;  %v2257_v45 = vrot.slane %v2243_v5, %v2752_v54 }
 0x1f6   : > { %v2241_v29 = vcombine.low %v2233_v7, %v2240_v8 }
 0x1f7   : > { %v2258_v13 = vcombine.low %v2250_v10, %v2257_v45 }
 0x1f8   : > { %v2261_v32 = vadd.f32 %v2241_v29, %v2189_v9 }
 0x1f9   : > { %v2262_v14 = vadd.f32 %v2258_v13, %v2190_v11 }
 0x1fa   : > { %v2263_v15 = vmax.f32 %v2261_v32, 0.0 }
 0x1fb   : > { %v2264_v16 = vmax.f32 %v2262_v14, 0.0 }
 0x1fc   : > { %2265 = vst [vmem:[%s3069_s3] sm:$0xff] %v2263_v15 }
 0x1fd   : > { %2266 = vst.msk [vmem:[%s3069_s3 + $0x8] sm:$0xff] %vm3027_vm13, %v2264_v16 }
 0x1fe PF: > { %s13_s14 = sadd.s32 1, %s2666_s14   ;;  %s3072_s12 = smov %s2662_s13 }
 0x1ff   : > { %p10_p8 = scmp.ge.s32.totalorder %s13_s14, 11   ;;  %s3073_s13 = smov %s3075_s15 }
 0x201   :  { %12 = sbr.rel (!%p10_p8) target bundleno = 2 (0x2), region = 73 }

// kernel: clasic_forward.16
= control target key start
LH: loop header
LB: loop body
LE: loop exit
PB: predicated region body
PF: predicated region fallthrough
CT: control target
= control target key end

     0   :  { %v2609_v36 = vmov 1983009808   ;;  %v23_v38 = vlaneseq  ;;  %vm1591_vm0 = vcmask 850944   ;;  %vm1595_vm1 = vcmask 1043456   ;;  %s3457_s1 = inlined_call_operand.vmem [shape: bf16[1000,500], index: 1, kind: input, shape index: {}]   ;;  %s3458_s0 = inlined_call_operand.vmem [shape: f32[2,1000], index: 0, kind: input, shape index: {}]   ;;  %s3459_s2 = inlined_call_operand.vmem [shape: f32[1,500], index: 2, kind: input, shape index: {}]   ;;  %s3460_s3 = inlined_call_operand.vmem [shape: f32[2,500], index: 3, kind: output, shape index: {}]  }
   0x1   :  { %v2231_v0 = vld [vmem:[%s3457_s1 + $0xe4] ss:$16 sps:$4 sm:$0xff]   ;;  %v2235_v2 = vld [vmem:[%s3457_s1 + $0xe0] ss:$16 sps:$4 sm:$0xff]   ;;  %v21_v37 = vunpack.c.l.s4 %v2609_v36  ;;  %vm1962_vm2 = vcmask 1041408   ;;  %vm1963_vm3 = vcmask 1043458  }
   0x2   :  { %v2233_v1 = vld [vmem:[%s3457_s1 + $0x2e4] ss:$16 sps:$4 sm:$0xff]   ;;  %1608 = vmatprep.subr.bf16.mxu0 %v2231_v0  ;;  %v2236_v3 = vld [vmem:[%s3457_s1 + $0x2e0] ss:$16 sps:$4 sm:$0xff]   ;;  %v2747_v43 = vshrl.u32 %v23_v38, 7  ;;  %vm1964_vm4 = vmor %vm1963_vm3, %vm1962_vm2  ;;  %vm1965_vm5 = vcmask 1045508  }
   0x3   :  { %1649 = vmatprep.subr.bf16.mxu1 %v2233_v1  ;;  %v2237_v4 = vld [vmem:[%s3457_s1 + $0xc4] ss:$16 sps:$4 sm:$0xff]   ;;  %1609 = vmatpush1.bf16.msra.mxu0 %v2235_v2  ;;  %v2241_v6 = vld [vmem:[%s3457_s1 + $0xc0] ss:$16 sps:$4 sm:$0xff]   ;;  %v22_v42 = vunpack.c.0.s8 %v21_v37  ;;  %vm1966_vm6 = vmor %vm1965_vm5, %vm1964_vm4  ;;  %vm1967_vm7 = vcmask 949254  }
   0x4   :  { %1650 = vmatpush1.bf16.msra.mxu1 %v2236_v3  ;;  %v2239_v5 = vld [vmem:[%s3457_s1 + $0x2c4] ss:$16 sps:$4 sm:$0xff]   ;;  %1610 = vmatprep.subr.bf16.mxu0 %v2237_v4  ;;  %v2242_v7 = vld [vmem:[%s3457_s1 + $0x2c0] ss:$16 sps:$4 sm:$0xff]   ;;  %v16_v4 = vld [vmem:[%s3458_s0 + $0x8] sm:$0xff] }
   0x5   :  { %1651 = vmatprep.subr.bf16.mxu1 %v2239_v5  ;;  %v2243_v8 = vld [vmem:[%s3457_s1 + $0xa4] ss:$16 sps:$4 sm:$0xff]   ;;  %v2247_v10 = vld [vmem:[%s3457_s1 + $0xa0] ss:$16 sps:$4 sm:$0xff]   ;;  %v2765_v49 = vsub.s32 %v22_v42, %v2747_v43  ;;  %vm1968_vm8 = vmor %vm1967_vm7, %vm1966_vm6 }
   0x6   :  { %v2245_v9 = vld [vmem:[%s3457_s1 + $0x2a4] ss:$16 sps:$4 sm:$0xff]   ;;  %v2248_v11 = vld [vmem:[%s3457_s1 + $0x2a0] ss:$16 sps:$4 sm:$0xff]  }
   0x7   :  { %1611 = vmatpush1.bf16.msra.mxu0 %v2241_v6  ;;  %v2249_v12 = vld [vmem:[%s3457_s1 + $0x84] ss:$16 sps:$4 sm:$0xff]   ;;  %v2253_v14 = vld [vmem:[%s3457_s1 + $0x80] ss:$16 sps:$4 sm:$0xff]  }
   0x8   :  { %1652 = vmatpush1.bf16.msra.mxu1 %v2242_v7  ;;  %1612 = vmatprep.subr.bf16.mxu0 %v2243_v8  ;;  %v2251_v13 = vld [vmem:[%s3457_s1 + $0x284] ss:$16 sps:$4 sm:$0xff]   ;;  %v2254_v15 = vld [vmem:[%s3457_s1 + $0x280] ss:$16 sps:$4 sm:$0xff]  }
   0x9   :  { %1653 = vmatprep.subr.bf16.mxu1 %v2245_v9  ;;  %v2255_v16 = vld [vmem:[%s3457_s1 + $0x64] ss:$16 sps:$4 sm:$0xff]   ;;  %v2259_v18 = vld [vmem:[%s3457_s1 + $0x60] ss:$16 sps:$4 sm:$0xff]   ;;  %v36_v9 = vcombine.high %v16_v4, %v16_v4 }
   0xa   :  { %v2257_v17 = vld [vmem:[%s3457_s1 + $0x264] ss:$16 sps:$4 sm:$0xff]   ;;  %v2260_v19 = vld [vmem:[%s3457_s1 + $0x260] ss:$16 sps:$4 sm:$0xff]  }
   0xb   :  { %1613 = vmatpush1.bf16.msra.mxu0 %v2247_v10  ;;  %v2261_v20 = vld [vmem:[%s3457_s1 + $0x44] ss:$16 sps:$4 sm:$0xff]   ;;  %v2265_v22 = vld [vmem:[%s3457_s1 + $0x40] ss:$16 sps:$4 sm:$0xff]  }
   0xc   :  { %1654 = vmatpush1.bf16.msra.mxu1 %v2248_v11  ;;  %1614 = vmatprep.subr.bf16.mxu0 %v2249_v12  ;;  %v2263_v21 = vld [vmem:[%s3457_s1 + $0x244] ss:$16 sps:$4 sm:$0xff]   ;;  %v2266_v23 = vld [vmem:[%s3457_s1 + $0x240] ss:$16 sps:$4 sm:$0xff]  }
   0xd   :  { %1655 = vmatprep.subr.bf16.mxu1 %v2251_v13  ;;  %v2267_v24 = vld [vmem:[%s3457_s1 + $0x24] ss:$16 sps:$4 sm:$0xff]   ;;  %v2271_v26 = vld [vmem:[%s3457_s1 + $0x20] ss:$16 sps:$4 sm:$0xff]  }
   0xe   :  { %v2269_v25 = vld [vmem:[%s3457_s1 + $0x224] ss:$16 sps:$4 sm:$0xff]   ;;  %v2272_v27 = vld [vmem:[%s3457_s1 + $0x220] ss:$16 sps:$4 sm:$0xff]  }
   0xf   :  { %1615 = vmatpush1.bf16.msra.mxu0 %v2253_v14  ;;  %v2273_v28 = vld [vmem:[%s3457_s1 + $0x4] ss:$16 sps:$4 sm:$0xff]   ;;  %v2277_v30 = vld [vmem:[%s3457_s1] ss:$16 sps:$4 sm:$0xff]   ;;  %v2836_v14 = vrot.slane %v36_v9, %v2765_v49 }
  0x10   :  { %1656 = vmatpush1.bf16.msra.mxu1 %v2254_v15  ;;  %1616 = vmatprep.subr.bf16.mxu0 %v2255_v16  ;;  %v2275_v29 = vld [vmem:[%s3457_s1 + $0x204] ss:$16 sps:$4 sm:$0xff]   ;;  %v2278_v31 = vld [vmem:[%s3457_s1 + $0x200] ss:$16 sps:$4 sm:$0xff]   ;;  %v2839_v15 = vrot.slane %v16_v4, %v2765_v49 }
  0x11   :  { %1657 = vmatprep.subr.bf16.mxu1 %v2257_v17  ;;  %v2279_v32 = vld [vmem:[%s3457_s1 + $0x1e4] ss:$16 sps:$4 sm:$0xff]   ;;  %v2283_v34 = vld [vmem:[%s3457_s1 + $0x1e0] ss:$16 sps:$4 sm:$0xff]  }
  0x12   :  { %v2281_v33 = vld [vmem:[%s3457_s1 + $0x3e4] ss:$16 sps:$4 sm:$0xff]   ;;  %v2284_v35 = vld [vmem:[%s3457_s1 + $0x3e0] ss:$16 sps:$4 sm:$0xff]  }
  0x13   :  { %1617 = vmatpush1.bf16.msra.mxu0 %v2259_v18  ;;  %v2285_v39 = vld [vmem:[%s3457_s1 + $0x1c4] ss:$16 sps:$4 sm:$0xff]   ;;  %v2289_v41 = vld [vmem:[%s3457_s1 + $0x1c0] ss:$16 sps:$4 sm:$0xff]  }
  0x14   :  { %1658 = vmatpush1.bf16.msra.mxu1 %v2260_v19  ;;  %1618 = vmatprep.subr.bf16.mxu0 %v2261_v20  ;;  %v2287_v40 = vld [vmem:[%s3457_s1 + $0x3c4] ss:$16 sps:$4 sm:$0xff]   ;;  %v2290_v44 = vld [vmem:[%s3457_s1 + $0x3c0] ss:$16 sps:$4 sm:$0xff]   ;;  %v52_v20 = vcombine.high %v2836_v14, %v2836_v14 }
  0x15   :  { %1659 = vmatprep.subr.bf16.mxu1 %v2263_v21  ;;  %v2291_v45 = vld [vmem:[%s3457_s1 + $0x1a4] ss:$16 sps:$4 sm:$0xff]   ;;  %v2295_v47 = vld [vmem:[%s3457_s1 + $0x1a0] ss:$16 sps:$4 sm:$0xff]   ;;  %v51_v21 = vcombine.high %v2839_v15, %v2839_v15 }
  0x16   :  { %v2293_v46 = vld [vmem:[%s3457_s1 + $0x3a4] ss:$16 sps:$4 sm:$0xff]   ;;  %v2296_v48 = vld [vmem:[%s3457_s1 + $0x3a0] ss:$16 sps:$4 sm:$0xff]  }
  0x17   :  { %1619 = vmatpush1.bf16.msra.mxu0 %v2265_v22  ;;  %v2297_v50 = vld [vmem:[%s3457_s1 + $0x184] ss:$16 sps:$4 sm:$0xff]   ;;  %v2301_v55 = vld [vmem:[%s3457_s1 + $0x180] ss:$16 sps:$4 sm:$0xff]  }
  0x18   :  { %1660 = vmatpush1.bf16.msra.mxu1 %v2266_v23  ;;  %1620 = vmatprep.subr.bf16.mxu0 %v2267_v24  ;;  %v2299_v51 = vld [vmem:[%s3457_s1 + $0x384] ss:$16 sps:$4 sm:$0xff]   ;;  %v2302_v56 = vld [vmem:[%s3457_s1 + $0x380] ss:$16 sps:$4 sm:$0xff]  }
  0x19   :  { %1661 = vmatprep.subr.bf16.mxu1 %v2269_v25  ;;  %v15_v52 = vld [vmem:[%s3458_s0] sm:$0xff] }
  0x1a   :  { %v26_v53 = vrot.slane %v15_v52, %v2765_v49  ;;  %v19_v54 = vcombine.high %v15_v52, %v15_v52  ;;  %v2303_v57 = vld [vmem:[%s3457_s1 + $0x164] ss:$16 sps:$4 sm:$0xff]   ;;  %v2307_v63 = vld [vmem:[%s3457_s1 + $0x160] ss:$16 sps:$4 sm:$0xff]  }
  0x1b   :  { %1621 = vmatpush1.bf16.msra.mxu0 %v2271_v26  ;;  %v2305_v58 = vld [vmem:[%s3457_s1 + $0x364] ss:$16 sps:$4 sm:$0xff]   ;;  %v2308_v0 = vld [vmem:[%s3457_s1 + $0x360] ss:$16 sps:$4 sm:$0xff]  }
  0x1c   :  { %1662 = vmatpush1.bf16.msra.mxu1 %v2272_v27  ;;  %1622 = vmatprep.subr.bf16.mxu0 %v2273_v28  ;;  %v34_v59 = vcombine.high %v26_v53, %v26_v53  ;;  %v33_v60 = vrot.slane %v19_v54, %v2765_v49  ;;  %v2309_v1 = vld [vmem:[%s3457_s1 + $0x144] ss:$16 sps:$4 sm:$0xff]   ;;  %v2313_v5 = vld [vmem:[%s3457_s1 + $0x140] ss:$16 sps:$4 sm:$0xff]   ;;  %v2857_v22 = vpack.c.bf16 %v26_v53, %v26_v53 }
  0x1d   :  { %1663 = vmatprep.subr.bf16.mxu1 %v2275_v29  ;;  %v2311_v2 = vld [vmem:[%s3457_s1 + $0x344] ss:$16 sps:$4 sm:$0xff]   ;;  %v2314_v6 = vld [vmem:[%s3457_s1 + $0x340] ss:$16 sps:$4 sm:$0xff]   ;;  %v2873_v28 = vpack.c.bf16 %v52_v20, %v52_v20  ;;  %v2875_v29 = vpack.c.bf16 %v51_v21, %v51_v21 }
  0x1e   :  { %v2790_v61 = vpack.c.bf16 %v34_v59, %v34_v59  ;;  %v35_v62 = vcombine.high %v33_v60, %v33_v60  ;;  %v2315_v7 = vld [vmem:[%s3457_s1 + $0x124] ss:$16 sps:$4 sm:$0xff]   ;;  %v2319_v10 = vld [vmem:[%s3457_s1 + $0x120] ss:$16 sps:$4 sm:$0xff]   ;;  %v2859_v23 = vpack.c.bf16 %v33_v60, %v33_v60 }
  0x1f   :  { %1623 = vmatpush1.bf16.msra.mxu0 %v2277_v30  ;;  %v2317_v8 = vld [vmem:[%s3457_s1 + $0x324] ss:$16 sps:$4 sm:$0xff]   ;;  %v2320_v11 = vld [vmem:[%s3457_s1 + $0x320] ss:$16 sps:$4 sm:$0xff]  }
  0x20   :  { %1664 = vmatpush1.bf16.msra.mxu1 %v2278_v31  ;;  %1624 = vmatprep.subr.bf16.mxu0 %v2279_v32  ;;  %v2804_v3 = vpack.c.bf16 %v35_v62, %v35_v62  ;;  %v2321_v12 = vld [vmem:[%s3457_s1 + $0x104] ss:$16 sps:$4 sm:$0xff]   ;;  %v2325_v16 = vld [vmem:[%s3457_s1 + $0x100] ss:$16 sps:$4 sm:$0xff]  }
  0x21   :  { %1665 = vmatprep.subr.bf16.mxu1 %v2281_v33  ;;  %1640 = vmatprep.mubr.bf16.mxu0 %v2790_v61  ;;  %v2323_v13 = vld [vmem:[%s3457_s1 + $0x304] ss:$16 sps:$4 sm:$0xff]   ;;  %v2326_v17 = vld [vmem:[%s3457_s1 + $0x300] ss:$16 sps:$4 sm:$0xff]  }
  0x22   :  { %1681 = vmatprep.mubr.bf16.mxu1 %v2804_v3  ;;  %v2331_v18 = vld [vmem:[%s3457_s1 + $0x4e4] ss:$16 sps:$4 sm:$0xff]   ;;  %v2329_v24 = vld [vmem:[%s3457_s1 + $0x4e0] ss:$16 sps:$4 sm:$0xff]  }
  0x23   :  { %1625 = vmatpush2.bf16.msra.mxu0 %v2283_v34  ;;  %v2334_v19 = vld [vmem:[%s3457_s1 + $0x6e4] ss:$16 sps:$4 sm:$0xff]   ;;  %v2332_v25 = vld [vmem:[%s3457_s1 + $0x6e0] ss:$16 sps:$4 sm:$0xff]  }
  0x24   :  { %1666 = vmatpush2.bf16.msra.mxu1 %v2284_v35  ;;  %1626 = vmatprep.subr.bf16.mxu0 %v2285_v39  ;;  %v2337_v26 = vld [vmem:[%s3457_s1 + $0x4c4] ss:$16 sps:$4 sm:$0xff]   ;;  %v2335_v30 = vld [vmem:[%s3457_s1 + $0x4c0] ss:$16 sps:$4 sm:$0xff]  }
  0x25   :  { %1667 = vmatprep.subr.bf16.mxu1 %v2287_v40  ;;  %v2340_v27 = vld [vmem:[%s3457_s1 + $0x6c4] ss:$16 sps:$4 sm:$0xff]   ;;  %v2338_v31 = vld [vmem:[%s3457_s1 + $0x6c0] ss:$16 sps:$4 sm:$0xff]  }
  0x26   :  { %v2343_v32 = vld [vmem:[%s3457_s1 + $0x4a4] ss:$16 sps:$4 sm:$0xff]   ;;  %v2341_v34 = vld [vmem:[%s3457_s1 + $0x4a0] ss:$16 sps:$4 sm:$0xff]  }
  0x27   :  { %1627 = vmatpush2.bf16.msra.mxu0 %v2289_v41  ;;  %v2346_v33 = vld [vmem:[%s3457_s1 + $0x6a4] ss:$16 sps:$4 sm:$0xff]   ;;  %v2344_v35 = vld [vmem:[%s3457_s1 + $0x6a0] ss:$16 sps:$4 sm:$0xff]  }
  0x28   :  { %1668 = vmatpush2.bf16.msra.mxu1 %v2290_v44  ;;  %1628 = vmatprep.subr.bf16.mxu0 %v2291_v45  ;;  %v2349_v36 = vld [vmem:[%s3457_s1 + $0x484] ss:$16 sps:$4 sm:$0xff]   ;;  %v2347_v38 = vld [vmem:[%s3457_s1 + $0x480] ss:$16 sps:$4 sm:$0xff]  }
  0x29   :  { %1669 = vmatprep.subr.bf16.mxu1 %v2293_v46  ;;  %v2352_v37 = vld [vmem:[%s3457_s1 + $0x684] ss:$16 sps:$4 sm:$0xff]   ;;  %v2350_v39 = vld [vmem:[%s3457_s1 + $0x680] ss:$16 sps:$4 sm:$0xff]  }
  0x2a   :  { %v2355_v40 = vld [vmem:[%s3457_s1 + $0x464] ss:$16 sps:$4 sm:$0xff]   ;;  %v2353_v42 = vld [vmem:[%s3457_s1 + $0x460] ss:$16 sps:$4 sm:$0xff]  }
  0x2b   :  { %1629 = vmatpush2.bf16.msra.mxu0 %v2295_v47  ;;  %v2358_v41 = vld [vmem:[%s3457_s1 + $0x664] ss:$16 sps:$4 sm:$0xff]   ;;  %v2356_v44 = vld [vmem:[%s3457_s1 + $0x660] ss:$16 sps:$4 sm:$0xff]  }
  0x2c   :  { %1670 = vmatpush2.bf16.msra.mxu1 %v2296_v48  ;;  %1630 = vmatprep.subr.bf16.mxu0 %v2297_v50  ;;  %v2361_v45 = vld [vmem:[%s3457_s1 + $0x444] ss:$16 sps:$4 sm:$0xff]   ;;  %v2359_v47 = vld [vmem:[%s3457_s1 + $0x440] ss:$16 sps:$4 sm:$0xff]  }
  0x2d   :  { %1671 = vmatprep.subr.bf16.mxu1 %v2299_v51  ;;  %v2364_v46 = vld [vmem:[%s3457_s1 + $0x644] ss:$16 sps:$4 sm:$0xff]   ;;  %v2362_v48 = vld [vmem:[%s3457_s1 + $0x640] ss:$16 sps:$4 sm:$0xff]  }
  0x2e   :  { %v2367_v50 = vld [vmem:[%s3457_s1 + $0x424] ss:$16 sps:$4 sm:$0xff]   ;;  %v2365_v52 = vld [vmem:[%s3457_s1 + $0x420] ss:$16 sps:$4 sm:$0xff]  }
  0x2f   :  { %1631 = vmatpush2.bf16.msra.mxu0 %v2301_v55  ;;  %v2370_v51 = vld [vmem:[%s3457_s1 + $0x624] ss:$16 sps:$4 sm:$0xff]   ;;  %v2368_v53 = vld [vmem:[%s3457_s1 + $0x620] ss:$16 sps:$4 sm:$0xff]  }
  0x30   :  { %1672 = vmatpush2.bf16.msra.mxu1 %v2302_v56  ;;  %1632 = vmatprep.subr.bf16.mxu0 %v2303_v57  ;;  %v2373_v54 = vld [vmem:[%s3457_s1 + $0x404] ss:$16 sps:$4 sm:$0xff]   ;;  %v2371_v57 = vld [vmem:[%s3457_s1 + $0x400] ss:$16 sps:$4 sm:$0xff]  }
  0x31   :  { %1673 = vmatprep.subr.bf16.mxu1 %v2305_v58  ;;  %v2376_v55 = vld [vmem:[%s3457_s1 + $0x604] ss:$16 sps:$4 sm:$0xff]   ;;  %v2374_v58 = vld [vmem:[%s3457_s1 + $0x600] ss:$16 sps:$4 sm:$0xff]  }
  0x32   :  { %v317_v56 = vld [vmem:[%s3457_s1 + $0x7c0] sm:$0xff] }
  0x33   :  { %1633 = vmatpush2.bf16.msra.mxu0 %v2307_v63  ;;  %v2379_v59 = vld [vmem:[%s3457_s1 + $0x5e4] ss:$16 sps:$4 sm:$0xff]   ;;  %v2223_v60 = vcombine.high %v317_v56, %v317_v56  ;;  %v2222_v62 = vcombine.low %v317_v56, %v317_v56  ;;  %v2377_v63 = vld [vmem:[%s3457_s1 + $0x5e0] ss:$16 sps:$4 sm:$0xff]   ;;  %v2456_v56 = vld [vmem:[%s3457_s1 + $0x2c] ss:$16 sps:$4 sm:$0xff]  }
  0x34   :  { %1674 = vmatpush2.bf16.msra.mxu1 %v2308_v0  ;;  %1634 = vmatprep.subr.bf16.mxu0 %v2309_v1  ;;  %v2384_v0 = vld [vmem:[%s3457_s1 + $0x5c4] ss:$16 sps:$4 sm:$0xff]   ;;  %v2382_v4 = vld [vmem:[%s3457_s1 + $0x5c0] ss:$16 sps:$4 sm:$0xff]  }
  0x35   :  { %1675 = vmatprep.subr.bf16.mxu1 %v2311_v2  ;;  %v1597_v1 = vsel %vm1595_vm1, %v2222_v62, 0  ;;  %v2387_v2 = vld [vmem:[%s3457_s1 + $0x7a4] ss:$16 sps:$4 sm:$0xff]   ;;  %v2391_v9 = vld [vmem:[%s3457_s1 + $0x780] ss:$16 sps:$4 sm:$0xff]  }
  0x36   :  { %v2408_v20 = vld [vmem:[%s3457_s1 + $0x544] ss:$16 sps:$4 sm:$0xff]   ;;  %v2465_v62 = vld [vmem:[%s3457_s1 + $0x22c] ss:$16 sps:$4 sm:$0xff]  }
  0x37   :  { %1635 = vmatpush2.bf16.msra.mxu0 %v2313_v5  ;;  %v2385_v5 = vld [vmem:[%s3457_s1 + $0x7a0] ss:$16 sps:$4 sm:$0xff]   ;;  %v2411_v21 = vld [vmem:[%s3457_s1 + $0x724] ss:$16 sps:$4 sm:$0xff]  }
  0x38   :  { %1676 = vmatpush2.bf16.msra.mxu1 %v2314_v6  ;;  %1636 = vmatprep.subr.bf16.mxu0 %v2315_v7  ;;  %v2390_v6 = vld [vmem:[%s3457_s1 + $0x5a4] ss:$16 sps:$4 sm:$0xff]  }
  0x39   :  { %1677 = vmatprep.subr.bf16.mxu1 %v2317_v8  ;;  %v2393_v7 = vld [vmem:[%s3457_s1 + $0x784] ss:$16 sps:$4 sm:$0xff]   ;;  %v2388_v8 = vld [vmem:[%s3457_s1 + $0x5a0] ss:$16 sps:$4 sm:$0xff]  }
  0x3b   :  { %1637 = vmatpush2.bf16.msra.mxu0 %v2319_v10  ;;  %v2396_v10 = vld [vmem:[%s3457_s1 + $0x584] ss:$16 sps:$4 sm:$0xff]  }
  0x3c   :  { %1678 = vmatpush2.bf16.msra.mxu1 %v2320_v11  ;;  %1638 = vmatprep.subr.bf16.mxu0 %v2321_v12  ;;  %v2399_v11 = vld [vmem:[%s3457_s1 + $0x764] ss:$16 sps:$4 sm:$0xff]   ;;  %v2394_v12 = vld [vmem:[%s3457_s1 + $0x580] ss:$16 sps:$4 sm:$0xff]  }
  0x3d   :  { %1679 = vmatprep.subr.bf16.mxu1 %v2323_v13  ;;  %v2397_v13 = vld [vmem:[%s3457_s1 + $0x760] ss:$16 sps:$4 sm:$0xff]  }
  0x3f   :  { %1639 = vmatpush2.bf16.msra.mxu0 %v2325_v16  ;;  %v2402_v16 = vld [vmem:[%s3457_s1 + $0x564] ss:$16 sps:$4 sm:$0xff]  }
  0x40   :  { %1680 = vmatpush2.bf16.msra.mxu1 %v2326_v17  ;;  %1690 = vmatprep.subr.bf16.mxu0 %v2331_v18  ;;  %v2405_v17 = vld [vmem:[%s3457_s1 + $0x744] ss:$16 sps:$4 sm:$0xff]   ;;  %v2400_v18 = vld [vmem:[%s3457_s1 + $0x560] ss:$16 sps:$4 sm:$0xff]  }
  0x41   :  { %1731 = vmatprep.subr.bf16.mxu1 %v2334_v19  ;;  %v2403_v19 = vld [vmem:[%s3457_s1 + $0x740] ss:$16 sps:$4 sm:$0xff]  }
  0x42   :  { %1641 = vmatmul.mubr.bf16.vlgmr.msra.gmra.mxu0 %v2857_v22 }
  0x43   :  { %1682 = vmatmul.mubr.bf16.vlgmr.msra.gmra.mxu1 %v2859_v23  ;;  %1691 = vmatpush1.bf16.msra.mxu0 %v2329_v24  ;;  %v2406_v24 = vld [vmem:[%s3457_s1 + $0x540] ss:$16 sps:$4 sm:$0xff]  }
  0x44   :  { %1732 = vmatpush1.bf16.msra.mxu1 %v2332_v25  ;;  %1692 = vmatprep.subr.bf16.mxu0 %v2337_v26  ;;  %v2409_v25 = vld [vmem:[%s3457_s1 + $0x720] ss:$16 sps:$4 sm:$0xff]   ;;  %v2414_v26 = vld [vmem:[%s3457_s1 + $0x524] ss:$16 sps:$4 sm:$0xff]  }
  0x45   :  { %1733 = vmatprep.subr.bf16.mxu1 %v2340_v27  ;;  %2227 = vmatprep.mubr.msk.bf16.mxu1 %vm1591_vm0, %v2873_v28  ;;  %v2417_v27 = vld [vmem:[%s3457_s1 + $0x704] ss:$16 sps:$4 sm:$0xff]  }
  0x46   :  { %1722 = vmatprep.mubr.bf16.mxu0 %v2875_v29 }
  0x47   :  { %1693 = vmatpush1.bf16.msra.mxu0 %v2335_v30  ;;  %v2412_v30 = vld [vmem:[%s3457_s1 + $0x520] ss:$16 sps:$4 sm:$0xff]  }
  0x48   :  { %1734 = vmatpush1.bf16.msra.mxu1 %v2338_v31  ;;  %1694 = vmatprep.subr.bf16.mxu0 %v2343_v32  ;;  %v2415_v31 = vld [vmem:[%s3457_s1 + $0x700] ss:$16 sps:$4 sm:$0xff]   ;;  %v2420_v32 = vld [vmem:[%s3457_s1 + $0x504] ss:$16 sps:$4 sm:$0xff]  }
  0x49   :  { %1735 = vmatprep.subr.bf16.mxu1 %v2346_v33  ;;  %v2423_v33 = vld [vmem:[%s3457_s1 + $0xec] ss:$16 sps:$4 sm:$0xff]  }
  0x4b   :  { %1695 = vmatpush1.bf16.msra.mxu0 %v2341_v34  ;;  %v2418_v34 = vld [vmem:[%s3457_s1 + $0x500] ss:$16 sps:$4 sm:$0xff]  }
  0x4c   :  { %1736 = vmatpush1.bf16.msra.mxu1 %v2344_v35  ;;  %1696 = vmatprep.subr.bf16.mxu0 %v2349_v36  ;;  %v3054_v35 = vpack.c.bf16 %v2836_v14, %v2836_v14  ;;  %v2421_v36 = vld [vmem:[%s3457_s1 + $0xe8] ss:$16 sps:$4 sm:$0xff]   ;;  %v3068_v14 = vpack.c.bf16 %v2839_v15, %v2839_v15  ;;  %v2435_v15 = vld [vmem:[%s3457_s1 + $0x2cc] ss:$16 sps:$4 sm:$0xff]  }
  0x4d   :  { %1737 = vmatprep.subr.bf16.mxu1 %v2352_v37  ;;  %v2426_v37 = vld [vmem:[%s3457_s1 + $0xcc] ss:$16 sps:$4 sm:$0xff]  }
  0x4f   :  { %1697 = vmatpush1.bf16.msra.mxu0 %v2347_v38  ;;  %v2429_v38 = vld [vmem:[%s3457_s1 + $0x2ec] ss:$16 sps:$4 sm:$0xff]  }
  0x50   :  { %1738 = vmatpush1.bf16.msra.mxu1 %v2350_v39  ;;  %1698 = vmatprep.subr.bf16.mxu0 %v2355_v40  ;;  %v2424_v39 = vld [vmem:[%s3457_s1 + $0xc8] ss:$16 sps:$4 sm:$0xff]  }
  0x51   :  { %1739 = vmatprep.subr.bf16.mxu1 %v2358_v41  ;;  %v2427_v40 = vld [vmem:[%s3457_s1 + $0x2e8] ss:$16 sps:$4 sm:$0xff]   ;;  %v2432_v41 = vld [vmem:[%s3457_s1 + $0xac] ss:$16 sps:$4 sm:$0xff]  }
  0x53   :  { %1699 = vmatpush1.bf16.msra.mxu0 %v2353_v42  ;;  %v2430_v42 = vld [vmem:[%s3457_s1 + $0xa8] ss:$16 sps:$4 sm:$0xff]  }
  0x54   :  { %1740 = vmatpush1.bf16.msra.mxu1 %v2356_v44  ;;  %1700 = vmatprep.subr.bf16.mxu0 %v2361_v45  ;;  %v2433_v44 = vld [vmem:[%s3457_s1 + $0x2c8] ss:$16 sps:$4 sm:$0xff]   ;;  %v2438_v45 = vld [vmem:[%s3457_s1 + $0x8c] ss:$16 sps:$4 sm:$0xff]  }
  0x55   :  { %1741 = vmatprep.subr.bf16.mxu1 %v2364_v46  ;;  %v2436_v46 = vld [vmem:[%s3457_s1 + $0x88] ss:$16 sps:$4 sm:$0xff]  }
  0x57   :  { %1701 = vmatpush1.bf16.msra.mxu0 %v2359_v47  ;;  %v2439_v47 = vld [vmem:[%s3457_s1 + $0x2a8] ss:$16 sps:$4 sm:$0xff]  }
  0x58   :  { %1742 = vmatpush1.bf16.msra.mxu1 %v2362_v48  ;;  %1702 = vmatprep.subr.bf16.mxu0 %v2367_v50  ;;  %v2444_v48 = vld [vmem:[%s3457_s1 + $0x6c] ss:$16 sps:$4 sm:$0xff]   ;;  %v2442_v50 = vld [vmem:[%s3457_s1 + $0x68] ss:$16 sps:$4 sm:$0xff]  }
  0x59   :  { %1743 = vmatprep.subr.bf16.mxu1 %v2370_v51  ;;  %v2445_v51 = vld [vmem:[%s3457_s1 + $0x288] ss:$16 sps:$4 sm:$0xff]  }
  0x5b   :  { %1703 = vmatpush1.bf16.msra.mxu0 %v2365_v52  ;;  %v2450_v52 = vld [vmem:[%s3457_s1 + $0x4c] ss:$16 sps:$4 sm:$0xff]  }
  0x5c   :  { %1744 = vmatpush1.bf16.msra.mxu1 %v2368_v53  ;;  %1704 = vmatprep.subr.bf16.mxu0 %v2373_v54  ;;  %v2453_v53 = vld [vmem:[%s3457_s1 + $0x26c] ss:$16 sps:$4 sm:$0xff]   ;;  %v2448_v54 = vld [vmem:[%s3457_s1 + $0x48] ss:$16 sps:$4 sm:$0xff]  }
  0x5d   :  { %1745 = vmatprep.subr.bf16.mxu1 %v2376_v55  ;;  %v2451_v55 = vld [vmem:[%s3457_s1 + $0x268] ss:$16 sps:$4 sm:$0xff]  }
  0x5f   :  { %1705 = vmatpush1.bf16.msra.mxu0 %v2371_v57  ;;  %v2459_v57 = vld [vmem:[%s3457_s1 + $0x24c] ss:$16 sps:$4 sm:$0xff]  }
  0x60   :  { %1746 = vmatpush1.bf16.msra.mxu1 %v2374_v58  ;;  %1706 = vmatprep.subr.bf16.mxu0 %v2379_v59  ;;  %v2454_v58 = vld [vmem:[%s3457_s1 + $0x28] ss:$16 sps:$4 sm:$0xff]  }
  0x61   :  { %2226 = vmatprep.subr.msk.bf16.mxu1 %vm1595_vm1, %v2223_v60  ;;  %v2457_v59 = vld [vmem:[%s3457_s1 + $0x248] ss:$16 sps:$4 sm:$0xff]   ;;  %v2462_v60 = vld [vmem:[%s3457_s1 + $0xc] ss:$16 sps:$4 sm:$0xff]  }
  0x63   :  { %1707 = vmatpush2.bf16.msra.mxu0 %v2377_v63  ;;  %v2460_v63 = vld [vmem:[%s3457_s1 + $0x8] ss:$16 sps:$4 sm:$0xff]  }
  0x64   :  { %1750 = vmatpush2.bf16.msra.mxu1 %v1597_v1  ;;  %1708 = vmatprep.subr.bf16.mxu0 %v2384_v0  ;;  %v2463_v0 = vld [vmem:[%s3457_s1 + $0x228] ss:$16 sps:$4 sm:$0xff]   ;;  %v2468_v1 = vld [vmem:[%s3457_s1 + $0x1ec] ss:$16 sps:$4 sm:$0xff]  }
  0x65   :  { %1751 = vmatprep.subr.bf16.mxu1 %v2387_v2  ;;  %v2471_v2 = vld [vmem:[%s3457_s1 + $0x20c] ss:$16 sps:$4 sm:$0xff]  }
  0x67   :  { %1709 = vmatpush2.bf16.msra.mxu0 %v2382_v4  ;;  %v2466_v4 = vld [vmem:[%s3457_s1 + $0x1e8] ss:$16 sps:$4 sm:$0xff]  }
  0x68   :  { %1752 = vmatpush2.bf16.msra.mxu1 %v2385_v5  ;;  %1710 = vmatprep.subr.bf16.mxu0 %v2390_v6  ;;  %v2469_v5 = vld [vmem:[%s3457_s1 + $0x208] ss:$16 sps:$4 sm:$0xff]   ;;  %v2474_v6 = vld [vmem:[%s3457_s1 + $0x1cc] ss:$16 sps:$4 sm:$0xff]  }
  0x69   :  { %1753 = vmatprep.subr.bf16.mxu1 %v2393_v7  ;;  %v2477_v7 = vld [vmem:[%s3457_s1 + $0x3ec] ss:$16 sps:$4 sm:$0xff]  }
  0x6b   :  { %1711 = vmatpush2.bf16.msra.mxu0 %v2388_v8  ;;  %v2472_v8 = vld [vmem:[%s3457_s1 + $0x1c8] ss:$16 sps:$4 sm:$0xff]  }
  0x6c   :  { %1754 = vmatpush2.bf16.msra.mxu1 %v2391_v9  ;;  %1712 = vmatprep.subr.bf16.mxu0 %v2396_v10  ;;  %v2475_v9 = vld [vmem:[%s3457_s1 + $0x3e8] ss:$16 sps:$4 sm:$0xff]   ;;  %v2480_v10 = vld [vmem:[%s3457_s1 + $0x1ac] ss:$16 sps:$4 sm:$0xff]  }
  0x6d   :  { %1755 = vmatprep.subr.bf16.mxu1 %v2399_v11  ;;  %v2483_v11 = vld [vmem:[%s3457_s1 + $0x3cc] ss:$16 sps:$4 sm:$0xff]  }
  0x6f   :  { %1713 = vmatpush2.bf16.msra.mxu0 %v2394_v12  ;;  %v2478_v12 = vld [vmem:[%s3457_s1 + $0x1a8] ss:$16 sps:$4 sm:$0xff]  }
  0x70   :  { %1756 = vmatpush2.bf16.msra.mxu1 %v2397_v13  ;;  %1714 = vmatprep.subr.bf16.mxu0 %v2402_v16  ;;  %v2481_v13 = vld [vmem:[%s3457_s1 + $0x3c8] ss:$16 sps:$4 sm:$0xff]   ;;  %v2486_v16 = vld [vmem:[%s3457_s1 + $0x18c] ss:$16 sps:$4 sm:$0xff]  }
  0x71   :  { %1757 = vmatprep.subr.bf16.mxu1 %v2405_v17  ;;  %v2489_v17 = vld [vmem:[%s3457_s1 + $0x3ac] ss:$16 sps:$4 sm:$0xff]  }
  0x73   :  { %1715 = vmatpush2.bf16.msra.mxu0 %v2400_v18  ;;  %v2484_v18 = vld [vmem:[%s3457_s1 + $0x188] ss:$16 sps:$4 sm:$0xff]  }
  0x74   :  { %1758 = vmatpush2.bf16.msra.mxu1 %v2403_v19  ;;  %1716 = vmatprep.subr.bf16.mxu0 %v2408_v20  ;;  %v2487_v19 = vld [vmem:[%s3457_s1 + $0x3a8] ss:$16 sps:$4 sm:$0xff]   ;;  %v2492_v20 = vld [vmem:[%s3457_s1 + $0x16c] ss:$16 sps:$4 sm:$0xff]  }
  0x75   :  { %1759 = vmatprep.subr.bf16.mxu1 %v2411_v21  ;;  %v2495_v21 = vld [vmem:[%s3457_s1 + $0x38c] ss:$16 sps:$4 sm:$0xff]  }
  0x77   :  { %1717 = vmatpush2.bf16.msra.mxu0 %v2406_v24  ;;  %v2490_v24 = vld [vmem:[%s3457_s1 + $0x168] ss:$16 sps:$4 sm:$0xff]  }
  0x78   :  { %1760 = vmatpush2.bf16.msra.mxu1 %v2409_v25  ;;  %1718 = vmatprep.subr.bf16.mxu0 %v2414_v26  ;;  %v2493_v25 = vld [vmem:[%s3457_s1 + $0x388] ss:$16 sps:$4 sm:$0xff]   ;;  %v2498_v26 = vld [vmem:[%s3457_s1 + $0x14c] ss:$16 sps:$4 sm:$0xff]  }
  0x79   :  { %1761 = vmatprep.subr.bf16.mxu1 %v2417_v27  ;;  %v2501_v27 = vld [vmem:[%s3457_s1 + $0x36c] ss:$16 sps:$4 sm:$0xff]  }
  0x7b   :  { %1719 = vmatpush2.bf16.msra.mxu0 %v2412_v30  ;;  %v2496_v30 = vld [vmem:[%s3457_s1 + $0x148] ss:$16 sps:$4 sm:$0xff]  }
  0x7c   :  { %1762 = vmatpush2.bf16.msra.mxu1 %v2415_v31  ;;  %1720 = vmatprep.subr.bf16.mxu0 %v2420_v32  ;;  %v2499_v31 = vld [vmem:[%s3457_s1 + $0x368] ss:$16 sps:$4 sm:$0xff]   ;;  %v2504_v32 = vld [vmem:[%s3457_s1 + $0x12c] ss:$16 sps:$4 sm:$0xff]  }
  0x7d   :  { %1772 = vmatprep.subr.bf16.mxu1 %v2423_v33  ;;  %v2507_v33 = vld [vmem:[%s3457_s1 + $0x34c] ss:$16 sps:$4 sm:$0xff]  }
  0x7f   :  { %1764 = vmatmul.mubr.bf16.vlgmr.msra.gmra.mxu1 %v3054_v35  ;;  %1721 = vmatpush2.bf16.msra.mxu0 %v2418_v34  ;;  %v2502_v34 = vld [vmem:[%s3457_s1 + $0x128] ss:$16 sps:$4 sm:$0xff]  }
  0x80   :  { %1773 = vmatpush1.bf16.msra.mxu1 %v2421_v36  ;;  %1813 = vmatprep.subr.bf16.mxu0 %v2429_v38  ;;  %v2505_v36 = vld [vmem:[%s3457_s1 + $0x348] ss:$16 sps:$4 sm:$0xff]   ;;  %v2513_v38 = vld [vmem:[%s3457_s1 + $0x32c] ss:$16 sps:$4 sm:$0xff]  }
  0x81   :  { %1774 = vmatprep.subr.bf16.mxu1 %v2426_v37  ;;  %1804 = vmatprep.mubr.bf16.mxu1 %v2790_v61  ;;  %v2441_v61 = vld [vmem:[%s3457_s1 + $0x2ac] ss:$16 sps:$4 sm:$0xff]  }
  0x82   :  { %1723 = vmatmul.mubr.bf16.vlgmr.msra.gmra.mxu0 %v3068_v14  ;;  %v2510_v37 = vld [vmem:[%s3457_s1 + $0x10c] ss:$16 sps:$4 sm:$0xff]  }
  0x83   :  { %1814 = vmatpush1.bf16.msra.mxu0 %v2427_v40  ;;  %1845 = vmatprep.mubr.bf16.mxu0 %v2804_v3  ;;  %v2447_v3 = vld [vmem:[%s3457_s1 + $0x28c] ss:$16 sps:$4 sm:$0xff]   ;;  %v2511_v40 = vld [vmem:[%s3457_s1 + $0x328] ss:$16 sps:$4 sm:$0xff]  }
  0x84   :  { %1775 = vmatpush1.bf16.msra.mxu1 %v2424_v39  ;;  %1815 = vmatprep.subr.bf16.mxu0 %v2435_v15  ;;  %v2508_v39 = vld [vmem:[%s3457_s1 + $0x108] ss:$16 sps:$4 sm:$0xff]   ;;  %v2519_v15 = vld [vmem:[%s3457_s1 + $0x4ec] ss:$16 sps:$4 sm:$0xff]  }
  0x85   :  { %1776 = vmatprep.subr.bf16.mxu1 %v2432_v41  ;;  %v2516_v41 = vld [vmem:[%s3457_s1 + $0x30c] ss:$16 sps:$4 sm:$0xff]  }
  0x87   :  { %1816 = vmatpush1.bf16.msra.mxu0 %v2433_v44  ;;  %v2517_v44 = vld [vmem:[%s3457_s1 + $0x4e8] ss:$16 sps:$4 sm:$0xff]  }
  0x88   :  { %1777 = vmatpush1.bf16.msra.mxu1 %v2430_v42  ;;  %1817 = vmatprep.subr.bf16.mxu0 %v2441_v61  ;;  %v2514_v42 = vld [vmem:[%s3457_s1 + $0x308] ss:$16 sps:$4 sm:$0xff]   ;;  %v2525_v61 = vld [vmem:[%s3457_s1 + $0x6ec] ss:$16 sps:$4 sm:$0xff]  }
  0x89   :  { %1778 = vmatprep.subr.bf16.mxu1 %v2438_v45  ;;  %v2522_v45 = vld [vmem:[%s3457_s1 + $0x4cc] ss:$16 sps:$4 sm:$0xff]  }
  0x8b   :  { %1818 = vmatpush1.bf16.msra.mxu0 %v2439_v47  ;;  %v2523_v47 = vld [vmem:[%s3457_s1 + $0x6e8] ss:$16 sps:$4 sm:$0xff]  }
  0x8c   :  { %1779 = vmatpush1.bf16.msra.mxu1 %v2436_v46  ;;  %1819 = vmatprep.subr.bf16.mxu0 %v2447_v3  ;;  %v2520_v46 = vld [vmem:[%s3457_s1 + $0x4c8] ss:$16 sps:$4 sm:$0xff]  }
  0x8d   :  { %1780 = vmatprep.subr.bf16.mxu1 %v2444_v48  ;;  %v2528_v48 = vld [vmem:[%s3457_s1 + $0x4ac] ss:$16 sps:$4 sm:$0xff]   ;;  %v2526_v3 = vld [vmem:[%s3457_s1 + $0x4a8] ss:$16 sps:$4 sm:$0xff]  }
  0x8f   :  { %1820 = vmatpush1.bf16.msra.mxu0 %v2445_v51  ;;  %v2534_v51 = vld [vmem:[%s3457_s1 + $0x48c] ss:$16 sps:$4 sm:$0xff]  }
  0x90   :  { %1781 = vmatpush1.bf16.msra.mxu1 %v2442_v50  ;;  %1821 = vmatprep.subr.bf16.mxu0 %v2453_v53  ;;  %v2529_v50 = vld [vmem:[%s3457_s1 + $0x6c8] ss:$16 sps:$4 sm:$0xff]   ;;  %v2540_v53 = vld [vmem:[%s3457_s1 + $0x46c] ss:$16 sps:$4 sm:$0xff]  }
  0x91   :  { %1782 = vmatprep.subr.bf16.mxu1 %v2450_v52  ;;  %v2535_v52 = vld [vmem:[%s3457_s1 + $0x6a8] ss:$16 sps:$4 sm:$0xff]  }
  0x93   :  { %1822 = vmatpush1.bf16.msra.mxu0 %v2451_v55  ;;  %v2541_v55 = vld [vmem:[%s3457_s1 + $0x688] ss:$16 sps:$4 sm:$0xff]  }
  0x94   :  { %1783 = vmatpush1.bf16.msra.mxu1 %v2448_v54  ;;  %1823 = vmatprep.subr.bf16.mxu0 %v2459_v57  ;;  %v2538_v54 = vld [vmem:[%s3457_s1 + $0x468] ss:$16 sps:$4 sm:$0xff]   ;;  %v2549_v57 = vld [vmem:[%s3457_s1 + $0x66c] ss:$16 sps:$4 sm:$0xff]  }
  0x95   :  { %1784 = vmatprep.subr.bf16.mxu1 %v2456_v56  ;;  %v2546_v56 = vld [vmem:[%s3457_s1 + $0x44c] ss:$16 sps:$4 sm:$0xff]  }
  0x97   :  { %1824 = vmatpush1.bf16.msra.mxu0 %v2457_v59  ;;  %v2547_v59 = vld [vmem:[%s3457_s1 + $0x668] ss:$16 sps:$4 sm:$0xff]  }
  0x98   :  { %1785 = vmatpush1.bf16.msra.mxu1 %v2454_v58  ;;  %1825 = vmatprep.subr.bf16.mxu0 %v2465_v62  ;;  %v2544_v58 = vld [vmem:[%s3457_s1 + $0x448] ss:$16 sps:$4 sm:$0xff]   ;;  %v2555_v62 = vld [vmem:[%s3457_s1 + $0x64c] ss:$16 sps:$4 sm:$0xff]  }
  0x99   :  { %1786 = vmatprep.subr.bf16.mxu1 %v2462_v60  ;;  %v2552_v60 = vld [vmem:[%s3457_s1 + $0x42c] ss:$16 sps:$4 sm:$0xff]  }
  0x9b   :  { %1826 = vmatpush1.bf16.msra.mxu0 %v2463_v0  ;;  %v2553_v0 = vld [vmem:[%s3457_s1 + $0x648] ss:$16 sps:$4 sm:$0xff]  }
  0x9c   :  { %1787 = vmatpush1.bf16.msra.mxu1 %v2460_v63  ;;  %1827 = vmatprep.subr.bf16.mxu0 %v2471_v2  ;;  %v2550_v63 = vld [vmem:[%s3457_s1 + $0x428] ss:$16 sps:$4 sm:$0xff]   ;;  %v2561_v2 = vld [vmem:[%s3457_s1 + $0x62c] ss:$16 sps:$4 sm:$0xff]  }
  0x9d   :  { %1788 = vmatprep.subr.bf16.mxu1 %v2468_v1  ;;  %v2558_v1 = vld [vmem:[%s3457_s1 + $0x40c] ss:$16 sps:$4 sm:$0xff]  }
  0x9f   :  { %1828 = vmatpush1.bf16.msra.mxu0 %v2469_v5  ;;  %v2559_v5 = vld [vmem:[%s3457_s1 + $0x628] ss:$16 sps:$4 sm:$0xff]  }
  0xa0   :  { %1789 = vmatpush2.bf16.msra.mxu1 %v2466_v4  ;;  %1829 = vmatprep.subr.bf16.mxu0 %v2477_v7  ;;  %v2556_v4 = vld [vmem:[%s3457_s1 + $0x408] ss:$16 sps:$4 sm:$0xff]   ;;  %v2567_v7 = vld [vmem:[%s3457_s1 + $0x60c] ss:$16 sps:$4 sm:$0xff]  }
  0xa1   :  { %1790 = vmatprep.subr.bf16.mxu1 %v2474_v6  ;;  %v2564_v6 = vld [vmem:[%s3457_s1 + $0x5ec] ss:$16 sps:$4 sm:$0xff]  }
  0xa3   :  { %1830 = vmatpush2.bf16.msra.mxu0 %v2475_v9  ;;  %v2562_v9 = vld [vmem:[%s3457_s1 + $0x5e8] ss:$16 sps:$4 sm:$0xff]  }
  0xa4   :  { %1791 = vmatpush2.bf16.msra.mxu1 %v2472_v8  ;;  %1831 = vmatprep.subr.bf16.mxu0 %v2483_v11  ;;  %v318_v8 = vld [vmem:[%s3457_s1 + $0x7c8] sm:$0xff] }
  0xa5   :  { %1792 = vmatprep.subr.bf16.mxu1 %v2480_v10  ;;  %v2565_v10 = vld [vmem:[%s3457_s1 + $0x608] ss:$16 sps:$4 sm:$0xff]   ;;  %v2570_v11 = vld [vmem:[%s3457_s1 + $0x5cc] ss:$16 sps:$4 sm:$0xff]  }
  0xa7   :  { %1832 = vmatpush2.bf16.msra.mxu0 %v2481_v13  ;;  %v2224_v13 = vcombine.low %v318_v8, %v318_v8 }
  0xa8   :  { %1793 = vmatpush2.bf16.msra.mxu1 %v2478_v12  ;;  %1833 = vmatprep.subr.bf16.mxu0 %v2489_v17  ;;  %v2225_v12 = vcombine.high %v318_v8, %v318_v8 }
  0xa9   :  { %1794 = vmatprep.subr.bf16.mxu1 %v2486_v16  ;;  %v2568_v16 = vld [vmem:[%s3457_s1 + $0x5c8] ss:$16 sps:$4 sm:$0xff]   ;;  %v1603_v17 = vsel %vm1595_vm1, %v2224_v13, 0 }
  0xab   :  { %1834 = vmatpush2.bf16.msra.mxu0 %v2487_v19  ;;  %v2578_v19 = vld [vmem:[%s3457_s1 + $0x7ac] ss:$16 sps:$4 sm:$0xff]  }
  0xac   :  { %1795 = vmatpush2.bf16.msra.mxu1 %v2484_v18  ;;  %1835 = vmatprep.subr.bf16.mxu0 %v2495_v21  ;;  %v2575_v18 = vld [vmem:[%s3457_s1 + $0x5ac] ss:$16 sps:$4 sm:$0xff]   ;;  %v2576_v21 = vld [vmem:[%s3457_s1 + $0x7a8] ss:$16 sps:$4 sm:$0xff]  }
  0xad   :  { %1796 = vmatprep.subr.bf16.mxu1 %v2492_v20  ;;  %v2573_v20 = vld [vmem:[%s3457_s1 + $0x5a8] ss:$16 sps:$4 sm:$0xff]  }
  0xaf   :  { %1836 = vmatpush2.bf16.msra.mxu0 %v2493_v25  ;;  %v2584_v25 = vld [vmem:[%s3457_s1 + $0x78c] ss:$16 sps:$4 sm:$0xff]  }
  0xb0   :  { %1797 = vmatpush2.bf16.msra.mxu1 %v2490_v24  ;;  %1837 = vmatprep.subr.bf16.mxu0 %v2501_v27  ;;  %v2581_v24 = vld [vmem:[%s3457_s1 + $0x58c] ss:$16 sps:$4 sm:$0xff]   ;;  %v2582_v27 = vld [vmem:[%s3457_s1 + $0x788] ss:$16 sps:$4 sm:$0xff]  }
  0xb1   :  { %1798 = vmatprep.subr.bf16.mxu1 %v2498_v26  ;;  %v2579_v26 = vld [vmem:[%s3457_s1 + $0x588] ss:$16 sps:$4 sm:$0xff]  }
  0xb3   :  { %1838 = vmatpush2.bf16.msra.mxu0 %v2499_v31  ;;  %v2590_v31 = vld [vmem:[%s3457_s1 + $0x76c] ss:$16 sps:$4 sm:$0xff]  }
  0xb4   :  { %1799 = vmatpush2.bf16.msra.mxu1 %v2496_v30  ;;  %1839 = vmatprep.subr.bf16.mxu0 %v2507_v33  ;;  %v2587_v30 = vld [vmem:[%s3457_s1 + $0x56c] ss:$16 sps:$4 sm:$0xff]   ;;  %v2588_v33 = vld [vmem:[%s3457_s1 + $0x768] ss:$16 sps:$4 sm:$0xff]  }
  0xb5   :  { %1800 = vmatprep.subr.bf16.mxu1 %v2504_v32  ;;  %v2585_v32 = vld [vmem:[%s3457_s1 + $0x568] ss:$16 sps:$4 sm:$0xff]  }
  0xb7   :  { %1840 = vmatpush2.bf16.msra.mxu0 %v2505_v36  ;;  %v2596_v36 = vld [vmem:[%s3457_s1 + $0x74c] ss:$16 sps:$4 sm:$0xff]  }
  0xb8   :  { %1801 = vmatpush2.bf16.msra.mxu1 %v2502_v34  ;;  %1841 = vmatprep.subr.bf16.mxu0 %v2513_v38  ;;  %v2593_v34 = vld [vmem:[%s3457_s1 + $0x54c] ss:$16 sps:$4 sm:$0xff]   ;;  %v2594_v38 = vld [vmem:[%s3457_s1 + $0x748] ss:$16 sps:$4 sm:$0xff]  }
  0xb9   :  { %1802 = vmatprep.subr.bf16.mxu1 %v2510_v37  ;;  %v2591_v37 = vld [vmem:[%s3457_s1 + $0x548] ss:$16 sps:$4 sm:$0xff]  }
  0xbb   :  { %1842 = vmatpush2.bf16.msra.mxu0 %v2511_v40  ;;  %v2602_v40 = vld [vmem:[%s3457_s1 + $0x72c] ss:$16 sps:$4 sm:$0xff]  }
  0xbc   :  { %1803 = vmatpush2.bf16.msra.mxu1 %v2508_v39  ;;  %1843 = vmatprep.subr.bf16.mxu0 %v2516_v41  ;;  %v2599_v39 = vld [vmem:[%s3457_s1 + $0x52c] ss:$16 sps:$4 sm:$0xff]   ;;  %v2597_v41 = vld [vmem:[%s3457_s1 + $0x528] ss:$16 sps:$4 sm:$0xff]  }
  0xbd   :  { %1854 = vmatprep.subr.bf16.mxu1 %v2519_v15  ;;  %v2600_v15 = vld [vmem:[%s3457_s1 + $0x728] ss:$16 sps:$4 sm:$0xff]  }
  0xbf   :  { %1805 = vmatmul.mubr.bf16.vlgmr.msra.gmra.mxu1 %v2857_v22  ;;  %1844 = vmatpush2.bf16.msra.mxu0 %v2514_v42  ;;  %v2531_v22 = vld [vmem:[%s3457_s1 + $0x6cc] ss:$16 sps:$4 sm:$0xff]  }
  0xc0   :  { %1855 = vmatpush1.bf16.msra.mxu1 %v2517_v44  ;;  %1895 = vmatprep.subr.bf16.mxu0 %v2525_v61  ;;  %v2605_v42 = vld [vmem:[%s3457_s1 + $0x50c] ss:$16 sps:$4 sm:$0xff]   ;;  %v2606_v61 = vld [vmem:[%s3457_s1 + $0x708] ss:$16 sps:$4 sm:$0xff]  }
  0xc1   :  { %1856 = vmatprep.subr.bf16.mxu1 %v2522_v45  ;;  %1886 = vmatprep.mubr.bf16.mxu1 %v2875_v29  ;;  %v2532_v29 = vld [vmem:[%s3457_s1 + $0x488] ss:$16 sps:$4 sm:$0xff]   ;;  %v2608_v44 = vld [vmem:[%s3457_s1 + $0x70c] ss:$16 sps:$4 sm:$0xff]  }
  0xc2   :  { %1846 = vmatmul.mubr.bf16.vlgmr.msra.gmra.mxu0 %v2859_v23  ;;  %v2537_v23 = vld [vmem:[%s3457_s1 + $0x6ac] ss:$16 sps:$4 sm:$0xff]   ;;  %v2603_v45 = vld [vmem:[%s3457_s1 + $0x508] ss:$16 sps:$4 sm:$0xff]  }
  0xc3   :  { %1896 = vmatpush1.bf16.msra.mxu0 %v2523_v47  ;;  %2229 = vmatprep.mubr.msk.bf16.mxu0 %vm1591_vm0, %v2873_v28  ;;  %v2543_v28 = vld [vmem:[%s3457_s1 + $0x68c] ss:$16 sps:$4 sm:$0xff]   ;;  %v319_v47 = vld [vmem:[%s3459_s2] sm:$0xf] }
  0xc4   :  { %1857 = vmatpush1.bf16.msra.mxu1 %v2520_v46  ;;  %1897 = vmatprep.subr.bf16.mxu0 %v2531_v22  ;;  %v323_v46 = vsub.s32 0, %v2747_v43 }
  0xc5   :  { %1858 = vmatprep.subr.bf16.mxu1 %v2528_v48  ;;  %v327_v48 = vsub.s32 1, %v2747_v43 }
  0xc6   :  { %v324_v22 = vrot.slane %v319_v47, %v323_v46 }
  0xc7   :  { %1898 = vmatpush1.bf16.msra.mxu0 %v2529_v50 }
  0xc8   :  { %1859 = vmatpush1.bf16.msra.mxu1 %v2526_v3  ;;  %1899 = vmatprep.subr.bf16.mxu0 %v2537_v23  ;;  %v328_v3 = vrot.slane %v319_v47, %v327_v48 }
  0xc9   :  { %1860 = vmatprep.subr.bf16.mxu1 %v2534_v51 }
  0xcb   :  { %1900 = vmatpush1.bf16.msra.mxu0 %v2535_v52 }
  0xcc   :  { %1861 = vmatpush1.bf16.msra.mxu1 %v2532_v29  ;;  %1901 = vmatprep.subr.bf16.mxu0 %v2543_v28 }
  0xcd   :  { %1862 = vmatprep.subr.bf16.mxu1 %v2540_v53 }
  0xcf   :  { %1902 = vmatpush1.bf16.msra.mxu0 %v2541_v55 }
  0xd0   :  { %1863 = vmatpush1.bf16.msra.mxu1 %v2538_v54  ;;  %1903 = vmatprep.subr.bf16.mxu0 %v2549_v57 }
  0xd1   :  { %1864 = vmatprep.subr.bf16.mxu1 %v2546_v56 }
  0xd3   :  { %1904 = vmatpush1.bf16.msra.mxu0 %v2547_v59 }
  0xd4   :  { %1865 = vmatpush1.bf16.msra.mxu1 %v2544_v58  ;;  %1905 = vmatprep.subr.bf16.mxu0 %v2555_v62 }
  0xd5   :  { %1866 = vmatprep.subr.bf16.mxu1 %v2552_v60 }
  0xd7   :  { %1906 = vmatpush1.bf16.msra.mxu0 %v2553_v0 }
  0xd8   :  { %1867 = vmatpush1.bf16.msra.mxu1 %v2550_v63  ;;  %1907 = vmatprep.subr.bf16.mxu0 %v2561_v2 }
  0xd9   :  { %1868 = vmatprep.subr.bf16.mxu1 %v2558_v1 }
  0xdb   :  { %1908 = vmatpush1.bf16.msra.mxu0 %v2559_v5 }
  0xdc   :  { %1869 = vmatpush1.bf16.msra.mxu1 %v2556_v4  ;;  %1909 = vmatprep.subr.bf16.mxu0 %v2567_v7 }
  0xdd   :  { %1870 = vmatprep.subr.bf16.mxu1 %v2564_v6 }
  0xdf   :  { %1910 = vmatpush1.bf16.msra.mxu0 %v2565_v10 }
  0xe0   :  { %1871 = vmatpush2.bf16.msra.mxu1 %v2562_v9  ;;  %2228 = vmatprep.subr.msk.bf16.mxu0 %vm1595_vm1, %v2225_v12 }
  0xe1   :  { %1872 = vmatprep.subr.bf16.mxu1 %v2570_v11 }
  0xe3   :  { %1914 = vmatpush2.bf16.msra.mxu0 %v1603_v17 }
  0xe4   :  { %1873 = vmatpush2.bf16.msra.mxu1 %v2568_v16  ;;  %1915 = vmatprep.subr.bf16.mxu0 %v2578_v19 }
  0xe5   :  { %1874 = vmatprep.subr.bf16.mxu1 %v2575_v18 }
  0xe7   :  { %1916 = vmatpush2.bf16.msra.mxu0 %v2576_v21 }
  0xe8   :  { %1875 = vmatpush2.bf16.msra.mxu1 %v2573_v20  ;;  %1917 = vmatprep.subr.bf16.mxu0 %v2584_v25  ;;  %v331_v20 = vsub.s32 2, %v2747_v43 }
  0xe9   :  { %1876 = vmatprep.subr.bf16.mxu1 %v2581_v24  ;;  %v335_v24 = vsub.s32 3, %v2747_v43 }
  0xea   :  { %v332_v21 = vrot.slane %v319_v47, %v331_v20 }
  0xeb   :  { %1918 = vmatpush2.bf16.msra.mxu0 %v2582_v27 }
  0xec   :  { %1877 = vmatpush2.bf16.msra.mxu1 %v2579_v26  ;;  %1919 = vmatprep.subr.bf16.mxu0 %v2590_v31  ;;  %v336_v26 = vrot.slane %v319_v47, %v335_v24 }
  0xed   :  { %1878 = vmatprep.subr.bf16.mxu1 %v2587_v30 }
  0xef   :  { %1920 = vmatpush2.bf16.msra.mxu0 %v2588_v33 }
  0xf0   :  { %1879 = vmatpush2.bf16.msra.mxu1 %v2585_v32  ;;  %1921 = vmatprep.subr.bf16.mxu0 %v2596_v36 }
  0xf1   :  { %1880 = vmatprep.subr.bf16.mxu1 %v2593_v34 }
  0xf3   :  { %1922 = vmatpush2.bf16.msra.mxu0 %v2594_v38 }
  0xf4   :  { %1881 = vmatpush2.bf16.msra.mxu1 %v2591_v37  ;;  %1923 = vmatprep.subr.bf16.mxu0 %v2602_v40 }
  0xf5   :  { %1882 = vmatprep.subr.bf16.mxu1 %v2599_v39 }
  0xf7   :  { %1924 = vmatpush2.bf16.msra.mxu0 %v2600_v15 }
  0xf8   :  { %1883 = vmatpush2.bf16.msra.mxu1 %v2597_v41  ;;  %1925 = vmatprep.subr.bf16.mxu0 %v2608_v44 }
  0xf9   :  { %1884 = vmatprep.subr.bf16.mxu1 %v2605_v42 }
  0xfb   :  { %1926 = vmatpush2.bf16.msra.mxu0 %v2606_v61 }
  0xfc   :  { %1885 = vmatpush2.bf16.msra.mxu1 %v2603_v45 }
  0xfe   :  { %1928 = vmatmul.mubr.bf16.vlgmr.msra.gmra.mxu0 %v3054_v35 }
  0xff   :  { %1887 = vmatmul.mubr.bf16.vlgmr.msra.gmra.mxu1 %v3068_v14 }
 0x102   :  { %v1642_v50 = vpop.f32.mrf.mxu0 }
 0x103   :  { %v1683_v51 = vpop.f32.mrf.mxu1  ;;  %v1643_v23 = vadd.f32 %v1642_v50, %v324_v22 }
 0x104   :  { %v1644_v29 = vpop.f32.mrf.mxu0 }
 0x105   :  { %v1685_v52 = vpop.f32.mrf.mxu1  ;;  %v1684_v53 = vadd.f32 %v1683_v51, %v1643_v23  ;;  %v1645_v28 = vadd.f32 %v1644_v29, %v328_v3 }
 0x106   :  { %v1646_v54 = vpop.f32.mrf.mxu0 }
 0x107   :  { %v1687_v55 = vpop.f32.mrf.mxu1  ;;  %v1686_v56 = vadd.f32 %v1685_v52, %v1645_v28 }
 0x108   :  { %v1647_v57 = vpop.f32.mrf.mxu0 }
 0x109   :  { %v1688_v58 = vpop.f32.mrf.mxu1 }
 0x13f   :  { %v1765_v59 = vpop.f32.mrf.mxu1 }
 0x141   :  { %v1767_v60 = vpop.f32.mrf.mxu1 }
 0x142   :  { %v1724_v62 = vpop.f32.mrf.mxu0 }
 0x143   :  { %v1769_v14 = vpop.f32.mrf.mxu1  ;;  %v1725_v63 = vadd.f32 %v1724_v62, %v1684_v53 }
 0x144   :  { %v1726_v35 = vpop.f32.mrf.mxu0 }
 0x145   :  { %v1770_v0 = vpop.f32.mrf.mxu1  ;;  %v1766_v1 = vadd.f32 %v1765_v59, %v1725_v63  ;;  %v1727_v2 = vadd.f32 %v1726_v35, %v1686_v56 }
 0x146   :  { %v1728_v4 = vpop.f32.mrf.mxu0 }
 0x147   :  { %v1768_v5 = vadd.f32 %v1767_v60, %v1727_v2  ;;  %v1936_v7 = vmax.f32 %v1766_v1, 0.0 }
 0x148   :  { %v1729_v6 = vpop.f32.mrf.mxu0 }
 0x149   :  { %v1937_v8 = vmax.f32 %v1768_v5, 0.0 }
 0x14b   :  { %v1944_v9 = vcombine.low %v1936_v7, %v1937_v8 }
 0x14d   :  { %v1952_v46 = vrot.slane %v1944_v9, %v2765_v49 }
 0x17f   :  { %v1806_v10 = vpop.f32.mrf.mxu1 }
 0x180   :  { %v1807_v25 = vadd.f32 %v1806_v10, %v332_v21 }
 0x181   :  { %v1808_v11 = vpop.f32.mrf.mxu1 }
 0x182   :  { %v1847_v13 = vpop.f32.mrf.mxu0  ;;  %v1809_v27 = vadd.f32 %v1808_v11, %v336_v26 }
 0x183   :  { %v1810_v12 = vpop.f32.mrf.mxu1  ;;  %v1848_v30 = vadd.f32 %v1847_v13, %v1807_v25 }
 0x184   :  { %v1849_v17 = vpop.f32.mrf.mxu0 }
 0x185   :  { %v1811_v16 = vpop.f32.mrf.mxu1  ;;  %v1850_v33 = vadd.f32 %v1849_v17, %v1809_v27 }
 0x186   :  { %v1851_v18 = vpop.f32.mrf.mxu0 }
 0x188   :  { %v1852_v19 = vpop.f32.mrf.mxu0 }
 0x1be   :  { %v1929_v32 = vpop.f32.mrf.mxu0 }
 0x1bf   :  { %v1888_v31 = vpop.f32.mrf.mxu1 }
 0x1c0   :  { %v1889_v34 = vadd.f32 %v1888_v31, %v1848_v30  ;;  %v1931_v37 = vpop.f32.mrf.mxu0 }
 0x1c1   :  { %v1890_v36 = vpop.f32.mrf.mxu1 }
 0x1c2   :  { %v1930_v38 = vadd.f32 %v1929_v32, %v1889_v34  ;;  %v1891_v39 = vadd.f32 %v1890_v36, %v1850_v33  ;;  %v1933_v41 = vpop.f32.mrf.mxu0 }
 0x1c3   :  { %v1892_v40 = vpop.f32.mrf.mxu1 }
 0x1c4   :  { %v1932_v15 = vadd.f32 %v1931_v37, %v1891_v39  ;;  %v1934_v42 = vpop.f32.mrf.mxu0  ;;  %v1938_v44 = vmax.f32 %v1930_v38, 0.0 }
 0x1c5   :  { %v1893_v43 = vpop.f32.mrf.mxu1 }
 0x1c6   :  { %v1939_v45 = vmax.f32 %v1932_v15, 0.0 }
 0x1c8   :  { %v1945_v61 = vcombine.low %v1938_v44, %v1939_v45 }
 0x1ca   :  { %v1959_v47 = vrot.slane %v1945_v61, %v2765_v49 }
 0x1cc   :  { %v1960_v48 = vcombine.low %v1952_v46, %v1959_v47 }
 0x1ce   :  { %1969 = vst.msk [vmem:[%s3460_s3] sm:$0xff] %vm1968_vm8, %v1960_v48 }

// kernel: clasic_forward.17
= control target key start
LH: loop header
LB: loop body
LE: loop exit
PB: predicated region body
PF: predicated region fallthrough
CT: control target
= control target key end

     0   :  { %vm306_vm0 = vcmask 1041408   ;;  %v22_v29 = vlaneseq  ;;  %v543_v34 = vmov 1983009808   ;;  %s670_s0 = inlined_call_operand.vmem [shape: f32[2,500], index: 0, kind: input, shape index: {}]   ;;  %s671_s1 = inlined_call_operand.vmem [shape: bf16[500,3], index: 1, kind: input, shape index: {}]   ;;  %s672_s2 = inlined_call_operand.vmem [shape: f32[1,3], index: 2, kind: input, shape index: {}]   ;;  %s673_s3 = inlined_call_operand.hbm [shape: f32[2,3], index: 3, kind: output, shape index: {}]  }
   0x1   :  { %v488_v0 = vld [vmem:[%s671_s1 + $0x78] sm:$0xff]   ;;  %v492_v4 = vld [vmem:[%s671_s1 + $0x70] sm:$0xff]   ;;  %v496_v8 = vld [vmem:[%s671_s1 + $0x68] sm:$0xff]   ;;  %v20_v35 = vunpack.c.l.s4 %v543_v34 }
   0x2   :  { %v489_v1 = vld [vmem:[%s671_s1 + $0xf8] ss:$0 sps:$4 sm:$0x33]   ;;  %441 = vmatprep.subr.bf16.mxu0 %v488_v0  ;;  %v493_v5 = vld [vmem:[%s671_s1 + $0xf0] sm:$0xff]   ;;  %v497_v9 = vld [vmem:[%s671_s1 + $0xe8] sm:$0xff]   ;;  %v23_v36 = vshrl.u32 %v22_v29, 7 }
   0x3   :  { %v490_v2 = vld [vmem:[%s671_s1 + $0x38] sm:$0xff]   ;;  %485 = vmatprep.subr.msk.bf16.mxu1 %vm306_vm0, %v489_v1  ;;  %v494_v6 = vld [vmem:[%s671_s1 + $0x30] sm:$0xff]   ;;  %v498_v10 = vld [vmem:[%s671_s1 + $0x28] sm:$0xff]  }
   0x4   :  { %442 = vmatpush3.bf16.msra.mxu0 %v490_v2  ;;  %v491_v3 = vld [vmem:[%s671_s1 + $0xb8] sm:$0xff]   ;;  %v495_v7 = vld [vmem:[%s671_s1 + $0xb0] sm:$0xff]   ;;  %v499_v11 = vld [vmem:[%s671_s1 + $0xa8] sm:$0xff]  }
   0x5   :  { %464 = vmatpush3.bf16.msra.mxu1 %v491_v3  ;;  %443 = vmatprep.subr.bf16.mxu0 %v492_v4  ;;  %v500_v12 = vld [vmem:[%s671_s1 + $0x60] sm:$0xff]   ;;  %v504_v16 = vld [vmem:[%s671_s1 + $0x58] sm:$0xff]   ;;  %v508_v20 = vld [vmem:[%s671_s1 + $0x50] sm:$0xff]  }
   0x6   :  { %465 = vmatprep.subr.bf16.mxu1 %v493_v5  ;;  %v501_v13 = vld [vmem:[%s671_s1 + $0xe0] sm:$0xff]   ;;  %v505_v17 = vld [vmem:[%s671_s1 + $0xd8] sm:$0xff]   ;;  %v509_v21 = vld [vmem:[%s671_s1 + $0xd0] sm:$0xff]  }
   0x7   :  { %v502_v14 = vld [vmem:[%s671_s1 + $0x20] sm:$0xff]   ;;  %v506_v18 = vld [vmem:[%s671_s1 + $0x18] sm:$0xff]   ;;  %v510_v22 = vld [vmem:[%s671_s1 + $0x10] sm:$0xff]  }
   0x8   :  { %444 = vmatpush3.bf16.msra.mxu0 %v494_v6  ;;  %v503_v15 = vld [vmem:[%s671_s1 + $0xa0] sm:$0xff]   ;;  %v507_v19 = vld [vmem:[%s671_s1 + $0x98] sm:$0xff]   ;;  %v511_v23 = vld [vmem:[%s671_s1 + $0x90] sm:$0xff]  }
   0x9   :  { %466 = vmatpush3.bf16.msra.mxu1 %v495_v7  ;;  %445 = vmatprep.subr.bf16.mxu0 %v496_v8  ;;  %v512_v24 = vld [vmem:[%s671_s1 + $0x48] sm:$0xff]   ;;  %v516_v28 = vld [vmem:[%s671_s1 + $0x40] sm:$0xff]  }
   0xa   :  { %467 = vmatprep.subr.bf16.mxu1 %v497_v9  ;;  %v513_v25 = vld [vmem:[%s671_s1 + $0xc8] sm:$0xff]   ;;  %v517_v30 = vld [vmem:[%s671_s1 + $0xc0] sm:$0xff]  }
   0xb   :  { %v514_v26 = vld [vmem:[%s671_s1 + $0x8] sm:$0xff]   ;;  %v518_v31 = vld [vmem:[%s671_s1] sm:$0xff]  }
   0xc   :  { %446 = vmatpush3.bf16.msra.mxu0 %v498_v10  ;;  %v515_v27 = vld [vmem:[%s671_s1 + $0x88] sm:$0xff]   ;;  %v519_v32 = vld [vmem:[%s671_s1 + $0x80] sm:$0xff]  }
   0xd   :  { %468 = vmatpush3.bf16.msra.mxu1 %v499_v11  ;;  %447 = vmatprep.subr.bf16.mxu0 %v500_v12  ;;  %v16_v33 = vld [vmem:[%s670_s0] sm:$0xff] }
   0xe   :  { %469 = vmatprep.subr.bf16.mxu1 %v501_v13 }
  0x10   :  { %448 = vmatpush3.bf16.msra.mxu0 %v502_v14 }
  0x11   :  { %470 = vmatpush3.bf16.msra.mxu1 %v503_v15  ;;  %449 = vmatprep.subr.bf16.mxu0 %v504_v16 }
  0x12   :  { %471 = vmatprep.subr.bf16.mxu1 %v505_v17 }
  0x14   :  { %450 = vmatpush3.bf16.msra.mxu0 %v506_v18 }
  0x15   :  { %472 = vmatpush3.bf16.msra.mxu1 %v507_v19  ;;  %451 = vmatprep.subr.bf16.mxu0 %v508_v20 }
  0x16   :  { %473 = vmatprep.subr.bf16.mxu1 %v509_v21 }
  0x18   :  { %452 = vmatpush3.bf16.msra.mxu0 %v510_v22 }
  0x19   :  { %474 = vmatpush3.bf16.msra.mxu1 %v511_v23  ;;  %453 = vmatprep.subr.bf16.mxu0 %v512_v24 }
  0x1a   :  { %475 = vmatprep.subr.bf16.mxu1 %v513_v25 }
  0x1c   :  { %454 = vmatpush3.bf16.msra.mxu0 %v514_v26 }
  0x1d   :  { %476 = vmatpush3.bf16.msra.mxu1 %v515_v27  ;;  %455 = vmatprep.subr.bf16.mxu0 %v516_v28 }
  0x1e   :  { %477 = vmatprep.subr.bf16.mxu1 %v517_v30 }
  0x20   :  { %456 = vmatpush3.bf16.msra.mxu0 %v518_v31 }
  0x21   :  { %8 = vsyncpa [#allocation3], 0  ;;  %478 = vmatpush3.bf16.msra.mxu1 %v519_v32  ;;  %v18_v37 = vcombine.high %v16_v33, %v16_v33  ;;  %v21_v38 = vunpack.c.0.s8 %v20_v35  ;;  %vm302_vm1 = vcmask 949248   ;;  %v407_v50 = vld [vmem:[%s672_s2] ss:$0 sm:$0xff]  ;;  %s544_s24 = smov [#allocation2]  }
  0x22   :  { %s399_s25 = sshll.u32 %s544_s24, 4  ;;  %vm391_vm2 = vcmask 17408   ;;  %s400_s25 = int_to_ptr.vmem [resolvable:$true] %s399_s25 }
  0x23   :  { %v24_v39 = vsub.s32 %v21_v38, %v23_v36  ;;  %s521_s26 = scalar_lea.vmem %s400_s25, 32  ;;  %p526_p1 = scmp.lt.s32.totalorder %s400_s25, %s400_s25 }
  0x24   :  { %p522_p0 = scmp.ne.s32.totalorder %s400_s25, %s521_s26  ;;  %p527_p2 = scmp.lt.s32.totalorder %s521_s26, %s521_s26 }
  0x25   :  { %v25_v40 = vrot.slane %v16_v33, %v24_v39  ;;  %v32_v41 = vrot.slane %v18_v37, %v24_v39 }
  0x26   :  { %p528_p3 = por %p527_p2, %p526_p1 }
  0x27   :  { %v33_v42 = vcombine.high %v25_v40, %v25_v40  ;;  %v34_v43 = vcombine.high %v32_v41, %v32_v41  ;;  %v39_v44 = vpack.c.bf16 %v25_v40, %v25_v40  ;;  %v41_v45 = vpack.c.bf16 %v32_v41, %v32_v41 }
  0x28   :  { %p529_p4 = pnand %p528_p3, %p522_p0 }
  0x29   :  { %v40_v46 = vpack.c.bf16 %v33_v42, %v33_v42  ;;  %v42_v47 = vpack.c.bf16 %v34_v43, %v34_v43 }
  0x2b   :  { %342 = vmatprep.mubr.bf16.mxu0 %v40_v46  ;;  %440 = vmatprep.mubr.msk.bf16.mxu1 %vm302_vm1, %v42_v47 }
  0x2c   :  { %343 = vmatmul.mubr.bf16.vlgmr.msra.gmra.mxu0 %v39_v44  ;;  %383 = vmatmul.mubr.bf16.vlgmr.msra.gmra.mxu1 %v41_v45 }
  0xec   :  { %v457_v48 = vpop.f32.mrf.mxu0  ;;  %v479_v49 = vpop.f32.mrf.mxu1 }
  0xee   :  { %v458_v51 = vpop.f32.mrf.mxu0  ;;  %v480_v52 = vpop.f32.mrf.mxu1 }
  0xef   :  { %v459_v53 = vadd.f32 %v458_v51, %v457_v48  ;;  %v481_v57 = vadd.f32 %v480_v52, %v479_v49 }
  0xf0   :  { %v460_v54 = vpop.f32.mrf.mxu0  ;;  %v482_v55 = vpop.f32.mrf.mxu1 }
  0xf1   :  { %v345_v56 = vadd.f32 %v459_v53, %v407_v50 }
  0xf2   :  { %v461_v58 = vpop.f32.mrf.mxu0  ;;  %v483_v59 = vpop.f32.mrf.mxu1 }
  0xf3   :  { %v385_v60 = vadd.f32 %v481_v57, %v345_v56 }
  0xf5   :  { %v390_v61 = vmax.f32 %v385_v60, 0.0 }
  0xf7   :  { %392 = vst.msk [vmem:[#allocation2] sm:$0x3] %vm391_vm2, %v390_v61 }
  0xf8   :  { %532 = shalt.err (!%p529_p4)
}
  0xf9   :  { %402 = dma.vmem_to_hbm [thread:$0]  %s400_s25, 32, %s673_s3, [#allocation3]  }
  0xfa   :  { %541 = dma.done.wait [#allocation3], 32  }
  0xfb   :  { %542 = vsyncadd [#allocation3], 4294967264 }
  0xfc   :  { %406 = vsyncpa [#allocation3], 1 }

</bundles_post_ra>
